<compile_context>
chip_gen: v6e
topology: v6e:2x2x1
jax: 0.10.0
libtpu: 0.0.40
codegen_flags: <defaults>
</compile_context>

<pallas_src>
import jax
import jax.numpy as jnp
from jax import lax
from jax.experimental import pallas as pl
from jax.experimental.pallas import tpu as pltpu

H = 100    # logical feature / hidden size (fixed by the module)
HP = 128   # lane-padded hidden size
S = 8      # sequence length of the example input


def _sigm(v):
    # sigmoid as a single EUP tanh + VPU FMA (avoids exp + reciprocal round-trip)
    return 0.5 * jnp.tanh(0.5 * v) + 0.5


def _cell(g, c):
    i_g = _sigm(g[:, 0 * HP:1 * HP])
    f_g = _sigm(g[:, 1 * HP:2 * HP])
    g_g = jnp.tanh(g[:, 2 * HP:3 * HP])
    o_g = _sigm(g[:, 3 * HP:4 * HP])
    c_new = f_g * c + i_g * g_g
    return o_g * jnp.tanh(c_new), c_new


def _cell_first(g):
    # Peeled zero-state step: c==0, so f*c vanishes and the f gate is never needed.
    i_g = _sigm(g[:, 0 * HP:1 * HP])
    g_g = jnp.tanh(g[:, 2 * HP:3 * HP])
    o_g = _sigm(g[:, 3 * HP:4 * HP])
    c_new = i_g * g_g
    return o_g * jnp.tanh(c_new), c_new


def lstm_net_kernel(x_ref, wfused_t_ref, bfused_ref,
                    whh0_hbm, wih1_hbm, b1_ref, whh1_hbm, wout_hbm, bout_ref,
                    out_ref,
                    gx0_ref, whh0_v, wih1_v, whh1_v, wout_v, sem):
    """Gate order is PyTorch's (i, f, g, o); each gate occupies one 128-lane block.
    Padded lanes are zero in every weight/bias, keeping padded lanes of c/h zero.

    x_ref      : (S, HP)      padded input sequence (batch squeezed), VMEM
    wfused_t   : (HP, 4*HP)   (Wih0 @ W_in)^T, per-gate padded (layer_in folded), VMEM
    bfused     : (1, 4*HP)    b_in @ Wih0^T + b_ih0 + b_hh0, per-gate padded, VMEM
    whh0/wih1/whh1 (HP,4*HP) and wout (HP,HP): transposed, padded, memory_space=ANY
                              (manually DMA'd into the *_v VMEM scratch buffers)
    b1         : (1, 4*HP)    b_ih1 + b_hh1, VMEM     bout : (1, HP), VMEM
    out_ref    : (S, HP)
    gx0_ref    : (S, 4*HP)    VMEM scratch for the fused input projection
    """
    # Kick off the trailing-weight DMAs immediately (issue order = first-use order).
    cp_wih1 = pltpu.make_async_copy(wih1_hbm, wih1_v, sem.at[0]); cp_wih1.start()
    cp_whh0 = pltpu.make_async_copy(whh0_hbm, whh0_v, sem.at[1]); cp_whh0.start()
    cp_wout = pltpu.make_async_copy(wout_hbm, wout_v, sem.at[2]); cp_wout.start()
    cp_whh1 = pltpu.make_async_copy(whh1_hbm, whh1_v, sem.at[3]); cp_whh1.start()

    # layer_in + LSTM-0 input projection (folded): one (S,HP) x (HP,4HP) MXU matmul,
    # staged through VMEM scratch so it is not held live across the unrolled body.
    gx0_ref[...] = jnp.dot(x_ref[...], wfused_t_ref[...],
                           preferred_element_type=jnp.float32) + bfused_ref[...]

    # TODO(synk): if the bundle dump shows Mosaic re-pushing the stationary recurrent
    # RHS every step, stage whh0_v/whh1_v once via pltpu.matmul_push_rhs and drive the
    # steps with matmul_acc_lhs / matmul_pop.
    # TODO(synk): on v6e/v7x, fuse the two per-wave recurrent dots with a
    # block-diagonal (256,1024) RHS to fill the 256x256 MXU (neutral on v5e).
    h0 = c0 = None
    h1 = c1 = None
    gx1_prev = None

    # Wavefront over time: wave w runs layer-0 step w and layer-1 step w-1, which are
    # data-independent; the fully unrolled trace lets the scheduler overlap their
    # MXU / EUP work and hide the weight DMAs behind the early waves.
    for w in range(S + 1):
        gx1_cur = None

        if w < S:                                          # ---- layer-0, step w ----
            g0 = gx0_ref[w:w + 1, :]
            if w == 0:
                h0, c0 = _cell_first(g0)                   # peeled: h0 == c0 == 0
            else:
                if w == 1:
                    cp_whh0.wait()
                g0 = g0 + jnp.dot(h0, whh0_v[...],
                                  preferred_element_type=jnp.float32)
                h0, c0 = _cell(g0, c0)
            # layer-1 input contribution for step w, computed on the fly.
            if w == 0:
                cp_wih1.wait()
            gx1_cur = jnp.dot(h0, wih1_v[...],
                              preferred_element_type=jnp.float32) + b1_ref[...]

        if w >= 1:                                         # ---- layer-1, step w-1 --
            if w == 1:
                h1, c1 = _cell_first(gx1_prev)             # peeled: h1 == c1 == 0
            else:
                if w == 2:
                    cp_whh1.wait()
                g1 = gx1_prev + jnp.dot(h1, whh1_v[...],
                                        preferred_element_type=jnp.float32)
                h1, c1 = _cell(g1, c1)
            # ReLU + layer_output folded into the wavefront: lane-dense row store.
            if w == 1:
                cp_wout.wait()
            out_ref[w - 1:w, :] = (
                jnp.dot(jnp.maximum(h1, 0.0), wout_v[...],
                        preferred_element_type=jnp.float32) + bout_ref[...])

        gx1_prev = gx1_cur


# ----------------------------------------------------------------------------
# Host-side parameter preparation (fusion, transpose, per-gate lane padding)
# ----------------------------------------------------------------------------
def _pad_to(a, shape):
    return jnp.pad(a, [(0, t - s) for s, t in zip(a.shape, shape)])


def _pack_gate_weight_t(w):
    """(4H, H) PyTorch gate-stacked weight -> transposed, per-gate padded (HP, 4*HP)."""
    blocks = [_pad_to(w[g * H:(g + 1) * H, :].T, (HP, HP)) for g in range(4)]
    return jnp.concatenate(blocks, axis=1)


def _pack_gate_bias(b):
    """(1, 4H) -> (1, 4*HP), per-gate padded."""
    blocks = [_pad_to(b[:, g * H:(g + 1) * H], (1, HP)) for g in range(4)]
    return jnp.concatenate(blocks, axis=1)


def prepare_params(params):
    """Fuse layer_in into LSTM-0, transpose all weights, pad to 128 lanes per gate."""
    w_in, b_in, wih0, whh0, b0, wih1, whh1, b1, wout, bout = params
    #   (x @ W_in^T + b_in) @ Wih0^T + b0 == x @ (Wih0 @ W_in)^T + (b_in @ Wih0^T + b0)
    wfused = wih0 @ w_in                      # (4H, H)
    bfused = b_in @ wih0.T + b0               # (1, 4H)
    return (
        _pack_gate_weight_t(wfused), _pack_gate_bias(bfused),
        _pack_gate_weight_t(whh0),
        _pack_gate_weight_t(wih1), _pack_gate_bias(b1),
        _pack_gate_weight_t(whh1),
        _pad_to(wout.T, (HP, HP)), _pad_to(bout, (1, HP)),
    )


def lstm_net_forward(x, prepared):
    """x: (S, 1, H) float32, matching the PyTorch (seq, batch=1, feature) layout."""
    seq_len, batch, feat = x.shape
    assert batch == 1 and feat == H
    x2d = _pad_to(x.reshape(seq_len, feat), (seq_len, HP))

    vmem = pl.BlockSpec(memory_space=pltpu.MemorySpace.VMEM)
    anym = pl.BlockSpec(memory_space=pl.ANY)   # big weights stay put; DMA'd manually
    #            x     wfused bfused whh0  wih1  b1    whh1  wout  bout
    in_specs = [vmem, vmem,  vmem,  anym, anym, vmem, anym, anym, vmem]

    out_p = pl.pallas_call(
        lstm_net_kernel,
        out_shape=jax.ShapeDtypeStruct((seq_len, HP), jnp.float32),
        in_specs=in_specs,
        out_specs=vmem,
        scratch_shapes=[
            pltpu.VMEM((seq_len, 4 * HP), jnp.float32),   # gx0 (input projection)
            pltpu.VMEM((HP, 4 * HP), jnp.float32),        # whh0
            pltpu.VMEM((HP, 4 * HP), jnp.float32),        # wih1
            pltpu.VMEM((HP, 4 * HP), jnp.float32),        # whh1
            pltpu.VMEM((HP, HP), jnp.float32),            # wout
            pltpu.SemaphoreType.DMA((4,)),
        ],
    )(x2d, *prepared)
    return out_p[:, :H].reshape(seq_len, 1, feat)


# ----------------------------------------------------------------------------
# Deterministic params + pure-JAX reference (PyTorch semantics, unpadded)
# ----------------------------------------------------------------------------
def make_params(key):
    """PyTorch-style uniform(-1/sqrt(H), 1/sqrt(H)) init, PyTorch layouts/shapes."""
    k = 1.0 / jnp.sqrt(jnp.float32(H))
    keys = jax.random.split(key, 14)
    u = lambda kk, shape: jax.random.uniform(kk, shape, jnp.float32, -k, k)
    w_in = u(keys[0], (H, H));       b_in = u(keys[1], (1, H))
    wih0 = u(keys[2], (4 * H, H));   whh0 = u(keys[3], (4 * H, H))
    b0 = u(keys[4], (1, 4 * H)) + u(keys[5], (1, 4 * H))   # b_ih_l0 + b_hh_l0
    wih1 = u(keys[6], (4 * H, H));   whh1 = u(keys[7], (4 * H, H))
    b1 = u(keys[8], (1, 4 * H)) + u(keys[9], (1, 4 * H))   # b_ih_l1 + b_hh_l1
    wout = u(keys[10], (H, H));      bout = u(keys[11], (1, H))
    return (w_in, b_in, wih0, whh0, b0, wih1, whh1, b1, wout, bout)


def reference_forward(x2d, w_in, b_in, wih0, whh0, b0, wih1, whh1, b1, wout, bout):
    x1 = x2d @ w_in.T + b_in

    def layer(xseq, wih, whh, b):
        gx = xseq @ wih.T + b

        def step(carry, g_row):
            h, c = carry
            g = g_row[None, :] + h @ whh.T
            i = jax.nn.sigmoid(g[:, :H])
            f = jax.nn.sigmoid(g[:, H:2 * H])
            gg = jnp.tanh(g[:, 2 * H:3 * H])
            o = jax.nn.sigmoid(g[:, 3 * H:])
            c = f * c + i * gg
            h = o * jnp.tanh(c)
            return (h, c), h[0]

        init = (jnp.zeros((1, H), jnp.float32), jnp.zeros((1, H), jnp.float32))
        _, hs = lax.scan(step, init, gx)
        return hs

    h0s = layer(x1, wih0, whh0, b0)
    h1s = layer(h0s, wih1, whh1, b1)
    y = jnp.maximum(h1s, 0.0)
    return y @ wout.T + bout


if __name__ == "__main__":
    key = jax.random.PRNGKey(0)
    k_x, k_p = jax.random.split(key)
    params = make_params(k_p)
    prepared = prepare_params(params)
    x = jax.random.normal(k_x, (S, 1, H), jnp.float32)   # (seq, batch=1, feat)

    out = lstm_net_forward(x, prepared)
    out = jax.block_until_ready(out)

    ref = reference_forward(x.reshape(S, H), *params).reshape(S, 1, H)
    assert out.shape == (S, 1, H)
    assert jnp.allclose(out, ref, atol=1e-4, rtol=1e-4), "mismatch vs reference"

    print("KERNEL_OK")
</pallas_src>

<mosaic_0001>
module attributes {stable_mosaic.version = 11 : i64} {
  func.func @lstm_net_kernel(%arg0: memref<8x128xf32, #tpu.memory_space<vmem>>, %arg1: memref<128x512xf32, #tpu.memory_space<vmem>>, %arg2: memref<1x512xf32, #tpu.memory_space<vmem>>, %arg3: memref<128x512xf32, #tpu.memory_space<any>>, %arg4: memref<128x512xf32, #tpu.memory_space<any>>, %arg5: memref<1x512xf32, #tpu.memory_space<vmem>>, %arg6: memref<128x512xf32, #tpu.memory_space<any>>, %arg7: memref<128x128xf32, #tpu.memory_space<any>>, %arg8: memref<1x128xf32, #tpu.memory_space<vmem>>, %arg9: memref<8x128xf32, #tpu.memory_space<vmem>>, %arg10: memref<8x512xf32, #tpu.memory_space<vmem>>, %arg11: memref<128x512xf32, #tpu.memory_space<vmem>>, %arg12: memref<128x512xf32, #tpu.memory_space<vmem>>, %arg13: memref<128x512xf32, #tpu.memory_space<vmem>>, %arg14: memref<128x128xf32, #tpu.memory_space<vmem>>, %arg15: memref<4x!tpu.dma_semaphore, #tpu.memory_space<semaphore_mem>>) attributes {dimension_semantics = [], scalar_prefetch = 0 : i64, scratch_operands = 6 : i64, tpu.core_type = #tpu.core_type<tc>} {
    %c0_i32 = arith.constant 0 : i32
    %0 = tpu.memref_slice %arg15[%c0_i32] : memref<4x!tpu.dma_semaphore, #tpu.memory_space<semaphore_mem>> -> memref<1x!tpu.dma_semaphore, #tpu.memory_space<semaphore_mem>>
    %1 = tpu.memref_squeeze %0 : memref<1x!tpu.dma_semaphore, #tpu.memory_space<semaphore_mem>> -> memref<!tpu.dma_semaphore, #tpu.memory_space<semaphore_mem>>
    tpu.enqueue_dma source(%arg4 : memref<128x512xf32, #tpu.memory_space<any>>) target(%arg12 : memref<128x512xf32, #tpu.memory_space<vmem>>) target_semaphore(%1 : memref<!tpu.dma_semaphore, #tpu.memory_space<semaphore_mem>>)
    %c1_i32 = arith.constant 1 : i32
    %2 = tpu.memref_slice %arg15[%c1_i32] : memref<4x!tpu.dma_semaphore, #tpu.memory_space<semaphore_mem>> -> memref<1x!tpu.dma_semaphore, #tpu.memory_space<semaphore_mem>>
    %3 = tpu.memref_squeeze %2 : memref<1x!tpu.dma_semaphore, #tpu.memory_space<semaphore_mem>> -> memref<!tpu.dma_semaphore, #tpu.memory_space<semaphore_mem>>
    tpu.enqueue_dma source(%arg3 : memref<128x512xf32, #tpu.memory_space<any>>) target(%arg11 : memref<128x512xf32, #tpu.memory_space<vmem>>) target_semaphore(%3 : memref<!tpu.dma_semaphore, #tpu.memory_space<semaphore_mem>>)
    %c2_i32 = arith.constant 2 : i32
    %4 = tpu.memref_slice %arg15[%c2_i32] : memref<4x!tpu.dma_semaphore, #tpu.memory_space<semaphore_mem>> -> memref<1x!tpu.dma_semaphore, #tpu.memory_space<semaphore_mem>>
    %5 = tpu.memref_squeeze %4 : memref<1x!tpu.dma_semaphore, #tpu.memory_space<semaphore_mem>> -> memref<!tpu.dma_semaphore, #tpu.memory_space<semaphore_mem>>
    tpu.enqueue_dma source(%arg7 : memref<128x128xf32, #tpu.memory_space<any>>) target(%arg14 : memref<128x128xf32, #tpu.memory_space<vmem>>) target_semaphore(%5 : memref<!tpu.dma_semaphore, #tpu.memory_space<semaphore_mem>>)
    %c3_i32 = arith.constant 3 : i32
    %6 = tpu.memref_slice %arg15[%c3_i32] : memref<4x!tpu.dma_semaphore, #tpu.memory_space<semaphore_mem>> -> memref<1x!tpu.dma_semaphore, #tpu.memory_space<semaphore_mem>>
    %7 = tpu.memref_squeeze %6 : memref<1x!tpu.dma_semaphore, #tpu.memory_space<semaphore_mem>> -> memref<!tpu.dma_semaphore, #tpu.memory_space<semaphore_mem>>
    tpu.enqueue_dma source(%arg6 : memref<128x512xf32, #tpu.memory_space<any>>) target(%arg13 : memref<128x512xf32, #tpu.memory_space<vmem>>) target_semaphore(%7 : memref<!tpu.dma_semaphore, #tpu.memory_space<semaphore_mem>>)
    %c0 = arith.constant 0 : index
    %c0_0 = arith.constant 0 : index
    %8 = vector.load %arg0[%c0, %c0_0] : memref<8x128xf32, #tpu.memory_space<vmem>>, vector<8x128xf32>
    %c0_1 = arith.constant 0 : index
    %c0_2 = arith.constant 0 : index
    %9 = vector.load %arg1[%c0_1, %c0_2] : memref<128x512xf32, #tpu.memory_space<vmem>>, vector<128x512xf32>
    %cst = arith.constant dense<0.000000e+00> : vector<8x512xf32>
    %10 = tpu.matmul %8, %9, %cst {dimension_numbers = #tpu.dot_dimension_numbers<[1], [0], [0], [1], [0, 0, 1, 1], [], []>} : vector<8x128xf32>, vector<128x512xf32>, vector<8x512xf32> -> vector<8x512xf32>
    %c0_3 = arith.constant 0 : index
    %c0_4 = arith.constant 0 : index
    %11 = vector.load %arg2[%c0_3, %c0_4] : memref<1x512xf32, #tpu.memory_space<vmem>>, vector<1x512xf32>
    %12 = vector.broadcast %11 : vector<1x512xf32> to vector<8x512xf32>
    %13 = arith.addf %10, %12 : vector<8x512xf32>
    %c0_5 = arith.constant 0 : index
    %c0_6 = arith.constant 0 : index
    %14 = vector.load %arg10[%c0_5, %c0_6] : memref<8x512xf32, #tpu.memory_space<vmem>>, vector<8x512xf32>
    tpu.vector_store %arg10[%c0_5, %c0_6], %13 {strides = array<i32>} : memref<8x512xf32, #tpu.memory_space<vmem>>, vector<8x512xf32>,
    %c0_7 = arith.constant 0 : index
    %c0_8 = arith.constant 0 : index
    %15 = vector.load %arg10[%c0_7, %c0_8] : memref<8x512xf32, #tpu.memory_space<vmem>>, vector<1x512xf32>
    %16 = vector.extract_strided_slice %15 {offsets = [0, 0], sizes = [1, 128], strides = [1, 1]} : vector<1x512xf32> to vector<1x128xf32>
    %cst_9 = arith.constant 5.000000e-01 : f32
    %17 = vector.broadcast %cst_9 : f32 to vector<1x128xf32>
    %18 = arith.mulf %17, %16 : vector<1x128xf32>
    %19 = math.tanh %18 : vector<1x128xf32>
    %cst_10 = arith.constant 5.000000e-01 : f32
    %20 = vector.broadcast %cst_10 : f32 to vector<1x128xf32>
    %21 = arith.mulf %20, %19 : vector<1x128xf32>
    %cst_11 = arith.constant 5.000000e-01 : f32
    %22 = vector.broadcast %cst_11 : f32 to vector<1x128xf32>
    %23 = arith.addf %21, %22 : vector<1x128xf32>
    %24 = vector.extract_strided_slice %15 {offsets = [0, 256], sizes = [1, 128], strides = [1, 1]} : vector<1x512xf32> to vector<1x128xf32>
    %25 = math.tanh %24 : vector<1x128xf32>
    %26 = vector.extract_strided_slice %15 {offsets = [0, 384], sizes = [1, 128], strides = [1, 1]} : vector<1x512xf32> to vector<1x128xf32>
    %cst_12 = arith.constant 5.000000e-01 : f32
    %27 = vector.broadcast %cst_12 : f32 to vector<1x128xf32>
    %28 = arith.mulf %27, %26 : vector<1x128xf32>
    %29 = math.tanh %28 : vector<1x128xf32>
    %cst_13 = arith.constant 5.000000e-01 : f32
    %30 = vector.broadcast %cst_13 : f32 to vector<1x128xf32>
    %31 = arith.mulf %30, %29 : vector<1x128xf32>
    %cst_14 = arith.constant 5.000000e-01 : f32
    %32 = vector.broadcast %cst_14 : f32 to vector<1x128xf32>
    %33 = arith.addf %31, %32 : vector<1x128xf32>
    %34 = arith.mulf %23, %25 : vector<1x128xf32>
    %35 = math.tanh %34 : vector<1x128xf32>
    %36 = arith.mulf %33, %35 : vector<1x128xf32>
    %c0_i32_15 = arith.constant 0 : i32
    %37 = tpu.memref_slice %arg15[%c0_i32_15] : memref<4x!tpu.dma_semaphore, #tpu.memory_space<semaphore_mem>> -> memref<1x!tpu.dma_semaphore, #tpu.memory_space<semaphore_mem>>
    %38 = tpu.memref_squeeze %37 : memref<1x!tpu.dma_semaphore, #tpu.memory_space<semaphore_mem>> -> memref<!tpu.dma_semaphore, #tpu.memory_space<semaphore_mem>>
    tpu.wait_dma2 semaphore(%38 : memref<!tpu.dma_semaphore, #tpu.memory_space<semaphore_mem>>) src(%arg4 : memref<128x512xf32, #tpu.memory_space<any>>) dst(%arg12 : memref<128x512xf32, #tpu.memory_space<vmem>>)
    %c0_16 = arith.constant 0 : index
    %c0_17 = arith.constant 0 : index
    %39 = vector.load %arg12[%c0_16, %c0_17] : memref<128x512xf32, #tpu.memory_space<vmem>>, vector<128x512xf32>
    %cst_18 = arith.constant dense<0.000000e+00> : vector<1x512xf32>
    %40 = tpu.matmul %36, %39, %cst_18 {dimension_numbers = #tpu.dot_dimension_numbers<[1], [0], [0], [1], [0, 0, 1, 1], [], []>} : vector<1x128xf32>, vector<128x512xf32>, vector<1x512xf32> -> vector<1x512xf32>
    %c0_19 = arith.constant 0 : index
    %c0_20 = arith.constant 0 : index
    %41 = vector.load %arg5[%c0_19, %c0_20] : memref<1x512xf32, #tpu.memory_space<vmem>>, vector<1x512xf32>
    %42 = arith.addf %40, %41 : vector<1x512xf32>
    %c1 = arith.constant 1 : index
    %c0_21 = arith.constant 0 : index
    %43 = vector.load %arg10[%c1, %c0_21] : memref<8x512xf32, #tpu.memory_space<vmem>>, vector<1x512xf32>
    %c1_i32_22 = arith.constant 1 : i32
    %44 = tpu.memref_slice %arg15[%c1_i32_22] : memref<4x!tpu.dma_semaphore, #tpu.memory_space<semaphore_mem>> -> memref<1x!tpu.dma_semaphore, #tpu.memory_space<semaphore_mem>>
    %45 = tpu.memref_squeeze %44 : memref<1x!tpu.dma_semaphore, #tpu.memory_space<semaphore_mem>> -> memref<!tpu.dma_semaphore, #tpu.memory_space<semaphore_mem>>
    tpu.wait_dma2 semaphore(%45 : memref<!tpu.dma_semaphore, #tpu.memory_space<semaphore_mem>>) src(%arg3 : memref<128x512xf32, #tpu.memory_space<any>>) dst(%arg11 : memref<128x512xf32, #tpu.memory_space<vmem>>)
    %c0_23 = arith.constant 0 : index
    %c0_24 = arith.constant 0 : index
    %46 = vector.load %arg11[%c0_23, %c0_24] : memref<128x512xf32, #tpu.memory_space<vmem>>, vector<128x512xf32>
    %cst_25 = arith.constant dense<0.000000e+00> : vector<1x512xf32>
    %47 = tpu.matmul %36, %46, %cst_25 {dimension_numbers = #tpu.dot_dimension_numbers<[1], [0], [0], [1], [0, 0, 1, 1], [], []>} : vector<1x128xf32>, vector<128x512xf32>, vector<1x512xf32> -> vector<1x512xf32>
    %48 = arith.addf %43, %47 : vector<1x512xf32>
    %49 = vector.extract_strided_slice %48 {offsets = [0, 0], sizes = [1, 128], strides = [1, 1]} : vector<1x512xf32> to vector<1x128xf32>
    %cst_26 = arith.constant 5.000000e-01 : f32
    %50 = vector.broadcast %cst_26 : f32 to vector<1x128xf32>
    %51 = arith.mulf %50, %49 : vector<1x128xf32>
    %52 = math.tanh %51 : vector<1x128xf32>
    %cst_27 = arith.constant 5.000000e-01 : f32
    %53 = vector.broadcast %cst_27 : f32 to vector<1x128xf32>
    %54 = arith.mulf %53, %52 : vector<1x128xf32>
    %cst_28 = arith.constant 5.000000e-01 : f32
    %55 = vector.broadcast %cst_28 : f32 to vector<1x128xf32>
    %56 = arith.addf %54, %55 : vector<1x128xf32>
    %57 = vector.extract_strided_slice %48 {offsets = [0, 128], sizes = [1, 128], strides = [1, 1]} : vector<1x512xf32> to vector<1x128xf32>
    %cst_29 = arith.constant 5.000000e-01 : f32
    %58 = vector.broadcast %cst_29 : f32 to vector<1x128xf32>
    %59 = arith.mulf %58, %57 : vector<1x128xf32>
    %60 = math.tanh %59 : vector<1x128xf32>
    %cst_30 = arith.constant 5.000000e-01 : f32
    %61 = vector.broadcast %cst_30 : f32 to vector<1x128xf32>
    %62 = arith.mulf %61, %60 : vector<1x128xf32>
    %cst_31 = arith.constant 5.000000e-01 : f32
    %63 = vector.broadcast %cst_31 : f32 to vector<1x128xf32>
    %64 = arith.addf %62, %63 : vector<1x128xf32>
    %65 = vector.extract_strided_slice %48 {offsets = [0, 256], sizes = [1, 128], strides = [1, 1]} : vector<1x512xf32> to vector<1x128xf32>
    %66 = math.tanh %65 : vector<1x128xf32>
    %67 = vector.extract_strided_slice %48 {offsets = [0, 384], sizes = [1, 128], strides = [1, 1]} : vector<1x512xf32> to vector<1x128xf32>
    %cst_32 = arith.constant 5.000000e-01 : f32
    %68 = vector.broadcast %cst_32 : f32 to vector<1x128xf32>
    %69 = arith.mulf %68, %67 : vector<1x128xf32>
    %70 = math.tanh %69 : vector<1x128xf32>
    %cst_33 = arith.constant 5.000000e-01 : f32
    %71 = vector.broadcast %cst_33 : f32 to vector<1x128xf32>
    %72 = arith.mulf %71, %70 : vector<1x128xf32>
    %cst_34 = arith.constant 5.000000e-01 : f32
    %73 = vector.broadcast %cst_34 : f32 to vector<1x128xf32>
    %74 = arith.addf %72, %73 : vector<1x128xf32>
    %75 = arith.mulf %64, %34 : vector<1x128xf32>
    %76 = arith.mulf %56, %66 : vector<1x128xf32>
    %77 = arith.addf %75, %76 : vector<1x128xf32>
    %78 = math.tanh %77 : vector<1x128xf32>
    %79 = arith.mulf %74, %78 : vector<1x128xf32>
    %c0_35 = arith.constant 0 : index
    %c0_36 = arith.constant 0 : index
    %80 = vector.load %arg12[%c0_35, %c0_36] : memref<128x512xf32, #tpu.memory_space<vmem>>, vector<128x512xf32>
    %cst_37 = arith.constant dense<0.000000e+00> : vector<1x512xf32>
    %81 = tpu.matmul %79, %80, %cst_37 {dimension_numbers = #tpu.dot_dimension_numbers<[1], [0], [0], [1], [0, 0, 1, 1], [], []>} : vector<1x128xf32>, vector<128x512xf32>, vector<1x512xf32> -> vector<1x512xf32>
    %c0_38 = arith.constant 0 : index
    %c0_39 = arith.constant 0 : index
    %82 = vector.load %arg5[%c0_38, %c0_39] : memref<1x512xf32, #tpu.memory_space<vmem>>, vector<1x512xf32>
    %83 = arith.addf %81, %82 : vector<1x512xf32>
    %84 = vector.extract_strided_slice %42 {offsets = [0, 0], sizes = [1, 128], strides = [1, 1]} : vector<1x512xf32> to vector<1x128xf32>
    %cst_40 = arith.constant 5.000000e-01 : f32
    %85 = vector.broadcast %cst_40 : f32 to vector<1x128xf32>
    %86 = arith.mulf %85, %84 : vector<1x128xf32>
    %87 = math.tanh %86 : vector<1x128xf32>
    %cst_41 = arith.constant 5.000000e-01 : f32
    %88 = vector.broadcast %cst_41 : f32 to vector<1x128xf32>
    %89 = arith.mulf %88, %87 : vector<1x128xf32>
    %cst_42 = arith.constant 5.000000e-01 : f32
    %90 = vector.broadcast %cst_42 : f32 to vector<1x128xf32>
    %91 = arith.addf %89, %90 : vector<1x128xf32>
    %92 = vector.extract_strided_slice %42 {offsets = [0, 256], sizes = [1, 128], strides = [1, 1]} : vector<1x512xf32> to vector<1x128xf32>
    %93 = math.tanh %92 : vector<1x128xf32>
    %94 = vector.extract_strided_slice %42 {offsets = [0, 384], sizes = [1, 128], strides = [1, 1]} : vector<1x512xf32> to vector<1x128xf32>
    %cst_43 = arith.constant 5.000000e-01 : f32
    %95 = vector.broadcast %cst_43 : f32 to vector<1x128xf32>
    %96 = arith.mulf %95, %94 : vector<1x128xf32>
    %97 = math.tanh %96 : vector<1x128xf32>
    %cst_44 = arith.constant 5.000000e-01 : f32
    %98 = vector.broadcast %cst_44 : f32 to vector<1x128xf32>
    %99 = arith.mulf %98, %97 : vector<1x128xf32>
    %cst_45 = arith.constant 5.000000e-01 : f32
    %100 = vector.broadcast %cst_45 : f32 to vector<1x128xf32>
    %101 = arith.addf %99, %100 : vector<1x128xf32>
    %102 = arith.mulf %91, %93 : vector<1x128xf32>
    %103 = math.tanh %102 : vector<1x128xf32>
    %104 = arith.mulf %101, %103 : vector<1x128xf32>
    %c2_i32_46 = arith.constant 2 : i32
    %105 = tpu.memref_slice %arg15[%c2_i32_46] : memref<4x!tpu.dma_semaphore, #tpu.memory_space<semaphore_mem>> -> memref<1x!tpu.dma_semaphore, #tpu.memory_space<semaphore_mem>>
    %106 = tpu.memref_squeeze %105 : memref<1x!tpu.dma_semaphore, #tpu.memory_space<semaphore_mem>> -> memref<!tpu.dma_semaphore, #tpu.memory_space<semaphore_mem>>
    tpu.wait_dma2 semaphore(%106 : memref<!tpu.dma_semaphore, #tpu.memory_space<semaphore_mem>>) src(%arg7 : memref<128x128xf32, #tpu.memory_space<any>>) dst(%arg14 : memref<128x128xf32, #tpu.memory_space<vmem>>)
    %cst_47 = arith.constant 0.000000e+00 : f32
    %107 = vector.broadcast %cst_47 : f32 to vector<1x128xf32>
    %108 = arith.maximumf %104, %107 : vector<1x128xf32>
    %c0_48 = arith.constant 0 : index
    %c0_49 = arith.constant 0 : index
    %109 = vector.load %arg14[%c0_48, %c0_49] : memref<128x128xf32, #tpu.memory_space<vmem>>, vector<128x128xf32>
    %cst_50 = arith.constant dense<0.000000e+00> : vector<1x128xf32>
    %110 = tpu.matmul %108, %109, %cst_50 {dimension_numbers = #tpu.dot_dimension_numbers<[1], [0], [0], [1], [0, 0, 1, 1], [], []>} : vector<1x128xf32>, vector<128x128xf32>, vector<1x128xf32> -> vector<1x128xf32>
    %c0_51 = arith.constant 0 : index
    %c0_52 = arith.constant 0 : index
    %111 = vector.load %arg8[%c0_51, %c0_52] : memref<1x128xf32, #tpu.memory_space<vmem>>, vector<1x128xf32>
    %112 = arith.addf %110, %111 : vector<1x128xf32>
    %c0_53 = arith.constant 0 : index
    %c0_54 = arith.constant 0 : index
    %113 = vector.load %arg9[%c0_53, %c0_54] : memref<8x128xf32, #tpu.memory_space<vmem>>, vector<1x128xf32>
    tpu.vector_store %arg9[%c0_53, %c0_54], %112 {strides = array<i32>} : memref<8x128xf32, #tpu.memory_space<vmem>>, vector<1x128xf32>,
    %c2 = arith.constant 2 : index
    %c0_55 = arith.constant 0 : index
    %114 = vector.load %arg10[%c2, %c0_55] : memref<8x512xf32, #tpu.memory_space<vmem>>, vector<1x512xf32>
    %c0_56 = arith.constant 0 : index
    %c0_57 = arith.constant 0 : index
    %115 = vector.load %arg11[%c0_56, %c0_57] : memref<128x512xf32, #tpu.memory_space<vmem>>, vector<128x512xf32>
    %cst_58 = arith.constant dense<0.000000e+00> : vector<1x512xf32>
    %116 = tpu.matmul %79, %115, %cst_58 {dimension_numbers = #tpu.dot_dimension_numbers<[1], [0], [0], [1], [0, 0, 1, 1], [], []>} : vector<1x128xf32>, vector<128x512xf32>, vector<1x512xf32> -> vector<1x512xf32>
    %117 = arith.addf %114, %116 : vector<1x512xf32>
    %118 = vector.extract_strided_slice %117 {offsets = [0, 0], sizes = [1, 128], strides = [1, 1]} : vector<1x512xf32> to vector<1x128xf32>
    %cst_59 = arith.constant 5.000000e-01 : f32
    %119 = vector.broadcast %cst_59 : f32 to vector<1x128xf32>
    %120 = arith.mulf %119, %118 : vector<1x128xf32>
    %121 = math.tanh %120 : vector<1x128xf32>
    %cst_60 = arith.constant 5.000000e-01 : f32
    %122 = vector.broadcast %cst_60 : f32 to vector<1x128xf32>
    %123 = arith.mulf %122, %121 : vector<1x128xf32>
    %cst_61 = arith.constant 5.000000e-01 : f32
    %124 = vector.broadcast %cst_61 : f32 to vector<1x128xf32>
    %125 = arith.addf %123, %124 : vector<1x128xf32>
    %126 = vector.extract_strided_slice %117 {offsets = [0, 128], sizes = [1, 128], strides = [1, 1]} : vector<1x512xf32> to vector<1x128xf32>
    %cst_62 = arith.constant 5.000000e-01 : f32
    %127 = vector.broadcast %cst_62 : f32 to vector<1x128xf32>
    %128 = arith.mulf %127, %126 : vector<1x128xf32>
    %129 = math.tanh %128 : vector<1x128xf32>
    %cst_63 = arith.constant 5.000000e-01 : f32
    %130 = vector.broadcast %cst_63 : f32 to vector<1x128xf32>
    %131 = arith.mulf %130, %129 : vector<1x128xf32>
    %cst_64 = arith.constant 5.000000e-01 : f32
    %132 = vector.broadcast %cst_64 : f32 to vector<1x128xf32>
    %133 = arith.addf %131, %132 : vector<1x128xf32>
    %134 = vector.extract_strided_slice %117 {offsets = [0, 256], sizes = [1, 128], strides = [1, 1]} : vector<1x512xf32> to vector<1x128xf32>
    %135 = math.tanh %134 : vector<1x128xf32>
    %136 = vector.extract_strided_slice %117 {offsets = [0, 384], sizes = [1, 128], strides = [1, 1]} : vector<1x512xf32> to vector<1x128xf32>
    %cst_65 = arith.constant 5.000000e-01 : f32
    %137 = vector.broadcast %cst_65 : f32 to vector<1x128xf32>
    %138 = arith.mulf %137, %136 : vector<1x128xf32>
    %139 = math.tanh %138 : vector<1x128xf32>
    %cst_66 = arith.constant 5.000000e-01 : f32
    %140 = vector.broadcast %cst_66 : f32 to vector<1x128xf32>
    %141 = arith.mulf %140, %139 : vector<1x128xf32>
    %cst_67 = arith.constant 5.000000e-01 : f32
    %142 = vector.broadcast %cst_67 : f32 to vector<1x128xf32>
    %143 = arith.addf %141, %142 : vector<1x128xf32>
    %144 = arith.mulf %133, %77 : vector<1x128xf32>
    %145 = arith.mulf %125, %135 : vector<1x128xf32>
    %146 = arith.addf %144, %145 : vector<1x128xf32>
    %147 = math.tanh %146 : vector<1x128xf32>
    %148 = arith.mulf %143, %147 : vector<1x128xf32>
    %c0_68 = arith.constant 0 : index
    %c0_69 = arith.constant 0 : index
    %149 = vector.load %arg12[%c0_68, %c0_69] : memref<128x512xf32, #tpu.memory_space<vmem>>, vector<128x512xf32>
    %cst_70 = arith.constant dense<0.000000e+00> : vector<1x512xf32>
    %150 = tpu.matmul %148, %149, %cst_70 {dimension_numbers = #tpu.dot_dimension_numbers<[1], [0], [0], [1], [0, 0, 1, 1], [], []>} : vector<1x128xf32>, vector<128x512xf32>, vector<1x512xf32> -> vector<1x512xf32>
    %c0_71 = arith.constant 0 : index
    %c0_72 = arith.constant 0 : index
    %151 = vector.load %arg5[%c0_71, %c0_72] : memref<1x512xf32, #tpu.memory_space<vmem>>, vector<1x512xf32>
    %152 = arith.addf %150, %151 : vector<1x512xf32>
    %c3_i32_73 = arith.constant 3 : i32
    %153 = tpu.memref_slice %arg15[%c3_i32_73] : memref<4x!tpu.dma_semaphore, #tpu.memory_space<semaphore_mem>> -> memref<1x!tpu.dma_semaphore, #tpu.memory_space<semaphore_mem>>
    %154 = tpu.memref_squeeze %153 : memref<1x!tpu.dma_semaphore, #tpu.memory_space<semaphore_mem>> -> memref<!tpu.dma_semaphore, #tpu.memory_space<semaphore_mem>>
    tpu.wait_dma2 semaphore(%154 : memref<!tpu.dma_semaphore, #tpu.memory_space<semaphore_mem>>) src(%arg6 : memref<128x512xf32, #tpu.memory_space<any>>) dst(%arg13 : memref<128x512xf32, #tpu.memory_space<vmem>>)
    %c0_74 = arith.constant 0 : index
    %c0_75 = arith.constant 0 : index
    %155 = vector.load %arg13[%c0_74, %c0_75] : memref<128x512xf32, #tpu.memory_space<vmem>>, vector<128x512xf32>
    %cst_76 = arith.constant dense<0.000000e+00> : vector<1x512xf32>
    %156 = tpu.matmul %104, %155, %cst_76 {dimension_numbers = #tpu.dot_dimension_numbers<[1], [0], [0], [1], [0, 0, 1, 1], [], []>} : vector<1x128xf32>, vector<128x512xf32>, vector<1x512xf32> -> vector<1x512xf32>
    %157 = arith.addf %83, %156 : vector<1x512xf32>
    %158 = vector.extract_strided_slice %157 {offsets = [0, 0], sizes = [1, 128], strides = [1, 1]} : vector<1x512xf32> to vector<1x128xf32>
    %cst_77 = arith.constant 5.000000e-01 : f32
    %159 = vector.broadcast %cst_77 : f32 to vector<1x128xf32>
    %160 = arith.mulf %159, %158 : vector<1x128xf32>
    %161 = math.tanh %160 : vector<1x128xf32>
    %cst_78 = arith.constant 5.000000e-01 : f32
    %162 = vector.broadcast %cst_78 : f32 to vector<1x128xf32>
    %163 = arith.mulf %162, %161 : vector<1x128xf32>
    %cst_79 = arith.constant 5.000000e-01 : f32
    %164 = vector.broadcast %cst_79 : f32 to vector<1x128xf32>
    %165 = arith.addf %163, %164 : vector<1x128xf32>
    %166 = vector.extract_strided_slice %157 {offsets = [0, 128], sizes = [1, 128], strides = [1, 1]} : vector<1x512xf32> to vector<1x128xf32>
    %cst_80 = arith.constant 5.000000e-01 : f32
    %167 = vector.broadcast %cst_80 : f32 to vector<1x128xf32>
    %168 = arith.mulf %167, %166 : vector<1x128xf32>
    %169 = math.tanh %168 : vector<1x128xf32>
    %cst_81 = arith.constant 5.000000e-01 : f32
    %170 = vector.broadcast %cst_81 : f32 to vector<1x128xf32>
    %171 = arith.mulf %170, %169 : vector<1x128xf32>
    %cst_82 = arith.constant 5.000000e-01 : f32
    %172 = vector.broadcast %cst_82 : f32 to vector<1x128xf32>
    %173 = arith.addf %171, %172 : vector<1x128xf32>
    %174 = vector.extract_strided_slice %157 {offsets = [0, 256], sizes = [1, 128], strides = [1, 1]} : vector<1x512xf32> to vector<1x128xf32>
    %175 = math.tanh %174 : vector<1x128xf32>
    %176 = vector.extract_strided_slice %157 {offsets = [0, 384], sizes = [1, 128], strides = [1, 1]} : vector<1x512xf32> to vector<1x128xf32>
    %cst_83 = arith.constant 5.000000e-01 : f32
    %177 = vector.broadcast %cst_83 : f32 to vector<1x128xf32>
    %178 = arith.mulf %177, %176 : vector<1x128xf32>
    %179 = math.tanh %178 : vector<1x128xf32>
    %cst_84 = arith.constant 5.000000e-01 : f32
    %180 = vector.broadcast %cst_84 : f32 to vector<1x128xf32>
    %181 = arith.mulf %180, %179 : vector<1x128xf32>
    %cst_85 = arith.constant 5.000000e-01 : f32
    %182 = vector.broadcast %cst_85 : f32 to vector<1x128xf32>
    %183 = arith.addf %181, %182 : vector<1x128xf32>
    %184 = arith.mulf %173, %102 : vector<1x128xf32>
    %185 = arith.mulf %165, %175 : vector<1x128xf32>
    %186 = arith.addf %184, %185 : vector<1x128xf32>
    %187 = math.tanh %186 : vector<1x128xf32>
    %188 = arith.mulf %183, %187 : vector<1x128xf32>
    %cst_86 = arith.constant 0.000000e+00 : f32
    %189 = vector.broadcast %cst_86 : f32 to vector<1x128xf32>
    %190 = arith.maximumf %188, %189 : vector<1x128xf32>
    %c0_87 = arith.constant 0 : index
    %c0_88 = arith.constant 0 : index
    %191 = vector.load %arg14[%c0_87, %c0_88] : memref<128x128xf32, #tpu.memory_space<vmem>>, vector<128x128xf32>
    %cst_89 = arith.constant dense<0.000000e+00> : vector<1x128xf32>
    %192 = tpu.matmul %190, %191, %cst_89 {dimension_numbers = #tpu.dot_dimension_numbers<[1], [0], [0], [1], [0, 0, 1, 1], [], []>} : vector<1x128xf32>, vector<128x128xf32>, vector<1x128xf32> -> vector<1x128xf32>
    %c0_90 = arith.constant 0 : index
    %c0_91 = arith.constant 0 : index
    %193 = vector.load %arg8[%c0_90, %c0_91] : memref<1x128xf32, #tpu.memory_space<vmem>>, vector<1x128xf32>
    %194 = arith.addf %192, %193 : vector<1x128xf32>
    %c1_92 = arith.constant 1 : index
    %c0_93 = arith.constant 0 : index
    %195 = vector.load %arg9[%c1_92, %c0_93] : memref<8x128xf32, #tpu.memory_space<vmem>>, vector<1x128xf32>
    tpu.vector_store %arg9[%c1_92, %c0_93], %194 {strides = array<i32>} : memref<8x128xf32, #tpu.memory_space<vmem>>, vector<1x128xf32>,
    %c3 = arith.constant 3 : index
    %c0_94 = arith.constant 0 : index
    %196 = vector.load %arg10[%c3, %c0_94] : memref<8x512xf32, #tpu.memory_space<vmem>>, vector<1x512xf32>
    %c0_95 = arith.constant 0 : index
    %c0_96 = arith.constant 0 : index
    %197 = vector.load %arg11[%c0_95, %c0_96] : memref<128x512xf32, #tpu.memory_space<vmem>>, vector<128x512xf32>
    %cst_97 = arith.constant dense<0.000000e+00> : vector<1x512xf32>
    %198 = tpu.matmul %148, %197, %cst_97 {dimension_numbers = #tpu.dot_dimension_numbers<[1], [0], [0], [1], [0, 0, 1, 1], [], []>} : vector<1x128xf32>, vector<128x512xf32>, vector<1x512xf32> -> vector<1x512xf32>
    %199 = arith.addf %196, %198 : vector<1x512xf32>
    %200 = vector.extract_strided_slice %199 {offsets = [0, 0], sizes = [1, 128], strides = [1, 1]} : vector<1x512xf32> to vector<1x128xf32>
    %cst_98 = arith.constant 5.000000e-01 : f32
    %201 = vector.broadcast %cst_98 : f32 to vector<1x128xf32>
    %202 = arith.mulf %201, %200 : vector<1x128xf32>
    %203 = math.tanh %202 : vector<1x128xf32>
    %cst_99 = arith.constant 5.000000e-01 : f32
    %204 = vector.broadcast %cst_99 : f32 to vector<1x128xf32>
    %205 = arith.mulf %204, %203 : vector<1x128xf32>
    %cst_100 = arith.constant 5.000000e-01 : f32
    %206 = vector.broadcast %cst_100 : f32 to vector<1x128xf32>
    %207 = arith.addf %205, %206 : vector<1x128xf32>
    %208 = vector.extract_strided_slice %199 {offsets = [0, 128], sizes = [1, 128], strides = [1, 1]} : vector<1x512xf32> to vector<1x128xf32>
    %cst_101 = arith.constant 5.000000e-01 : f32
    %209 = vector.broadcast %cst_101 : f32 to vector<1x128xf32>
    %210 = arith.mulf %209, %208 : vector<1x128xf32>
    %211 = math.tanh %210 : vector<1x128xf32>
    %cst_102 = arith.constant 5.000000e-01 : f32
    %212 = vector.broadcast %cst_102 : f32 to vector<1x128xf32>
    %213 = arith.mulf %212, %211 : vector<1x128xf32>
    %cst_103 = arith.constant 5.000000e-01 : f32
    %214 = vector.broadcast %cst_103 : f32 to vector<1x128xf32>
    %215 = arith.addf %213, %214 : vector<1x128xf32>
    %216 = vector.extract_strided_slice %199 {offsets = [0, 256], sizes = [1, 128], strides = [1, 1]} : vector<1x512xf32> to vector<1x128xf32>
    %217 = math.tanh %216 : vector<1x128xf32>
    %218 = vector.extract_strided_slice %199 {offsets = [0, 384], sizes = [1, 128], strides = [1, 1]} : vector<1x512xf32> to vector<1x128xf32>
    %cst_104 = arith.constant 5.000000e-01 : f32
    %219 = vector.broadcast %cst_104 : f32 to vector<1x128xf32>
    %220 = arith.mulf %219, %218 : vector<1x128xf32>
    %221 = math.tanh %220 : vector<1x128xf32>
    %cst_105 = arith.constant 5.000000e-01 : f32
    %222 = vector.broadcast %cst_105 : f32 to vector<1x128xf32>
    %223 = arith.mulf %222, %221 : vector<1x128xf32>
    %cst_106 = arith.constant 5.000000e-01 : f32
    %224 = vector.broadcast %cst_106 : f32 to vector<1x128xf32>
    %225 = arith.addf %223, %224 : vector<1x128xf32>
    %226 = arith.mulf %215, %146 : vector<1x128xf32>
    %227 = arith.mulf %207, %217 : vector<1x128xf32>
    %228 = arith.addf %226, %227 : vector<1x128xf32>
    %229 = math.tanh %228 : vector<1x128xf32>
    %230 = arith.mulf %225, %229 : vector<1x128xf32>
    %c0_107 = arith.constant 0 : index
    %c0_108 = arith.constant 0 : index
    %231 = vector.load %arg12[%c0_107, %c0_108] : memref<128x512xf32, #tpu.memory_space<vmem>>, vector<128x512xf32>
    %cst_109 = arith.constant dense<0.000000e+00> : vector<1x512xf32>
    %232 = tpu.matmul %230, %231, %cst_109 {dimension_numbers = #tpu.dot_dimension_numbers<[1], [0], [0], [1], [0, 0, 1, 1], [], []>} : vector<1x128xf32>, vector<128x512xf32>, vector<1x512xf32> -> vector<1x512xf32>
    %c0_110 = arith.constant 0 : index
    %c0_111 = arith.constant 0 : index
    %233 = vector.load %arg5[%c0_110, %c0_111] : memref<1x512xf32, #tpu.memory_space<vmem>>, vector<1x512xf32>
    %234 = arith.addf %232, %233 : vector<1x512xf32>
    %c0_112 = arith.constant 0 : index
    %c0_113 = arith.constant 0 : index
    %235 = vector.load %arg13[%c0_112, %c0_113] : memref<128x512xf32, #tpu.memory_space<vmem>>, vector<128x512xf32>
    %cst_114 = arith.constant dense<0.000000e+00> : vector<1x512xf32>
    %236 = tpu.matmul %188, %235, %cst_114 {dimension_numbers = #tpu.dot_dimension_numbers<[1], [0], [0], [1], [0, 0, 1, 1], [], []>} : vector<1x128xf32>, vector<128x512xf32>, vector<1x512xf32> -> vector<1x512xf32>
    %237 = arith.addf %152, %236 : vector<1x512xf32>
    %238 = vector.extract_strided_slice %237 {offsets = [0, 0], sizes = [1, 128], strides = [1, 1]} : vector<1x512xf32> to vector<1x128xf32>
    %cst_115 = arith.constant 5.000000e-01 : f32
    %239 = vector.broadcast %cst_115 : f32 to vector<1x128xf32>
    %240 = arith.mulf %239, %238 : vector<1x128xf32>
    %241 = math.tanh %240 : vector<1x128xf32>
    %cst_116 = arith.constant 5.000000e-01 : f32
    %242 = vector.broadcast %cst_116 : f32 to vector<1x128xf32>
    %243 = arith.mulf %242, %241 : vector<1x128xf32>
    %cst_117 = arith.constant 5.000000e-01 : f32
    %244 = vector.broadcast %cst_117 : f32 to vector<1x128xf32>
    %245 = arith.addf %243, %244 : vector<1x128xf32>
    %246 = vector.extract_strided_slice %237 {offsets = [0, 128], sizes = [1, 128], strides = [1, 1]} : vector<1x512xf32> to vector<1x128xf32>
    %cst_118 = arith.constant 5.000000e-01 : f32
    %247 = vector.broadcast %cst_118 : f32 to vector<1x128xf32>
    %248 = arith.mulf %247, %246 : vector<1x128xf32>
    %249 = math.tanh %248 : vector<1x128xf32>
    %cst_119 = arith.constant 5.000000e-01 : f32
    %250 = vector.broadcast %cst_119 : f32 to vector<1x128xf32>
    %251 = arith.mulf %250, %249 : vector<1x128xf32>
    %cst_120 = arith.constant 5.000000e-01 : f32
    %252 = vector.broadcast %cst_120 : f32 to vector<1x128xf32>
    %253 = arith.addf %251, %252 : vector<1x128xf32>
    %254 = vector.extract_strided_slice %237 {offsets = [0, 256], sizes = [1, 128], strides = [1, 1]} : vector<1x512xf32> to vector<1x128xf32>
    %255 = math.tanh %254 : vector<1x128xf32>
    %256 = vector.extract_strided_slice %237 {offsets = [0, 384], sizes = [1, 128], strides = [1, 1]} : vector<1x512xf32> to vector<1x128xf32>
    %cst_121 = arith.constant 5.000000e-01 : f32
    %257 = vector.broadcast %cst_121 : f32 to vector<1x128xf32>
    %258 = arith.mulf %257, %256 : vector<1x128xf32>
    %259 = math.tanh %258 : vector<1x128xf32>
    %cst_122 = arith.constant 5.000000e-01 : f32
    %260 = vector.broadcast %cst_122 : f32 to vector<1x128xf32>
    %261 = arith.mulf %260, %259 : vector<1x128xf32>
    %cst_123 = arith.constant 5.000000e-01 : f32
    %262 = vector.broadcast %cst_123 : f32 to vector<1x128xf32>
    %263 = arith.addf %261, %262 : vector<1x128xf32>
    %264 = arith.mulf %253, %186 : vector<1x128xf32>
    %265 = arith.mulf %245, %255 : vector<1x128xf32>
    %266 = arith.addf %264, %265 : vector<1x128xf32>
    %267 = math.tanh %266 : vector<1x128xf32>
    %268 = arith.mulf %263, %267 : vector<1x128xf32>
    %cst_124 = arith.constant 0.000000e+00 : f32
    %269 = vector.broadcast %cst_124 : f32 to vector<1x128xf32>
    %270 = arith.maximumf %268, %269 : vector<1x128xf32>
    %c0_125 = arith.constant 0 : index
    %c0_126 = arith.constant 0 : index
    %271 = vector.load %arg14[%c0_125, %c0_126] : memref<128x128xf32, #tpu.memory_space<vmem>>, vector<128x128xf32>
    %cst_127 = arith.constant dense<0.000000e+00> : vector<1x128xf32>
    %272 = tpu.matmul %270, %271, %cst_127 {dimension_numbers = #tpu.dot_dimension_numbers<[1], [0], [0], [1], [0, 0, 1, 1], [], []>} : vector<1x128xf32>, vector<128x128xf32>, vector<1x128xf32> -> vector<1x128xf32>
    %c0_128 = arith.constant 0 : index
    %c0_129 = arith.constant 0 : index
    %273 = vector.load %arg8[%c0_128, %c0_129] : memref<1x128xf32, #tpu.memory_space<vmem>>, vector<1x128xf32>
    %274 = arith.addf %272, %273 : vector<1x128xf32>
    %c2_130 = arith.constant 2 : index
    %c0_131 = arith.constant 0 : index
    %275 = vector.load %arg9[%c2_130, %c0_131] : memref<8x128xf32, #tpu.memory_space<vmem>>, vector<1x128xf32>
    tpu.vector_store %arg9[%c2_130, %c0_131], %274 {strides = array<i32>} : memref<8x128xf32, #tpu.memory_space<vmem>>, vector<1x128xf32>,
    %c4 = arith.constant 4 : index
    %c0_132 = arith.constant 0 : index
    %276 = vector.load %arg10[%c4, %c0_132] : memref<8x512xf32, #tpu.memory_space<vmem>>, vector<1x512xf32>
    %c0_133 = arith.constant 0 : index
    %c0_134 = arith.constant 0 : index
    %277 = vector.load %arg11[%c0_133, %c0_134] : memref<128x512xf32, #tpu.memory_space<vmem>>, vector<128x512xf32>
    %cst_135 = arith.constant dense<0.000000e+00> : vector<1x512xf32>
    %278 = tpu.matmul %230, %277, %cst_135 {dimension_numbers = #tpu.dot_dimension_numbers<[1], [0], [0], [1], [0, 0, 1, 1], [], []>} : vector<1x128xf32>, vector<128x512xf32>, vector<1x512xf32> -> vector<1x512xf32>
    %279 = arith.addf %276, %278 : vector<1x512xf32>
    %280 = vector.extract_strided_slice %279 {offsets = [0, 0], sizes = [1, 128], strides = [1, 1]} : vector<1x512xf32> to vector<1x128xf32>
    %cst_136 = arith.constant 5.000000e-01 : f32
    %281 = vector.broadcast %cst_136 : f32 to vector<1x128xf32>
    %282 = arith.mulf %281, %280 : vector<1x128xf32>
    %283 = math.tanh %282 : vector<1x128xf32>
    %cst_137 = arith.constant 5.000000e-01 : f32
    %284 = vector.broadcast %cst_137 : f32 to vector<1x128xf32>
    %285 = arith.mulf %284, %283 : vector<1x128xf32>
    %cst_138 = arith.constant 5.000000e-01 : f32
    %286 = vector.broadcast %cst_138 : f32 to vector<1x128xf32>
    %287 = arith.addf %285, %286 : vector<1x128xf32>
    %288 = vector.extract_strided_slice %279 {offsets = [0, 128], sizes = [1, 128], strides = [1, 1]} : vector<1x512xf32> to vector<1x128xf32>
    %cst_139 = arith.constant 5.000000e-01 : f32
    %289 = vector.broadcast %cst_139 : f32 to vector<1x128xf32>
    %290 = arith.mulf %289, %288 : vector<1x128xf32>
    %291 = math.tanh %290 : vector<1x128xf32>
    %cst_140 = arith.constant 5.000000e-01 : f32
    %292 = vector.broadcast %cst_140 : f32 to vector<1x128xf32>
    %293 = arith.mulf %292, %291 : vector<1x128xf32>
    %cst_141 = arith.constant 5.000000e-01 : f32
    %294 = vector.broadcast %cst_141 : f32 to vector<1x128xf32>
    %295 = arith.addf %293, %294 : vector<1x128xf32>
    %296 = vector.extract_strided_slice %279 {offsets = [0, 256], sizes = [1, 128], strides = [1, 1]} : vector<1x512xf32> to vector<1x128xf32>
    %297 = math.tanh %296 : vector<1x128xf32>
    %298 = vector.extract_strided_slice %279 {offsets = [0, 384], sizes = [1, 128], strides = [1, 1]} : vector<1x512xf32> to vector<1x128xf32>
    %cst_142 = arith.constant 5.000000e-01 : f32
    %299 = vector.broadcast %cst_142 : f32 to vector<1x128xf32>
    %300 = arith.mulf %299, %298 : vector<1x128xf32>
    %301 = math.tanh %300 : vector<1x128xf32>
    %cst_143 = arith.constant 5.000000e-01 : f32
    %302 = vector.broadcast %cst_143 : f32 to vector<1x128xf32>
    %303 = arith.mulf %302, %301 : vector<1x128xf32>
    %cst_144 = arith.constant 5.000000e-01 : f32
    %304 = vector.broadcast %cst_144 : f32 to vector<1x128xf32>
    %305 = arith.addf %303, %304 : vector<1x128xf32>
    %306 = arith.mulf %295, %228 : vector<1x128xf32>
    %307 = arith.mulf %287, %297 : vector<1x128xf32>
    %308 = arith.addf %306, %307 : vector<1x128xf32>
    %309 = math.tanh %308 : vector<1x128xf32>
    %310 = arith.mulf %305, %309 : vector<1x128xf32>
    %c0_145 = arith.constant 0 : index
    %c0_146 = arith.constant 0 : index
    %311 = vector.load %arg12[%c0_145, %c0_146] : memref<128x512xf32, #tpu.memory_space<vmem>>, vector<128x512xf32>
    %cst_147 = arith.constant dense<0.000000e+00> : vector<1x512xf32>
    %312 = tpu.matmul %310, %311, %cst_147 {dimension_numbers = #tpu.dot_dimension_numbers<[1], [0], [0], [1], [0, 0, 1, 1], [], []>} : vector<1x128xf32>, vector<128x512xf32>, vector<1x512xf32> -> vector<1x512xf32>
    %c0_148 = arith.constant 0 : index
    %c0_149 = arith.constant 0 : index
    %313 = vector.load %arg5[%c0_148, %c0_149] : memref<1x512xf32, #tpu.memory_space<vmem>>, vector<1x512xf32>
    %314 = arith.addf %312, %313 : vector<1x512xf32>
    %c0_150 = arith.constant 0 : index
    %c0_151 = arith.constant 0 : index
    %315 = vector.load %arg13[%c0_150, %c0_151] : memref<128x512xf32, #tpu.memory_space<vmem>>, vector<128x512xf32>
    %cst_152 = arith.constant dense<0.000000e+00> : vector<1x512xf32>
    %316 = tpu.matmul %268, %315, %cst_152 {dimension_numbers = #tpu.dot_dimension_numbers<[1], [0], [0], [1], [0, 0, 1, 1], [], []>} : vector<1x128xf32>, vector<128x512xf32>, vector<1x512xf32> -> vector<1x512xf32>
    %317 = arith.addf %234, %316 : vector<1x512xf32>
    %318 = vector.extract_strided_slice %317 {offsets = [0, 0], sizes = [1, 128], strides = [1, 1]} : vector<1x512xf32> to vector<1x128xf32>
    %cst_153 = arith.constant 5.000000e-01 : f32
    %319 = vector.broadcast %cst_153 : f32 to vector<1x128xf32>
    %320 = arith.mulf %319, %318 : vector<1x128xf32>
    %321 = math.tanh %320 : vector<1x128xf32>
    %cst_154 = arith.constant 5.000000e-01 : f32
    %322 = vector.broadcast %cst_154 : f32 to vector<1x128xf32>
    %323 = arith.mulf %322, %321 : vector<1x128xf32>
    %cst_155 = arith.constant 5.000000e-01 : f32
    %324 = vector.broadcast %cst_155 : f32 to vector<1x128xf32>
    %325 = arith.addf %323, %324 : vector<1x128xf32>
    %326 = vector.extract_strided_slice %317 {offsets = [0, 128], sizes = [1, 128], strides = [1, 1]} : vector<1x512xf32> to vector<1x128xf32>
    %cst_156 = arith.constant 5.000000e-01 : f32
    %327 = vector.broadcast %cst_156 : f32 to vector<1x128xf32>
    %328 = arith.mulf %327, %326 : vector<1x128xf32>
    %329 = math.tanh %328 : vector<1x128xf32>
    %cst_157 = arith.constant 5.000000e-01 : f32
    %330 = vector.broadcast %cst_157 : f32 to vector<1x128xf32>
    %331 = arith.mulf %330, %329 : vector<1x128xf32>
    %cst_158 = arith.constant 5.000000e-01 : f32
    %332 = vector.broadcast %cst_158 : f32 to vector<1x128xf32>
    %333 = arith.addf %331, %332 : vector<1x128xf32>
    %334 = vector.extract_strided_slice %317 {offsets = [0, 256], sizes = [1, 128], strides = [1, 1]} : vector<1x512xf32> to vector<1x128xf32>
    %335 = math.tanh %334 : vector<1x128xf32>
    %336 = vector.extract_strided_slice %317 {offsets = [0, 384], sizes = [1, 128], strides = [1, 1]} : vector<1x512xf32> to vector<1x128xf32>
    %cst_159 = arith.constant 5.000000e-01 : f32
    %337 = vector.broadcast %cst_159 : f32 to vector<1x128xf32>
    %338 = arith.mulf %337, %336 : vector<1x128xf32>
    %339 = math.tanh %338 : vector<1x128xf32>
    %cst_160 = arith.constant 5.000000e-01 : f32
    %340 = vector.broadcast %cst_160 : f32 to vector<1x128xf32>
    %341 = arith.mulf %340, %339 : vector<1x128xf32>
    %cst_161 = arith.constant 5.000000e-01 : f32
    %342 = vector.broadcast %cst_161 : f32 to vector<1x128xf32>
    %343 = arith.addf %341, %342 : vector<1x128xf32>
    %344 = arith.mulf %333, %266 : vector<1x128xf32>
    %345 = arith.mulf %325, %335 : vector<1x128xf32>
    %346 = arith.addf %344, %345 : vector<1x128xf32>
    %347 = math.tanh %346 : vector<1x128xf32>
    %348 = arith.mulf %343, %347 : vector<1x128xf32>
    %cst_162 = arith.constant 0.000000e+00 : f32
    %349 = vector.broadcast %cst_162 : f32 to vector<1x128xf32>
    %350 = arith.maximumf %348, %349 : vector<1x128xf32>
    %c0_163 = arith.constant 0 : index
    %c0_164 = arith.constant 0 : index
    %351 = vector.load %arg14[%c0_163, %c0_164] : memref<128x128xf32, #tpu.memory_space<vmem>>, vector<128x128xf32>
    %cst_165 = arith.constant dense<0.000000e+00> : vector<1x128xf32>
    %352 = tpu.matmul %350, %351, %cst_165 {dimension_numbers = #tpu.dot_dimension_numbers<[1], [0], [0], [1], [0, 0, 1, 1], [], []>} : vector<1x128xf32>, vector<128x128xf32>, vector<1x128xf32> -> vector<1x128xf32>
    %c0_166 = arith.constant 0 : index
    %c0_167 = arith.constant 0 : index
    %353 = vector.load %arg8[%c0_166, %c0_167] : memref<1x128xf32, #tpu.memory_space<vmem>>, vector<1x128xf32>
    %354 = arith.addf %352, %353 : vector<1x128xf32>
    %c3_168 = arith.constant 3 : index
    %c0_169 = arith.constant 0 : index
    %355 = vector.load %arg9[%c3_168, %c0_169] : memref<8x128xf32, #tpu.memory_space<vmem>>, vector<1x128xf32>
    tpu.vector_store %arg9[%c3_168, %c0_169], %354 {strides = array<i32>} : memref<8x128xf32, #tpu.memory_space<vmem>>, vector<1x128xf32>,
    %c5 = arith.constant 5 : index
    %c0_170 = arith.constant 0 : index
    %356 = vector.load %arg10[%c5, %c0_170] : memref<8x512xf32, #tpu.memory_space<vmem>>, vector<1x512xf32>
    %c0_171 = arith.constant 0 : index
    %c0_172 = arith.constant 0 : index
    %357 = vector.load %arg11[%c0_171, %c0_172] : memref<128x512xf32, #tpu.memory_space<vmem>>, vector<128x512xf32>
    %cst_173 = arith.constant dense<0.000000e+00> : vector<1x512xf32>
    %358 = tpu.matmul %310, %357, %cst_173 {dimension_numbers = #tpu.dot_dimension_numbers<[1], [0], [0], [1], [0, 0, 1, 1], [], []>} : vector<1x128xf32>, vector<128x512xf32>, vector<1x512xf32> -> vector<1x512xf32>
    %359 = arith.addf %356, %358 : vector<1x512xf32>
    %360 = vector.extract_strided_slice %359 {offsets = [0, 0], sizes = [1, 128], strides = [1, 1]} : vector<1x512xf32> to vector<1x128xf32>
    %cst_174 = arith.constant 5.000000e-01 : f32
    %361 = vector.broadcast %cst_174 : f32 to vector<1x128xf32>
    %362 = arith.mulf %361, %360 : vector<1x128xf32>
    %363 = math.tanh %362 : vector<1x128xf32>
    %cst_175 = arith.constant 5.000000e-01 : f32
    %364 = vector.broadcast %cst_175 : f32 to vector<1x128xf32>
    %365 = arith.mulf %364, %363 : vector<1x128xf32>
    %cst_176 = arith.constant 5.000000e-01 : f32
    %366 = vector.broadcast %cst_176 : f32 to vector<1x128xf32>
    %367 = arith.addf %365, %366 : vector<1x128xf32>
    %368 = vector.extract_strided_slice %359 {offsets = [0, 128], sizes = [1, 128], strides = [1, 1]} : vector<1x512xf32> to vector<1x128xf32>
    %cst_177 = arith.constant 5.000000e-01 : f32
    %369 = vector.broadcast %cst_177 : f32 to vector<1x128xf32>
    %370 = arith.mulf %369, %368 : vector<1x128xf32>
    %371 = math.tanh %370 : vector<1x128xf32>
    %cst_178 = arith.constant 5.000000e-01 : f32
    %372 = vector.broadcast %cst_178 : f32 to vector<1x128xf32>
    %373 = arith.mulf %372, %371 : vector<1x128xf32>
    %cst_179 = arith.constant 5.000000e-01 : f32
    %374 = vector.broadcast %cst_179 : f32 to vector<1x128xf32>
    %375 = arith.addf %373, %374 : vector<1x128xf32>
    %376 = vector.extract_strided_slice %359 {offsets = [0, 256], sizes = [1, 128], strides = [1, 1]} : vector<1x512xf32> to vector<1x128xf32>
    %377 = math.tanh %376 : vector<1x128xf32>
    %378 = vector.extract_strided_slice %359 {offsets = [0, 384], sizes = [1, 128], strides = [1, 1]} : vector<1x512xf32> to vector<1x128xf32>
    %cst_180 = arith.constant 5.000000e-01 : f32
    %379 = vector.broadcast %cst_180 : f32 to vector<1x128xf32>
    %380 = arith.mulf %379, %378 : vector<1x128xf32>
    %381 = math.tanh %380 : vector<1x128xf32>
    %cst_181 = arith.constant 5.000000e-01 : f32
    %382 = vector.broadcast %cst_181 : f32 to vector<1x128xf32>
    %383 = arith.mulf %382, %381 : vector<1x128xf32>
    %cst_182 = arith.constant 5.000000e-01 : f32
    %384 = vector.broadcast %cst_182 : f32 to vector<1x128xf32>
    %385 = arith.addf %383, %384 : vector<1x128xf32>
    %386 = arith.mulf %375, %308 : vector<1x128xf32>
    %387 = arith.mulf %367, %377 : vector<1x128xf32>
    %388 = arith.addf %386, %387 : vector<1x128xf32>
    %389 = math.tanh %388 : vector<1x128xf32>
    %390 = arith.mulf %385, %389 : vector<1x128xf32>
    %c0_183 = arith.constant 0 : index
    %c0_184 = arith.constant 0 : index
    %391 = vector.load %arg12[%c0_183, %c0_184] : memref<128x512xf32, #tpu.memory_space<vmem>>, vector<128x512xf32>
    %cst_185 = arith.constant dense<0.000000e+00> : vector<1x512xf32>
    %392 = tpu.matmul %390, %391, %cst_185 {dimension_numbers = #tpu.dot_dimension_numbers<[1], [0], [0], [1], [0, 0, 1, 1], [], []>} : vector<1x128xf32>, vector<128x512xf32>, vector<1x512xf32> -> vector<1x512xf32>
    %c0_186 = arith.constant 0 : index
    %c0_187 = arith.constant 0 : index
    %393 = vector.load %arg5[%c0_186, %c0_187] : memref<1x512xf32, #tpu.memory_space<vmem>>, vector<1x512xf32>
    %394 = arith.addf %392, %393 : vector<1x512xf32>
    %c0_188 = arith.constant 0 : index
    %c0_189 = arith.constant 0 : index
    %395 = vector.load %arg13[%c0_188, %c0_189] : memref<128x512xf32, #tpu.memory_space<vmem>>, vector<128x512xf32>
    %cst_190 = arith.constant dense<0.000000e+00> : vector<1x512xf32>
    %396 = tpu.matmul %348, %395, %cst_190 {dimension_numbers = #tpu.dot_dimension_numbers<[1], [0], [0], [1], [0, 0, 1, 1], [], []>} : vector<1x128xf32>, vector<128x512xf32>, vector<1x512xf32> -> vector<1x512xf32>
    %397 = arith.addf %314, %396 : vector<1x512xf32>
    %398 = vector.extract_strided_slice %397 {offsets = [0, 0], sizes = [1, 128], strides = [1, 1]} : vector<1x512xf32> to vector<1x128xf32>
    %cst_191 = arith.constant 5.000000e-01 : f32
    %399 = vector.broadcast %cst_191 : f32 to vector<1x128xf32>
    %400 = arith.mulf %399, %398 : vector<1x128xf32>
    %401 = math.tanh %400 : vector<1x128xf32>
    %cst_192 = arith.constant 5.000000e-01 : f32
    %402 = vector.broadcast %cst_192 : f32 to vector<1x128xf32>
    %403 = arith.mulf %402, %401 : vector<1x128xf32>
    %cst_193 = arith.constant 5.000000e-01 : f32
    %404 = vector.broadcast %cst_193 : f32 to vector<1x128xf32>
    %405 = arith.addf %403, %404 : vector<1x128xf32>
    %406 = vector.extract_strided_slice %397 {offsets = [0, 128], sizes = [1, 128], strides = [1, 1]} : vector<1x512xf32> to vector<1x128xf32>
    %cst_194 = arith.constant 5.000000e-01 : f32
    %407 = vector.broadcast %cst_194 : f32 to vector<1x128xf32>
    %408 = arith.mulf %407, %406 : vector<1x128xf32>
    %409 = math.tanh %408 : vector<1x128xf32>
    %cst_195 = arith.constant 5.000000e-01 : f32
    %410 = vector.broadcast %cst_195 : f32 to vector<1x128xf32>
    %411 = arith.mulf %410, %409 : vector<1x128xf32>
    %cst_196 = arith.constant 5.000000e-01 : f32
    %412 = vector.broadcast %cst_196 : f32 to vector<1x128xf32>
    %413 = arith.addf %411, %412 : vector<1x128xf32>
    %414 = vector.extract_strided_slice %397 {offsets = [0, 256], sizes = [1, 128], strides = [1, 1]} : vector<1x512xf32> to vector<1x128xf32>
    %415 = math.tanh %414 : vector<1x128xf32>
    %416 = vector.extract_strided_slice %397 {offsets = [0, 384], sizes = [1, 128], strides = [1, 1]} : vector<1x512xf32> to vector<1x128xf32>
    %cst_197 = arith.constant 5.000000e-01 : f32
    %417 = vector.broadcast %cst_197 : f32 to vector<1x128xf32>
    %418 = arith.mulf %417, %416 : vector<1x128xf32>
    %419 = math.tanh %418 : vector<1x128xf32>
    %cst_198 = arith.constant 5.000000e-01 : f32
    %420 = vector.broadcast %cst_198 : f32 to vector<1x128xf32>
    %421 = arith.mulf %420, %419 : vector<1x128xf32>
    %cst_199 = arith.constant 5.000000e-01 : f32
    %422 = vector.broadcast %cst_199 : f32 to vector<1x128xf32>
    %423 = arith.addf %421, %422 : vector<1x128xf32>
    %424 = arith.mulf %413, %346 : vector<1x128xf32>
    %425 = arith.mulf %405, %415 : vector<1x128xf32>
    %426 = arith.addf %424, %425 : vector<1x128xf32>
    %427 = math.tanh %426 : vector<1x128xf32>
    %428 = arith.mulf %423, %427 : vector<1x128xf32>
    %cst_200 = arith.constant 0.000000e+00 : f32
    %429 = vector.broadcast %cst_200 : f32 to vector<1x128xf32>
    %430 = arith.maximumf %428, %429 : vector<1x128xf32>
    %c0_201 = arith.constant 0 : index
    %c0_202 = arith.constant 0 : index
    %431 = vector.load %arg14[%c0_201, %c0_202] : memref<128x128xf32, #tpu.memory_space<vmem>>, vector<128x128xf32>
    %cst_203 = arith.constant dense<0.000000e+00> : vector<1x128xf32>
    %432 = tpu.matmul %430, %431, %cst_203 {dimension_numbers = #tpu.dot_dimension_numbers<[1], [0], [0], [1], [0, 0, 1, 1], [], []>} : vector<1x128xf32>, vector<128x128xf32>, vector<1x128xf32> -> vector<1x128xf32>
    %c0_204 = arith.constant 0 : index
    %c0_205 = arith.constant 0 : index
    %433 = vector.load %arg8[%c0_204, %c0_205] : memref<1x128xf32, #tpu.memory_space<vmem>>, vector<1x128xf32>
    %434 = arith.addf %432, %433 : vector<1x128xf32>
    %c4_206 = arith.constant 4 : index
    %c0_207 = arith.constant 0 : index
    %435 = vector.load %arg9[%c4_206, %c0_207] : memref<8x128xf32, #tpu.memory_space<vmem>>, vector<1x128xf32>
    tpu.vector_store %arg9[%c4_206, %c0_207], %434 {strides = array<i32>} : memref<8x128xf32, #tpu.memory_space<vmem>>, vector<1x128xf32>,
    %c6 = arith.constant 6 : index
    %c0_208 = arith.constant 0 : index
    %436 = vector.load %arg10[%c6, %c0_208] : memref<8x512xf32, #tpu.memory_space<vmem>>, vector<1x512xf32>
    %c0_209 = arith.constant 0 : index
    %c0_210 = arith.constant 0 : index
    %437 = vector.load %arg11[%c0_209, %c0_210] : memref<128x512xf32, #tpu.memory_space<vmem>>, vector<128x512xf32>
    %cst_211 = arith.constant dense<0.000000e+00> : vector<1x512xf32>
    %438 = tpu.matmul %390, %437, %cst_211 {dimension_numbers = #tpu.dot_dimension_numbers<[1], [0], [0], [1], [0, 0, 1, 1], [], []>} : vector<1x128xf32>, vector<128x512xf32>, vector<1x512xf32> -> vector<1x512xf32>
    %439 = arith.addf %436, %438 : vector<1x512xf32>
    %440 = vector.extract_strided_slice %439 {offsets = [0, 0], sizes = [1, 128], strides = [1, 1]} : vector<1x512xf32> to vector<1x128xf32>
    %cst_212 = arith.constant 5.000000e-01 : f32
    %441 = vector.broadcast %cst_212 : f32 to vector<1x128xf32>
    %442 = arith.mulf %441, %440 : vector<1x128xf32>
    %443 = math.tanh %442 : vector<1x128xf32>
    %cst_213 = arith.constant 5.000000e-01 : f32
    %444 = vector.broadcast %cst_213 : f32 to vector<1x128xf32>
    %445 = arith.mulf %444, %443 : vector<1x128xf32>
    %cst_214 = arith.constant 5.000000e-01 : f32
    %446 = vector.broadcast %cst_214 : f32 to vector<1x128xf32>
    %447 = arith.addf %445, %446 : vector<1x128xf32>
    %448 = vector.extract_strided_slice %439 {offsets = [0, 128], sizes = [1, 128], strides = [1, 1]} : vector<1x512xf32> to vector<1x128xf32>
    %cst_215 = arith.constant 5.000000e-01 : f32
    %449 = vector.broadcast %cst_215 : f32 to vector<1x128xf32>
    %450 = arith.mulf %449, %448 : vector<1x128xf32>
    %451 = math.tanh %450 : vector<1x128xf32>
    %cst_216 = arith.constant 5.000000e-01 : f32
    %452 = vector.broadcast %cst_216 : f32 to vector<1x128xf32>
    %453 = arith.mulf %452, %451 : vector<1x128xf32>
    %cst_217 = arith.constant 5.000000e-01 : f32
    %454 = vector.broadcast %cst_217 : f32 to vector<1x128xf32>
    %455 = arith.addf %453, %454 : vector<1x128xf32>
    %456 = vector.extract_strided_slice %439 {offsets = [0, 256], sizes = [1, 128], strides = [1, 1]} : vector<1x512xf32> to vector<1x128xf32>
    %457 = math.tanh %456 : vector<1x128xf32>
    %458 = vector.extract_strided_slice %439 {offsets = [0, 384], sizes = [1, 128], strides = [1, 1]} : vector<1x512xf32> to vector<1x128xf32>
    %cst_218 = arith.constant 5.000000e-01 : f32
    %459 = vector.broadcast %cst_218 : f32 to vector<1x128xf32>
    %460 = arith.mulf %459, %458 : vector<1x128xf32>
    %461 = math.tanh %460 : vector<1x128xf32>
    %cst_219 = arith.constant 5.000000e-01 : f32
    %462 = vector.broadcast %cst_219 : f32 to vector<1x128xf32>
    %463 = arith.mulf %462, %461 : vector<1x128xf32>
    %cst_220 = arith.constant 5.000000e-01 : f32
    %464 = vector.broadcast %cst_220 : f32 to vector<1x128xf32>
    %465 = arith.addf %463, %464 : vector<1x128xf32>
    %466 = arith.mulf %455, %388 : vector<1x128xf32>
    %467 = arith.mulf %447, %457 : vector<1x128xf32>
    %468 = arith.addf %466, %467 : vector<1x128xf32>
    %469 = math.tanh %468 : vector<1x128xf32>
    %470 = arith.mulf %465, %469 : vector<1x128xf32>
    %c0_221 = arith.constant 0 : index
    %c0_222 = arith.constant 0 : index
    %471 = vector.load %arg12[%c0_221, %c0_222] : memref<128x512xf32, #tpu.memory_space<vmem>>, vector<128x512xf32>
    %cst_223 = arith.constant dense<0.000000e+00> : vector<1x512xf32>
    %472 = tpu.matmul %470, %471, %cst_223 {dimension_numbers = #tpu.dot_dimension_numbers<[1], [0], [0], [1], [0, 0, 1, 1], [], []>} : vector<1x128xf32>, vector<128x512xf32>, vector<1x512xf32> -> vector<1x512xf32>
    %c0_224 = arith.constant 0 : index
    %c0_225 = arith.constant 0 : index
    %473 = vector.load %arg5[%c0_224, %c0_225] : memref<1x512xf32, #tpu.memory_space<vmem>>, vector<1x512xf32>
    %474 = arith.addf %472, %473 : vector<1x512xf32>
    %c0_226 = arith.constant 0 : index
    %c0_227 = arith.constant 0 : index
    %475 = vector.load %arg13[%c0_226, %c0_227] : memref<128x512xf32, #tpu.memory_space<vmem>>, vector<128x512xf32>
    %cst_228 = arith.constant dense<0.000000e+00> : vector<1x512xf32>
    %476 = tpu.matmul %428, %475, %cst_228 {dimension_numbers = #tpu.dot_dimension_numbers<[1], [0], [0], [1], [0, 0, 1, 1], [], []>} : vector<1x128xf32>, vector<128x512xf32>, vector<1x512xf32> -> vector<1x512xf32>
    %477 = arith.addf %394, %476 : vector<1x512xf32>
    %478 = vector.extract_strided_slice %477 {offsets = [0, 0], sizes = [1, 128], strides = [1, 1]} : vector<1x512xf32> to vector<1x128xf32>
    %cst_229 = arith.constant 5.000000e-01 : f32
    %479 = vector.broadcast %cst_229 : f32 to vector<1x128xf32>
    %480 = arith.mulf %479, %478 : vector<1x128xf32>
    %481 = math.tanh %480 : vector<1x128xf32>
    %cst_230 = arith.constant 5.000000e-01 : f32
    %482 = vector.broadcast %cst_230 : f32 to vector<1x128xf32>
    %483 = arith.mulf %482, %481 : vector<1x128xf32>
    %cst_231 = arith.constant 5.000000e-01 : f32
    %484 = vector.broadcast %cst_231 : f32 to vector<1x128xf32>
    %485 = arith.addf %483, %484 : vector<1x128xf32>
    %486 = vector.extract_strided_slice %477 {offsets = [0, 128], sizes = [1, 128], strides = [1, 1]} : vector<1x512xf32> to vector<1x128xf32>
    %cst_232 = arith.constant 5.000000e-01 : f32
    %487 = vector.broadcast %cst_232 : f32 to vector<1x128xf32>
    %488 = arith.mulf %487, %486 : vector<1x128xf32>
    %489 = math.tanh %488 : vector<1x128xf32>
    %cst_233 = arith.constant 5.000000e-01 : f32
    %490 = vector.broadcast %cst_233 : f32 to vector<1x128xf32>
    %491 = arith.mulf %490, %489 : vector<1x128xf32>
    %cst_234 = arith.constant 5.000000e-01 : f32
    %492 = vector.broadcast %cst_234 : f32 to vector<1x128xf32>
    %493 = arith.addf %491, %492 : vector<1x128xf32>
    %494 = vector.extract_strided_slice %477 {offsets = [0, 256], sizes = [1, 128], strides = [1, 1]} : vector<1x512xf32> to vector<1x128xf32>
    %495 = math.tanh %494 : vector<1x128xf32>
    %496 = vector.extract_strided_slice %477 {offsets = [0, 384], sizes = [1, 128], strides = [1, 1]} : vector<1x512xf32> to vector<1x128xf32>
    %cst_235 = arith.constant 5.000000e-01 : f32
    %497 = vector.broadcast %cst_235 : f32 to vector<1x128xf32>
    %498 = arith.mulf %497, %496 : vector<1x128xf32>
    %499 = math.tanh %498 : vector<1x128xf32>
    %cst_236 = arith.constant 5.000000e-01 : f32
    %500 = vector.broadcast %cst_236 : f32 to vector<1x128xf32>
    %501 = arith.mulf %500, %499 : vector<1x128xf32>
    %cst_237 = arith.constant 5.000000e-01 : f32
    %502 = vector.broadcast %cst_237 : f32 to vector<1x128xf32>
    %503 = arith.addf %501, %502 : vector<1x128xf32>
    %504 = arith.mulf %493, %426 : vector<1x128xf32>
    %505 = arith.mulf %485, %495 : vector<1x128xf32>
    %506 = arith.addf %504, %505 : vector<1x128xf32>
    %507 = math.tanh %506 : vector<1x128xf32>
    %508 = arith.mulf %503, %507 : vector<1x128xf32>
    %cst_238 = arith.constant 0.000000e+00 : f32
    %509 = vector.broadcast %cst_238 : f32 to vector<1x128xf32>
    %510 = arith.maximumf %508, %509 : vector<1x128xf32>
    %c0_239 = arith.constant 0 : index
    %c0_240 = arith.constant 0 : index
    %511 = vector.load %arg14[%c0_239, %c0_240] : memref<128x128xf32, #tpu.memory_space<vmem>>, vector<128x128xf32>
    %cst_241 = arith.constant dense<0.000000e+00> : vector<1x128xf32>
    %512 = tpu.matmul %510, %511, %cst_241 {dimension_numbers = #tpu.dot_dimension_numbers<[1], [0], [0], [1], [0, 0, 1, 1], [], []>} : vector<1x128xf32>, vector<128x128xf32>, vector<1x128xf32> -> vector<1x128xf32>
    %c0_242 = arith.constant 0 : index
    %c0_243 = arith.constant 0 : index
    %513 = vector.load %arg8[%c0_242, %c0_243] : memref<1x128xf32, #tpu.memory_space<vmem>>, vector<1x128xf32>
    %514 = arith.addf %512, %513 : vector<1x128xf32>
    %c5_244 = arith.constant 5 : index
    %c0_245 = arith.constant 0 : index
    %515 = vector.load %arg9[%c5_244, %c0_245] : memref<8x128xf32, #tpu.memory_space<vmem>>, vector<1x128xf32>
    tpu.vector_store %arg9[%c5_244, %c0_245], %514 {strides = array<i32>} : memref<8x128xf32, #tpu.memory_space<vmem>>, vector<1x128xf32>,
    %c7 = arith.constant 7 : index
    %c0_246 = arith.constant 0 : index
    %516 = vector.load %arg10[%c7, %c0_246] : memref<8x512xf32, #tpu.memory_space<vmem>>, vector<1x512xf32>
    %c0_247 = arith.constant 0 : index
    %c0_248 = arith.constant 0 : index
    %517 = vector.load %arg11[%c0_247, %c0_248] : memref<128x512xf32, #tpu.memory_space<vmem>>, vector<128x512xf32>
    %cst_249 = arith.constant dense<0.000000e+00> : vector<1x512xf32>
    %518 = tpu.matmul %470, %517, %cst_249 {dimension_numbers = #tpu.dot_dimension_numbers<[1], [0], [0], [1], [0, 0, 1, 1], [], []>} : vector<1x128xf32>, vector<128x512xf32>, vector<1x512xf32> -> vector<1x512xf32>
    %519 = arith.addf %516, %518 : vector<1x512xf32>
    %520 = vector.extract_strided_slice %519 {offsets = [0, 0], sizes = [1, 128], strides = [1, 1]} : vector<1x512xf32> to vector<1x128xf32>
    %cst_250 = arith.constant 5.000000e-01 : f32
    %521 = vector.broadcast %cst_250 : f32 to vector<1x128xf32>
    %522 = arith.mulf %521, %520 : vector<1x128xf32>
    %523 = math.tanh %522 : vector<1x128xf32>
    %cst_251 = arith.constant 5.000000e-01 : f32
    %524 = vector.broadcast %cst_251 : f32 to vector<1x128xf32>
    %525 = arith.mulf %524, %523 : vector<1x128xf32>
    %cst_252 = arith.constant 5.000000e-01 : f32
    %526 = vector.broadcast %cst_252 : f32 to vector<1x128xf32>
    %527 = arith.addf %525, %526 : vector<1x128xf32>
    %528 = vector.extract_strided_slice %519 {offsets = [0, 128], sizes = [1, 128], strides = [1, 1]} : vector<1x512xf32> to vector<1x128xf32>
    %cst_253 = arith.constant 5.000000e-01 : f32
    %529 = vector.broadcast %cst_253 : f32 to vector<1x128xf32>
    %530 = arith.mulf %529, %528 : vector<1x128xf32>
    %531 = math.tanh %530 : vector<1x128xf32>
    %cst_254 = arith.constant 5.000000e-01 : f32
    %532 = vector.broadcast %cst_254 : f32 to vector<1x128xf32>
    %533 = arith.mulf %532, %531 : vector<1x128xf32>
    %cst_255 = arith.constant 5.000000e-01 : f32
    %534 = vector.broadcast %cst_255 : f32 to vector<1x128xf32>
    %535 = arith.addf %533, %534 : vector<1x128xf32>
    %536 = vector.extract_strided_slice %519 {offsets = [0, 256], sizes = [1, 128], strides = [1, 1]} : vector<1x512xf32> to vector<1x128xf32>
    %537 = math.tanh %536 : vector<1x128xf32>
    %538 = vector.extract_strided_slice %519 {offsets = [0, 384], sizes = [1, 128], strides = [1, 1]} : vector<1x512xf32> to vector<1x128xf32>
    %cst_256 = arith.constant 5.000000e-01 : f32
    %539 = vector.broadcast %cst_256 : f32 to vector<1x128xf32>
    %540 = arith.mulf %539, %538 : vector<1x128xf32>
    %541 = math.tanh %540 : vector<1x128xf32>
    %cst_257 = arith.constant 5.000000e-01 : f32
    %542 = vector.broadcast %cst_257 : f32 to vector<1x128xf32>
    %543 = arith.mulf %542, %541 : vector<1x128xf32>
    %cst_258 = arith.constant 5.000000e-01 : f32
    %544 = vector.broadcast %cst_258 : f32 to vector<1x128xf32>
    %545 = arith.addf %543, %544 : vector<1x128xf32>
    %546 = arith.mulf %535, %468 : vector<1x128xf32>
    %547 = arith.mulf %527, %537 : vector<1x128xf32>
    %548 = arith.addf %546, %547 : vector<1x128xf32>
    %549 = math.tanh %548 : vector<1x128xf32>
    %550 = arith.mulf %545, %549 : vector<1x128xf32>
    %c0_259 = arith.constant 0 : index
    %c0_260 = arith.constant 0 : index
    %551 = vector.load %arg12[%c0_259, %c0_260] : memref<128x512xf32, #tpu.memory_space<vmem>>, vector<128x512xf32>
    %cst_261 = arith.constant dense<0.000000e+00> : vector<1x512xf32>
    %552 = tpu.matmul %550, %551, %cst_261 {dimension_numbers = #tpu.dot_dimension_numbers<[1], [0], [0], [1], [0, 0, 1, 1], [], []>} : vector<1x128xf32>, vector<128x512xf32>, vector<1x512xf32> -> vector<1x512xf32>
    %c0_262 = arith.constant 0 : index
    %c0_263 = arith.constant 0 : index
    %553 = vector.load %arg5[%c0_262, %c0_263] : memref<1x512xf32, #tpu.memory_space<vmem>>, vector<1x512xf32>
    %554 = arith.addf %552, %553 : vector<1x512xf32>
    %c0_264 = arith.constant 0 : index
    %c0_265 = arith.constant 0 : index
    %555 = vector.load %arg13[%c0_264, %c0_265] : memref<128x512xf32, #tpu.memory_space<vmem>>, vector<128x512xf32>
    %cst_266 = arith.constant dense<0.000000e+00> : vector<1x512xf32>
    %556 = tpu.matmul %508, %555, %cst_266 {dimension_numbers = #tpu.dot_dimension_numbers<[1], [0], [0], [1], [0, 0, 1, 1], [], []>} : vector<1x128xf32>, vector<128x512xf32>, vector<1x512xf32> -> vector<1x512xf32>
    %557 = arith.addf %474, %556 : vector<1x512xf32>
    %558 = vector.extract_strided_slice %557 {offsets = [0, 0], sizes = [1, 128], strides = [1, 1]} : vector<1x512xf32> to vector<1x128xf32>
    %cst_267 = arith.constant 5.000000e-01 : f32
    %559 = vector.broadcast %cst_267 : f32 to vector<1x128xf32>
    %560 = arith.mulf %559, %558 : vector<1x128xf32>
    %561 = math.tanh %560 : vector<1x128xf32>
    %cst_268 = arith.constant 5.000000e-01 : f32
    %562 = vector.broadcast %cst_268 : f32 to vector<1x128xf32>
    %563 = arith.mulf %562, %561 : vector<1x128xf32>
    %cst_269 = arith.constant 5.000000e-01 : f32
    %564 = vector.broadcast %cst_269 : f32 to vector<1x128xf32>
    %565 = arith.addf %563, %564 : vector<1x128xf32>
    %566 = vector.extract_strided_slice %557 {offsets = [0, 128], sizes = [1, 128], strides = [1, 1]} : vector<1x512xf32> to vector<1x128xf32>
    %cst_270 = arith.constant 5.000000e-01 : f32
    %567 = vector.broadcast %cst_270 : f32 to vector<1x128xf32>
    %568 = arith.mulf %567, %566 : vector<1x128xf32>
    %569 = math.tanh %568 : vector<1x128xf32>
    %cst_271 = arith.constant 5.000000e-01 : f32
    %570 = vector.broadcast %cst_271 : f32 to vector<1x128xf32>
    %571 = arith.mulf %570, %569 : vector<1x128xf32>
    %cst_272 = arith.constant 5.000000e-01 : f32
    %572 = vector.broadcast %cst_272 : f32 to vector<1x128xf32>
    %573 = arith.addf %571, %572 : vector<1x128xf32>
    %574 = vector.extract_strided_slice %557 {offsets = [0, 256], sizes = [1, 128], strides = [1, 1]} : vector<1x512xf32> to vector<1x128xf32>
    %575 = math.tanh %574 : vector<1x128xf32>
    %576 = vector.extract_strided_slice %557 {offsets = [0, 384], sizes = [1, 128], strides = [1, 1]} : vector<1x512xf32> to vector<1x128xf32>
    %cst_273 = arith.constant 5.000000e-01 : f32
    %577 = vector.broadcast %cst_273 : f32 to vector<1x128xf32>
    %578 = arith.mulf %577, %576 : vector<1x128xf32>
    %579 = math.tanh %578 : vector<1x128xf32>
    %cst_274 = arith.constant 5.000000e-01 : f32
    %580 = vector.broadcast %cst_274 : f32 to vector<1x128xf32>
    %581 = arith.mulf %580, %579 : vector<1x128xf32>
    %cst_275 = arith.constant 5.000000e-01 : f32
    %582 = vector.broadcast %cst_275 : f32 to vector<1x128xf32>
    %583 = arith.addf %581, %582 : vector<1x128xf32>
    %584 = arith.mulf %573, %506 : vector<1x128xf32>
    %585 = arith.mulf %565, %575 : vector<1x128xf32>
    %586 = arith.addf %584, %585 : vector<1x128xf32>
    %587 = math.tanh %586 : vector<1x128xf32>
    %588 = arith.mulf %583, %587 : vector<1x128xf32>
    %cst_276 = arith.constant 0.000000e+00 : f32
    %589 = vector.broadcast %cst_276 : f32 to vector<1x128xf32>
    %590 = arith.maximumf %588, %589 : vector<1x128xf32>
    %c0_277 = arith.constant 0 : index
    %c0_278 = arith.constant 0 : index
    %591 = vector.load %arg14[%c0_277, %c0_278] : memref<128x128xf32, #tpu.memory_space<vmem>>, vector<128x128xf32>
    %cst_279 = arith.constant dense<0.000000e+00> : vector<1x128xf32>
    %592 = tpu.matmul %590, %591, %cst_279 {dimension_numbers = #tpu.dot_dimension_numbers<[1], [0], [0], [1], [0, 0, 1, 1], [], []>} : vector<1x128xf32>, vector<128x128xf32>, vector<1x128xf32> -> vector<1x128xf32>
    %c0_280 = arith.constant 0 : index
    %c0_281 = arith.constant 0 : index
    %593 = vector.load %arg8[%c0_280, %c0_281] : memref<1x128xf32, #tpu.memory_space<vmem>>, vector<1x128xf32>
    %594 = arith.addf %592, %593 : vector<1x128xf32>
    %c6_282 = arith.constant 6 : index
    %c0_283 = arith.constant 0 : index
    %595 = vector.load %arg9[%c6_282, %c0_283] : memref<8x128xf32, #tpu.memory_space<vmem>>, vector<1x128xf32>
    tpu.vector_store %arg9[%c6_282, %c0_283], %594 {strides = array<i32>} : memref<8x128xf32, #tpu.memory_space<vmem>>, vector<1x128xf32>,
    %c0_284 = arith.constant 0 : index
    %c0_285 = arith.constant 0 : index
    %596 = vector.load %arg13[%c0_284, %c0_285] : memref<128x512xf32, #tpu.memory_space<vmem>>, vector<128x512xf32>
    %cst_286 = arith.constant dense<0.000000e+00> : vector<1x512xf32>
    %597 = tpu.matmul %588, %596, %cst_286 {dimension_numbers = #tpu.dot_dimension_numbers<[1], [0], [0], [1], [0, 0, 1, 1], [], []>} : vector<1x128xf32>, vector<128x512xf32>, vector<1x512xf32> -> vector<1x512xf32>
    %598 = arith.addf %554, %597 : vector<1x512xf32>
    %599 = vector.extract_strided_slice %598 {offsets = [0, 0], sizes = [1, 128], strides = [1, 1]} : vector<1x512xf32> to vector<1x128xf32>
    %cst_287 = arith.constant 5.000000e-01 : f32
    %600 = vector.broadcast %cst_287 : f32 to vector<1x128xf32>
    %601 = arith.mulf %600, %599 : vector<1x128xf32>
    %602 = math.tanh %601 : vector<1x128xf32>
    %cst_288 = arith.constant 5.000000e-01 : f32
    %603 = vector.broadcast %cst_288 : f32 to vector<1x128xf32>
    %604 = arith.mulf %603, %602 : vector<1x128xf32>
    %cst_289 = arith.constant 5.000000e-01 : f32
    %605 = vector.broadcast %cst_289 : f32 to vector<1x128xf32>
    %606 = arith.addf %604, %605 : vector<1x128xf32>
    %607 = vector.extract_strided_slice %598 {offsets = [0, 128], sizes = [1, 128], strides = [1, 1]} : vector<1x512xf32> to vector<1x128xf32>
    %cst_290 = arith.constant 5.000000e-01 : f32
    %608 = vector.broadcast %cst_290 : f32 to vector<1x128xf32>
    %609 = arith.mulf %608, %607 : vector<1x128xf32>
    %610 = math.tanh %609 : vector<1x128xf32>
    %cst_291 = arith.constant 5.000000e-01 : f32
    %611 = vector.broadcast %cst_291 : f32 to vector<1x128xf32>
    %612 = arith.mulf %611, %610 : vector<1x128xf32>
    %cst_292 = arith.constant 5.000000e-01 : f32
    %613 = vector.broadcast %cst_292 : f32 to vector<1x128xf32>
    %614 = arith.addf %612, %613 : vector<1x128xf32>
    %615 = vector.extract_strided_slice %598 {offsets = [0, 256], sizes = [1, 128], strides = [1, 1]} : vector<1x512xf32> to vector<1x128xf32>
    %616 = math.tanh %615 : vector<1x128xf32>
    %617 = vector.extract_strided_slice %598 {offsets = [0, 384], sizes = [1, 128], strides = [1, 1]} : vector<1x512xf32> to vector<1x128xf32>
    %cst_293 = arith.constant 5.000000e-01 : f32
    %618 = vector.broadcast %cst_293 : f32 to vector<1x128xf32>
    %619 = arith.mulf %618, %617 : vector<1x128xf32>
    %620 = math.tanh %619 : vector<1x128xf32>
    %cst_294 = arith.constant 5.000000e-01 : f32
    %621 = vector.broadcast %cst_294 : f32 to vector<1x128xf32>
    %622 = arith.mulf %621, %620 : vector<1x128xf32>
    %cst_295 = arith.constant 5.000000e-01 : f32
    %623 = vector.broadcast %cst_295 : f32 to vector<1x128xf32>
    %624 = arith.addf %622, %623 : vector<1x128xf32>
    %625 = arith.mulf %614, %586 : vector<1x128xf32>
    %626 = arith.mulf %606, %616 : vector<1x128xf32>
    %627 = arith.addf %625, %626 : vector<1x128xf32>
    %628 = math.tanh %627 : vector<1x128xf32>
    %629 = arith.mulf %624, %628 : vector<1x128xf32>
    %cst_296 = arith.constant 0.000000e+00 : f32
    %630 = vector.broadcast %cst_296 : f32 to vector<1x128xf32>
    %631 = arith.maximumf %629, %630 : vector<1x128xf32>
    %c0_297 = arith.constant 0 : index
    %c0_298 = arith.constant 0 : index
    %632 = vector.load %arg14[%c0_297, %c0_298] : memref<128x128xf32, #tpu.memory_space<vmem>>, vector<128x128xf32>
    %cst_299 = arith.constant dense<0.000000e+00> : vector<1x128xf32>
    %633 = tpu.matmul %631, %632, %cst_299 {dimension_numbers = #tpu.dot_dimension_numbers<[1], [0], [0], [1], [0, 0, 1, 1], [], []>} : vector<1x128xf32>, vector<128x128xf32>, vector<1x128xf32> -> vector<1x128xf32>
    %c0_300 = arith.constant 0 : index
    %c0_301 = arith.constant 0 : index
    %634 = vector.load %arg8[%c0_300, %c0_301] : memref<1x128xf32, #tpu.memory_space<vmem>>, vector<1x128xf32>
    %635 = arith.addf %633, %634 : vector<1x128xf32>
    %c7_302 = arith.constant 7 : index
    %c0_303 = arith.constant 0 : index
    %636 = vector.load %arg9[%c7_302, %c0_303] : memref<8x128xf32, #tpu.memory_space<vmem>>, vector<1x128xf32>
    tpu.vector_store %arg9[%c7_302, %c0_303], %635 {strides = array<i32>} : memref<8x128xf32, #tpu.memory_space<vmem>>, vector<1x128xf32>,
    return
  }
}

</mosaic_0001>

<bundles_post_ra>
// kernel: tpu_custom_call.1
= control target key start
LH: loop header
LB: loop body
LE: loop exit
PB: predicated region body
PF: predicated region fallthrough
CT: control target
= control target key end

     0   :  { %14 = vsyncpa [#allocation9], 0  ;;  %s8331_s0 = inlined_call_operand.hbm [shape: f32[8,128], index: 0, kind: input, shape index: {}]   ;;  %s8332_s1 = inlined_call_operand.hbm [shape: f32[128,512], index: 1, kind: input, shape index: {}]   ;;  %s8333_s2 = inlined_call_operand.hbm [shape: f32[1,512], index: 2, kind: input, shape index: {}]   ;;  %s8334_s3 = inlined_call_operand.hbm [shape: f32[128,512], index: 3, kind: input, shape index: {}]   ;;  %s8335_s4 = inlined_call_operand.hbm [shape: f32[128,512], index: 4, kind: input, shape index: {}]   ;;  %s8336_s5 = inlined_call_operand.vmem [shape: f32[1,512], index: 5, kind: input, shape index: {}]   ;;  %s8337_s6 = inlined_call_operand.hbm [shape: f32[128,512], index: 6, kind: input, shape index: {}]   ;;  %s8338_s7 = inlined_call_operand.hbm [shape: f32[128,128], index: 7, kind: input, shape index: {}]   ;;  %s8339_s8 = inlined_call_operand.vmem [shape: f32[1,128], index: 8, kind: input, shape index: {}]   ;;  %s8340_s9 = inlined_call_operand.hbm [shape: f32[8,128], index: 9, kind: output, shape index: {}]  }
   0x1   :  { %15 = vsyncpa [#allocation12], 0 }
   0x2   :  { %16 = vsyncpa [#allocation10], 0  ;;  %s7165_s30 = smov [#allocation11]  }
   0x3   :  { %s32_s10 = sshll.u32 %s7165_s30, 4  ;;  %s33_s10 = int_to_ptr.vmem [resolvable:$true] %s32_s10 }
   0x4   :  { %s6999_s11 = scalar_lea.vmem %s33_s10, 8192  ;;  %p7004_p1 = scmp.lt.s32.totalorder %s33_s10, %s33_s10 }
   0x5   :  { %p7000_p0 = scmp.ne.s32.totalorder %s33_s10, %s6999_s11  ;;  %p7005_p2 = scmp.lt.s32.totalorder %s6999_s11, %s6999_s11 }
   0x7   :  { %p7006_p3 = por %p7005_p2, %p7004_p1 }
   0x9   :  { %p7007_p4 = pnand %p7006_p3, %p7000_p0 }
   0xb   :  { %7010 = shalt.err (!%p7007_p4)
}
   0xc   :  { %s7166_s12 = smov 512   ;;  %s7167_s13 = smov 32  }
   0xd   :  { %38 = dma.hbm_to_vmem [thread:$0]  %s8332_s1, 8192, %s33_s10, [#allocation12], %s7166_s12, %s7166_s12, %s7167_s13  }
   0xe   :  { %s7168_s16 = smov [#allocation8]   ;;  %s7169_s18 = smov [#allocation13]  }
   0xf   :  { %s23_s17 = sshll.u32 %s7168_s16, 4  ;;  %s45_s19 = sshll.u32 %s7169_s18, 4  ;;  %s24_s17 = int_to_ptr.vmem [resolvable:$true] %s23_s17  ;;  %s46_s19 = int_to_ptr.vmem [resolvable:$true] %s45_s19 }
  0x10   :  { %s7019_s20 = scalar_lea.vmem %s24_s17, 128  ;;  %p7024_p6 = scmp.lt.s32.totalorder %s24_s17, %s24_s17 }
  0x11   :  { %p7020_p5 = scmp.ne.s32.totalorder %s24_s17, %s7019_s20  ;;  %p7025_p7 = scmp.lt.s32.totalorder %s7019_s20, %s7019_s20 }
  0x13   :  { %p7026_p8 = por %p7025_p7, %p7024_p6 }
  0x15   :  { %p7027_p9 = pnand %p7026_p8, %p7020_p5 }
  0x17   :  { %7030 = shalt.err (!%p7027_p9)
}
  0x18   :  { %26 = dma.hbm_to_vmem [thread:$0]  %s8331_s0, 128, %s24_s17, [#allocation9]  }
  0x19   :  { %s7039_s23 = scalar_lea.vmem %s46_s19, 64  ;;  %p7044_p11 = scmp.lt.s32.totalorder %s46_s19, %s46_s19 }
  0x1a   :  { %p7040_p10 = scmp.ne.s32.totalorder %s46_s19, %s7039_s23  ;;  %p7045_p12 = scmp.lt.s32.totalorder %s7039_s23, %s7039_s23 }
  0x1c   :  { %p7046_p13 = por %p7045_p12, %p7044_p11 }
  0x1e   :  { %p7047_p0 = pnand %p7046_p13, %p7040_p10 }
  0x20   :  { %7050 = shalt.err (!%p7047_p0)
}
  0x21   :  { %48 = dma.hbm_to_vmem [thread:$0]  %s8333_s2, 64, %s46_s19, [#allocation12]  }
  0x22   :  { %7151 = dma.done.wait [#allocation9], 128  }
  0x23   :  { %7152 = vsyncadd [#allocation9], 4294967168 }
  0x24   :  { %7153 = dma.done.wait [#allocation12], 8256  }
  0x25   :  { %7154 = vsyncadd [#allocation12], 4294959040  ;;  %v8341_v0 = vmov 0.0   ;;  %v171_v1 = vld [vmem:[#allocation11 + $0x1e8] sm:$0xff]  ;;  %v173_v2 = vld [vmem:[#allocation11 + $0x1f8] sm:$0xff]  ;;  %s7171_s0 = smov [#allocation4]  }
  0x26   :  { %260 = vmatprep.mubr.f32.mxu0 %v8341_v0  ;;  %331 = vmatprep.mubr.f32.mxu1 %v8341_v0  ;;  %v170_v3 = vld [vmem:[#allocation11 + $0x1e0] sm:$0xff]  ;;  %v172_v4 = vld [vmem:[#allocation11 + $0x1f0] sm:$0xff]  ;;  %v167_v5 = vld [vmem:[#allocation11 + $0x1c8] sm:$0xff]  ;;  %s69_s2 = sshll.u32 %s7171_s0, 4  ;;  %s7172_s25 = smov [#allocation3]   ;;  %s70_s2 = int_to_ptr.vmem [resolvable:$true] %s69_s2 }
  0x27   :  { %196 = vmatprep.subr.mxu0 %v171_v1  ;;  %267 = vmatprep.subr.mxu1 %v173_v2  ;;  %v169_v6 = vld [vmem:[#allocation11 + $0x1d8] sm:$0xff]  ;;  %v166_v7 = vld [vmem:[#allocation11 + $0x1c0] sm:$0xff]  ;;  %v168_v8 = vld [vmem:[#allocation11 + $0x1d0] sm:$0xff]  ;;  %s81_s26 = sshll.u32 %s7172_s25, 4  ;;  %s7059_s27 = scalar_lea.vmem %s70_s2, 8192  ;;  %s82_s26 = int_to_ptr.vmem [resolvable:$true] %s81_s26 }
  0x28   :  { %197 = vmatpush1.msra.mxu0 %v170_v3  ;;  %268 = vmatpush1.msra.mxu1 %v172_v4  ;;  %v163_v9 = vld [vmem:[#allocation11 + $0x1a8] sm:$0xff]  ;;  %v165_v10 = vld [vmem:[#allocation11 + $0x1b8] sm:$0xff]  ;;  %v162_v11 = vld [vmem:[#allocation11 + $0x1a0] sm:$0xff]  ;;  %p7060_p1 = scmp.ne.s32.totalorder %s70_s2, %s7059_s27  ;;  %p7064_p2 = scmp.lt.s32.totalorder %s70_s2, %s70_s2 }
  0x29   :  { %198 = vmatprep.subr.mxu0 %v167_v5  ;;  %269 = vmatprep.subr.mxu1 %v169_v6  ;;  %v164_v12 = vld [vmem:[#allocation11 + $0x1b0] sm:$0xff]  ;;  %v159_v13 = vld [vmem:[#allocation11 + $0x188] sm:$0xff]  ;;  %v161_v14 = vld [vmem:[#allocation11 + $0x198] sm:$0xff]  ;;  %p7065_p3 = scmp.lt.s32.totalorder %s7059_s27, %s7059_s27 }
  0x2a   :  { %199 = vmatpush1.msra.mxu0 %v166_v7  ;;  %270 = vmatpush1.msra.mxu1 %v168_v8  ;;  %v158_v15 = vld [vmem:[#allocation11 + $0x180] sm:$0xff]  ;;  %v160_v16 = vld [vmem:[#allocation11 + $0x190] sm:$0xff]  ;;  %v155_v17 = vld [vmem:[#allocation11 + $0x168] sm:$0xff] }
  0x2b   :  { %200 = vmatprep.subr.mxu0 %v163_v9  ;;  %271 = vmatprep.subr.mxu1 %v165_v10  ;;  %v157_v18 = vld [vmem:[#allocation11 + $0x178] sm:$0xff]  ;;  %v154_v19 = vld [vmem:[#allocation11 + $0x160] sm:$0xff]  ;;  %v156_v20 = vld [vmem:[#allocation11 + $0x170] sm:$0xff]  ;;  %p7066_p4 = por %p7065_p3, %p7064_p2 }
  0x2c   :  { %201 = vmatpush1.msra.mxu0 %v162_v11  ;;  %272 = vmatpush1.msra.mxu1 %v164_v12  ;;  %v151_v21 = vld [vmem:[#allocation11 + $0x148] sm:$0xff]  ;;  %v153_v22 = vld [vmem:[#allocation11 + $0x158] sm:$0xff]  ;;  %v150_v23 = vld [vmem:[#allocation11 + $0x140] sm:$0xff] }
  0x2d   :  { %202 = vmatprep.subr.mxu0 %v159_v13  ;;  %273 = vmatprep.subr.mxu1 %v161_v14  ;;  %v152_v24 = vld [vmem:[#allocation11 + $0x150] sm:$0xff]  ;;  %v147_v25 = vld [vmem:[#allocation11 + $0x128] sm:$0xff]  ;;  %v149_v26 = vld [vmem:[#allocation11 + $0x138] sm:$0xff]  ;;  %p7067_p5 = pnand %p7066_p4, %p7060_p1 }
  0x2e   :  { %203 = vmatpush1.msra.mxu0 %v158_v15  ;;  %274 = vmatpush1.msra.mxu1 %v160_v16  ;;  %v146_v27 = vld [vmem:[#allocation11 + $0x120] sm:$0xff]  ;;  %v148_v28 = vld [vmem:[#allocation11 + $0x130] sm:$0xff]  ;;  %v143_v29 = vld [vmem:[#allocation11 + $0x108] sm:$0xff] }
  0x2f   :  { %204 = vmatprep.subr.mxu0 %v155_v17  ;;  %275 = vmatprep.subr.mxu1 %v157_v18  ;;  %v145_v30 = vld [vmem:[#allocation11 + $0x118] sm:$0xff]  ;;  %v142_v31 = vld [vmem:[#allocation11 + $0x100] sm:$0xff]  ;;  %v144_v32 = vld [vmem:[#allocation11 + $0x110] sm:$0xff] }
  0x30   :  { %205 = vmatpush1.msra.mxu0 %v154_v19  ;;  %276 = vmatpush1.msra.mxu1 %v156_v20  ;;  %v139_v33 = vld [vmem:[#allocation11 + $0xe8] sm:$0xff]  ;;  %v141_v34 = vld [vmem:[#allocation11 + $0xf8] sm:$0xff]  ;;  %v138_v35 = vld [vmem:[#allocation11 + $0xe0] sm:$0xff] }
  0x31   :  { %206 = vmatprep.subr.mxu0 %v151_v21  ;;  %277 = vmatprep.subr.mxu1 %v153_v22  ;;  %v140_v36 = vld [vmem:[#allocation11 + $0xf0] sm:$0xff]  ;;  %v135_v37 = vld [vmem:[#allocation11 + $0xc8] sm:$0xff]  ;;  %v137_v38 = vld [vmem:[#allocation11 + $0xd8] sm:$0xff] }
  0x32   :  { %207 = vmatpush1.msra.mxu0 %v150_v23  ;;  %278 = vmatpush1.msra.mxu1 %v152_v24  ;;  %v134_v39 = vld [vmem:[#allocation11 + $0xc0] sm:$0xff]  ;;  %v136_v40 = vld [vmem:[#allocation11 + $0xd0] sm:$0xff]  ;;  %v131_v41 = vld [vmem:[#allocation11 + $0xa8] sm:$0xff] }
  0x33   :  { %208 = vmatprep.subr.mxu0 %v147_v25  ;;  %279 = vmatprep.subr.mxu1 %v149_v26  ;;  %v133_v42 = vld [vmem:[#allocation11 + $0xb8] sm:$0xff]  ;;  %v130_v43 = vld [vmem:[#allocation11 + $0xa0] sm:$0xff]  ;;  %v132_v44 = vld [vmem:[#allocation11 + $0xb0] sm:$0xff] }
  0x34   :  { %209 = vmatpush1.msra.mxu0 %v146_v27  ;;  %280 = vmatpush1.msra.mxu1 %v148_v28  ;;  %v127_v45 = vld [vmem:[#allocation11 + $0x88] sm:$0xff]  ;;  %v129_v46 = vld [vmem:[#allocation11 + $0x98] sm:$0xff]  ;;  %v126_v47 = vld [vmem:[#allocation11 + $0x80] sm:$0xff] }
  0x35   :  { %210 = vmatprep.subr.mxu0 %v143_v29  ;;  %281 = vmatprep.subr.mxu1 %v145_v30  ;;  %v128_v48 = vld [vmem:[#allocation11 + $0x90] sm:$0xff]  ;;  %v123_v49 = vld [vmem:[#allocation11 + $0x68] sm:$0xff]  ;;  %v125_v50 = vld [vmem:[#allocation11 + $0x78] sm:$0xff] }
  0x36   :  { %211 = vmatpush1.msra.mxu0 %v142_v31  ;;  %282 = vmatpush1.msra.mxu1 %v144_v32  ;;  %v122_v51 = vld [vmem:[#allocation11 + $0x60] sm:$0xff]  ;;  %v124_v52 = vld [vmem:[#allocation11 + $0x70] sm:$0xff]  ;;  %v119_v53 = vld [vmem:[#allocation11 + $0x48] sm:$0xff] }
  0x37   :  { %212 = vmatprep.subr.mxu0 %v139_v33  ;;  %283 = vmatprep.subr.mxu1 %v141_v34  ;;  %v121_v54 = vld [vmem:[#allocation11 + $0x58] sm:$0xff]  ;;  %v118_v55 = vld [vmem:[#allocation11 + $0x40] sm:$0xff]  ;;  %v120_v56 = vld [vmem:[#allocation11 + $0x50] sm:$0xff] }
  0x38   :  { %213 = vmatpush1.msra.mxu0 %v138_v35  ;;  %284 = vmatpush1.msra.mxu1 %v140_v36  ;;  %v115_v57 = vld [vmem:[#allocation11 + $0x28] sm:$0xff]  ;;  %v117_v58 = vld [vmem:[#allocation11 + $0x38] sm:$0xff]  ;;  %v114_v59 = vld [vmem:[#allocation11 + $0x20] sm:$0xff] }
  0x39   :  { %214 = vmatprep.subr.mxu0 %v135_v37  ;;  %285 = vmatprep.subr.mxu1 %v137_v38  ;;  %v116_v60 = vld [vmem:[#allocation11 + $0x30] sm:$0xff]  ;;  %v111_v61 = vld [vmem:[#allocation11 + $0x8] sm:$0xff]  ;;  %v113_v62 = vld [vmem:[#allocation11 + $0x18] sm:$0xff] }
  0x3a   :  { %215 = vmatpush1.msra.mxu0 %v134_v39  ;;  %286 = vmatpush1.msra.mxu1 %v136_v40  ;;  %v110_v63 = vld [vmem:[#allocation11] sm:$0xff]  ;;  %v112_v1 = vld [vmem:[#allocation11 + $0x10] sm:$0xff]  ;;  %v109_v2 = vld [vmem:[#allocation8] sm:$0xff] }
  0x3b   :  { %216 = vmatprep.subr.mxu0 %v131_v41  ;;  %287 = vmatprep.subr.mxu1 %v133_v42 }
  0x3c   :  { %217 = vmatpush1.msra.mxu0 %v130_v43  ;;  %288 = vmatpush1.msra.mxu1 %v132_v44 }
  0x3d   :  { %218 = vmatprep.subr.mxu0 %v127_v45  ;;  %289 = vmatprep.subr.mxu1 %v129_v46 }
  0x3e   :  { %219 = vmatpush1.msra.mxu0 %v126_v47  ;;  %290 = vmatpush1.msra.mxu1 %v128_v48 }
  0x3f   :  { %220 = vmatprep.subr.mxu0 %v123_v49  ;;  %291 = vmatprep.subr.mxu1 %v125_v50 }
  0x40   :  { %221 = vmatpush1.msra.mxu0 %v122_v51  ;;  %292 = vmatpush1.msra.mxu1 %v124_v52 }
  0x41   :  { %222 = vmatprep.subr.mxu0 %v119_v53  ;;  %293 = vmatprep.subr.mxu1 %v121_v54 }
  0x42   :  { %223 = vmatpush1.msra.mxu0 %v118_v55  ;;  %294 = vmatpush1.msra.mxu1 %v120_v56 }
  0x43   :  { %224 = vmatprep.subr.mxu0 %v115_v57  ;;  %295 = vmatprep.subr.mxu1 %v117_v58 }
  0x44   :  { %225 = vmatpush1.msra.mxu0 %v114_v59  ;;  %296 = vmatpush1.msra.mxu1 %v116_v60 }
  0x45   :  { %226 = vmatprep.subr.mxu0 %v111_v61  ;;  %297 = vmatprep.subr.mxu1 %v113_v62 }
  0x46   :  { %227 = vmatpush1.msra.mxu0 %v110_v63  ;;  %298 = vmatpush1.msra.mxu1 %v112_v1 }
  0x47   :  { %261 = vmatmul.mubr.f32.vlgmr.msra.gmra.mxu0 %v109_v2  ;;  %332 = vmatmul.mubr.f32.vlgmr.msra.gmra.mxu1 %v109_v2 }
  0x48   :  { %7070 = shalt.err (!%p7067_p5)  }
  0x49   :  { %72 = dma.hbm_to_vmem [thread:$0]  %s8335_s4, 8192, %s70_s2, [#allocation7] }
  0x4a   :  { %s7079_s30 = scalar_lea.vmem %s82_s26, 8192  ;;  %p7084_p7 = scmp.lt.s32.totalorder %s82_s26, %s82_s26 }
  0x4b   :  { %p7080_p6 = scmp.ne.s32.totalorder %s82_s26, %s7079_s30  ;;  %p7085_p8 = scmp.lt.s32.totalorder %s7079_s30, %s7079_s30 }
  0x4d   :  { %p7086_p9 = por %p7085_p8, %p7084_p7 }
  0x4f   :  { %p7087_p10 = pnand %p7086_p9, %p7080_p6 }
  0x51   :  { %7090 = shalt.err (!%p7087_p10)  }
  0x52   :  { %84 = dma.hbm_to_vmem [thread:$0]  %s8334_s3, 8192, %s82_s26, [#allocation7 + $0x1] }
  0x53   :  { %s7173_s12 = smov [#allocation6]   ;;  %s7174_s14 = smov [#allocation5]  }
  0x54   :  { %s93_s13 = sshll.u32 %s7173_s12, 4  ;;  %s105_s15 = sshll.u32 %s7174_s14, 4  ;;  %s94_s13 = int_to_ptr.vmem [resolvable:$true] %s93_s13  ;;  %s106_s15 = int_to_ptr.vmem [resolvable:$true] %s105_s15 }
  0x55   :  { %s7099_s16 = scalar_lea.vmem %s94_s13, 2048  ;;  %p7104_p12 = scmp.lt.s32.totalorder %s94_s13, %s94_s13 }
  0x56   :  { %p7100_p11 = scmp.ne.s32.totalorder %s94_s13, %s7099_s16  ;;  %p7105_p13 = scmp.lt.s32.totalorder %s7099_s16, %s7099_s16 }
  0x58   :  { %p7106_p0 = por %p7105_p13, %p7104_p12 }
  0x5a   :  { %p7107_p1 = pnand %p7106_p0, %p7100_p11 }
  0x5c   :  { %7110 = shalt.err (!%p7107_p1)  }
  0x5d   :  { %96 = dma.hbm_to_vmem [thread:$0]  %s8338_s7, 2048, %s94_s13, [#allocation7 + $0x2] }
  0x5e   :  { %s7119_s18 = scalar_lea.vmem %s106_s15, 8192  ;;  %p7124_p3 = scmp.lt.s32.totalorder %s106_s15, %s106_s15 }
  0x5f   :  { %p7120_p2 = scmp.ne.s32.totalorder %s106_s15, %s7119_s18  ;;  %p7125_p4 = scmp.lt.s32.totalorder %s7119_s18, %s7119_s18 }
  0x61   :  { %p7126_p5 = por %p7125_p4, %p7124_p3 }
  0x63   :  { %p7127_p6 = pnand %p7126_p5, %p7120_p2 }
  0x65   :  { %7130 = shalt.err (!%p7127_p6)  }
  0x66   :  { %108 = dma.hbm_to_vmem [thread:$0]  %s8337_s6, 8192, %s106_s15, [#allocation7 + $0x3]  ;;  %v176_v3 = vlaneseq  ;;  %v174_v7 = vld [vmem:[#allocation13] sm:$0xf] }
  0x68   :  { %v7251_v4 = vshrl.u32 %v176_v3, 7 }
  0x6a   :  { %v7254_v5 = vsub.s32 0, %v7251_v4  ;;  %v7257_v6 = vsub.s32 2, %v7251_v4  ;;  %v7260_v8 = vsub.s32 1, %v7251_v4  ;;  %v7263_v9 = vsub.s32 3, %v7251_v4 }
  0x6c   :  { %8392 = vst [vmem:[#allocation32_spill] sm:$0xff] %v7254_v5  ;;  %8393 = vst [vmem:[#allocation33_spill] sm:$0xff] %v7257_v6  ;;  %v179_v10 = vrot.slane %v174_v7, %v7254_v5  ;;  %v187_v11 = vrot.slane %v174_v7, %v7257_v6  ;;  %v183_v12 = vrot.slane %v174_v7, %v7260_v8 }
  0x6d   :  { %8394 = vst [vmem:[#allocation34_spill] sm:$0xff] %v7260_v8  ;;  %8395 = vst [vmem:[#allocation35_spill] sm:$0xff] %v7263_v9  ;;  %v191_v13 = vrot.slane %v174_v7, %v7263_v9 }
 0x107   :  { %v262_v14 = vpop.f32.mrf.mxu0  ;;  %v333_v15 = vpop.f32.mrf.mxu1 }
 0x108   :  { %v263_v16 = vadd.f32 %v262_v14, %v179_v10  ;;  %v334_v17 = vadd.f32 %v333_v15, %v187_v11 }
 0x109   :  { %v264_v18 = vpop.f32.mrf.mxu0  ;;  %v335_v19 = vpop.f32.mrf.mxu1 }
 0x10a   :  { %338 = vst [vmem:[#allocation2] sm:$0xff] %v263_v16  ;;  %340 = vst [vmem:[#allocation2 + $0x10] sm:$0xff] %v334_v17  ;;  %v265_v20 = vadd.f32 %v264_v18, %v183_v12  ;;  %v336_v21 = vadd.f32 %v335_v19, %v191_v13 }
 0x10c   :  { %339 = vst [vmem:[#allocation2 + $0x8] sm:$0xff] %v265_v20  ;;  %341 = vst [vmem:[#allocation2 + $0x18] sm:$0xff] %v336_v21 }
 0x113   :  { %v342_v22 = vld [vmem:[#allocation2] ss:$8 sm:$0xf] }
 0x114   :  { %v343_v23 = vmul.f32 0.5, %v342_v22  ;;  %v348_v24 = vrot.slane %v342_v22, 2  ;;  %v351_v25 = vrot.slane %v342_v22, 3 }
 0x116   :  { %6826 = vtanh.f32 %v343_v23  ;;  %v353_v26 = vmul.f32 0.5, %v351_v25 }
 0x117   :  { %6828 = vtanh.f32 %v348_v24 }
 0x118   :  { %6830 = vtanh.f32 %v353_v26 }
 0x123   :  { %v6827_v27 = vpop.eup %6826 }
 0x124   :  { %v345_v28 = vmul.f32 0.5, %v6827_v27  ;;  %v6829_v30 = vpop.eup %6828 }
 0x125   :  { %v6831_v32 = vpop.eup %6830 }
 0x126   :  { %v346_v29 = vadd.f32 0.5, %v345_v28  ;;  %v355_v33 = vmul.f32 0.5, %v6831_v32 }
 0x128   :  { %v7269_v31 = vmul.f32 %v6829_v30, %v346_v29  ;;  %v356_v34 = vadd.f32 0.5, %v355_v33 }
 0x12a   :  { %6832 = vtanh.f32 %v7269_v31 }
 0x137   :  { %v6833_v35 = vpop.eup %6832 }
 0x138   :  { %v7272_v36 = vmul.f32 %v6833_v35, %v356_v34 }
 0x139   :  { %7155 = dma.done.wait [#allocation7], 8192 }
 0x13a   :  { %7156 = vsyncadd [#allocation7], 4294959104  ;;  %509 = vmatprep.mubr.f32.mxu0 %v8341_v0  ;;  %579 = vmatprep.mubr.f32.mxu1 %v8341_v0  ;;  %v7276_v37 = vld [vmem:[#allocation2 + $0x1] ss:$8 sm:$0xf] }
 0x13b   :  { %v425_v38 = vld [vmem:[#allocation4 + $0x1e8] sm:$0xff]  ;;  %v427_v39 = vld [vmem:[#allocation4 + $0x1f8] sm:$0xff]  ;;  %v424_v40 = vld [vmem:[#allocation4 + $0x1e0] sm:$0xff] }
 0x13c   :  { %445 = vmatprep.subr.mxu0 %v425_v38  ;;  %515 = vmatprep.subr.mxu1 %v427_v39  ;;  %v426_v41 = vld [vmem:[#allocation4 + $0x1f0] sm:$0xff]  ;;  %v421_v42 = vld [vmem:[#allocation4 + $0x1c8] sm:$0xff]  ;;  %v423_v43 = vld [vmem:[#allocation4 + $0x1d8] sm:$0xff] }
 0x13d   :  { %446 = vmatpush1.msra.mxu0 %v424_v40  ;;  %516 = vmatpush1.msra.mxu1 %v426_v41  ;;  %v420_v44 = vld [vmem:[#allocation4 + $0x1c0] sm:$0xff]  ;;  %v422_v45 = vld [vmem:[#allocation4 + $0x1d0] sm:$0xff]  ;;  %v417_v46 = vld [vmem:[#allocation4 + $0x1a8] sm:$0xff] }
 0x13e   :  { %447 = vmatprep.subr.mxu0 %v421_v42  ;;  %517 = vmatprep.subr.mxu1 %v423_v43  ;;  %v419_v47 = vld [vmem:[#allocation4 + $0x1b8] sm:$0xff]  ;;  %v416_v48 = vld [vmem:[#allocation4 + $0x1a0] sm:$0xff]  ;;  %v418_v49 = vld [vmem:[#allocation4 + $0x1b0] sm:$0xff] }
 0x13f   :  { %448 = vmatpush1.msra.mxu0 %v420_v44  ;;  %518 = vmatpush1.msra.mxu1 %v422_v45  ;;  %v413_v50 = vld [vmem:[#allocation4 + $0x188] sm:$0xff]  ;;  %v415_v51 = vld [vmem:[#allocation4 + $0x198] sm:$0xff]  ;;  %v412_v52 = vld [vmem:[#allocation4 + $0x180] sm:$0xff] }
 0x140   :  { %449 = vmatprep.subr.mxu0 %v417_v46  ;;  %519 = vmatprep.subr.mxu1 %v419_v47  ;;  %v414_v53 = vld [vmem:[#allocation4 + $0x190] sm:$0xff]  ;;  %v409_v54 = vld [vmem:[#allocation4 + $0x168] sm:$0xff]  ;;  %v411_v55 = vld [vmem:[#allocation4 + $0x178] sm:$0xff] }
 0x141   :  { %450 = vmatpush1.msra.mxu0 %v416_v48  ;;  %520 = vmatpush1.msra.mxu1 %v418_v49  ;;  %v408_v56 = vld [vmem:[#allocation4 + $0x160] sm:$0xff]  ;;  %v410_v57 = vld [vmem:[#allocation4 + $0x170] sm:$0xff]  ;;  %v405_v58 = vld [vmem:[#allocation4 + $0x148] sm:$0xff] }
 0x142   :  { %451 = vmatprep.subr.mxu0 %v413_v50  ;;  %521 = vmatprep.subr.mxu1 %v415_v51  ;;  %v407_v59 = vld [vmem:[#allocation4 + $0x158] sm:$0xff]  ;;  %v404_v60 = vld [vmem:[#allocation4 + $0x140] sm:$0xff]  ;;  %v406_v61 = vld [vmem:[#allocation4 + $0x150] sm:$0xff] }
 0x143   :  { %452 = vmatpush1.msra.mxu0 %v412_v52  ;;  %522 = vmatpush1.msra.mxu1 %v414_v53  ;;  %v401_v62 = vld [vmem:[#allocation4 + $0x128] sm:$0xff]  ;;  %v403_v63 = vld [vmem:[#allocation4 + $0x138] sm:$0xff]  ;;  %v400_v1 = vld [vmem:[#allocation4 + $0x120] sm:$0xff] }
 0x144   :  { %453 = vmatprep.subr.mxu0 %v409_v54  ;;  %523 = vmatprep.subr.mxu1 %v411_v55  ;;  %v402_v2 = vld [vmem:[#allocation4 + $0x130] sm:$0xff]  ;;  %v397_v3 = vld [vmem:[#allocation4 + $0x108] sm:$0xff]  ;;  %v399_v7 = vld [vmem:[#allocation4 + $0x118] sm:$0xff] }
 0x145   :  { %454 = vmatpush1.msra.mxu0 %v408_v56  ;;  %524 = vmatpush1.msra.mxu1 %v410_v57  ;;  %v396_v10 = vld [vmem:[#allocation4 + $0x100] sm:$0xff]  ;;  %v398_v11 = vld [vmem:[#allocation4 + $0x110] sm:$0xff]  ;;  %v393_v12 = vld [vmem:[#allocation4 + $0xe8] sm:$0xff] }
 0x146   :  { %455 = vmatprep.subr.mxu0 %v405_v58  ;;  %525 = vmatprep.subr.mxu1 %v407_v59  ;;  %v395_v13 = vld [vmem:[#allocation4 + $0xf8] sm:$0xff]  ;;  %v392_v14 = vld [vmem:[#allocation4 + $0xe0] sm:$0xff]  ;;  %v394_v15 = vld [vmem:[#allocation4 + $0xf0] sm:$0xff] }
 0x147   :  { %456 = vmatpush1.msra.mxu0 %v404_v60  ;;  %526 = vmatpush1.msra.mxu1 %v406_v61  ;;  %v389_v16 = vld [vmem:[#allocation4 + $0xc8] sm:$0xff]  ;;  %v391_v17 = vld [vmem:[#allocation4 + $0xd8] sm:$0xff]  ;;  %v388_v18 = vld [vmem:[#allocation4 + $0xc0] sm:$0xff] }
 0x148   :  { %457 = vmatprep.subr.mxu0 %v401_v62  ;;  %527 = vmatprep.subr.mxu1 %v403_v63  ;;  %v390_v19 = vld [vmem:[#allocation4 + $0xd0] sm:$0xff]  ;;  %v385_v20 = vld [vmem:[#allocation4 + $0xa8] sm:$0xff]  ;;  %v387_v21 = vld [vmem:[#allocation4 + $0xb8] sm:$0xff] }
 0x149   :  { %458 = vmatpush1.msra.mxu0 %v400_v1  ;;  %528 = vmatpush1.msra.mxu1 %v402_v2  ;;  %v384_v22 = vld [vmem:[#allocation4 + $0xa0] sm:$0xff]  ;;  %v386_v23 = vld [vmem:[#allocation4 + $0xb0] sm:$0xff]  ;;  %v381_v24 = vld [vmem:[#allocation4 + $0x88] sm:$0xff] }
 0x14a   :  { %459 = vmatprep.subr.mxu0 %v397_v3  ;;  %529 = vmatprep.subr.mxu1 %v399_v7  ;;  %v383_v25 = vld [vmem:[#allocation4 + $0x98] sm:$0xff]  ;;  %v380_v26 = vld [vmem:[#allocation4 + $0x80] sm:$0xff]  ;;  %v382_v27 = vld [vmem:[#allocation4 + $0x90] sm:$0xff] }
 0x14b   :  { %460 = vmatpush1.msra.mxu0 %v396_v10  ;;  %530 = vmatpush1.msra.mxu1 %v398_v11  ;;  %v377_v28 = vld [vmem:[#allocation4 + $0x68] sm:$0xff]  ;;  %v379_v29 = vld [vmem:[#allocation4 + $0x78] sm:$0xff]  ;;  %v376_v30 = vld [vmem:[#allocation4 + $0x60] sm:$0xff] }
 0x14c   :  { %461 = vmatprep.subr.mxu0 %v393_v12  ;;  %531 = vmatprep.subr.mxu1 %v395_v13  ;;  %v378_v32 = vld [vmem:[#allocation4 + $0x70] sm:$0xff]  ;;  %v373_v33 = vld [vmem:[#allocation4 + $0x48] sm:$0xff]  ;;  %v375_v34 = vld [vmem:[#allocation4 + $0x58] sm:$0xff] }
 0x14d   :  { %462 = vmatpush1.msra.mxu0 %v392_v14  ;;  %532 = vmatpush1.msra.mxu1 %v394_v15  ;;  %v372_v35 = vld [vmem:[#allocation4 + $0x40] sm:$0xff]  ;;  %v374_v38 = vld [vmem:[#allocation4 + $0x50] sm:$0xff]  ;;  %v369_v39 = vld [vmem:[#allocation4 + $0x28] sm:$0xff] }
 0x14e   :  { %463 = vmatprep.subr.mxu0 %v389_v16  ;;  %533 = vmatprep.subr.mxu1 %v391_v17  ;;  %v371_v40 = vld [vmem:[#allocation4 + $0x38] sm:$0xff]  ;;  %v368_v41 = vld [vmem:[#allocation4 + $0x20] sm:$0xff]  ;;  %v370_v42 = vld [vmem:[#allocation4 + $0x30] sm:$0xff] }
 0x14f   :  { %464 = vmatpush1.msra.mxu0 %v388_v18  ;;  %534 = vmatpush1.msra.mxu1 %v390_v19  ;;  %v365_v43 = vld [vmem:[#allocation4 + $0x8] sm:$0xff]  ;;  %v367_v44 = vld [vmem:[#allocation4 + $0x18] sm:$0xff]  ;;  %v364_v45 = vld [vmem:[#allocation4] sm:$0xff] }
 0x150   :  { %465 = vmatprep.subr.mxu0 %v385_v20  ;;  %535 = vmatprep.subr.mxu1 %v387_v21  ;;  %v366_v46 = vld [vmem:[#allocation4 + $0x10] sm:$0xff]  ;;  %v428_v47 = vld [vmem:[%s8336_s5] sm:$0xf] }
 0x151   :  { %466 = vmatpush1.msra.mxu0 %v384_v22  ;;  %536 = vmatpush1.msra.mxu1 %v386_v23  ;;  %v433_v48 = vrot.slane %v428_v47, %v7254_v5  ;;  %v437_v49 = vrot.slane %v428_v47, %v7257_v6  ;;  %v441_v50 = vrot.slane %v428_v47, %v7263_v9 }
 0x152   :  { %467 = vmatprep.subr.mxu0 %v381_v24  ;;  %537 = vmatprep.subr.mxu1 %v383_v25 }
 0x153   :  { %468 = vmatpush1.msra.mxu0 %v380_v26  ;;  %538 = vmatpush1.msra.mxu1 %v382_v27 }
 0x154   :  { %469 = vmatprep.subr.mxu0 %v377_v28  ;;  %539 = vmatprep.subr.mxu1 %v379_v29 }
 0x155   :  { %470 = vmatpush1.msra.mxu0 %v376_v30  ;;  %540 = vmatpush1.msra.mxu1 %v378_v32 }
 0x156   :  { %471 = vmatprep.subr.mxu0 %v373_v33  ;;  %541 = vmatprep.subr.mxu1 %v375_v34 }
 0x157   :  { %472 = vmatpush1.msra.mxu0 %v372_v35  ;;  %542 = vmatpush1.msra.mxu1 %v374_v38 }
 0x158   :  { %473 = vmatprep.subr.mxu0 %v369_v39  ;;  %543 = vmatprep.subr.mxu1 %v371_v40 }
 0x159   :  { %474 = vmatpush1.msra.mxu0 %v368_v41  ;;  %544 = vmatpush1.msra.mxu1 %v370_v42 }
 0x15a   :  { %475 = vmatprep.subr.mxu0 %v365_v43  ;;  %545 = vmatprep.subr.mxu1 %v367_v44 }
 0x15b   :  { %476 = vmatpush1.msra.mxu0 %v364_v45  ;;  %546 = vmatpush1.msra.mxu1 %v366_v46 }
 0x15c   :  { %510 = vmatmul.mubr.f32.vlgmr.msra.gmra.mxu0 %v7272_v36  ;;  %580 = vmatmul.mubr.f32.vlgmr.msra.gmra.mxu1 %v7272_v36 }
 0x21c   :  { %v511_v51 = vpop.f32.mrf.mxu0  ;;  %v581_v52 = vpop.f32.mrf.mxu1 }
 0x21d   :  { %v7286_v53 = vadd.f32 %v511_v51, %v433_v48  ;;  %v7288_v54 = vadd.f32 %v581_v52, %v437_v49 }
 0x21e   :  { %v513_v55 = vpop.f32.mrf.mxu0  ;;  %v583_v56 = vpop.f32.mrf.mxu1 }
 0x21f   :  { %v7290_v57 = vadd.f32 %v583_v56, %v441_v50 }
 0x220   :  { %7157 = dma.done.wait [#allocation7 + $0x1], 8192 }
 0x221   :  { %7158 = vsyncadd [#allocation7 + $0x1], 4294959104  ;;  %718 = vmatprep.mubr.f32.mxu0 %v8341_v0  ;;  %789 = vmatprep.mubr.f32.mxu1 %v8341_v0  ;;  %v651_v58 = vld [vmem:[#allocation3 + $0x1e8] sm:$0xff]  ;;  %v653_v59 = vld [vmem:[#allocation3 + $0x1f8] sm:$0xff] }
 0x222   :  { %v650_v60 = vld [vmem:[#allocation3 + $0x1e0] sm:$0xff]  ;;  %654 = vmatprep.subr.mxu0 %v651_v58  ;;  %725 = vmatprep.subr.mxu1 %v653_v59  ;;  %v652_v61 = vld [vmem:[#allocation3 + $0x1f0] sm:$0xff]  ;;  %v647_v62 = vld [vmem:[#allocation3 + $0x1c8] sm:$0xff] }
 0x223   :  { %v649_v63 = vld [vmem:[#allocation3 + $0x1d8] sm:$0xff]  ;;  %655 = vmatpush1.msra.mxu0 %v650_v60  ;;  %726 = vmatpush1.msra.mxu1 %v652_v61  ;;  %v646_v1 = vld [vmem:[#allocation3 + $0x1c0] sm:$0xff]  ;;  %v648_v2 = vld [vmem:[#allocation3 + $0x1d0] sm:$0xff] }
 0x224   :  { %v643_v3 = vld [vmem:[#allocation3 + $0x1a8] sm:$0xff]  ;;  %656 = vmatprep.subr.mxu0 %v647_v62  ;;  %727 = vmatprep.subr.mxu1 %v649_v63  ;;  %v645_v7 = vld [vmem:[#allocation3 + $0x1b8] sm:$0xff]  ;;  %v642_v10 = vld [vmem:[#allocation3 + $0x1a0] sm:$0xff] }
 0x225   :  { %v644_v11 = vld [vmem:[#allocation3 + $0x1b0] sm:$0xff]  ;;  %657 = vmatpush1.msra.mxu0 %v646_v1  ;;  %728 = vmatpush1.msra.mxu1 %v648_v2  ;;  %v639_v12 = vld [vmem:[#allocation3 + $0x188] sm:$0xff]  ;;  %v641_v13 = vld [vmem:[#allocation3 + $0x198] sm:$0xff] }
 0x226   :  { %658 = vmatprep.subr.mxu0 %v643_v3  ;;  %729 = vmatprep.subr.mxu1 %v645_v7  ;;  %v638_v14 = vld [vmem:[#allocation3 + $0x180] sm:$0xff]  ;;  %v640_v15 = vld [vmem:[#allocation3 + $0x190] sm:$0xff]  ;;  %v635_v16 = vld [vmem:[#allocation3 + $0x168] sm:$0xff] }
 0x227   :  { %659 = vmatpush1.msra.mxu0 %v642_v10  ;;  %730 = vmatpush1.msra.mxu1 %v644_v11  ;;  %v637_v17 = vld [vmem:[#allocation3 + $0x178] sm:$0xff]  ;;  %v634_v18 = vld [vmem:[#allocation3 + $0x160] sm:$0xff]  ;;  %v636_v19 = vld [vmem:[#allocation3 + $0x170] sm:$0xff] }
 0x228   :  { %660 = vmatprep.subr.mxu0 %v639_v12  ;;  %731 = vmatprep.subr.mxu1 %v641_v13  ;;  %v631_v20 = vld [vmem:[#allocation3 + $0x148] sm:$0xff]  ;;  %v633_v21 = vld [vmem:[#allocation3 + $0x158] sm:$0xff]  ;;  %v630_v22 = vld [vmem:[#allocation3 + $0x140] sm:$0xff] }
 0x229   :  { %661 = vmatpush1.msra.mxu0 %v638_v14  ;;  %732 = vmatpush1.msra.mxu1 %v640_v15  ;;  %v632_v23 = vld [vmem:[#allocation3 + $0x150] sm:$0xff]  ;;  %v627_v24 = vld [vmem:[#allocation3 + $0x128] sm:$0xff]  ;;  %v629_v25 = vld [vmem:[#allocation3 + $0x138] sm:$0xff] }
 0x22a   :  { %662 = vmatprep.subr.mxu0 %v635_v16  ;;  %733 = vmatprep.subr.mxu1 %v637_v17  ;;  %v626_v26 = vld [vmem:[#allocation3 + $0x120] sm:$0xff]  ;;  %v628_v27 = vld [vmem:[#allocation3 + $0x130] sm:$0xff]  ;;  %v623_v28 = vld [vmem:[#allocation3 + $0x108] sm:$0xff] }
 0x22b   :  { %663 = vmatpush1.msra.mxu0 %v634_v18  ;;  %734 = vmatpush1.msra.mxu1 %v636_v19  ;;  %v625_v29 = vld [vmem:[#allocation3 + $0x118] sm:$0xff]  ;;  %v622_v30 = vld [vmem:[#allocation3 + $0x100] sm:$0xff]  ;;  %v624_v32 = vld [vmem:[#allocation3 + $0x110] sm:$0xff] }
 0x22c   :  { %664 = vmatprep.subr.mxu0 %v631_v20  ;;  %735 = vmatprep.subr.mxu1 %v633_v21  ;;  %v619_v33 = vld [vmem:[#allocation3 + $0xe8] sm:$0xff]  ;;  %v621_v34 = vld [vmem:[#allocation3 + $0xf8] sm:$0xff]  ;;  %v618_v35 = vld [vmem:[#allocation3 + $0xe0] sm:$0xff] }
 0x22d   :  { %665 = vmatpush1.msra.mxu0 %v630_v22  ;;  %736 = vmatpush1.msra.mxu1 %v632_v23  ;;  %v620_v38 = vld [vmem:[#allocation3 + $0xf0] sm:$0xff]  ;;  %v615_v39 = vld [vmem:[#allocation3 + $0xc8] sm:$0xff]  ;;  %v617_v40 = vld [vmem:[#allocation3 + $0xd8] sm:$0xff] }
 0x22e   :  { %666 = vmatprep.subr.mxu0 %v627_v24  ;;  %737 = vmatprep.subr.mxu1 %v629_v25  ;;  %v614_v41 = vld [vmem:[#allocation3 + $0xc0] sm:$0xff]  ;;  %v616_v42 = vld [vmem:[#allocation3 + $0xd0] sm:$0xff]  ;;  %v611_v43 = vld [vmem:[#allocation3 + $0xa8] sm:$0xff] }
 0x22f   :  { %667 = vmatpush1.msra.mxu0 %v626_v26  ;;  %738 = vmatpush1.msra.mxu1 %v628_v27  ;;  %v613_v44 = vld [vmem:[#allocation3 + $0xb8] sm:$0xff]  ;;  %v610_v45 = vld [vmem:[#allocation3 + $0xa0] sm:$0xff]  ;;  %v612_v46 = vld [vmem:[#allocation3 + $0xb0] sm:$0xff] }
 0x230   :  { %668 = vmatprep.subr.mxu0 %v623_v28  ;;  %739 = vmatprep.subr.mxu1 %v625_v29  ;;  %v607_v47 = vld [vmem:[#allocation3 + $0x88] sm:$0xff]  ;;  %v609_v48 = vld [vmem:[#allocation3 + $0x98] sm:$0xff]  ;;  %v606_v49 = vld [vmem:[#allocation3 + $0x80] sm:$0xff] }
 0x231   :  { %669 = vmatpush1.msra.mxu0 %v622_v30  ;;  %740 = vmatpush1.msra.mxu1 %v624_v32  ;;  %v608_v50 = vld [vmem:[#allocation3 + $0x90] sm:$0xff]  ;;  %v603_v51 = vld [vmem:[#allocation3 + $0x68] sm:$0xff]  ;;  %v605_v52 = vld [vmem:[#allocation3 + $0x78] sm:$0xff] }
 0x232   :  { %670 = vmatprep.subr.mxu0 %v619_v33  ;;  %741 = vmatprep.subr.mxu1 %v621_v34  ;;  %v602_v55 = vld [vmem:[#allocation3 + $0x60] sm:$0xff]  ;;  %v604_v56 = vld [vmem:[#allocation3 + $0x70] sm:$0xff]  ;;  %v599_v58 = vld [vmem:[#allocation3 + $0x48] sm:$0xff] }
 0x233   :  { %671 = vmatpush1.msra.mxu0 %v618_v35  ;;  %742 = vmatpush1.msra.mxu1 %v620_v38  ;;  %v601_v59 = vld [vmem:[#allocation3 + $0x58] sm:$0xff]  ;;  %v598_v60 = vld [vmem:[#allocation3 + $0x40] sm:$0xff]  ;;  %v600_v61 = vld [vmem:[#allocation3 + $0x50] sm:$0xff] }
 0x234   :  { %672 = vmatprep.subr.mxu0 %v615_v39  ;;  %743 = vmatprep.subr.mxu1 %v617_v40  ;;  %v595_v62 = vld [vmem:[#allocation3 + $0x28] sm:$0xff]  ;;  %v597_v63 = vld [vmem:[#allocation3 + $0x38] sm:$0xff]  ;;  %v594_v1 = vld [vmem:[#allocation3 + $0x20] sm:$0xff] }
 0x235   :  { %673 = vmatpush1.msra.mxu0 %v614_v41  ;;  %744 = vmatpush1.msra.mxu1 %v616_v42  ;;  %v596_v2 = vld [vmem:[#allocation3 + $0x30] sm:$0xff]  ;;  %v591_v3 = vld [vmem:[#allocation3 + $0x8] sm:$0xff]  ;;  %v593_v7 = vld [vmem:[#allocation3 + $0x18] sm:$0xff] }
 0x236   :  { %674 = vmatprep.subr.mxu0 %v611_v43  ;;  %745 = vmatprep.subr.mxu1 %v613_v44  ;;  %v590_v10 = vld [vmem:[#allocation3] sm:$0xff]  ;;  %v592_v11 = vld [vmem:[#allocation3 + $0x10] sm:$0xff]  ;;  %v912_v12 = vld [vmem:[#allocation4 + $0x1e8] sm:$0xff] }
 0x237   :  { %675 = vmatpush1.msra.mxu0 %v610_v45  ;;  %746 = vmatpush1.msra.mxu1 %v612_v46  ;;  %v914_v13 = vld [vmem:[#allocation4 + $0x1f8] sm:$0xff]  ;;  %v911_v14 = vld [vmem:[#allocation4 + $0x1e0] sm:$0xff]  ;;  %v913_v15 = vld [vmem:[#allocation4 + $0x1f0] sm:$0xff] }
 0x238   :  { %676 = vmatprep.subr.mxu0 %v607_v47  ;;  %747 = vmatprep.subr.mxu1 %v609_v48  ;;  %v908_v16 = vld [vmem:[#allocation4 + $0x1c8] sm:$0xff]  ;;  %v910_v17 = vld [vmem:[#allocation4 + $0x1d8] sm:$0xff]  ;;  %v907_v18 = vld [vmem:[#allocation4 + $0x1c0] sm:$0xff] }
 0x239   :  { %677 = vmatpush1.msra.mxu0 %v606_v49  ;;  %748 = vmatpush1.msra.mxu1 %v608_v50  ;;  %v909_v19 = vld [vmem:[#allocation4 + $0x1d0] sm:$0xff]  ;;  %v906_v20 = vld [vmem:[#allocation4 + $0x1b8] sm:$0xff]  ;;  %v903_v21 = vld [vmem:[#allocation4 + $0x1a0] sm:$0xff] }
 0x23a   :  { %678 = vmatprep.subr.mxu0 %v603_v51  ;;  %749 = vmatprep.subr.mxu1 %v605_v52  ;;  %v905_v22 = vld [vmem:[#allocation4 + $0x1b0] sm:$0xff]  ;;  %v900_v23 = vld [vmem:[#allocation4 + $0x188] sm:$0xff]  ;;  %v902_v24 = vld [vmem:[#allocation4 + $0x198] sm:$0xff] }
 0x23b   :  { %679 = vmatpush1.msra.mxu0 %v602_v55  ;;  %750 = vmatpush1.msra.mxu1 %v604_v56  ;;  %v899_v25 = vld [vmem:[#allocation4 + $0x180] sm:$0xff]  ;;  %v901_v26 = vld [vmem:[#allocation4 + $0x190] sm:$0xff]  ;;  %v896_v27 = vld [vmem:[#allocation4 + $0x168] sm:$0xff] }
 0x23c   :  { %680 = vmatprep.subr.mxu0 %v599_v58  ;;  %751 = vmatprep.subr.mxu1 %v601_v59  ;;  %v898_v28 = vld [vmem:[#allocation4 + $0x178] sm:$0xff]  ;;  %v895_v29 = vld [vmem:[#allocation4 + $0x160] sm:$0xff]  ;;  %v897_v30 = vld [vmem:[#allocation4 + $0x170] sm:$0xff] }
 0x23d   :  { %681 = vmatpush1.msra.mxu0 %v598_v60  ;;  %752 = vmatpush1.msra.mxu1 %v600_v61  ;;  %v892_v32 = vld [vmem:[#allocation4 + $0x148] sm:$0xff]  ;;  %v894_v33 = vld [vmem:[#allocation4 + $0x158] sm:$0xff]  ;;  %v891_v34 = vld [vmem:[#allocation4 + $0x140] sm:$0xff] }
 0x23e   :  { %682 = vmatprep.subr.mxu0 %v595_v62  ;;  %753 = vmatprep.subr.mxu1 %v597_v63  ;;  %v893_v35 = vld [vmem:[#allocation4 + $0x150] sm:$0xff]  ;;  %v888_v38 = vld [vmem:[#allocation4 + $0x128] sm:$0xff]  ;;  %v890_v39 = vld [vmem:[#allocation4 + $0x138] sm:$0xff] }
 0x23f   :  { %683 = vmatpush1.msra.mxu0 %v594_v1  ;;  %754 = vmatpush1.msra.mxu1 %v596_v2  ;;  %v887_v40 = vld [vmem:[#allocation4 + $0x120] sm:$0xff]  ;;  %v889_v41 = vld [vmem:[#allocation4 + $0x130] sm:$0xff]  ;;  %v884_v42 = vld [vmem:[#allocation4 + $0x108] sm:$0xff] }
 0x240   :  { %684 = vmatprep.subr.mxu0 %v591_v3  ;;  %755 = vmatprep.subr.mxu1 %v593_v7  ;;  %v886_v43 = vld [vmem:[#allocation4 + $0x118] sm:$0xff]  ;;  %v883_v44 = vld [vmem:[#allocation4 + $0x100] sm:$0xff]  ;;  %v885_v45 = vld [vmem:[#allocation4 + $0x110] sm:$0xff] }
 0x241   :  { %685 = vmatpush1.msra.mxu0 %v590_v10  ;;  %756 = vmatpush1.msra.mxu1 %v592_v11  ;;  %v880_v46 = vld [vmem:[#allocation4 + $0xe8] sm:$0xff]  ;;  %v882_v47 = vld [vmem:[#allocation4 + $0xf8] sm:$0xff]  ;;  %v879_v48 = vld [vmem:[#allocation4 + $0xe0] sm:$0xff] }
 0x242   :  { %719 = vmatmul.mubr.f32.vlgmr.msra.gmra.mxu0 %v7272_v36  ;;  %790 = vmatmul.mubr.f32.vlgmr.msra.gmra.mxu1 %v7272_v36  ;;  %v904_v36 = vld [vmem:[#allocation4 + $0x1a8] sm:$0xff]  ;;  %v881_v49 = vld [vmem:[#allocation4 + $0xf0] sm:$0xff]  ;;  %v878_v51 = vld [vmem:[#allocation4 + $0xd8] sm:$0xff] }
 0x243   :  { %1001 = vmatprep.mubr.f32.mxu0 %v8341_v0  ;;  %1072 = vmatprep.mubr.f32.mxu1 %v8341_v0  ;;  %v876_v50 = vld [vmem:[#allocation4 + $0xc8] sm:$0xff]  ;;  %v875_v52 = vld [vmem:[#allocation4 + $0xc0] sm:$0xff]  ;;  %v877_v55 = vld [vmem:[#allocation4 + $0xd0] sm:$0xff] }
 0x244   :  { %937 = vmatprep.subr.mxu0 %v912_v12  ;;  %1008 = vmatprep.subr.mxu1 %v914_v13  ;;  %v872_v56 = vld [vmem:[#allocation4 + $0xa8] sm:$0xff]  ;;  %v874_v58 = vld [vmem:[#allocation4 + $0xb8] sm:$0xff]  ;;  %v871_v59 = vld [vmem:[#allocation4 + $0xa0] sm:$0xff] }
 0x245   :  { %938 = vmatpush1.msra.mxu0 %v911_v14  ;;  %1009 = vmatpush1.msra.mxu1 %v913_v15  ;;  %v873_v60 = vld [vmem:[#allocation4 + $0xb0] sm:$0xff]  ;;  %v868_v61 = vld [vmem:[#allocation4 + $0x88] sm:$0xff]  ;;  %v870_v62 = vld [vmem:[#allocation4 + $0x98] sm:$0xff] }
 0x246   :  { %939 = vmatprep.subr.mxu0 %v908_v16  ;;  %1010 = vmatprep.subr.mxu1 %v910_v17  ;;  %v867_v63 = vld [vmem:[#allocation4 + $0x80] sm:$0xff]  ;;  %v869_v1 = vld [vmem:[#allocation4 + $0x90] sm:$0xff]  ;;  %v864_v2 = vld [vmem:[#allocation4 + $0x68] sm:$0xff] }
 0x247   :  { %940 = vmatpush1.msra.mxu0 %v907_v18  ;;  %1011 = vmatpush1.msra.mxu1 %v909_v19  ;;  %v866_v3 = vld [vmem:[#allocation4 + $0x78] sm:$0xff]  ;;  %v863_v7 = vld [vmem:[#allocation4 + $0x60] sm:$0xff]  ;;  %v865_v10 = vld [vmem:[#allocation4 + $0x70] sm:$0xff] }
 0x248   :  { %941 = vmatprep.subr.mxu0 %v904_v36  ;;  %1012 = vmatprep.subr.mxu1 %v906_v20  ;;  %v860_v11 = vld [vmem:[#allocation4 + $0x48] sm:$0xff]  ;;  %v862_v12 = vld [vmem:[#allocation4 + $0x58] sm:$0xff]  ;;  %v859_v13 = vld [vmem:[#allocation4 + $0x40] sm:$0xff] }
 0x249   :  { %942 = vmatpush1.msra.mxu0 %v903_v21  ;;  %1013 = vmatpush1.msra.mxu1 %v905_v22  ;;  %v861_v14 = vld [vmem:[#allocation4 + $0x50] sm:$0xff]  ;;  %v856_v15 = vld [vmem:[#allocation4 + $0x28] sm:$0xff]  ;;  %v858_v16 = vld [vmem:[#allocation4 + $0x38] sm:$0xff]  ;;  %v7175_v22 = vmov 1966171168  }
 0x24a   :  { %943 = vmatprep.subr.mxu0 %v900_v23  ;;  %1014 = vmatprep.subr.mxu1 %v902_v24  ;;  %v855_v17 = vld [vmem:[#allocation4 + $0x20] sm:$0xff]  ;;  %v857_v18 = vld [vmem:[#allocation4 + $0x30] sm:$0xff]  ;;  %v852_v19 = vld [vmem:[#allocation4 + $0x8] sm:$0xff]  ;;  %v803_v23 = vunpack.c.l.s4 %v7175_v22 }
 0x24b   :  { %944 = vmatpush1.msra.mxu0 %v899_v25  ;;  %1015 = vmatpush1.msra.mxu1 %v901_v26  ;;  %v854_v36 = vld [vmem:[#allocation4 + $0x18] sm:$0xff]  ;;  %v851_v20 = vld [vmem:[#allocation4] sm:$0xff]  ;;  %v853_v21 = vld [vmem:[#allocation4 + $0x10] sm:$0xff] }
 0x24c   :  { %945 = vmatprep.subr.mxu0 %v896_v27  ;;  %1016 = vmatprep.subr.mxu1 %v898_v28  ;;  %v804_v24 = vunpack.c.0.s8 %v803_v23 }
 0x24d   :  { %946 = vmatpush1.msra.mxu0 %v895_v29  ;;  %1017 = vmatpush1.msra.mxu1 %v897_v30 }
 0x24e   :  { %947 = vmatprep.subr.mxu0 %v892_v32  ;;  %1018 = vmatprep.subr.mxu1 %v894_v33  ;;  %v7299_v27 = vsub.s32 %v804_v24, %v7251_v4 }
 0x24f   :  { %948 = vmatpush1.msra.mxu0 %v891_v34  ;;  %1019 = vmatpush1.msra.mxu1 %v893_v35 }
 0x250   :  { %949 = vmatprep.subr.mxu0 %v888_v38  ;;  %1020 = vmatprep.subr.mxu1 %v890_v39 }
 0x251   :  { %950 = vmatpush1.msra.mxu0 %v887_v40  ;;  %1021 = vmatpush1.msra.mxu1 %v889_v41 }
 0x252   :  { %951 = vmatprep.subr.mxu0 %v884_v42  ;;  %1022 = vmatprep.subr.mxu1 %v886_v43 }
 0x253   :  { %952 = vmatpush1.msra.mxu0 %v883_v44  ;;  %1023 = vmatpush1.msra.mxu1 %v885_v45 }
 0x254   :  { %953 = vmatprep.subr.mxu0 %v880_v46  ;;  %1024 = vmatprep.subr.mxu1 %v882_v47 }
 0x255   :  { %954 = vmatpush1.msra.mxu0 %v879_v48  ;;  %1025 = vmatpush1.msra.mxu1 %v881_v49 }
 0x256   :  { %955 = vmatprep.subr.mxu0 %v876_v50  ;;  %1026 = vmatprep.subr.mxu1 %v878_v51 }
 0x257   :  { %956 = vmatpush1.msra.mxu0 %v875_v52  ;;  %1027 = vmatpush1.msra.mxu1 %v877_v55 }
 0x258   :  { %957 = vmatprep.subr.mxu0 %v872_v56  ;;  %1028 = vmatprep.subr.mxu1 %v874_v58 }
 0x259   :  { %958 = vmatpush1.msra.mxu0 %v871_v59  ;;  %1029 = vmatpush1.msra.mxu1 %v873_v60 }
 0x25a   :  { %959 = vmatprep.subr.mxu0 %v868_v61  ;;  %1030 = vmatprep.subr.mxu1 %v870_v62  ;;  %v1079_v62 = vmul.f32 0.5, %v7286_v53  ;;  %v915_v53 = vld [vmem:[%s8336_s5] sm:$0xf] }
 0x25b   :  { %960 = vmatpush1.msra.mxu0 %v867_v63  ;;  %1031 = vmatpush1.msra.mxu1 %v869_v1  ;;  %v1084_v1 = vmul.f32 0.5, %v7290_v57  ;;  %v928_v57 = vrot.slane %v915_v53, %v7257_v6 }
 0x25c   :  { %961 = vmatprep.subr.mxu0 %v864_v2  ;;  %1032 = vmatprep.subr.mxu1 %v866_v3 }
 0x25d   :  { %962 = vmatpush1.msra.mxu0 %v863_v7  ;;  %1033 = vmatpush1.msra.mxu1 %v865_v10 }
 0x25e   :  { %963 = vmatprep.subr.mxu0 %v860_v11  ;;  %1034 = vmatprep.subr.mxu1 %v862_v12 }
 0x25f   :  { %964 = vmatpush1.msra.mxu0 %v859_v13  ;;  %1035 = vmatpush1.msra.mxu1 %v861_v14 }
 0x260   :  { %965 = vmatprep.subr.mxu0 %v856_v15  ;;  %1036 = vmatprep.subr.mxu1 %v858_v16  ;;  %v924_v15 = vrot.slane %v915_v53, %v7260_v8  ;;  %v932_v16 = vrot.slane %v915_v53, %v7263_v9 }
 0x261   :  { %966 = vmatpush1.msra.mxu0 %v855_v17  ;;  %1037 = vmatpush1.msra.mxu1 %v857_v18 }
 0x262   :  { %967 = vmatprep.subr.mxu0 %v852_v19  ;;  %1038 = vmatprep.subr.mxu1 %v854_v36 }
 0x263   :  { %968 = vmatpush1.msra.mxu0 %v851_v20  ;;  %1039 = vmatpush1.msra.mxu1 %v853_v21 }
 0x302   :  { %v720_v25 = vpop.f32.mrf.mxu0  ;;  %v791_v26 = vpop.f32.mrf.mxu1 }
 0x304   :  { %v722_v28 = vpop.f32.mrf.mxu0  ;;  %v793_v29 = vpop.f32.mrf.mxu1 }
 0x305   :  { %v800_v30 = vcombine.low %v720_v25, %v722_v28  ;;  %v801_v32 = vcombine.low %v791_v26, %v793_v29 }
 0x307   :  { %v808_v33 = vrot.slane %v800_v30, %v7299_v27  ;;  %v815_v34 = vrot.slane %v801_v32, %v7299_v27 }
 0x309   :  { %v816_v35 = vcombine.low %v808_v33, %v815_v34 }
 0x30b   :  { %v823_v38 = vrot.slane %v816_v35, %v7299_v27 }
 0x30d   :  { %v825_v39 = vadd.f32 %v823_v38, %v7276_v37 }
 0x30f   :  { %v826_v40 = vmul.f32 0.5, %v825_v39  ;;  %v831_v41 = vrot.slane %v825_v39, 1  ;;  %v837_v4 = vrot.slane %v825_v39, 2  ;;  %v840_v43 = vrot.slane %v825_v39, 3 }
 0x311   :  { %6834 = vtanh.f32 %v826_v40  ;;  %v833_v42 = vmul.f32 0.5, %v831_v41  ;;  %v842_v44 = vmul.f32 0.5, %v840_v43 }
 0x313   :  { %6836 = vtanh.f32 %v833_v42 }
 0x314   :  { %6838 = vtanh.f32 %v837_v4 }
 0x315   :  { %6840 = vtanh.f32 %v842_v44 }
 0x31e   :  { %v6835_v45 = vpop.eup %6834 }
 0x31f   :  { %v828_v46 = vmul.f32 0.5, %v6835_v45 }
 0x320   :  { %v6837_v47 = vpop.eup %6836 }
 0x321   :  { %v829_v48 = vadd.f32 0.5, %v828_v46  ;;  %v835_v49 = vmul.f32 0.5, %v6837_v47  ;;  %v6839_v51 = vpop.eup %6838 }
 0x322   :  { %v6841_v56 = vpop.eup %6840 }
 0x323   :  { %v836_v50 = vadd.f32 0.5, %v835_v49  ;;  %v847_v37 = vmul.f32 %v6839_v51, %v829_v48  ;;  %v844_v58 = vmul.f32 0.5, %v6841_v56 }
 0x325   :  { %v846_v52 = vmul.f32 %v836_v50, %v7269_v31  ;;  %v845_v59 = vadd.f32 0.5, %v844_v58 }
 0x327   :  { %v7306_v55 = vadd.f32 %v847_v37, %v846_v52 }
 0x329   :  { %6842 = vtanh.f32 %v7306_v55 }
 0x32a   :  { %6844 = vtanh.f32 %v1079_v62 }
 0x32b   :  { %6846 = vtanh.f32 %v7288_v54  ;;  %v920_v54 = vrot.slane %v915_v53, %v7254_v5 }
 0x32c   :  { %6848 = vtanh.f32 %v1084_v1 }
 0x336   :  { %v6843_v60 = vpop.eup %6842 }
 0x337   :  { %v7309_v61 = vmul.f32 %v6843_v60, %v845_v59  ;;  %v6845_v31 = vpop.eup %6844 }
 0x338   :  { %v1081_v63 = vmul.f32 0.5, %v6845_v31  ;;  %v6847_v3 = vpop.eup %6846 }
 0x339   :  { %1002 = vmatmul.mubr.f32.vlgmr.msra.gmra.mxu0 %v7309_v61  ;;  %1073 = vmatmul.mubr.f32.vlgmr.msra.gmra.mxu1 %v7309_v61  ;;  %v6849_v10 = vpop.eup %6848 }
 0x33a   :  { %v1082_v2 = vadd.f32 0.5, %v1081_v63  ;;  %v1086_v11 = vmul.f32 0.5, %v6849_v10 }
 0x33c   :  { %v7316_v7 = vmul.f32 %v6847_v3, %v1082_v2  ;;  %v1087_v12 = vadd.f32 0.5, %v1086_v11 }
 0x33e   :  { %6850 = vtanh.f32 %v7316_v7 }
 0x34b   :  { %v6851_v13 = vpop.eup %6850 }
 0x34c   :  { %v7319_v14 = vmul.f32 %v6851_v13, %v1087_v12 }
 0x3f9   :  { %v1003_v17 = vpop.f32.mrf.mxu0  ;;  %v1074_v18 = vpop.f32.mrf.mxu1 }
 0x3fa   :  { %v7328_v19 = vadd.f32 %v1003_v17, %v920_v54  ;;  %v7330_v36 = vadd.f32 %v1074_v18, %v928_v57 }
 0x3fb   :  { %v1005_v20 = vpop.f32.mrf.mxu0  ;;  %v1076_v21 = vpop.f32.mrf.mxu1 }
 0x3fc   :  { %v7332_v22 = vadd.f32 %v1005_v20, %v924_v15  ;;  %v7334_v23 = vadd.f32 %v1076_v21, %v932_v16 }
 0x3fd   :  { %7159 = dma.done.wait [#allocation7 + $0x2], 2048 }
 0x3fe   :  { %7160 = vsyncadd [#allocation7 + $0x2], 4294965248  ;;  %6533 = vmatprep.subr.mxu0 %v8341_v0  ;;  %1313 = vmatprep.mubr.f32.mxu1 %v8341_v0  ;;  %vm7176_vm0 = vmmov 0   ;;  %v1110_v24 = vld [vmem:[#allocation6 + $0x78] sm:$0xff]  ;;  %v1109_v25 = vld [vmem:[#allocation6 + $0x70] sm:$0xff]  ;;  %v1094_v53 = vmax.f32 %v7319_v14, 0.0 }
 0x3ff   :  { %6565 = vmatprep.mubr.msk.f32.mxu0 %vm7176_vm0, %v8341_v0  ;;  %6534 = vmatpush3.msra.mxu0 %v1110_v24  ;;  %v1108_v26 = vld [vmem:[#allocation6 + $0x68] sm:$0xff]  ;;  %v1107_v28 = vld [vmem:[#allocation6 + $0x60] sm:$0xff]  ;;  %v1106_v32 = vld [vmem:[#allocation6 + $0x58] sm:$0xff] }
 0x400   :  { %6535 = vmatprep.subr.mxu0 %v8341_v0  ;;  %v1246_v29 = vld [vmem:[#allocation3 + $0x1e8] sm:$0xff]  ;;  %v1245_v30 = vld [vmem:[#allocation3 + $0x1e0] sm:$0xff]  ;;  %v1105_v38 = vld [vmem:[#allocation6 + $0x50] sm:$0xff] }
 0x401   :  { %6536 = vmatpush3.msra.mxu0 %v1109_v25  ;;  %1249 = vmatprep.subr.mxu1 %v1246_v29  ;;  %v1242_v33 = vld [vmem:[#allocation3 + $0x1c8] sm:$0xff]  ;;  %v1241_v34 = vld [vmem:[#allocation3 + $0x1c0] sm:$0xff]  ;;  %v1102_v46 = vld [vmem:[#allocation6 + $0x38] sm:$0xff] }
 0x402   :  { %6537 = vmatprep.subr.mxu0 %v8341_v0  ;;  %1250 = vmatpush1.msra.mxu1 %v1245_v30  ;;  %v1238_v35 = vld [vmem:[#allocation3 + $0x1a8] sm:$0xff]  ;;  %v1237_v39 = vld [vmem:[#allocation3 + $0x1a0] sm:$0xff]  ;;  %v1101_v49 = vld [vmem:[#allocation6 + $0x30] sm:$0xff] }
 0x403   :  { %6538 = vmatpush3.msra.mxu0 %v1108_v26  ;;  %1251 = vmatprep.subr.mxu1 %v1242_v33  ;;  %v1234_v40 = vld [vmem:[#allocation3 + $0x188] sm:$0xff]  ;;  %v1233_v42 = vld [vmem:[#allocation3 + $0x180] sm:$0xff]  ;;  %v1098_v62 = vld [vmem:[#allocation6 + $0x18] sm:$0xff] }
 0x404   :  { %6539 = vmatprep.subr.mxu0 %v8341_v0  ;;  %1252 = vmatpush1.msra.mxu1 %v1241_v34  ;;  %v1104_v41 = vld [vmem:[#allocation6 + $0x48] sm:$0xff]  ;;  %v1103_v43 = vld [vmem:[#allocation6 + $0x40] sm:$0xff]  ;;  %v1097_v1 = vld [vmem:[#allocation6 + $0x10] sm:$0xff] }
 0x405   :  { %6540 = vmatpush3.msra.mxu0 %v1107_v28  ;;  %1253 = vmatprep.subr.mxu1 %v1238_v35  ;;  %v1230_v4 = vld [vmem:[#allocation3 + $0x168] sm:$0xff]  ;;  %v1229_v44 = vld [vmem:[#allocation3 + $0x160] sm:$0xff]  ;;  %v1248_v57 = vld [vmem:[#allocation3 + $0x1f8] sm:$0xff] }
 0x406   :  { %6541 = vmatprep.subr.mxu0 %v8341_v0  ;;  %1254 = vmatpush1.msra.mxu1 %v1237_v39  ;;  %v1226_v45 = vld [vmem:[#allocation3 + $0x148] sm:$0xff]  ;;  %v1225_v47 = vld [vmem:[#allocation3 + $0x140] sm:$0xff]  ;;  %v1247_v15 = vld [vmem:[#allocation3 + $0x1f0] sm:$0xff] }
 0x407   :  { %6542 = vmatpush3.msra.mxu0 %v1106_v32  ;;  %1255 = vmatprep.subr.mxu1 %v1234_v40  ;;  %v1222_v48 = vld [vmem:[#allocation3 + $0x128] sm:$0xff]  ;;  %v1221_v50 = vld [vmem:[#allocation3 + $0x120] sm:$0xff]  ;;  %v1244_v17 = vld [vmem:[#allocation3 + $0x1d8] sm:$0xff] }
 0x408   :  { %6543 = vmatprep.subr.mxu0 %v8341_v0  ;;  %1256 = vmatpush1.msra.mxu1 %v1233_v42  ;;  %v1218_v51 = vld [vmem:[#allocation3 + $0x108] sm:$0xff]  ;;  %v1217_v37 = vld [vmem:[#allocation3 + $0x100] sm:$0xff]  ;;  %v1243_v20 = vld [vmem:[#allocation3 + $0x1d0] sm:$0xff] }
 0x409   :  { %6544 = vmatpush3.msra.mxu0 %v1105_v38  ;;  %1257 = vmatprep.subr.mxu1 %v1230_v4  ;;  %v1100_v52 = vld [vmem:[#allocation6 + $0x28] sm:$0xff]  ;;  %v1099_v58 = vld [vmem:[#allocation6 + $0x20] sm:$0xff]  ;;  %v1240_v24 = vld [vmem:[#allocation3 + $0x1b8] sm:$0xff] }
 0x40a   :  { %6545 = vmatprep.subr.mxu0 %v8341_v0  ;;  %1258 = vmatpush1.msra.mxu1 %v1229_v44  ;;  %v1214_v56 = vld [vmem:[#allocation3 + $0xe8] sm:$0xff]  ;;  %v1213_v59 = vld [vmem:[#allocation3 + $0xe0] sm:$0xff]  ;;  %v1239_v26 = vld [vmem:[#allocation3 + $0x1b0] sm:$0xff] }
 0x40b   :  { %6546 = vmatpush3.msra.mxu0 %v1104_v41  ;;  %1259 = vmatprep.subr.mxu1 %v1226_v45  ;;  %v1210_v60 = vld [vmem:[#allocation3 + $0xc8] sm:$0xff]  ;;  %v1209_v31 = vld [vmem:[#allocation3 + $0xc0] sm:$0xff]  ;;  %v1236_v29 = vld [vmem:[#allocation3 + $0x198] sm:$0xff] }
 0x40c   :  { %6547 = vmatprep.subr.mxu0 %v8341_v0  ;;  %1260 = vmatpush1.msra.mxu1 %v1225_v47  ;;  %v1206_v63 = vld [vmem:[#allocation3 + $0xa8] sm:$0xff]  ;;  %v1205_v2 = vld [vmem:[#allocation3 + $0xa0] sm:$0xff]  ;;  %v1235_v32 = vld [vmem:[#allocation3 + $0x190] sm:$0xff] }
 0x40d   :  { %6548 = vmatpush3.msra.mxu0 %v1103_v43  ;;  %1261 = vmatprep.subr.mxu1 %v1222_v48  ;;  %v1202_v3 = vld [vmem:[#allocation3 + $0x88] sm:$0xff]  ;;  %v1201_v11 = vld [vmem:[#allocation3 + $0x80] sm:$0xff]  ;;  %v1232_v33 = vld [vmem:[#allocation3 + $0x178] sm:$0xff] }
 0x40e   :  { %6549 = vmatprep.subr.mxu0 %v8341_v0  ;;  %1262 = vmatpush1.msra.mxu1 %v1221_v50  ;;  %v1096_v10 = vld [vmem:[#allocation6 + $0x8] sm:$0xff]  ;;  %v1095_v13 = vld [vmem:[#allocation6] sm:$0xff]  ;;  %v1231_v34 = vld [vmem:[#allocation3 + $0x170] sm:$0xff] }
 0x40f   :  { %6550 = vmatpush3.msra.mxu0 %v1102_v46  ;;  %1263 = vmatprep.subr.mxu1 %v1218_v51  ;;  %v1198_v12 = vld [vmem:[#allocation3 + $0x68] sm:$0xff]  ;;  %v1197_v54 = vld [vmem:[#allocation3 + $0x60] sm:$0xff]  ;;  %v1228_v35 = vld [vmem:[#allocation3 + $0x158] sm:$0xff] }
 0x410   :  { %6551 = vmatprep.subr.mxu0 %v8341_v0  ;;  %1264 = vmatpush1.msra.mxu1 %v1217_v37  ;;  %v1194_v16 = vld [vmem:[#allocation3 + $0x48] sm:$0xff]  ;;  %v1193_v18 = vld [vmem:[#allocation3 + $0x40] sm:$0xff]  ;;  %v1227_v38 = vld [vmem:[#allocation3 + $0x150] sm:$0xff] }
 0x411   :  { %6552 = vmatpush3.msra.mxu0 %v1101_v49  ;;  %1265 = vmatprep.subr.mxu1 %v1214_v56  ;;  %v1190_v21 = vld [vmem:[#allocation3 + $0x28] sm:$0xff]  ;;  %v1189_v25 = vld [vmem:[#allocation3 + $0x20] sm:$0xff]  ;;  %v1224_v39 = vld [vmem:[#allocation3 + $0x138] sm:$0xff] }
 0x412   :  { %6553 = vmatprep.subr.mxu0 %v8341_v0  ;;  %1266 = vmatpush1.msra.mxu1 %v1213_v59  ;;  %v1186_v28 = vld [vmem:[#allocation3 + $0x8] sm:$0xff]  ;;  %v1185_v30 = vld [vmem:[#allocation3] sm:$0xff]  ;;  %v1223_v40 = vld [vmem:[#allocation3 + $0x130] sm:$0xff] }
 0x413   :  { %6554 = vmatpush3.msra.mxu0 %v1100_v52  ;;  %1267 = vmatprep.subr.mxu1 %v1210_v60  ;;  %v1220_v41 = vld [vmem:[#allocation3 + $0x118] sm:$0xff]  ;;  %v1219_v42 = vld [vmem:[#allocation3 + $0x110] sm:$0xff] }
 0x414   :  { %6555 = vmatprep.subr.mxu0 %v8341_v0  ;;  %1268 = vmatpush1.msra.mxu1 %v1209_v31  ;;  %v1216_v4 = vld [vmem:[#allocation3 + $0xf8] sm:$0xff]  ;;  %v1215_v43 = vld [vmem:[#allocation3 + $0xf0] sm:$0xff] }
 0x415   :  { %6556 = vmatpush3.msra.mxu0 %v1099_v58  ;;  %1269 = vmatprep.subr.mxu1 %v1206_v63  ;;  %v1212_v44 = vld [vmem:[#allocation3 + $0xd8] sm:$0xff]  ;;  %v1211_v45 = vld [vmem:[#allocation3 + $0xd0] sm:$0xff]  ;;  %v1506_v63 = vld [vmem:[#allocation4 + $0x1e0] sm:$0xff] }
 0x416   :  { %6557 = vmatprep.subr.mxu0 %v8341_v0  ;;  %1270 = vmatpush1.msra.mxu1 %v1205_v2  ;;  %v1208_v46 = vld [vmem:[#allocation3 + $0xb8] sm:$0xff]  ;;  %v1207_v47 = vld [vmem:[#allocation3 + $0xb0] sm:$0xff]  ;;  %v1503_v2 = vld [vmem:[#allocation4 + $0x1c8] sm:$0xff] }
 0x417   :  { %6558 = vmatpush3.msra.mxu0 %v1098_v62  ;;  %1271 = vmatprep.subr.mxu1 %v1202_v3  ;;  %v1204_v48 = vld [vmem:[#allocation3 + $0x98] sm:$0xff]  ;;  %v1203_v49 = vld [vmem:[#allocation3 + $0x90] sm:$0xff]  ;;  %v1507_v62 = vld [vmem:[#allocation4 + $0x1e8] sm:$0xff] }
 0x418   :  { %6559 = vmatprep.subr.mxu0 %v8341_v0  ;;  %1272 = vmatpush1.msra.mxu1 %v1201_v11  ;;  %v1200_v50 = vld [vmem:[#allocation3 + $0x78] sm:$0xff]  ;;  %v1199_v51 = vld [vmem:[#allocation3 + $0x70] sm:$0xff] }
 0x419   :  { %6560 = vmatpush3.msra.mxu0 %v1097_v1  ;;  %1273 = vmatprep.subr.mxu1 %v1198_v12  ;;  %v1196_v52 = vld [vmem:[#allocation3 + $0x58] sm:$0xff]  ;;  %v1195_v37 = vld [vmem:[#allocation3 + $0x50] sm:$0xff]  ;;  %v1499_v12 = vld [vmem:[#allocation4 + $0x1a8] sm:$0xff] }
 0x41a   :  { %6561 = vmatprep.subr.mxu0 %v8341_v0  ;;  %1274 = vmatpush1.msra.mxu1 %v1197_v54  ;;  %v1192_v56 = vld [vmem:[#allocation3 + $0x38] sm:$0xff]  ;;  %v1191_v58 = vld [vmem:[#allocation3 + $0x30] sm:$0xff]  ;;  %v1495_v54 = vld [vmem:[#allocation4 + $0x188] sm:$0xff] }
 0x41b   :  { %6562 = vmatpush3.msra.mxu0 %v1096_v10  ;;  %1275 = vmatprep.subr.mxu1 %v1194_v16  ;;  %v1188_v59 = vld [vmem:[#allocation3 + $0x18] sm:$0xff]  ;;  %v1187_v60 = vld [vmem:[#allocation3 + $0x10] sm:$0xff]  ;;  %v1502_v10 = vld [vmem:[#allocation4 + $0x1c0] sm:$0xff] }
 0x41c   :  { %6563 = vmatprep.subr.mxu0 %v8341_v0  ;;  %1276 = vmatpush1.msra.mxu1 %v1193_v18  ;;  %v1509_v31 = vld [vmem:[#allocation4 + $0x1f8] sm:$0xff]  ;;  %v1508_v1 = vld [vmem:[#allocation4 + $0x1f0] sm:$0xff] }
 0x41d   :  { %6564 = vmatpush3.msra.mxu0 %v1095_v13  ;;  %1277 = vmatprep.subr.mxu1 %v1190_v21  ;;  %v1505_v3 = vld [vmem:[#allocation4 + $0x1d8] sm:$0xff]  ;;  %v1504_v11 = vld [vmem:[#allocation4 + $0x1d0] sm:$0xff]  ;;  %v1498_v13 = vld [vmem:[#allocation4 + $0x1a0] sm:$0xff] }
 0x41e   :  { %6566 = vmatmul.mubr.f32.vlgmr.msra.gmra.mxu0 %v1094_v53  ;;  %1320 = vmatprep.subr.mxu0 %v1248_v57  ;;  %v1500_v53 = vld [vmem:[#allocation4 + $0x1b0] sm:$0xff]  ;;  %v1497_v57 = vld [vmem:[#allocation4 + $0x198] sm:$0xff] }
 0x41f   :  { %1321 = vmatpush1.msra.mxu0 %v1247_v15  ;;  %1278 = vmatpush1.msra.mxu1 %v1189_v25  ;;  %v1494_v15 = vld [vmem:[#allocation4 + $0x180] sm:$0xff]  ;;  %v1496_v16 = vld [vmem:[#allocation4 + $0x190] sm:$0xff]  ;;  %v1493_v18 = vld [vmem:[#allocation4 + $0x178] sm:$0xff] }
 0x420   :  { %1322 = vmatprep.subr.mxu0 %v1244_v17  ;;  %1279 = vmatprep.subr.mxu1 %v1186_v28  ;;  %v1491_v17 = vld [vmem:[#allocation4 + $0x168] sm:$0xff]  ;;  %v1492_v21 = vld [vmem:[#allocation4 + $0x170] sm:$0xff]  ;;  %v1489_v25 = vld [vmem:[#allocation4 + $0x158] sm:$0xff] }
 0x421   :  { %1323 = vmatpush1.msra.mxu0 %v1243_v20  ;;  %1280 = vmatpush1.msra.mxu1 %v1185_v30  ;;  %v1490_v20 = vld [vmem:[#allocation4 + $0x160] sm:$0xff]  ;;  %v1488_v28 = vld [vmem:[#allocation4 + $0x150] sm:$0xff]  ;;  %v1485_v30 = vld [vmem:[#allocation4 + $0x138] sm:$0xff] }
 0x422   :  { %1324 = vmatprep.subr.mxu0 %v1240_v24  ;;  %1314 = vmatmul.mubr.f32.vlgmr.msra.gmra.mxu1 %v7309_v61  ;;  %v1487_v24 = vld [vmem:[#allocation4 + $0x148] sm:$0xff] }
 0x423   :  { %1325 = vmatpush1.msra.mxu0 %v1239_v26  ;;  %1384 = vmatprep.mubr.f32.mxu0 %v8341_v0  ;;  %v1486_v26 = vld [vmem:[#allocation4 + $0x140] sm:$0xff] }
 0x424   :  { %1326 = vmatprep.subr.mxu0 %v1236_v29  ;;  %1596 = vmatprep.mubr.f32.mxu1 %v8341_v0  ;;  %v1483_v29 = vld [vmem:[#allocation4 + $0x128] sm:$0xff] }
 0x425   :  { %1327 = vmatpush1.msra.mxu0 %v1235_v32  ;;  %1532 = vmatprep.subr.mxu1 %v1507_v62  ;;  %v1482_v32 = vld [vmem:[#allocation4 + $0x120] sm:$0xff]  ;;  %v1460_v62 = vld [vmem:[#allocation4 + $0x70] sm:$0xff] }
 0x426   :  { %1328 = vmatprep.subr.mxu0 %v1232_v33  ;;  %1533 = vmatpush1.msra.mxu1 %v1506_v63  ;;  %v1484_v33 = vld [vmem:[#allocation4 + $0x130] sm:$0xff]  ;;  %v1457_v63 = vld [vmem:[#allocation4 + $0x58] sm:$0xff] }
 0x427   :  { %1329 = vmatpush1.msra.mxu0 %v1231_v34  ;;  %1534 = vmatprep.subr.mxu1 %v1503_v2  ;;  %v1479_v34 = vld [vmem:[#allocation4 + $0x108] sm:$0xff]  ;;  %v1456_v2 = vld [vmem:[#allocation4 + $0x50] sm:$0xff] }
 0x428   :  { %1330 = vmatprep.subr.mxu0 %v1228_v35  ;;  %1535 = vmatpush1.msra.mxu1 %v1502_v10  ;;  %v1481_v35 = vld [vmem:[#allocation4 + $0x118] sm:$0xff] }
 0x429   :  { %1331 = vmatpush1.msra.mxu0 %v1227_v38  ;;  %1536 = vmatprep.subr.mxu1 %v1499_v12  ;;  %v1478_v38 = vld [vmem:[#allocation4 + $0x100] sm:$0xff]  ;;  %v1453_v10 = vld [vmem:[#allocation4 + $0x38] sm:$0xff]  ;;  %v1452_v12 = vld [vmem:[#allocation4 + $0x30] sm:$0xff] }
 0x42a   :  { %1332 = vmatprep.subr.mxu0 %v1224_v39  ;;  %1537 = vmatpush1.msra.mxu1 %v1498_v13  ;;  %v1480_v39 = vld [vmem:[#allocation4 + $0x110] sm:$0xff]  ;;  %v1449_v13 = vld [vmem:[#allocation4 + $0x18] sm:$0xff] }
 0x42b   :  { %1333 = vmatpush1.msra.mxu0 %v1223_v40  ;;  %1538 = vmatprep.subr.mxu1 %v1495_v54  ;;  %v1475_v40 = vld [vmem:[#allocation4 + $0xe8] sm:$0xff]  ;;  %v1448_v54 = vld [vmem:[#allocation4 + $0x10] sm:$0xff] }
 0x42c   :  { %1334 = vmatprep.subr.mxu0 %v1220_v41  ;;  %1539 = vmatpush1.msra.mxu1 %v1494_v15  ;;  %v1477_v41 = vld [vmem:[#allocation4 + $0xf8] sm:$0xff] }
 0x42d   :  { %1335 = vmatpush1.msra.mxu0 %v1219_v42  ;;  %1540 = vmatprep.subr.mxu1 %v1491_v17  ;;  %v1474_v42 = vld [vmem:[#allocation4 + $0xe0] sm:$0xff] }
 0x42e   :  { %1336 = vmatprep.subr.mxu0 %v1216_v4  ;;  %1541 = vmatpush1.msra.mxu1 %v1490_v20  ;;  %v1476_v4 = vld [vmem:[#allocation4 + $0xf0] sm:$0xff] }
 0x42f   :  { %1337 = vmatpush1.msra.mxu0 %v1215_v43  ;;  %1542 = vmatprep.subr.mxu1 %v1487_v24  ;;  %v1471_v43 = vld [vmem:[#allocation4 + $0xc8] sm:$0xff] }
 0x430   :  { %1338 = vmatprep.subr.mxu0 %v1212_v44  ;;  %1543 = vmatpush1.msra.mxu1 %v1486_v26  ;;  %v1473_v44 = vld [vmem:[#allocation4 + $0xd8] sm:$0xff] }
 0x431   :  { %1339 = vmatpush1.msra.mxu0 %v1211_v45  ;;  %1544 = vmatprep.subr.mxu1 %v1483_v29  ;;  %v1470_v45 = vld [vmem:[#allocation4 + $0xc0] sm:$0xff] }
 0x432   :  { %1340 = vmatprep.subr.mxu0 %v1208_v46  ;;  %1545 = vmatpush1.msra.mxu1 %v1482_v32  ;;  %v1472_v46 = vld [vmem:[#allocation4 + $0xd0] sm:$0xff] }
 0x433   :  { %1341 = vmatpush1.msra.mxu0 %v1207_v47  ;;  %1546 = vmatprep.subr.mxu1 %v1479_v34  ;;  %v1467_v47 = vld [vmem:[#allocation4 + $0xa8] sm:$0xff] }
 0x434   :  { %1342 = vmatprep.subr.mxu0 %v1204_v48  ;;  %1547 = vmatpush1.msra.mxu1 %v1478_v38  ;;  %v1469_v48 = vld [vmem:[#allocation4 + $0xb8] sm:$0xff] }
 0x435   :  { %1343 = vmatpush1.msra.mxu0 %v1203_v49  ;;  %1548 = vmatprep.subr.mxu1 %v1475_v40  ;;  %v1466_v49 = vld [vmem:[#allocation4 + $0xa0] sm:$0xff] }
 0x436   :  { %1344 = vmatprep.subr.mxu0 %v1200_v50  ;;  %1549 = vmatpush1.msra.mxu1 %v1474_v42  ;;  %v1468_v50 = vld [vmem:[#allocation4 + $0xb0] sm:$0xff] }
 0x437   :  { %1345 = vmatpush1.msra.mxu0 %v1199_v51  ;;  %1550 = vmatprep.subr.mxu1 %v1471_v43  ;;  %v1463_v51 = vld [vmem:[#allocation4 + $0x88] sm:$0xff] }
 0x438   :  { %1346 = vmatprep.subr.mxu0 %v1196_v52  ;;  %1551 = vmatpush1.msra.mxu1 %v1470_v45  ;;  %v1465_v52 = vld [vmem:[#allocation4 + $0x98] sm:$0xff] }
 0x439   :  { %1347 = vmatpush1.msra.mxu0 %v1195_v37  ;;  %1552 = vmatprep.subr.mxu1 %v1467_v47  ;;  %v1462_v37 = vld [vmem:[#allocation4 + $0x80] sm:$0xff] }
 0x43a   :  { %1348 = vmatprep.subr.mxu0 %v1192_v56  ;;  %v1464_v56 = vld [vmem:[#allocation4 + $0x90] sm:$0xff]  ;;  %1553 = vmatpush1.msra.mxu1 %v1466_v49 }
 0x43b   :  { %1349 = vmatpush1.msra.mxu0 %v1191_v58  ;;  %v1459_v58 = vld [vmem:[#allocation4 + $0x68] sm:$0xff]  ;;  %1554 = vmatprep.subr.mxu1 %v1463_v51 }
 0x43c   :  { %1350 = vmatprep.subr.mxu0 %v1188_v59  ;;  %v1461_v59 = vld [vmem:[#allocation4 + $0x78] sm:$0xff]  ;;  %1555 = vmatpush1.msra.mxu1 %v1462_v37 }
 0x43d   :  { %1351 = vmatpush1.msra.mxu0 %v1187_v60  ;;  %v1458_v60 = vld [vmem:[#allocation4 + $0x60] sm:$0xff]  ;;  %1556 = vmatprep.subr.mxu1 %v1459_v58 }
 0x43e   :  { %1385 = vmatmul.mubr.f32.vlgmr.msra.gmra.mxu0 %v7309_v61  ;;  %1603 = vmatprep.subr.mxu0 %v1509_v31  ;;  %v1501_v61 = vld [vmem:[#allocation4 + $0x1b8] sm:$0xff]  ;;  %v1455_v31 = vld [vmem:[#allocation4 + $0x48] sm:$0xff] }
 0x43f   :  { %1667 = vmatprep.mubr.f32.mxu0 %v8341_v0  ;;  %1604 = vmatpush1.msra.mxu0 %v1508_v1  ;;  %v1454_v1 = vld [vmem:[#allocation4 + $0x40] sm:$0xff] }
 0x440   :  { %1605 = vmatprep.subr.mxu0 %v1505_v3  ;;  %1557 = vmatpush1.msra.mxu1 %v1458_v60  ;;  %v1451_v3 = vld [vmem:[#allocation4 + $0x28] sm:$0xff]  ;;  %v1510_v60 = vld [vmem:[%s8336_s5] sm:$0xf] }
 0x441   :  { %1606 = vmatpush1.msra.mxu0 %v1504_v11  ;;  %1558 = vmatprep.subr.mxu1 %v1455_v31  ;;  %v1450_v11 = vld [vmem:[#allocation4 + $0x20] sm:$0xff]  ;;  %v1519_v31 = vrot.slane %v1510_v60, %v7260_v8 }
 0x442   :  { %1607 = vmatprep.subr.mxu0 %v1501_v61  ;;  %1559 = vmatpush1.msra.mxu1 %v1454_v1  ;;  %v1447_v61 = vld [vmem:[#allocation4 + $0x8] sm:$0xff] }
 0x443   :  { %1608 = vmatpush1.msra.mxu0 %v1500_v53  ;;  %1560 = vmatprep.subr.mxu1 %v1451_v3  ;;  %v1446_v53 = vld [vmem:[#allocation4] sm:$0xff] }
 0x444   :  { %1609 = vmatprep.subr.mxu0 %v1497_v57  ;;  %1561 = vmatpush1.msra.mxu1 %v1450_v11  ;;  %v1111_v57 = vld [vmem:[%s8339_s8] sm:$0x1]  ;;  %v1184_v32 = vld [vmem:[#allocation2 + $0x2] ss:$8 sm:$0xf] }
 0x445   :  { %1610 = vmatpush1.msra.mxu0 %v1496_v16  ;;  %1562 = vmatprep.subr.mxu1 %v1447_v61 }
 0x446   :  { %1611 = vmatprep.subr.mxu0 %v1493_v18  ;;  %1563 = vmatpush1.msra.mxu1 %v1446_v53 }
 0x447   :  { %1612 = vmatpush1.msra.mxu0 %v1492_v21 }
 0x448   :  { %1613 = vmatprep.subr.mxu0 %v1489_v25 }
 0x449   :  { %1614 = vmatpush1.msra.mxu0 %v1488_v28 }
 0x44a   :  { %1615 = vmatprep.subr.mxu0 %v1485_v30 }
 0x44b   :  { %1616 = vmatpush1.msra.mxu0 %v1484_v33 }
 0x44c   :  { %1617 = vmatprep.subr.mxu0 %v1481_v35 }
 0x44d   :  { %1618 = vmatpush1.msra.mxu0 %v1480_v39 }
 0x44e   :  { %1619 = vmatprep.subr.mxu0 %v1477_v41 }
 0x44f   :  { %1620 = vmatpush1.msra.mxu0 %v1476_v4 }
 0x450   :  { %1621 = vmatprep.subr.mxu0 %v1473_v44 }
 0x451   :  { %1622 = vmatpush1.msra.mxu0 %v1472_v46 }
 0x452   :  { %1623 = vmatprep.subr.mxu0 %v1469_v48 }
 0x453   :  { %1624 = vmatpush1.msra.mxu0 %v1468_v50 }
 0x454   :  { %1625 = vmatprep.subr.mxu0 %v1465_v52 }
 0x455   :  { %1626 = vmatpush1.msra.mxu0 %v1464_v56 }
 0x456   :  { %1627 = vmatprep.subr.mxu0 %v1461_v59 }
 0x457   :  { %1628 = vmatpush1.msra.mxu0 %v1460_v62  ;;  %v1523_v62 = vrot.slane %v1510_v60, %v7257_v6 }
 0x458   :  { %1629 = vmatprep.subr.mxu0 %v1457_v63  ;;  %v1527_v63 = vrot.slane %v1510_v60, %v7263_v9 }
 0x459   :  { %1630 = vmatpush1.msra.mxu0 %v1456_v2 }
 0x45a   :  { %1631 = vmatprep.subr.mxu0 %v1453_v10 }
 0x45b   :  { %1632 = vmatpush1.msra.mxu0 %v1452_v12 }
 0x45c   :  { %1633 = vmatprep.subr.mxu0 %v1449_v13 }
 0x45d   :  { %1634 = vmatpush1.msra.mxu0 %v1448_v54 }
 0x4de   :  { %v1178_v15 = vpop.f32.mrf.mxu0 }
 0x4df   :  { %v1179_v16 = vadd.f32 %v1178_v15, %v1111_v57 }
 0x4e0   :  { %v6567_v17 = vpop.f32.mrf.mxu0 }
 0x4e1   :  { %1182 = vst [vmem:[#allocation14] sm:$0x1] %v1179_v16 }
 0x4e2   :  { %v1315_v18 = vpop.f32.mrf.mxu1 }
 0x4e4   :  { %v1317_v20 = vpop.f32.mrf.mxu1 }
 0x4e5   :  { %v1395_v24 = vcombine.low %v1315_v18, %v1317_v20 }
 0x4e7   :  { %v1403_v28 = vrot.slane %v1395_v24, %v7299_v27 }
 0x4fe   :  { %v1386_v21 = vpop.f32.mrf.mxu0 }
 0x500   :  { %v1388_v25 = vpop.f32.mrf.mxu0 }
 0x501   :  { %v1396_v26 = vcombine.low %v1386_v21, %v1388_v25 }
 0x503   :  { %v1410_v29 = vrot.slane %v1396_v26, %v7299_v27 }
 0x505   :  { %v1411_v30 = vcombine.low %v1403_v28, %v1410_v29 }
 0x507   :  { %v1418_v33 = vrot.slane %v1411_v30, %v7299_v27 }
 0x509   :  { %v1420_v34 = vadd.f32 %v1418_v33, %v1184_v32 }
 0x50b   :  { %v1421_v35 = vmul.f32 0.5, %v1420_v34  ;;  %v1426_v38 = vrot.slane %v1420_v34, 1  ;;  %v1432_v40 = vrot.slane %v1420_v34, 2  ;;  %v1435_v41 = vrot.slane %v1420_v34, 3 }
 0x50d   :  { %6852 = vtanh.f32 %v1421_v35  ;;  %v1428_v39 = vmul.f32 0.5, %v1426_v38  ;;  %v1437_v42 = vmul.f32 0.5, %v1435_v41 }
 0x50f   :  { %6854 = vtanh.f32 %v1428_v39 }
 0x510   :  { %6856 = vtanh.f32 %v1432_v40 }
 0x511   :  { %6858 = vtanh.f32 %v1437_v42 }
 0x51a   :  { %v6853_v4 = vpop.eup %6852 }
 0x51b   :  { %v1423_v43 = vmul.f32 0.5, %v6853_v4 }
 0x51c   :  { %v6855_v44 = vpop.eup %6854 }
 0x51d   :  { %v1424_v45 = vadd.f32 0.5, %v1423_v43  ;;  %v1430_v46 = vmul.f32 0.5, %v6855_v44  ;;  %v6857_v48 = vpop.eup %6856 }
 0x51e   :  { %v6859_v52 = vpop.eup %6858 }
 0x51f   :  { %v1431_v47 = vadd.f32 0.5, %v1430_v46  ;;  %v1442_v50 = vmul.f32 %v6857_v48, %v1424_v45  ;;  %v1439_v37 = vmul.f32 0.5, %v6859_v52 }
 0x521   :  { %v1441_v49 = vmul.f32 %v1431_v47, %v7306_v55  ;;  %v1440_v56 = vadd.f32 0.5, %v1439_v37  ;;  %v1515_v55 = vrot.slane %v1510_v60, %v7254_v5 }
 0x523   :  { %v7368_v51 = vadd.f32 %v1442_v50, %v1441_v49 }
 0x525   :  { %6860 = vtanh.f32 %v7368_v51 }
 0x532   :  { %v6861_v58 = vpop.eup %6860 }
 0x533   :  { %v7371_v59 = vmul.f32 %v6861_v58, %v1440_v56 }
 0x535   :  { %1597 = vmatmul.mubr.f32.vlgmr.msra.gmra.mxu1 %v7371_v59  ;;  %1668 = vmatmul.mubr.f32.vlgmr.msra.gmra.mxu0 %v7371_v59 }
 0x5f5   :  { %v1598_v1 = vpop.f32.mrf.mxu1  ;;  %v1669_v2 = vpop.f32.mrf.mxu0 }
 0x5f6   :  { %v7382_v3 = vadd.f32 %v1598_v1, %v1515_v55  ;;  %v7384_v10 = vadd.f32 %v1669_v2, %v1523_v62 }
 0x5f7   :  { %v1600_v11 = vpop.f32.mrf.mxu1  ;;  %v1671_v12 = vpop.f32.mrf.mxu0 }
 0x5f8   :  { %8396 = vst [vmem:[#allocation36_spill] sm:$0xff] %v7382_v3  ;;  %8397 = vst [vmem:[#allocation37_spill] sm:$0xff] %v7384_v10  ;;  %v7386_v61 = vadd.f32 %v1600_v11, %v1519_v31  ;;  %v7388_v13 = vadd.f32 %v1671_v12, %v1527_v63 }
 0x5fa   :  { %8398 = vst [vmem:[#allocation38_spill] sm:$0xff] %v7386_v61  ;;  %8399 = vst [vmem:[#allocation39_spill] sm:$0xff] %v7388_v13 }
 0x5fb   :  { %7161 = dma.done.wait [#allocation7 + $0x3], 8192 }
 0x5fc   :  { %7162 = vsyncadd [#allocation7 + $0x3], 4294959104  ;;  %1804 = vmatprep.mubr.f32.mxu1 %v8341_v0  ;;  %1875 = vmatprep.mubr.f32.mxu0 %v8341_v0  ;;  %v7392_v53 = vld [vmem:[#allocation5 + $0x1e8] sm:$0xff]  ;;  %v1736_v54 = vld [vmem:[#allocation5 + $0x1e0] sm:$0xff]  ;;  %s7177_s21 = smov [#allocation14]  }
 0x5fd   :  { %v1733_v57 = vld [vmem:[#allocation5 + $0x1c8] sm:$0xff]  ;;  %1740 = vmatprep.subr.mxu1 %v7392_v53  ;;  %v1732_v15 = vld [vmem:[#allocation5 + $0x1c0] sm:$0xff]  ;;  %v7395_v17 = vld [vmem:[#allocation5 + $0x1f8] sm:$0xff]  ;;  %s6356_s22 = sshll.u32 %s7177_s21, 4  ;;  %s6357_s22 = int_to_ptr.vmem [resolvable:$true] %s6356_s22 }
 0x5fe   :  { %1741 = vmatpush1.msra.mxu1 %v1736_v54  ;;  %v1729_v16 = vld [vmem:[#allocation5 + $0x1a8] sm:$0xff]  ;;  %v1728_v18 = vld [vmem:[#allocation5 + $0x1a0] sm:$0xff]  ;;  %1811 = vmatprep.subr.mxu0 %v7395_v17  ;;  %v1738_v20 = vld [vmem:[#allocation5 + $0x1f0] sm:$0xff]  ;;  %s7131_s23 = scalar_lea.vmem %s6357_s22, 128  ;;  %p7136_p8 = scmp.lt.s32.totalorder %s6357_s22, %s6357_s22 }
 0x5ff   :  { %1742 = vmatprep.subr.mxu1 %v1733_v57  ;;  %v1735_v21 = vld [vmem:[#allocation5 + $0x1d8] sm:$0xff]  ;;  %v1725_v24 = vld [vmem:[#allocation5 + $0x188] sm:$0xff]  ;;  %1812 = vmatpush1.msra.mxu0 %v1738_v20  ;;  %v1734_v25 = vld [vmem:[#allocation5 + $0x1d0] sm:$0xff]  ;;  %p7132_p7 = scmp.ne.s32.totalorder %s6357_s22, %s7131_s23  ;;  %p7137_p9 = scmp.lt.s32.totalorder %s7131_s23, %s7131_s23 }
 0x600   :  { %1743 = vmatpush1.msra.mxu1 %v1732_v15  ;;  %v1724_v26 = vld [vmem:[#allocation5 + $0x180] sm:$0xff]  ;;  %1813 = vmatprep.subr.mxu0 %v1735_v21  ;;  %v1731_v28 = vld [vmem:[#allocation5 + $0x1b8] sm:$0xff]  ;;  %v1730_v29 = vld [vmem:[#allocation5 + $0x1b0] sm:$0xff] }
 0x601   :  { %1744 = vmatprep.subr.mxu1 %v1729_v16  ;;  %v1721_v30 = vld [vmem:[#allocation5 + $0x168] sm:$0xff]  ;;  %1814 = vmatpush1.msra.mxu0 %v1734_v25  ;;  %v1727_v32 = vld [vmem:[#allocation5 + $0x198] sm:$0xff]  ;;  %v1720_v33 = vld [vmem:[#allocation5 + $0x160] sm:$0xff]  ;;  %p7138_p10 = por %p7137_p9, %p7136_p8 }
 0x602   :  { %1745 = vmatpush1.msra.mxu1 %v1728_v18  ;;  %1815 = vmatprep.subr.mxu0 %v1731_v28  ;;  %v1726_v34 = vld [vmem:[#allocation5 + $0x190] sm:$0xff]  ;;  %v1717_v35 = vld [vmem:[#allocation5 + $0x148] sm:$0xff]  ;;  %v1723_v38 = vld [vmem:[#allocation5 + $0x178] sm:$0xff] }
 0x603   :  { %1746 = vmatprep.subr.mxu1 %v1725_v24  ;;  %1816 = vmatpush1.msra.mxu0 %v1730_v29  ;;  %v1716_v39 = vld [vmem:[#allocation5 + $0x140] sm:$0xff]  ;;  %v1722_v40 = vld [vmem:[#allocation5 + $0x170] sm:$0xff]  ;;  %v1713_v41 = vld [vmem:[#allocation5 + $0x128] sm:$0xff]  ;;  %p7139_p11 = pnand %p7138_p10, %p7132_p7 }
 0x604   :  { %1747 = vmatpush1.msra.mxu1 %v1724_v26  ;;  %1817 = vmatprep.subr.mxu0 %v1727_v32  ;;  %v7398_v42 = vld [vmem:[#allocation5 + $0x158] sm:$0xff]  ;;  %v1712_v4 = vld [vmem:[#allocation5 + $0x120] sm:$0xff]  ;;  %v7400_v43 = vld [vmem:[#allocation5 + $0x150] sm:$0xff] }
 0x605   :  { %1748 = vmatprep.subr.mxu1 %v1721_v30  ;;  %1818 = vmatpush1.msra.mxu0 %v1726_v34  ;;  %v1709_v44 = vld [vmem:[#allocation5 + $0x108] sm:$0xff]  ;;  %v7402_v45 = vld [vmem:[#allocation5 + $0x138] sm:$0xff]  ;;  %v1708_v46 = vld [vmem:[#allocation5 + $0x100] sm:$0xff] }
 0x606   :  { %1749 = vmatpush1.msra.mxu1 %v1720_v33  ;;  %1819 = vmatprep.subr.mxu0 %v1723_v38  ;;  %v7405_v47 = vld [vmem:[#allocation5 + $0x130] sm:$0xff]  ;;  %v1705_v48 = vld [vmem:[#allocation5 + $0xe8] sm:$0xff]  ;;  %v7408_v49 = vld [vmem:[#allocation5 + $0x118] sm:$0xff] }
 0x607   :  { %1750 = vmatprep.subr.mxu1 %v1717_v35  ;;  %1820 = vmatpush1.msra.mxu0 %v1722_v40  ;;  %v1704_v50 = vld [vmem:[#allocation5 + $0xe0] sm:$0xff]  ;;  %v7411_v52 = vld [vmem:[#allocation5 + $0x110] sm:$0xff]  ;;  %v1701_v37 = vld [vmem:[#allocation5 + $0xc8] sm:$0xff] }
 0x608   :  { %1751 = vmatpush1.msra.mxu1 %v1716_v39  ;;  %1821 = vmatprep.subr.mxu0 %v7398_v42  ;;  %v7414_v56 = vld [vmem:[#allocation5 + $0xf8] sm:$0xff]  ;;  %v1700_v58 = vld [vmem:[#allocation5 + $0xc0] sm:$0xff]  ;;  %v7417_v60 = vld [vmem:[#allocation5 + $0xf0] sm:$0xff] }
 0x609   :  { %1752 = vmatprep.subr.mxu1 %v1713_v41  ;;  %1822 = vmatpush1.msra.mxu0 %v7400_v43  ;;  %v1697_v55 = vld [vmem:[#allocation5 + $0xa8] sm:$0xff]  ;;  %v7420_v62 = vld [vmem:[#allocation5 + $0xd8] sm:$0xff]  ;;  %v1696_v31 = vld [vmem:[#allocation5 + $0xa0] sm:$0xff] }
 0x60a   :  { %1753 = vmatpush1.msra.mxu1 %v1712_v4  ;;  %1823 = vmatprep.subr.mxu0 %v7402_v45  ;;  %v7423_v63 = vld [vmem:[#allocation5 + $0xd0] sm:$0xff]  ;;  %v1693_v1 = vld [vmem:[#allocation5 + $0x88] sm:$0xff]  ;;  %v7426_v2 = vld [vmem:[#allocation5 + $0xb8] sm:$0xff] }
 0x60b   :  { %1754 = vmatprep.subr.mxu1 %v1709_v44  ;;  %1824 = vmatpush1.msra.mxu0 %v7405_v47  ;;  %v1692_v11 = vld [vmem:[#allocation5 + $0x80] sm:$0xff]  ;;  %v7429_v12 = vld [vmem:[#allocation5 + $0xb0] sm:$0xff]  ;;  %v1689_v54 = vld [vmem:[#allocation5 + $0x68] sm:$0xff] }
 0x60c   :  { %1755 = vmatpush1.msra.mxu1 %v1708_v46  ;;  %1825 = vmatprep.subr.mxu0 %v7408_v49  ;;  %v7432_v57 = vld [vmem:[#allocation5 + $0x98] sm:$0xff]  ;;  %v1688_v15 = vld [vmem:[#allocation5 + $0x60] sm:$0xff]  ;;  %v7435_v16 = vld [vmem:[#allocation5 + $0x90] sm:$0xff] }
 0x60d   :  { %1756 = vmatprep.subr.mxu1 %v1705_v48  ;;  %1826 = vmatpush1.msra.mxu0 %v7411_v52  ;;  %v1685_v18 = vld [vmem:[#allocation5 + $0x48] sm:$0xff]  ;;  %v7438_v20 = vld [vmem:[#allocation5 + $0x78] sm:$0xff]  ;;  %v1684_v21 = vld [vmem:[#allocation5 + $0x40] sm:$0xff] }
 0x60e   :  { %1757 = vmatpush1.msra.mxu1 %v1704_v50  ;;  %1827 = vmatprep.subr.mxu0 %v7414_v56  ;;  %v7441_v24 = vld [vmem:[#allocation5 + $0x70] sm:$0xff]  ;;  %v1681_v25 = vld [vmem:[#allocation5 + $0x28] sm:$0xff]  ;;  %v7444_v26 = vld [vmem:[#allocation5 + $0x58] sm:$0xff] }
 0x60f   :  { %1758 = vmatprep.subr.mxu1 %v1701_v37  ;;  %1828 = vmatpush1.msra.mxu0 %v7417_v60  ;;  %v1680_v28 = vld [vmem:[#allocation5 + $0x20] sm:$0xff]  ;;  %v7447_v29 = vld [vmem:[#allocation5 + $0x50] sm:$0xff]  ;;  %v1677_v30 = vld [vmem:[#allocation5 + $0x8] sm:$0xff] }
 0x610   :  { %1759 = vmatpush1.msra.mxu1 %v1700_v58  ;;  %1829 = vmatprep.subr.mxu0 %v7420_v62  ;;  %v7450_v32 = vld [vmem:[#allocation5 + $0x38] sm:$0xff]  ;;  %v1676_v33 = vld [vmem:[#allocation5] sm:$0xff]  ;;  %v7453_v34 = vld [vmem:[#allocation5 + $0x30] sm:$0xff] }
 0x611   :  { %1760 = vmatprep.subr.mxu1 %v1697_v55  ;;  %1830 = vmatpush1.msra.mxu0 %v7423_v63  ;;  %v7456_v35 = vld [vmem:[#allocation5 + $0x18] sm:$0xff]  ;;  %v7459_v38 = vld [vmem:[#allocation5 + $0x10] sm:$0xff]  ;;  %v1918_v41 = vld [vmem:[#allocation6 + $0x68] sm:$0xff] }
 0x612   :  { %1761 = vmatpush1.msra.mxu1 %v1696_v31  ;;  %1831 = vmatprep.subr.mxu0 %v7426_v2  ;;  %v1920_v39 = vld [vmem:[#allocation6 + $0x78] sm:$0xff]  ;;  %v1919_v40 = vld [vmem:[#allocation6 + $0x70] sm:$0xff]  ;;  %v1917_v4 = vld [vmem:[#allocation6 + $0x60] sm:$0xff] }
 0x613   :  { %1762 = vmatprep.subr.mxu1 %v1693_v1  ;;  %1832 = vmatpush1.msra.mxu0 %v7429_v12  ;;  %v1915_v44 = vld [vmem:[#allocation6 + $0x50] sm:$0xff]  ;;  %v1914_v46 = vld [vmem:[#allocation6 + $0x48] sm:$0xff]  ;;  %v1913_v48 = vld [vmem:[#allocation6 + $0x40] sm:$0xff] }
 0x614   :  { %1763 = vmatpush1.msra.mxu1 %v1692_v11  ;;  %1833 = vmatprep.subr.mxu0 %v7432_v57  ;;  %v1912_v50 = vld [vmem:[#allocation6 + $0x38] sm:$0xff]  ;;  %v1911_v37 = vld [vmem:[#allocation6 + $0x30] sm:$0xff]  ;;  %v1910_v58 = vld [vmem:[#allocation6 + $0x28] sm:$0xff] }
 0x615   :  { %1764 = vmatprep.subr.mxu1 %v1689_v54  ;;  %1834 = vmatpush1.msra.mxu0 %v7435_v16  ;;  %v1909_v55 = vld [vmem:[#allocation6 + $0x20] sm:$0xff]  ;;  %v1908_v31 = vld [vmem:[#allocation6 + $0x18] sm:$0xff]  ;;  %v1907_v1 = vld [vmem:[#allocation6 + $0x10] sm:$0xff] }
 0x616   :  { %1765 = vmatpush1.msra.mxu1 %v1688_v15  ;;  %1835 = vmatprep.subr.mxu0 %v7438_v20  ;;  %v1906_v11 = vld [vmem:[#allocation6 + $0x8] sm:$0xff]  ;;  %v1905_v15 = vld [vmem:[#allocation6] sm:$0xff] }
 0x617   :  { %1766 = vmatprep.subr.mxu1 %v1685_v18  ;;  %1836 = vmatpush1.msra.mxu0 %v7441_v24  ;;  %v7484_v54 = vld [vmem:[#allocation3 + $0x1e8] sm:$0xff]  ;;  %v7486_v18 = vld [vmem:[#allocation3 + $0x1e0] sm:$0xff] }
 0x618   :  { %1767 = vmatpush1.msra.mxu1 %v1684_v21  ;;  %1837 = vmatprep.subr.mxu0 %v7444_v26  ;;  %v7490_v21 = vld [vmem:[#allocation3 + $0x1c8] sm:$0xff]  ;;  %v7560_v6 = vld [vmem:[#allocation3 + $0x60] sm:$0xff] }
 0x619   :  { %1768 = vmatprep.subr.mxu1 %v1681_v25  ;;  %1838 = vmatpush1.msra.mxu0 %v7447_v29  ;;  %v2058_v25 = vld [vmem:[#allocation3 + $0x1f8] sm:$0xff]  ;;  %v7557_v9 = vld [vmem:[#allocation3 + $0x68] sm:$0xff]  ;;  %8409 = vst [vmem:[#allocation49_spill] sm:$0xff] %v7560_v6  ;;  %v7566_v5 = vld [vmem:[#allocation3 + $0x40] sm:$0xff] }
 0x61a   :  { %1769 = vmatpush1.msra.mxu1 %v1680_v28  ;;  %1839 = vmatprep.subr.mxu0 %v7450_v32  ;;  %v7494_v28 = vld [vmem:[#allocation3 + $0x1c0] sm:$0xff]  ;;  %8408 = vst [vmem:[#allocation48_spill] sm:$0xff] %v7557_v9  ;;  %v7563_v8 = vld [vmem:[#allocation3 + $0x48] sm:$0xff]  ;;  %8411 = vst [vmem:[#allocation51_spill] sm:$0xff] %v7566_v5 }
 0x61b   :  { %1770 = vmatprep.subr.mxu1 %v1677_v30  ;;  %1840 = vmatpush1.msra.mxu0 %v7453_v34  ;;  %v7497_v30 = vld [vmem:[#allocation3 + $0x1a8] sm:$0xff]  ;;  %8410 = vst [vmem:[#allocation50_spill] sm:$0xff] %v7563_v8  ;;  %v7572_v10 = vld [vmem:[#allocation3 + $0x20] sm:$0xff] }
 0x61c   :  { %1771 = vmatpush1.msra.mxu1 %v1676_v33  ;;  %1841 = vmatprep.subr.mxu0 %v7456_v35  ;;  %v7500_v33 = vld [vmem:[#allocation3 + $0x1a0] sm:$0xff]  ;;  %v7569_v13 = vld [vmem:[#allocation3 + $0x28] sm:$0xff]  ;;  %8413 = vst [vmem:[#allocation53_spill] sm:$0xff] %v7572_v10 }
 0x61d   :  { %1805 = vmatmul.mubr.f32.vlgmr.msra.gmra.mxu1 %v7319_v14  ;;  %1842 = vmatpush1.msra.mxu0 %v7459_v38  ;;  %8412 = vst [vmem:[#allocation52_spill] sm:$0xff] %v7569_v13  ;;  %v7575_v61 = vld [vmem:[#allocation3 + $0x8] sm:$0xff]  ;;  %v7578_v3 = vld [vmem:[#allocation3] sm:$0xff] }
 0x61e   :  { %6568 = vmatprep.subr.mxu1 %v8341_v0  ;;  %1876 = vmatmul.mubr.f32.vlgmr.msra.gmra.mxu0 %v7319_v14  ;;  %v1916_v14 = vld [vmem:[#allocation6 + $0x58] sm:$0xff]  ;;  %8414 = vst [vmem:[#allocation54_spill] sm:$0xff] %v7575_v61  ;;  %8415 = vst [vmem:[#allocation55_spill] sm:$0xff] %v7578_v3 }
 0x61f   :  { %6600 = vmatprep.mubr.msk.f32.mxu1 %vm7176_vm0, %v8341_v0  ;;  %2123 = vmatprep.mubr.f32.mxu0 %v8341_v0 }
 0x620   :  { %6569 = vmatpush3.msra.mxu1 %v1920_v39  ;;  %2059 = vmatprep.subr.mxu0 %v7484_v54  ;;  %v7503_v39 = vld [vmem:[#allocation3 + $0x188] sm:$0xff] }
 0x621   :  { %6570 = vmatprep.subr.mxu1 %v8341_v0  ;;  %2060 = vmatpush1.msra.mxu0 %v7486_v18 }
 0x622   :  { %6571 = vmatpush3.msra.mxu1 %v1919_v40  ;;  %2061 = vmatprep.subr.mxu0 %v7490_v21  ;;  %v7506_v40 = vld [vmem:[#allocation3 + $0x180] sm:$0xff] }
 0x623   :  { %6572 = vmatprep.subr.mxu1 %v8341_v0  ;;  %2062 = vmatpush1.msra.mxu0 %v7494_v28 }
 0x624   :  { %6573 = vmatpush3.msra.mxu1 %v1918_v41  ;;  %2063 = vmatprep.subr.mxu0 %v7497_v30  ;;  %v7509_v41 = vld [vmem:[#allocation3 + $0x168] sm:$0xff] }
 0x625   :  { %6574 = vmatprep.subr.mxu1 %v8341_v0  ;;  %2064 = vmatpush1.msra.mxu0 %v7500_v33 }
 0x626   :  { %6575 = vmatpush3.msra.mxu1 %v1917_v4  ;;  %2065 = vmatprep.subr.mxu0 %v7503_v39  ;;  %v7512_v4 = vld [vmem:[#allocation3 + $0x160] sm:$0xff] }
 0x627   :  { %6576 = vmatprep.subr.mxu1 %v8341_v0  ;;  %2066 = vmatpush1.msra.mxu0 %v7506_v40 }
 0x628   :  { %6577 = vmatpush3.msra.mxu1 %v1916_v14  ;;  %2067 = vmatprep.subr.mxu0 %v7509_v41  ;;  %v7515_v14 = vld [vmem:[#allocation3 + $0x148] sm:$0xff] }
 0x629   :  { %6578 = vmatprep.subr.mxu1 %v8341_v0  ;;  %2068 = vmatpush1.msra.mxu0 %v7512_v4 }
 0x62a   :  { %6579 = vmatpush3.msra.mxu1 %v1915_v44  ;;  %2069 = vmatprep.subr.mxu0 %v7515_v14  ;;  %v7518_v44 = vld [vmem:[#allocation3 + $0x140] sm:$0xff] }
 0x62b   :  { %6580 = vmatprep.subr.mxu1 %v8341_v0  ;;  %2070 = vmatpush1.msra.mxu0 %v7518_v44 }
 0x62c   :  { %6581 = vmatpush3.msra.mxu1 %v1914_v46  ;;  %v7521_v46 = vld [vmem:[#allocation3 + $0x128] sm:$0xff] }
 0x62d   :  { %6582 = vmatprep.subr.mxu1 %v8341_v0  ;;  %2071 = vmatprep.subr.mxu0 %v7521_v46 }
 0x62e   :  { %6583 = vmatpush3.msra.mxu1 %v1913_v48  ;;  %v7524_v48 = vld [vmem:[#allocation3 + $0x120] sm:$0xff] }
 0x62f   :  { %6584 = vmatprep.subr.mxu1 %v8341_v0  ;;  %2072 = vmatpush1.msra.mxu0 %v7524_v48 }
 0x630   :  { %6585 = vmatpush3.msra.mxu1 %v1912_v50  ;;  %v7527_v50 = vld [vmem:[#allocation3 + $0x108] sm:$0xff] }
 0x631   :  { %6586 = vmatprep.subr.mxu1 %v8341_v0  ;;  %2073 = vmatprep.subr.mxu0 %v7527_v50 }
 0x632   :  { %6587 = vmatpush3.msra.mxu1 %v1911_v37  ;;  %v7530_v37 = vld [vmem:[#allocation3 + $0x100] sm:$0xff] }
 0x633   :  { %6588 = vmatprep.subr.mxu1 %v8341_v0  ;;  %2074 = vmatpush1.msra.mxu0 %v7530_v37 }
 0x634   :  { %6589 = vmatpush3.msra.mxu1 %v1910_v58  ;;  %v7533_v58 = vld [vmem:[#allocation3 + $0xe8] sm:$0xff] }
 0x635   :  { %6590 = vmatprep.subr.mxu1 %v8341_v0  ;;  %8400 = vst [vmem:[#allocation40_spill] sm:$0xff] %v7533_v58  ;;  %2075 = vmatprep.subr.mxu0 %v7533_v58 }
 0x636   :  { %6591 = vmatpush3.msra.mxu1 %v1909_v55  ;;  %v7536_v55 = vld [vmem:[#allocation3 + $0xe0] sm:$0xff] }
 0x637   :  { %6592 = vmatprep.subr.mxu1 %v8341_v0  ;;  %8401 = vst [vmem:[#allocation41_spill] sm:$0xff] %v7536_v55  ;;  %2076 = vmatpush1.msra.mxu0 %v7536_v55 }
 0x638   :  { %6593 = vmatpush3.msra.mxu1 %v1908_v31  ;;  %v7539_v31 = vld [vmem:[#allocation3 + $0xc8] sm:$0xff] }
 0x639   :  { %6594 = vmatprep.subr.mxu1 %v8341_v0  ;;  %8402 = vst [vmem:[#allocation42_spill] sm:$0xff] %v7539_v31  ;;  %2077 = vmatprep.subr.mxu0 %v7539_v31 }
 0x63a   :  { %6595 = vmatpush3.msra.mxu1 %v1907_v1  ;;  %v7542_v1 = vld [vmem:[#allocation3 + $0xc0] sm:$0xff] }
 0x63b   :  { %6596 = vmatprep.subr.mxu1 %v8341_v0  ;;  %8403 = vst [vmem:[#allocation43_spill] sm:$0xff] %v7542_v1  ;;  %2078 = vmatpush1.msra.mxu0 %v7542_v1 }
 0x63c   :  { %6597 = vmatpush3.msra.mxu1 %v1906_v11  ;;  %v7545_v11 = vld [vmem:[#allocation3 + $0xa8] sm:$0xff] }
 0x63d   :  { %6598 = vmatprep.subr.mxu1 %v8341_v0  ;;  %8404 = vst [vmem:[#allocation44_spill] sm:$0xff] %v7545_v11  ;;  %2079 = vmatprep.subr.mxu0 %v7545_v11  ;;  %v7554_v0 = vld [vmem:[#allocation3 + $0x80] sm:$0xff] }
 0x63e   :  { %6599 = vmatpush3.msra.mxu1 %v1905_v15  ;;  %v7548_v15 = vld [vmem:[#allocation3 + $0xa0] sm:$0xff]  ;;  %8407 = vst [vmem:[#allocation47_spill] sm:$0xff] %v7554_v0 }
 0x63f   :  { %2130 = vmatprep.subr.mxu1 %v2058_v25  ;;  %8405 = vst [vmem:[#allocation45_spill] sm:$0xff] %v7548_v15  ;;  %2080 = vmatpush1.msra.mxu0 %v7548_v15  ;;  %v7551_v25 = vld [vmem:[#allocation3 + $0x88] sm:$0xff] }
 0x640   :  { %8406 = vst [vmem:[#allocation46_spill] sm:$0xff] %v7551_v25  ;;  %2081 = vmatprep.subr.mxu0 %v7551_v25 }
 0x641   :  { %2082 = vmatpush1.msra.mxu0 %v7554_v0 }
 0x642   :  { %2083 = vmatprep.subr.mxu0 %v7557_v9 }
 0x643   :  { %2084 = vmatpush1.msra.mxu0 %v7560_v6 }
 0x644   :  { %2085 = vmatprep.subr.mxu0 %v7563_v8  ;;  %v8416_v8 = vmov 0.0  }
 0x645   :  { %2086 = vmatpush1.msra.mxu0 %v7566_v5 }
 0x646   :  { %2087 = vmatprep.subr.mxu0 %v7569_v13 }
 0x647   :  { %2088 = vmatpush1.msra.mxu0 %v7572_v10 }
 0x648   :  { %2089 = vmatprep.subr.mxu0 %v7575_v61 }
 0x649   :  { %2090 = vmatpush1.msra.mxu0 %v7578_v3 }
 0x64a   :  { %2124 = vmatmul.mubr.f32.vlgmr.msra.gmra.mxu0 %v7371_v59 }
 0x64b   :  { %2406 = vmatprep.mubr.f32.mxu0 %v8416_v8 }
 0x6dd   :  { %v1806_v5 = vpop.f32.mrf.mxu1 }
 0x6de   :  { %v1882_v6 = vadd.f32 %v1806_v5, %v7328_v19  ;;  %v1877_v9 = vpop.f32.mrf.mxu0 }
 0x6df   :  { %v1808_v13 = vpop.f32.mrf.mxu1  ;;  %v1884_v61 = vadd.f32 %v1877_v9, %v7330_v36 }
 0x6e0   :  { %v1886_v0 = vmul.f32 0.5, %v1882_v6  ;;  %v1883_v10 = vadd.f32 %v1808_v13, %v7332_v22  ;;  %v1879_v15 = vpop.f32.mrf.mxu0 }
 0x6e1   :  { %v1885_v3 = vadd.f32 %v1879_v15, %v7334_v23  ;;  %v2045_v15 = vld [vmem:[#allocation3 + $0x190] sm:$0xff] }
 0x6e2   :  { %6862 = vtanh.f32 %v1886_v0  ;;  %v1890_v25 = vmul.f32 0.5, %v1883_v10 }
 0x6e3   :  { %v1895_v11 = vmul.f32 0.5, %v1885_v3 }
 0x6e4   :  { %6864 = vtanh.f32 %v1890_v25  ;;  %v2042_v25 = vld [vmem:[#allocation3 + $0x178] sm:$0xff] }
 0x6e5   :  { %6866 = vtanh.f32 %v1884_v61 }
 0x6e6   :  { %6868 = vtanh.f32 %v1895_v11  ;;  %v2050_v11 = vld [vmem:[#allocation3 + $0x1b8] sm:$0xff] }
 0x6ef   :  { %v6863_v1 = vpop.eup %6862 }
 0x6f0   :  { %v1888_v31 = vmul.f32 0.5, %v6863_v1  ;;  %v2053_v1 = vld [vmem:[#allocation3 + $0x1d0] sm:$0xff] }
 0x6f1   :  { %v6865_v55 = vpop.eup %6864 }
 0x6f2   :  { %v1889_v58 = vadd.f32 0.5, %v1888_v31  ;;  %v1892_v5 = vmul.f32 0.5, %v6865_v55  ;;  %v6867_v19 = vpop.eup %6866  ;;  %v2057_v31 = vld [vmem:[#allocation3 + $0x1f0] sm:$0xff]  ;;  %v2054_v55 = vld [vmem:[#allocation3 + $0x1d8] sm:$0xff] }
 0x6f3   :  { %v6869_v9 = vpop.eup %6868 }
 0x6f4   :  { %v1893_v6 = vadd.f32 0.5, %v1892_v5  ;;  %v1900_v0 = vmul.f32 %v6867_v19, %v1889_v58  ;;  %v1897_v36 = vmul.f32 0.5, %v6869_v9  ;;  %v2046_v58 = vld [vmem:[#allocation3 + $0x198] sm:$0xff]  ;;  %v2041_v5 = vld [vmem:[#allocation3 + $0x170] sm:$0xff] }
 0x6f5   :  { %v2038_v19 = vld [vmem:[#allocation3 + $0x158] sm:$0xff] }
 0x6f6   :  { %v1899_v22 = vmul.f32 %v1893_v6, %v7316_v7  ;;  %v1898_v61 = vadd.f32 0.5, %v1897_v36  ;;  %v2049_v7 = vld [vmem:[#allocation3 + $0x1b0] sm:$0xff]  ;;  %v2030_v9 = vld [vmem:[#allocation3 + $0x118] sm:$0xff] }
 0x6f7   :  { %v2037_v6 = vld [vmem:[#allocation3 + $0x150] sm:$0xff] }
 0x6f8   :  { %v7588_v10 = vadd.f32 %v1900_v0, %v1899_v22  ;;  %v2034_v22 = vld [vmem:[#allocation3 + $0x138] sm:$0xff]  ;;  %v2033_v0 = vld [vmem:[#allocation3 + $0x130] sm:$0xff] }
 0x6f9   :  { %v2029_v36 = vld [vmem:[#allocation3 + $0x110] sm:$0xff] }
 0x6fa   :  { %6870 = vtanh.f32 %v7588_v10 }
 0x707   :  { %v6871_v23 = vpop.eup %6870 }
 0x708   :  { %v7591_v3 = vmul.f32 %v6871_v23, %v1898_v61  ;;  %v2026_v61 = vld [vmem:[#allocation3 + $0xf8] sm:$0xff]  ;;  %v2025_v23 = vld [vmem:[#allocation3 + $0xf0] sm:$0xff] }
 0x70a   :  { %v1904_v13 = vmax.f32 %v7591_v3, 0.0 }
 0x70c   :  { %6601 = vmatmul.mubr.f32.vlgmr.msra.gmra.mxu1 %v1904_v13  ;;  %v2022_v13 = vld [vmem:[#allocation3 + $0xd8] sm:$0xff] }
 0x70d   :  { %2131 = vmatpush1.msra.mxu1 %v2057_v31  ;;  %2194 = vmatprep.mubr.f32.mxu1 %v8416_v8  ;;  %v2021_v31 = vld [vmem:[#allocation3 + $0xd0] sm:$0xff] }
 0x70e   :  { %2132 = vmatprep.subr.mxu1 %v2054_v55  ;;  %v2018_v55 = vld [vmem:[#allocation3 + $0xb8] sm:$0xff] }
 0x70f   :  { %2133 = vmatpush1.msra.mxu1 %v2053_v1  ;;  %v2017_v1 = vld [vmem:[#allocation3 + $0xb0] sm:$0xff] }
 0x710   :  { %2134 = vmatprep.subr.mxu1 %v2050_v11  ;;  %v2014_v11 = vld [vmem:[#allocation3 + $0x98] sm:$0xff] }
 0x711   :  { %2135 = vmatpush1.msra.mxu1 %v2049_v7  ;;  %v2013_v7 = vld [vmem:[#allocation3 + $0x90] sm:$0xff] }
 0x712   :  { %2136 = vmatprep.subr.mxu1 %v2046_v58  ;;  %v2010_v58 = vld [vmem:[#allocation3 + $0x78] sm:$0xff] }
 0x713   :  { %2137 = vmatpush1.msra.mxu1 %v2045_v15  ;;  %v2009_v15 = vld [vmem:[#allocation3 + $0x70] sm:$0xff] }
 0x714   :  { %2138 = vmatprep.subr.mxu1 %v2042_v25  ;;  %v2006_v25 = vld [vmem:[#allocation3 + $0x58] sm:$0xff] }
 0x715   :  { %2139 = vmatpush1.msra.mxu1 %v2041_v5  ;;  %v2005_v5 = vld [vmem:[#allocation3 + $0x50] sm:$0xff] }
 0x716   :  { %2140 = vmatprep.subr.mxu1 %v2038_v19  ;;  %v2002_v19 = vld [vmem:[#allocation3 + $0x38] sm:$0xff] }
 0x717   :  { %2141 = vmatpush1.msra.mxu1 %v2037_v6  ;;  %v2001_v6 = vld [vmem:[#allocation3 + $0x30] sm:$0xff] }
 0x718   :  { %2142 = vmatprep.subr.mxu1 %v2034_v22  ;;  %v1998_v22 = vld [vmem:[#allocation3 + $0x18] sm:$0xff] }
 0x719   :  { %2143 = vmatpush1.msra.mxu1 %v2033_v0  ;;  %v1997_v0 = vld [vmem:[#allocation3 + $0x10] sm:$0xff] }
 0x71a   :  { %2144 = vmatprep.subr.mxu1 %v2030_v9  ;;  %v2317_v9 = vld [vmem:[#allocation4 + $0x1e8] sm:$0xff] }
 0x71b   :  { %2145 = vmatpush1.msra.mxu1 %v2029_v36  ;;  %v2319_v36 = vld [vmem:[#allocation4 + $0x1f8] sm:$0xff]  ;;  %2342 = vmatprep.subr.mxu0 %v2317_v9  ;;  %v2302_v9 = vld [vmem:[#allocation4 + $0x170] sm:$0xff] }
 0x71c   :  { %2146 = vmatprep.subr.mxu1 %v2026_v61  ;;  %v2316_v61 = vld [vmem:[#allocation4 + $0x1e0] sm:$0xff] }
 0x71d   :  { %2147 = vmatpush1.msra.mxu1 %v2025_v23  ;;  %v2318_v23 = vld [vmem:[#allocation4 + $0x1f0] sm:$0xff]  ;;  %2343 = vmatpush1.msra.mxu0 %v2316_v61  ;;  %v2299_v61 = vld [vmem:[#allocation4 + $0x158] sm:$0xff] }
 0x71e   :  { %2148 = vmatprep.subr.mxu1 %v2022_v13  ;;  %v2313_v13 = vld [vmem:[#allocation4 + $0x1c8] sm:$0xff] }
 0x71f   :  { %2149 = vmatpush1.msra.mxu1 %v2021_v31  ;;  %v2315_v31 = vld [vmem:[#allocation4 + $0x1d8] sm:$0xff]  ;;  %2344 = vmatprep.subr.mxu0 %v2313_v13  ;;  %v2298_v13 = vld [vmem:[#allocation4 + $0x150] sm:$0xff] }
 0x720   :  { %2150 = vmatprep.subr.mxu1 %v2018_v55  ;;  %v2312_v55 = vld [vmem:[#allocation4 + $0x1c0] sm:$0xff] }
 0x721   :  { %2151 = vmatpush1.msra.mxu1 %v2017_v1  ;;  %v2314_v1 = vld [vmem:[#allocation4 + $0x1d0] sm:$0xff]  ;;  %2345 = vmatpush1.msra.mxu0 %v2312_v55  ;;  %v2295_v55 = vld [vmem:[#allocation4 + $0x138] sm:$0xff] }
 0x722   :  { %2152 = vmatprep.subr.mxu1 %v2014_v11  ;;  %v2309_v11 = vld [vmem:[#allocation4 + $0x1a8] sm:$0xff] }
 0x723   :  { %2153 = vmatpush1.msra.mxu1 %v2013_v7  ;;  %2346 = vmatprep.subr.mxu0 %v2309_v11  ;;  %v2308_v7 = vld [vmem:[#allocation4 + $0x1a0] sm:$0xff]  ;;  %v2294_v11 = vld [vmem:[#allocation4 + $0x130] sm:$0xff] }
 0x724   :  { %2154 = vmatprep.subr.mxu1 %v2010_v58  ;;  %v2310_v58 = vld [vmem:[#allocation4 + $0x1b0] sm:$0xff]  ;;  %2347 = vmatpush1.msra.mxu0 %v2308_v7  ;;  %v2291_v7 = vld [vmem:[#allocation4 + $0x118] sm:$0xff] }
 0x725   :  { %2155 = vmatpush1.msra.mxu1 %v2009_v15  ;;  %v2305_v15 = vld [vmem:[#allocation4 + $0x188] sm:$0xff] }
 0x726   :  { %2156 = vmatprep.subr.mxu1 %v2006_v25  ;;  %v2307_v25 = vld [vmem:[#allocation4 + $0x198] sm:$0xff]  ;;  %2348 = vmatprep.subr.mxu0 %v2305_v15  ;;  %v2290_v15 = vld [vmem:[#allocation4 + $0x110] sm:$0xff] }
 0x727   :  { %2157 = vmatpush1.msra.mxu1 %v2005_v5  ;;  %v2304_v5 = vld [vmem:[#allocation4 + $0x180] sm:$0xff] }
 0x728   :  { %2158 = vmatprep.subr.mxu1 %v2002_v19  ;;  %v2306_v19 = vld [vmem:[#allocation4 + $0x190] sm:$0xff]  ;;  %2349 = vmatpush1.msra.mxu0 %v2304_v5  ;;  %v2287_v5 = vld [vmem:[#allocation4 + $0xf8] sm:$0xff] }
 0x729   :  { %2159 = vmatpush1.msra.mxu1 %v2001_v6  ;;  %v2301_v6 = vld [vmem:[#allocation4 + $0x168] sm:$0xff] }
 0x72a   :  { %2160 = vmatprep.subr.mxu1 %v1998_v22  ;;  %v2303_v22 = vld [vmem:[#allocation4 + $0x178] sm:$0xff]  ;;  %2350 = vmatprep.subr.mxu0 %v2301_v6  ;;  %v2286_v6 = vld [vmem:[#allocation4 + $0xf0] sm:$0xff] }
 0x72b   :  { %2161 = vmatpush1.msra.mxu1 %v1997_v0  ;;  %v2300_v0 = vld [vmem:[#allocation4 + $0x160] sm:$0xff] }
 0x72c   :  { %2195 = vmatmul.mubr.f32.vlgmr.msra.gmra.mxu1 %v7371_v59  ;;  %2413 = vmatprep.subr.mxu1 %v2319_v36  ;;  %v2311_v59 = vld [vmem:[#allocation4 + $0x1b8] sm:$0xff]  ;;  %v2297_v36 = vld [vmem:[#allocation4 + $0x148] sm:$0xff] }
 0x72d   :  { %2477 = vmatprep.mubr.f32.mxu1 %v8416_v8  ;;  %2414 = vmatpush1.msra.mxu1 %v2318_v23  ;;  %v2296_v23 = vld [vmem:[#allocation4 + $0x140] sm:$0xff] }
 0x72e   :  { %2415 = vmatprep.subr.mxu1 %v2315_v31  ;;  %2351 = vmatpush1.msra.mxu0 %v2300_v0  ;;  %v2293_v31 = vld [vmem:[#allocation4 + $0x128] sm:$0xff]  ;;  %v2283_v0 = vld [vmem:[#allocation4 + $0xd8] sm:$0xff] }
 0x72f   :  { %2416 = vmatpush1.msra.mxu1 %v2314_v1  ;;  %2352 = vmatprep.subr.mxu0 %v2297_v36  ;;  %v2292_v1 = vld [vmem:[#allocation4 + $0x120] sm:$0xff]  ;;  %v2282_v36 = vld [vmem:[#allocation4 + $0xd0] sm:$0xff] }
 0x730   :  { %2417 = vmatprep.subr.mxu1 %v2311_v59  ;;  %2353 = vmatpush1.msra.mxu0 %v2296_v23  ;;  %v2289_v59 = vld [vmem:[#allocation4 + $0x108] sm:$0xff]  ;;  %v2279_v23 = vld [vmem:[#allocation4 + $0xb8] sm:$0xff] }
 0x731   :  { %2418 = vmatpush1.msra.mxu1 %v2310_v58  ;;  %2354 = vmatprep.subr.mxu0 %v2293_v31  ;;  %v2288_v58 = vld [vmem:[#allocation4 + $0x100] sm:$0xff]  ;;  %v2278_v31 = vld [vmem:[#allocation4 + $0xb0] sm:$0xff] }
 0x732   :  { %2419 = vmatprep.subr.mxu1 %v2307_v25  ;;  %2355 = vmatpush1.msra.mxu0 %v2292_v1  ;;  %v2285_v25 = vld [vmem:[#allocation4 + $0xe8] sm:$0xff]  ;;  %v2275_v1 = vld [vmem:[#allocation4 + $0x98] sm:$0xff] }
 0x733   :  { %2420 = vmatpush1.msra.mxu1 %v2306_v19  ;;  %2356 = vmatprep.subr.mxu0 %v2289_v59  ;;  %v2284_v19 = vld [vmem:[#allocation4 + $0xe0] sm:$0xff]  ;;  %v2274_v59 = vld [vmem:[#allocation4 + $0x90] sm:$0xff] }
 0x734   :  { %2421 = vmatprep.subr.mxu1 %v2303_v22  ;;  %2357 = vmatpush1.msra.mxu0 %v2288_v58  ;;  %v2281_v22 = vld [vmem:[#allocation4 + $0xc8] sm:$0xff]  ;;  %v2271_v58 = vld [vmem:[#allocation4 + $0x78] sm:$0xff] }
 0x735   :  { %2422 = vmatpush1.msra.mxu1 %v2302_v9  ;;  %2358 = vmatprep.subr.mxu0 %v2285_v25  ;;  %v2280_v9 = vld [vmem:[#allocation4 + $0xc0] sm:$0xff]  ;;  %v2270_v25 = vld [vmem:[#allocation4 + $0x70] sm:$0xff] }
 0x736   :  { %2423 = vmatprep.subr.mxu1 %v2299_v61  ;;  %2359 = vmatpush1.msra.mxu0 %v2284_v19  ;;  %v2277_v61 = vld [vmem:[#allocation4 + $0xa8] sm:$0xff]  ;;  %v2267_v19 = vld [vmem:[#allocation4 + $0x58] sm:$0xff] }
 0x737   :  { %2424 = vmatpush1.msra.mxu1 %v2298_v13  ;;  %2360 = vmatprep.subr.mxu0 %v2281_v22  ;;  %v2276_v13 = vld [vmem:[#allocation4 + $0xa0] sm:$0xff]  ;;  %v2266_v22 = vld [vmem:[#allocation4 + $0x50] sm:$0xff] }
 0x738   :  { %2425 = vmatprep.subr.mxu1 %v2295_v55  ;;  %2361 = vmatpush1.msra.mxu0 %v2280_v9  ;;  %v2273_v55 = vld [vmem:[#allocation4 + $0x88] sm:$0xff]  ;;  %v2263_v9 = vld [vmem:[#allocation4 + $0x38] sm:$0xff] }
 0x739   :  { %2426 = vmatpush1.msra.mxu1 %v2294_v11  ;;  %2362 = vmatprep.subr.mxu0 %v2277_v61  ;;  %v2272_v11 = vld [vmem:[#allocation4 + $0x80] sm:$0xff]  ;;  %v2262_v61 = vld [vmem:[#allocation4 + $0x30] sm:$0xff] }
 0x73a   :  { %2427 = vmatprep.subr.mxu1 %v2291_v7  ;;  %2363 = vmatpush1.msra.mxu0 %v2276_v13  ;;  %v2269_v7 = vld [vmem:[#allocation4 + $0x68] sm:$0xff]  ;;  %v2259_v13 = vld [vmem:[#allocation4 + $0x18] sm:$0xff] }
 0x73b   :  { %2428 = vmatpush1.msra.mxu1 %v2290_v15  ;;  %2364 = vmatprep.subr.mxu0 %v2273_v55  ;;  %v2268_v15 = vld [vmem:[#allocation4 + $0x60] sm:$0xff]  ;;  %v2258_v55 = vld [vmem:[#allocation4 + $0x10] sm:$0xff] }
 0x73c   :  { %2429 = vmatprep.subr.mxu1 %v2287_v5  ;;  %2365 = vmatpush1.msra.mxu0 %v2272_v11  ;;  %v2265_v5 = vld [vmem:[#allocation4 + $0x48] sm:$0xff] }
 0x73d   :  { %2430 = vmatpush1.msra.mxu1 %v2286_v6  ;;  %2366 = vmatprep.subr.mxu0 %v2269_v7  ;;  %v2264_v6 = vld [vmem:[#allocation4 + $0x40] sm:$0xff] }
 0x73e   :  { %2431 = vmatprep.subr.mxu1 %v2283_v0  ;;  %2367 = vmatpush1.msra.mxu0 %v2268_v15  ;;  %v2261_v0 = vld [vmem:[#allocation4 + $0x28] sm:$0xff] }
 0x73f   :  { %2432 = vmatpush1.msra.mxu1 %v2282_v36  ;;  %2368 = vmatprep.subr.mxu0 %v2265_v5  ;;  %v2260_v36 = vld [vmem:[#allocation4 + $0x20] sm:$0xff] }
 0x740   :  { %2433 = vmatprep.subr.mxu1 %v2279_v23  ;;  %2369 = vmatpush1.msra.mxu0 %v2264_v6  ;;  %v2257_v23 = vld [vmem:[#allocation4 + $0x8] sm:$0xff] }
 0x741   :  { %2434 = vmatpush1.msra.mxu1 %v2278_v31  ;;  %2370 = vmatprep.subr.mxu0 %v2261_v0  ;;  %v2256_v31 = vld [vmem:[#allocation4] sm:$0xff] }
 0x742   :  { %2435 = vmatprep.subr.mxu1 %v2275_v1  ;;  %2371 = vmatpush1.msra.mxu0 %v2260_v36  ;;  %v1921_v1 = vld [vmem:[%s8339_s8] sm:$0x1] }
 0x743   :  { %2436 = vmatpush1.msra.mxu1 %v2274_v59  ;;  %2372 = vmatprep.subr.mxu0 %v2257_v23 }
 0x744   :  { %2437 = vmatprep.subr.mxu1 %v2271_v58  ;;  %2373 = vmatpush1.msra.mxu0 %v2256_v31  ;;  %v2125_v58 = vpop.f32.mrf.mxu0 }
 0x745   :  { %2438 = vmatpush1.msra.mxu1 %v2270_v25  ;;  %2548 = vmatprep.subr.mxu0 %v7392_v53 }
 0x746   :  { %2439 = vmatprep.subr.mxu1 %v2267_v19  ;;  %v2127_v15 = vpop.f32.mrf.mxu0 }
 0x747   :  { %2440 = vmatpush1.msra.mxu1 %v2266_v22  ;;  %v2205_v5 = vcombine.low %v2125_v58, %v2127_v15 }
 0x748   :  { %2441 = vmatprep.subr.mxu1 %v2263_v9 }
 0x749   :  { %2442 = vmatpush1.msra.mxu1 %v2262_v61  ;;  %v2213_v22 = vrot.slane %v2205_v5, %v7299_v27 }
 0x74a   :  { %2443 = vmatprep.subr.mxu1 %v2259_v13 }
 0x74b   :  { %2444 = vmatpush1.msra.mxu1 %v2258_v55 }
 0x74c   :  { %2619 = vmatprep.subr.mxu1 %v7395_v17  ;;  %v1994_v17 = vld [vmem:[#allocation2 + $0x3] ss:$8 sm:$0xf] }
 0x7cc   :  { %v1988_v11 = vpop.f32.mrf.mxu1 }
 0x7cd   :  { %v1989_v59 = vadd.f32 %v1988_v11, %v1921_v1 }
 0x7ce   :  { %v6602_v7 = vpop.f32.mrf.mxu1 }
 0x7cf   :  { %1992 = vst [vmem:[#allocation14 + $0x1] sm:$0x1] %v1989_v59 }
 0x7ec   :  { %v2196_v25 = vpop.f32.mrf.mxu1 }
 0x7ee   :  { %v2198_v19 = vpop.f32.mrf.mxu1 }
 0x7ef   :  { %v2206_v6 = vcombine.low %v2196_v25, %v2198_v19 }
 0x7f1   :  { %v2220_v53 = vrot.slane %v2206_v6, %v7299_v27 }
 0x7f3   :  { %v2221_v0 = vcombine.low %v2213_v22, %v2220_v53 }
 0x7f5   :  { %v2228_v9 = vrot.slane %v2221_v0, %v7299_v27 }
 0x7f7   :  { %v2230_v36 = vadd.f32 %v2228_v9, %v1994_v17 }
 0x7f9   :  { %v2231_v61 = vmul.f32 0.5, %v2230_v36  ;;  %v2236_v23 = vrot.slane %v2230_v36, 1  ;;  %v2242_v31 = vrot.slane %v2230_v36, 2  ;;  %v2245_v55 = vrot.slane %v2230_v36, 3 }
 0x7fb   :  { %6872 = vtanh.f32 %v2231_v61  ;;  %v2238_v13 = vmul.f32 0.5, %v2236_v23  ;;  %v2247_v1 = vmul.f32 0.5, %v2245_v55  ;;  %v2544_v61 = vld [vmem:[#allocation5 + $0x1e0] sm:$0xff]  ;;  %v2541_v23 = vld [vmem:[#allocation5 + $0x1c8] sm:$0xff]  ;;  %v6983_v55 = vld [vmem:[#allocation5 + $0x1d8] sm:$0xff] }
 0x7fd   :  { %6874 = vtanh.f32 %v2238_v13  ;;  %v2540_v13 = vld [vmem:[#allocation5 + $0x1c0] sm:$0xff] }
 0x7fe   :  { %6876 = vtanh.f32 %v2242_v31  ;;  %v2537_v31 = vld [vmem:[#allocation5 + $0x1a8] sm:$0xff] }
 0x7ff   :  { %6878 = vtanh.f32 %v2247_v1  ;;  %v2536_v1 = vld [vmem:[#allocation5 + $0x1a0] sm:$0xff] }
 0x808   :  { %v6873_v11 = vpop.eup %6872 }
 0x809   :  { %v2233_v59 = vmul.f32 0.5, %v6873_v11  ;;  %v6984_v11 = vld [vmem:[#allocation5 + $0x1d0] sm:$0xff] }
 0x80a   :  { %v6875_v7 = vpop.eup %6874 }
 0x80b   :  { %v2234_v58 = vadd.f32 0.5, %v2233_v59  ;;  %v2240_v15 = vmul.f32 0.5, %v6875_v7  ;;  %v6877_v5 = vpop.eup %6876  ;;  %v2533_v59 = vld [vmem:[#allocation5 + $0x188] sm:$0xff]  ;;  %v6985_v7 = vld [vmem:[#allocation5 + $0x1b8] sm:$0xff] }
 0x80c   :  { %v6879_v53 = vpop.eup %6878 }
 0x80d   :  { %v2241_v25 = vadd.f32 0.5, %v2240_v15  ;;  %v2252_v6 = vmul.f32 %v6877_v5, %v2234_v58  ;;  %v2249_v0 = vmul.f32 0.5, %v6879_v53  ;;  %v2532_v58 = vld [vmem:[#allocation5 + $0x180] sm:$0xff]  ;;  %v6986_v15 = vld [vmem:[#allocation5 + $0x1b0] sm:$0xff]  ;;  %v6987_v5 = vld [vmem:[#allocation5 + $0x198] sm:$0xff] }
 0x80e   :  { %v2525_v53 = vld [vmem:[#allocation5 + $0x148] sm:$0xff] }
 0x80f   :  { %v2251_v19 = vmul.f32 %v2241_v25, %v7368_v51  ;;  %v2250_v17 = vadd.f32 0.5, %v2249_v0  ;;  %v6982_v51 = vld [vmem:[#allocation5 + $0x1f0] sm:$0xff]  ;;  %v2529_v25 = vld [vmem:[#allocation5 + $0x168] sm:$0xff]  ;;  %v6989_v0 = vld [vmem:[#allocation5 + $0x178] sm:$0xff] }
 0x811   :  { %v7606_v22 = vadd.f32 %v2252_v6, %v2251_v19  ;;  %v2528_v19 = vld [vmem:[#allocation5 + $0x160] sm:$0xff]  ;;  %v6988_v6 = vld [vmem:[#allocation5 + $0x190] sm:$0xff] }
 0x813   :  { %6880 = vtanh.f32 %v7606_v22 }
 0x820   :  { %v6881_v9 = vpop.eup %6880 }
 0x821   :  { %v7609_v36 = vmul.f32 %v6881_v9, %v2250_v17  ;;  %v2524_v17 = vld [vmem:[#allocation5 + $0x140] sm:$0xff]  ;;  %v6990_v9 = vld [vmem:[#allocation5 + $0x170] sm:$0xff] }
 0x823   :  { %2407 = vmatmul.mubr.f32.vlgmr.msra.gmra.mxu0 %v7609_v36  ;;  %2478 = vmatmul.mubr.f32.vlgmr.msra.gmra.mxu1 %v7609_v36 }
 0x824   :  { %2549 = vmatpush1.msra.mxu0 %v2544_v61  ;;  %2620 = vmatpush1.msra.mxu1 %v6982_v51  ;;  %v2521_v61 = vld [vmem:[#allocation5 + $0x128] sm:$0xff]  ;;  %v2516_v51 = vld [vmem:[#allocation5 + $0x100] sm:$0xff] }
 0x825   :  { %2550 = vmatprep.subr.mxu0 %v2541_v23  ;;  %2621 = vmatprep.subr.mxu1 %v6983_v55  ;;  %v2520_v23 = vld [vmem:[#allocation5 + $0x120] sm:$0xff] }
 0x826   :  { %2551 = vmatpush1.msra.mxu0 %v2540_v13  ;;  %2622 = vmatpush1.msra.mxu1 %v6984_v11  ;;  %v2517_v13 = vld [vmem:[#allocation5 + $0x108] sm:$0xff]  ;;  %v2512_v55 = vld [vmem:[#allocation5 + $0xe0] sm:$0xff] }
 0x827   :  { %2552 = vmatprep.subr.mxu0 %v2537_v31  ;;  %2623 = vmatprep.subr.mxu1 %v6985_v7  ;;  %v2513_v31 = vld [vmem:[#allocation5 + $0xe8] sm:$0xff]  ;;  %v2716_v7 = vld [vmem:[#allocation6 + $0x18] sm:$0xff] }
 0x828   :  { %2553 = vmatpush1.msra.mxu0 %v2536_v1  ;;  %2624 = vmatpush1.msra.mxu1 %v6986_v15  ;;  %v2719_v1 = vld [vmem:[#allocation6 + $0x30] sm:$0xff]  ;;  %v2718_v11 = vld [vmem:[#allocation6 + $0x28] sm:$0xff] }
 0x829   :  { %2554 = vmatprep.subr.mxu0 %v2533_v59  ;;  %2625 = vmatprep.subr.mxu1 %v6987_v5  ;;  %v2717_v59 = vld [vmem:[#allocation6 + $0x20] sm:$0xff]  ;;  %v2714_v15 = vld [vmem:[#allocation6 + $0x8] sm:$0xff]  ;;  %v2866_v5 = vld [vmem:[#allocation3 + $0x1f8] sm:$0xff] }
 0x82a   :  { %2555 = vmatpush1.msra.mxu0 %v2532_v58  ;;  %2626 = vmatpush1.msra.mxu1 %v6988_v6  ;;  %v2715_v58 = vld [vmem:[#allocation6 + $0x10] sm:$0xff] }
 0x82b   :  { %2556 = vmatprep.subr.mxu0 %v2529_v25  ;;  %2627 = vmatprep.subr.mxu1 %v6989_v0  ;;  %v2713_v25 = vld [vmem:[#allocation6] sm:$0xff] }
 0x82c   :  { %2557 = vmatpush1.msra.mxu0 %v2528_v19  ;;  %2628 = vmatpush1.msra.mxu1 %v6990_v9 }
 0x82d   :  { %2558 = vmatprep.subr.mxu0 %v2525_v53  ;;  %2629 = vmatprep.subr.mxu1 %v7398_v42  ;;  %v2509_v42 = vld [vmem:[#allocation5 + $0xc8] sm:$0xff] }
 0x82e   :  { %2559 = vmatpush1.msra.mxu0 %v2524_v17  ;;  %2630 = vmatpush1.msra.mxu1 %v7400_v43  ;;  %v2508_v43 = vld [vmem:[#allocation5 + $0xc0] sm:$0xff]  ;;  %v8433_v17 = vld [vmem:[#allocation36_spill] sm:$0xff] }
 0x82f   :  { %2560 = vmatprep.subr.mxu0 %v2521_v61  ;;  %2631 = vmatprep.subr.mxu1 %v7402_v45  ;;  %v2505_v45 = vld [vmem:[#allocation5 + $0xa8] sm:$0xff] }
 0x830   :  { %2561 = vmatpush1.msra.mxu0 %v2520_v23  ;;  %2632 = vmatpush1.msra.mxu1 %v7405_v47  ;;  %v2504_v47 = vld [vmem:[#allocation5 + $0xa0] sm:$0xff] }
 0x831   :  { %2562 = vmatprep.subr.mxu0 %v2517_v13  ;;  %2633 = vmatprep.subr.mxu1 %v7408_v49  ;;  %v2501_v49 = vld [vmem:[#allocation5 + $0x88] sm:$0xff] }
 0x832   :  { %2563 = vmatpush1.msra.mxu0 %v2516_v51  ;;  %2634 = vmatpush1.msra.mxu1 %v7411_v52  ;;  %v2500_v52 = vld [vmem:[#allocation5 + $0x80] sm:$0xff] }
 0x833   :  { %2564 = vmatprep.subr.mxu0 %v2513_v31  ;;  %2635 = vmatprep.subr.mxu1 %v7414_v56  ;;  %v2497_v56 = vld [vmem:[#allocation5 + $0x68] sm:$0xff] }
 0x834   :  { %2565 = vmatpush1.msra.mxu0 %v2512_v55  ;;  %2636 = vmatpush1.msra.mxu1 %v7417_v60  ;;  %v2496_v60 = vld [vmem:[#allocation5 + $0x60] sm:$0xff] }
 0x835   :  { %2566 = vmatprep.subr.mxu0 %v2509_v42  ;;  %2637 = vmatprep.subr.mxu1 %v7420_v62  ;;  %v2493_v62 = vld [vmem:[#allocation5 + $0x48] sm:$0xff] }
 0x836   :  { %2567 = vmatpush1.msra.mxu0 %v2508_v43  ;;  %2638 = vmatpush1.msra.mxu1 %v7423_v63  ;;  %v2492_v63 = vld [vmem:[#allocation5 + $0x40] sm:$0xff] }
 0x837   :  { %2568 = vmatprep.subr.mxu0 %v2505_v45  ;;  %2639 = vmatprep.subr.mxu1 %v7426_v2  ;;  %v2489_v2 = vld [vmem:[#allocation5 + $0x28] sm:$0xff]  ;;  %v8435_v43 = vld [vmem:[#allocation37_spill] sm:$0xff] }
 0x838   :  { %2569 = vmatpush1.msra.mxu0 %v2504_v47  ;;  %2640 = vmatpush1.msra.mxu1 %v7429_v12  ;;  %v2488_v12 = vld [vmem:[#allocation5 + $0x20] sm:$0xff] }
 0x839   :  { %2570 = vmatprep.subr.mxu0 %v2501_v49  ;;  %2641 = vmatprep.subr.mxu1 %v7432_v57  ;;  %v2485_v57 = vld [vmem:[#allocation5 + $0x8] sm:$0xff] }
 0x83a   :  { %2571 = vmatpush1.msra.mxu0 %v2500_v52  ;;  %2642 = vmatpush1.msra.mxu1 %v7435_v16  ;;  %v2484_v16 = vld [vmem:[#allocation5] sm:$0xff]  ;;  %v8436_v49 = vld [vmem:[#allocation39_spill] sm:$0xff] }
 0x83b   :  { %2572 = vmatprep.subr.mxu0 %v2497_v56  ;;  %2643 = vmatprep.subr.mxu1 %v7438_v20  ;;  %v8417_v20 = vld [vmem:[#allocation40_spill] sm:$0xff]  ;;  %v8434_v51 = vld [vmem:[#allocation38_spill] sm:$0xff] }
 0x83c   :  { %2573 = vmatpush1.msra.mxu0 %v2496_v60  ;;  %2644 = vmatpush1.msra.mxu1 %v7441_v24  ;;  %v8418_v24 = vld [vmem:[#allocation41_spill] sm:$0xff] }
 0x83d   :  { %2574 = vmatprep.subr.mxu0 %v2493_v62  ;;  %2645 = vmatprep.subr.mxu1 %v7444_v26  ;;  %v8419_v26 = vld [vmem:[#allocation42_spill] sm:$0xff] }
 0x83e   :  { %2575 = vmatpush1.msra.mxu0 %v2492_v63  ;;  %2646 = vmatpush1.msra.mxu1 %v7447_v29  ;;  %v8420_v29 = vld [vmem:[#allocation43_spill] sm:$0xff] }
 0x83f   :  { %2576 = vmatprep.subr.mxu0 %v2489_v2  ;;  %2647 = vmatprep.subr.mxu1 %v7450_v32  ;;  %v8421_v32 = vld [vmem:[#allocation44_spill] sm:$0xff] }
 0x840   :  { %2577 = vmatpush1.msra.mxu0 %v2488_v12  ;;  %2648 = vmatpush1.msra.mxu1 %v7453_v34  ;;  %v8422_v34 = vld [vmem:[#allocation45_spill] sm:$0xff] }
 0x841   :  { %2578 = vmatprep.subr.mxu0 %v2485_v57  ;;  %2649 = vmatprep.subr.mxu1 %v7456_v35  ;;  %v8423_v35 = vld [vmem:[#allocation46_spill] sm:$0xff] }
 0x842   :  { %2579 = vmatpush1.msra.mxu0 %v2484_v16  ;;  %2612 = vmatprep.mubr.f32.mxu0 %v8416_v8 }
 0x843   :  { %2650 = vmatpush1.msra.mxu1 %v7459_v38  ;;  %2683 = vmatprep.mubr.f32.mxu1 %v8416_v8  ;;  %v8424_v38 = vld [vmem:[#allocation47_spill] sm:$0xff] }
 0x844   :  { %2613 = vmatmul.mubr.f32.vlgmr.msra.gmra.mxu0 %v7591_v3  ;;  %2684 = vmatmul.mubr.f32.vlgmr.msra.gmra.mxu1 %v7591_v3  ;;  %v2720_v3 = vld [vmem:[#allocation6 + $0x38] sm:$0xff] }
 0x845   :  { %2867 = vmatprep.subr.mxu1 %v7484_v54  ;;  %2931 = vmatprep.mubr.f32.mxu1 %v8416_v8  ;;  %v8425_v54 = vld [vmem:[#allocation48_spill] sm:$0xff] }
 0x846   :  { %2868 = vmatpush1.msra.mxu1 %v7486_v18  ;;  %6603 = vmatprep.subr.mxu0 %v8416_v8  ;;  %v8426_v18 = vld [vmem:[#allocation49_spill] sm:$0xff] }
 0x847   :  { %2869 = vmatprep.subr.mxu1 %v7490_v21  ;;  %6635 = vmatprep.mubr.msk.f32.mxu0 %vm7176_vm0, %v8416_v8  ;;  %v8427_v21 = vld [vmem:[#allocation50_spill] sm:$0xff] }
 0x848   :  { %2870 = vmatpush1.msra.mxu1 %v7494_v28  ;;  %v8428_v28 = vld [vmem:[#allocation51_spill] sm:$0xff] }
 0x849   :  { %2871 = vmatprep.subr.mxu1 %v7497_v30  ;;  %v8429_v30 = vld [vmem:[#allocation52_spill] sm:$0xff] }
 0x84a   :  { %2872 = vmatpush1.msra.mxu1 %v7500_v33  ;;  %v8430_v33 = vld [vmem:[#allocation53_spill] sm:$0xff] }
 0x84b   :  { %2873 = vmatprep.subr.mxu1 %v7503_v39  ;;  %v8431_v39 = vld [vmem:[#allocation54_spill] sm:$0xff] }
 0x84c   :  { %2874 = vmatpush1.msra.mxu1 %v7506_v40  ;;  %v8432_v40 = vld [vmem:[#allocation55_spill] sm:$0xff] }
 0x84d   :  { %2875 = vmatprep.subr.mxu1 %v7509_v41  ;;  %v2728_v41 = vld [vmem:[#allocation6 + $0x78] sm:$0xff] }
 0x84e   :  { %2876 = vmatpush1.msra.mxu1 %v7512_v4  ;;  %6604 = vmatpush3.msra.mxu0 %v2728_v41  ;;  %v2727_v4 = vld [vmem:[#allocation6 + $0x70] sm:$0xff] }
 0x84f   :  { %2877 = vmatprep.subr.mxu1 %v7515_v14  ;;  %6605 = vmatprep.subr.mxu0 %v8416_v8  ;;  %v2726_v14 = vld [vmem:[#allocation6 + $0x68] sm:$0xff]  ;;  %v2849_v41 = vld [vmem:[#allocation3 + $0x170] sm:$0xff] }
 0x850   :  { %2878 = vmatpush1.msra.mxu1 %v7518_v44  ;;  %6606 = vmatpush3.msra.mxu0 %v2727_v4  ;;  %v2725_v44 = vld [vmem:[#allocation6 + $0x60] sm:$0xff]  ;;  %v2846_v4 = vld [vmem:[#allocation3 + $0x158] sm:$0xff] }
 0x851   :  { %2879 = vmatprep.subr.mxu1 %v7521_v46  ;;  %6607 = vmatprep.subr.mxu0 %v8416_v8  ;;  %v2724_v46 = vld [vmem:[#allocation6 + $0x58] sm:$0xff] }
 0x852   :  { %2880 = vmatpush1.msra.mxu1 %v7524_v48  ;;  %6608 = vmatpush3.msra.mxu0 %v2726_v14  ;;  %v2723_v48 = vld [vmem:[#allocation6 + $0x50] sm:$0xff] }
 0x853   :  { %2881 = vmatprep.subr.mxu1 %v7527_v50  ;;  %6609 = vmatprep.subr.mxu0 %v8416_v8  ;;  %v2722_v50 = vld [vmem:[#allocation6 + $0x48] sm:$0xff]  ;;  %v2845_v14 = vld [vmem:[#allocation3 + $0x150] sm:$0xff] }
 0x854   :  { %2882 = vmatpush1.msra.mxu1 %v7530_v37  ;;  %6610 = vmatpush3.msra.mxu0 %v2725_v44  ;;  %v2721_v37 = vld [vmem:[#allocation6 + $0x40] sm:$0xff]  ;;  %v2842_v44 = vld [vmem:[#allocation3 + $0x138] sm:$0xff] }
 0x855   :  { %2883 = vmatprep.subr.mxu1 %v8417_v20  ;;  %6611 = vmatprep.subr.mxu0 %v8416_v8 }
 0x856   :  { %2884 = vmatpush1.msra.mxu1 %v8418_v24  ;;  %6612 = vmatpush3.msra.mxu0 %v2724_v46  ;;  %v2841_v46 = vld [vmem:[#allocation3 + $0x130] sm:$0xff] }
 0x857   :  { %2885 = vmatprep.subr.mxu1 %v8419_v26  ;;  %6613 = vmatprep.subr.mxu0 %v8416_v8 }
 0x858   :  { %2886 = vmatpush1.msra.mxu1 %v8420_v29  ;;  %6614 = vmatpush3.msra.mxu0 %v2723_v48  ;;  %v2838_v48 = vld [vmem:[#allocation3 + $0x118] sm:$0xff] }
 0x859   :  { %2887 = vmatprep.subr.mxu1 %v8421_v32  ;;  %6615 = vmatprep.subr.mxu0 %v8416_v8 }
 0x85a   :  { %2888 = vmatpush1.msra.mxu1 %v8422_v34  ;;  %6616 = vmatpush3.msra.mxu0 %v2722_v50  ;;  %v2837_v50 = vld [vmem:[#allocation3 + $0x110] sm:$0xff] }
 0x85b   :  { %2889 = vmatprep.subr.mxu1 %v8423_v35  ;;  %6617 = vmatprep.subr.mxu0 %v8416_v8 }
 0x85c   :  { %2890 = vmatpush1.msra.mxu1 %v8424_v38  ;;  %6618 = vmatpush3.msra.mxu0 %v2721_v37  ;;  %v2834_v37 = vld [vmem:[#allocation3 + $0xf8] sm:$0xff] }
 0x85d   :  { %2891 = vmatprep.subr.mxu1 %v8425_v54  ;;  %6619 = vmatprep.subr.mxu0 %v8416_v8 }
 0x85e   :  { %2892 = vmatpush1.msra.mxu1 %v8426_v18  ;;  %6620 = vmatpush3.msra.mxu0 %v2720_v3  ;;  %v2865_v18 = vld [vmem:[#allocation3 + $0x1f0] sm:$0xff] }
 0x85f   :  { %2893 = vmatprep.subr.mxu1 %v8427_v21  ;;  %6621 = vmatprep.subr.mxu0 %v8416_v8  ;;  %v2862_v21 = vld [vmem:[#allocation3 + $0x1d8] sm:$0xff]  ;;  %v2833_v3 = vld [vmem:[#allocation3 + $0xf0] sm:$0xff] }
 0x860   :  { %2894 = vmatpush1.msra.mxu1 %v8428_v28  ;;  %6622 = vmatpush3.msra.mxu0 %v2719_v1  ;;  %v2861_v28 = vld [vmem:[#allocation3 + $0x1d0] sm:$0xff]  ;;  %v2830_v1 = vld [vmem:[#allocation3 + $0xd8] sm:$0xff] }
 0x861   :  { %2895 = vmatprep.subr.mxu1 %v8429_v30  ;;  %6623 = vmatprep.subr.mxu0 %v8416_v8  ;;  %v2858_v30 = vld [vmem:[#allocation3 + $0x1b8] sm:$0xff] }
 0x862   :  { %2896 = vmatpush1.msra.mxu1 %v8430_v33  ;;  %6624 = vmatpush3.msra.mxu0 %v2718_v11  ;;  %v2854_v33 = vld [vmem:[#allocation3 + $0x198] sm:$0xff]  ;;  %v2829_v11 = vld [vmem:[#allocation3 + $0xd0] sm:$0xff] }
 0x863   :  { %2897 = vmatprep.subr.mxu1 %v8431_v39  ;;  %6625 = vmatprep.subr.mxu0 %v8416_v8  ;;  %v2853_v39 = vld [vmem:[#allocation3 + $0x190] sm:$0xff] }
 0x864   :  { %2898 = vmatpush1.msra.mxu1 %v8432_v40  ;;  %6626 = vmatpush3.msra.mxu0 %v2717_v59  ;;  %v2850_v40 = vld [vmem:[#allocation3 + $0x178] sm:$0xff] }
 0x865   :  { %2932 = vmatmul.mubr.f32.vlgmr.msra.gmra.mxu1 %v7609_v36  ;;  %6627 = vmatprep.subr.mxu0 %v8416_v8  ;;  %v2826_v59 = vld [vmem:[#allocation3 + $0xb8] sm:$0xff] }
 0x866   :  { %3214 = vmatprep.mubr.f32.mxu1 %v8416_v8  ;;  %6628 = vmatpush3.msra.mxu0 %v2716_v7  ;;  %v2825_v7 = vld [vmem:[#allocation3 + $0xb0] sm:$0xff] }
 0x867   :  { %6629 = vmatprep.subr.mxu0 %v8416_v8 }
 0x868   :  { %6630 = vmatpush3.msra.mxu0 %v2715_v58  ;;  %v2822_v58 = vld [vmem:[#allocation3 + $0x98] sm:$0xff] }
 0x869   :  { %6631 = vmatprep.subr.mxu0 %v8416_v8 }
 0x86a   :  { %6632 = vmatpush3.msra.mxu0 %v2714_v15  ;;  %v2821_v15 = vld [vmem:[#allocation3 + $0x90] sm:$0xff] }
 0x86b   :  { %6633 = vmatprep.subr.mxu0 %v8416_v8 }
 0x86c   :  { %6634 = vmatpush3.msra.mxu0 %v2713_v25  ;;  %v2818_v25 = vld [vmem:[#allocation3 + $0x78] sm:$0xff] }
 0x86d   :  { %2938 = vmatprep.subr.mxu0 %v2866_v5  ;;  %v2817_v5 = vld [vmem:[#allocation3 + $0x70] sm:$0xff] }
 0x8e3   :  { %v7692_v19 = vpop.f32.mrf.mxu0  ;;  %v7694_v6 = vpop.f32.mrf.mxu1 }
 0x8e5   :  { %v7696_v53 = vpop.f32.mrf.mxu0  ;;  %v7699_v61 = vpop.f32.mrf.mxu1 }
 0x904   :  { %v2614_v0 = vpop.f32.mrf.mxu0  ;;  %v2685_v55 = vpop.f32.mrf.mxu1 }
 0x905   :  { %v2690_v9 = vadd.f32 %v2614_v0, %v8433_v17  ;;  %v2692_v45 = vadd.f32 %v2685_v55, %v8435_v43  ;;  %v2814_v0 = vld [vmem:[#allocation3 + $0x58] sm:$0xff]  ;;  %v2813_v17 = vld [vmem:[#allocation3 + $0x50] sm:$0xff] }
 0x906   :  { %v2616_v23 = vpop.f32.mrf.mxu0  ;;  %v2687_v47 = vpop.f32.mrf.mxu1  ;;  %v3127_v55 = vld [vmem:[#allocation4 + $0x1f8] sm:$0xff]  ;;  %v3126_v43 = vld [vmem:[#allocation4 + $0x1f0] sm:$0xff] }
 0x907   :  { %v2694_v13 = vmul.f32 0.5, %v2690_v9  ;;  %v2691_v31 = vadd.f32 %v2616_v23, %v8434_v51  ;;  %v2693_v52 = vadd.f32 %v2687_v47, %v8436_v49  ;;  %v2810_v9 = vld [vmem:[#allocation3 + $0x38] sm:$0xff]  ;;  %v2809_v23 = vld [vmem:[#allocation3 + $0x30] sm:$0xff]  ;;  %v3120_v49 = vld [vmem:[#allocation4 + $0x1c0] sm:$0xff] }
 0x908   :  { %v2805_v51 = vld [vmem:[#allocation3 + $0x10] sm:$0xff]  ;;  %v3123_v47 = vld [vmem:[#allocation4 + $0x1d8] sm:$0xff] }
 0x909   :  { %6882 = vtanh.f32 %v2694_v13  ;;  %v2698_v42 = vmul.f32 0.5, %v2691_v31  ;;  %v2703_v56 = vmul.f32 0.5, %v2693_v52  ;;  %v2806_v13 = vld [vmem:[#allocation3 + $0x18] sm:$0xff]  ;;  %v3125_v31 = vld [vmem:[#allocation4 + $0x1e8] sm:$0xff]  ;;  %v3122_v52 = vld [vmem:[#allocation4 + $0x1d0] sm:$0xff] }
 0x90a   :  { %3150 = vmatprep.subr.mxu1 %v3125_v31  ;;  %v3074_v31 = vld [vmem:[#allocation4 + $0x50] sm:$0xff] }
 0x90b   :  { %6884 = vtanh.f32 %v2698_v42  ;;  %v3124_v42 = vld [vmem:[#allocation4 + $0x1e0] sm:$0xff] }
 0x90c   :  { %6886 = vtanh.f32 %v2692_v45  ;;  %3151 = vmatpush1.msra.mxu1 %v3124_v42  ;;  %v3121_v45 = vld [vmem:[#allocation4 + $0x1c8] sm:$0xff]  ;;  %v3071_v42 = vld [vmem:[#allocation4 + $0x38] sm:$0xff] }
 0x90d   :  { %6888 = vtanh.f32 %v2703_v56  ;;  %3152 = vmatprep.subr.mxu1 %v3121_v45  ;;  %v3117_v56 = vld [vmem:[#allocation4 + $0x1a8] sm:$0xff]  ;;  %v3070_v45 = vld [vmem:[#allocation4 + $0x30] sm:$0xff] }
 0x90e   :  { %3153 = vmatpush1.msra.mxu1 %v3120_v49  ;;  %v3067_v49 = vld [vmem:[#allocation4 + $0x18] sm:$0xff] }
 0x90f   :  { %3154 = vmatprep.subr.mxu1 %v3117_v56  ;;  %v3066_v56 = vld [vmem:[#allocation4 + $0x10] sm:$0xff] }
 0x916   :  { %v6883_v60 = vpop.eup %6882 }
 0x917   :  { %v2696_v62 = vmul.f32 0.5, %v6883_v60  ;;  %v3116_v60 = vld [vmem:[#allocation4 + $0x1a0] sm:$0xff] }
 0x918   :  { %v6885_v63 = vpop.eup %6884  ;;  %3155 = vmatpush1.msra.mxu1 %v3116_v60  ;;  %v3355_v60 = vld [vmem:[#allocation5 + $0x1f8] sm:$0xff] }
 0x919   :  { %v2697_v2 = vadd.f32 0.5, %v2696_v62  ;;  %v2700_v12 = vmul.f32 0.5, %v6885_v63  ;;  %v6887_v16 = vpop.eup %6886  ;;  %v3118_v62 = vld [vmem:[#allocation4 + $0x1b0] sm:$0xff]  ;;  %v3113_v63 = vld [vmem:[#allocation4 + $0x188] sm:$0xff] }
 0x91a   :  { %v6889_v29 = vpop.eup %6888  ;;  %3156 = vmatprep.subr.mxu1 %v3113_v63 }
 0x91b   :  { %v2701_v57 = vadd.f32 0.5, %v2700_v12  ;;  %v2708_v24 = vmul.f32 %v6887_v16, %v2697_v2  ;;  %v2705_v32 = vmul.f32 0.5, %v6889_v29  ;;  %v3115_v2 = vld [vmem:[#allocation4 + $0x198] sm:$0xff]  ;;  %v3112_v12 = vld [vmem:[#allocation4 + $0x180] sm:$0xff]  ;;  %v3109_v16 = vld [vmem:[#allocation4 + $0x168] sm:$0xff] }
 0x91c   :  { %3157 = vmatpush1.msra.mxu1 %v3112_v12  ;;  %v3110_v29 = vld [vmem:[#allocation4 + $0x170] sm:$0xff] }
 0x91d   :  { %v2707_v20 = vmul.f32 %v2701_v57, %v7588_v10  ;;  %v2706_v34 = vadd.f32 0.5, %v2705_v32  ;;  %v2857_v10 = vld [vmem:[#allocation3 + $0x1b0] sm:$0xff]  ;;  %3158 = vmatprep.subr.mxu1 %v3109_v16  ;;  %v3105_v32 = vld [vmem:[#allocation4 + $0x148] sm:$0xff] }
 0x91e   :  { %v3114_v57 = vld [vmem:[#allocation4 + $0x190] sm:$0xff] }
 0x91f   :  { %v7705_v26 = vadd.f32 %v2708_v24, %v2707_v20  ;;  %v3111_v20 = vld [vmem:[#allocation4 + $0x178] sm:$0xff]  ;;  %v3108_v24 = vld [vmem:[#allocation4 + $0x160] sm:$0xff] }
 0x920   :  { %3159 = vmatpush1.msra.mxu1 %v3108_v24 }
 0x921   :  { %6890 = vtanh.f32 %v7705_v26  ;;  %3160 = vmatprep.subr.mxu1 %v3105_v32 }
 0x92e   :  { %v6891_v35 = vpop.eup %6890 }
 0x92f   :  { %v7708_v38 = vmul.f32 %v6891_v35, %v2706_v34  ;;  %v3107_v34 = vld [vmem:[#allocation4 + $0x158] sm:$0xff]  ;;  %v3104_v35 = vld [vmem:[#allocation4 + $0x140] sm:$0xff] }
 0x930   :  { %3161 = vmatpush1.msra.mxu1 %v3104_v35 }
 0x931   :  { %v2712_v54 = vmax.f32 %v7708_v38, 0.0 }
 0x933   :  { %6636 = vmatmul.mubr.f32.vlgmr.msra.gmra.mxu0 %v2712_v54  ;;  %v3106_v54 = vld [vmem:[#allocation4 + $0x150] sm:$0xff] }
 0x934   :  { %2939 = vmatpush1.msra.mxu0 %v2865_v18  ;;  %3002 = vmatprep.mubr.f32.mxu0 %v8416_v8  ;;  %v3101_v18 = vld [vmem:[#allocation4 + $0x128] sm:$0xff] }
 0x935   :  { %2940 = vmatprep.subr.mxu0 %v2862_v21  ;;  %v3103_v21 = vld [vmem:[#allocation4 + $0x138] sm:$0xff]  ;;  %3162 = vmatprep.subr.mxu1 %v3101_v18 }
 0x936   :  { %2941 = vmatpush1.msra.mxu0 %v2861_v28  ;;  %v3100_v28 = vld [vmem:[#allocation4 + $0x120] sm:$0xff] }
 0x937   :  { %2942 = vmatprep.subr.mxu0 %v2858_v30  ;;  %v3102_v30 = vld [vmem:[#allocation4 + $0x130] sm:$0xff]  ;;  %3163 = vmatpush1.msra.mxu1 %v3100_v28 }
 0x938   :  { %2943 = vmatpush1.msra.mxu0 %v2857_v10  ;;  %v3097_v10 = vld [vmem:[#allocation4 + $0x108] sm:$0xff] }
 0x939   :  { %2944 = vmatprep.subr.mxu0 %v2854_v33  ;;  %v3099_v33 = vld [vmem:[#allocation4 + $0x118] sm:$0xff]  ;;  %3164 = vmatprep.subr.mxu1 %v3097_v10 }
 0x93a   :  { %2945 = vmatpush1.msra.mxu0 %v2853_v39  ;;  %v3096_v39 = vld [vmem:[#allocation4 + $0x100] sm:$0xff] }
 0x93b   :  { %2946 = vmatprep.subr.mxu0 %v2850_v40  ;;  %v3098_v40 = vld [vmem:[#allocation4 + $0x110] sm:$0xff]  ;;  %3165 = vmatpush1.msra.mxu1 %v3096_v39 }
 0x93c   :  { %2947 = vmatpush1.msra.mxu0 %v2849_v41  ;;  %v3093_v41 = vld [vmem:[#allocation4 + $0xe8] sm:$0xff] }
 0x93d   :  { %2948 = vmatprep.subr.mxu0 %v2846_v4  ;;  %v3095_v4 = vld [vmem:[#allocation4 + $0xf8] sm:$0xff]  ;;  %3166 = vmatprep.subr.mxu1 %v3093_v41 }
 0x93e   :  { %2949 = vmatpush1.msra.mxu0 %v2845_v14  ;;  %v3092_v14 = vld [vmem:[#allocation4 + $0xe0] sm:$0xff] }
 0x93f   :  { %2950 = vmatprep.subr.mxu0 %v2842_v44  ;;  %v3094_v44 = vld [vmem:[#allocation4 + $0xf0] sm:$0xff]  ;;  %3167 = vmatpush1.msra.mxu1 %v3092_v14 }
 0x940   :  { %2951 = vmatpush1.msra.mxu0 %v2841_v46  ;;  %v3089_v46 = vld [vmem:[#allocation4 + $0xc8] sm:$0xff] }
 0x941   :  { %2952 = vmatprep.subr.mxu0 %v2838_v48  ;;  %v3091_v48 = vld [vmem:[#allocation4 + $0xd8] sm:$0xff]  ;;  %3168 = vmatprep.subr.mxu1 %v3089_v46 }
 0x942   :  { %2953 = vmatpush1.msra.mxu0 %v2837_v50  ;;  %v3088_v50 = vld [vmem:[#allocation4 + $0xc0] sm:$0xff] }
 0x943   :  { %2954 = vmatprep.subr.mxu0 %v2834_v37  ;;  %v3090_v37 = vld [vmem:[#allocation4 + $0xd0] sm:$0xff]  ;;  %3169 = vmatpush1.msra.mxu1 %v3088_v50 }
 0x944   :  { %2955 = vmatpush1.msra.mxu0 %v2833_v3  ;;  %v3085_v3 = vld [vmem:[#allocation4 + $0xa8] sm:$0xff] }
 0x945   :  { %2956 = vmatprep.subr.mxu0 %v2830_v1  ;;  %v3087_v1 = vld [vmem:[#allocation4 + $0xb8] sm:$0xff]  ;;  %3170 = vmatprep.subr.mxu1 %v3085_v3 }
 0x946   :  { %2957 = vmatpush1.msra.mxu0 %v2829_v11  ;;  %v3084_v11 = vld [vmem:[#allocation4 + $0xa0] sm:$0xff] }
 0x947   :  { %2958 = vmatprep.subr.mxu0 %v2826_v59  ;;  %v3086_v59 = vld [vmem:[#allocation4 + $0xb0] sm:$0xff]  ;;  %3171 = vmatpush1.msra.mxu1 %v3084_v11 }
 0x948   :  { %2959 = vmatpush1.msra.mxu0 %v2825_v7  ;;  %v3081_v7 = vld [vmem:[#allocation4 + $0x88] sm:$0xff] }
 0x949   :  { %2960 = vmatprep.subr.mxu0 %v2822_v58  ;;  %v3083_v58 = vld [vmem:[#allocation4 + $0x98] sm:$0xff]  ;;  %3172 = vmatprep.subr.mxu1 %v3081_v7 }
 0x94a   :  { %2961 = vmatpush1.msra.mxu0 %v2821_v15  ;;  %v3080_v15 = vld [vmem:[#allocation4 + $0x80] sm:$0xff] }
 0x94b   :  { %2962 = vmatprep.subr.mxu0 %v2818_v25  ;;  %v3082_v25 = vld [vmem:[#allocation4 + $0x90] sm:$0xff]  ;;  %3173 = vmatpush1.msra.mxu1 %v3080_v15 }
 0x94c   :  { %2963 = vmatpush1.msra.mxu0 %v2817_v5  ;;  %v3077_v5 = vld [vmem:[#allocation4 + $0x68] sm:$0xff] }
 0x94d   :  { %2964 = vmatprep.subr.mxu0 %v2814_v0  ;;  %v3079_v0 = vld [vmem:[#allocation4 + $0x78] sm:$0xff]  ;;  %3174 = vmatprep.subr.mxu1 %v3077_v5  ;;  %v3352_v5 = vld [vmem:[#allocation5 + $0x1e0] sm:$0xff] }
 0x94e   :  { %2965 = vmatpush1.msra.mxu0 %v2813_v17  ;;  %v3076_v17 = vld [vmem:[#allocation4 + $0x60] sm:$0xff] }
 0x94f   :  { %2966 = vmatprep.subr.mxu0 %v2810_v9  ;;  %v3078_v9 = vld [vmem:[#allocation4 + $0x70] sm:$0xff]  ;;  %3175 = vmatpush1.msra.mxu1 %v3076_v17  ;;  %v3349_v17 = vld [vmem:[#allocation5 + $0x1c8] sm:$0xff] }
 0x950   :  { %2967 = vmatpush1.msra.mxu0 %v2809_v23  ;;  %v3073_v23 = vld [vmem:[#allocation4 + $0x48] sm:$0xff] }
 0x951   :  { %2968 = vmatprep.subr.mxu0 %v2806_v13  ;;  %v3075_v13 = vld [vmem:[#allocation4 + $0x58] sm:$0xff]  ;;  %3176 = vmatprep.subr.mxu1 %v3073_v23  ;;  %v3350_v23 = vld [vmem:[#allocation5 + $0x1d0] sm:$0xff] }
 0x952   :  { %2969 = vmatpush1.msra.mxu0 %v2805_v51  ;;  %v3072_v51 = vld [vmem:[#allocation4 + $0x40] sm:$0xff] }
 0x953   :  { %3003 = vmatmul.mubr.f32.vlgmr.msra.gmra.mxu0 %v7609_v36  ;;  %3221 = vmatprep.subr.mxu0 %v3127_v55  ;;  %v3119_v36 = vld [vmem:[#allocation4 + $0x1b8] sm:$0xff]  ;;  %v3069_v55 = vld [vmem:[#allocation4 + $0x28] sm:$0xff] }
 0x954   :  { %3285 = vmatprep.mubr.f32.mxu0 %v8416_v8  ;;  %3222 = vmatpush1.msra.mxu0 %v3126_v43  ;;  %v3068_v43 = vld [vmem:[#allocation4 + $0x20] sm:$0xff] }
 0x955   :  { %3223 = vmatprep.subr.mxu0 %v3123_v47  ;;  %3177 = vmatpush1.msra.mxu1 %v3072_v51  ;;  %v3065_v47 = vld [vmem:[#allocation4 + $0x8] sm:$0xff]  ;;  %v3347_v51 = vld [vmem:[#allocation5 + $0x1b8] sm:$0xff] }
 0x956   :  { %3224 = vmatpush1.msra.mxu0 %v3122_v52  ;;  %3178 = vmatprep.subr.mxu1 %v3069_v55  ;;  %v3064_v52 = vld [vmem:[#allocation4] sm:$0xff]  ;;  %v3346_v55 = vld [vmem:[#allocation5 + $0x1b0] sm:$0xff] }
 0x957   :  { %3225 = vmatprep.subr.mxu0 %v3119_v36  ;;  %3179 = vmatpush1.msra.mxu1 %v3068_v43  ;;  %v3353_v36 = vld [vmem:[#allocation5 + $0x1e8] sm:$0xff]  ;;  %v3343_v43 = vld [vmem:[#allocation5 + $0x198] sm:$0xff] }
 0x958   :  { %3226 = vmatpush1.msra.mxu0 %v3118_v62  ;;  %3180 = vmatprep.subr.mxu1 %v3065_v47  ;;  %v2729_v62 = vld [vmem:[%s8339_s8] sm:$0x1]  ;;  %v2802_v18 = vld [vmem:[#allocation2 + $0x4] ss:$8 sm:$0xf] }
 0x959   :  { %3227 = vmatprep.subr.mxu0 %v3115_v2  ;;  %3181 = vmatpush1.msra.mxu1 %v3064_v52  ;;  %v3342_v47 = vld [vmem:[#allocation5 + $0x190] sm:$0xff]  ;;  %v3339_v52 = vld [vmem:[#allocation5 + $0x178] sm:$0xff] }
 0x95a   :  { %3228 = vmatpush1.msra.mxu0 %v3114_v57  ;;  %3356 = vmatprep.subr.mxu1 %v3353_v36  ;;  %v2933_v57 = vpop.f32.mrf.mxu1  ;;  %v3338_v36 = vld [vmem:[#allocation5 + $0x170] sm:$0xff] }
 0x95b   :  { %3229 = vmatprep.subr.mxu0 %v3111_v20 }
 0x95c   :  { %3230 = vmatpush1.msra.mxu0 %v3110_v29  ;;  %v2935_v16 = vpop.f32.mrf.mxu1 }
 0x95d   :  { %3231 = vmatprep.subr.mxu0 %v3107_v34  ;;  %v3013_v24 = vcombine.low %v2933_v57, %v2935_v16  ;;  %v3331_v57 = vld [vmem:[#allocation5 + $0x138] sm:$0xff]  ;;  %v3328_v16 = vld [vmem:[#allocation5 + $0x120] sm:$0xff] }
 0x95e   :  { %3232 = vmatpush1.msra.mxu0 %v3106_v54 }
 0x95f   :  { %3233 = vmatprep.subr.mxu0 %v3103_v21  ;;  %v3021_v34 = vrot.slane %v3013_v24, %v7299_v27  ;;  %v3325_v24 = vld [vmem:[#allocation5 + $0x108] sm:$0xff] }
 0x960   :  { %3234 = vmatpush1.msra.mxu0 %v3102_v30 }
 0x961   :  { %3235 = vmatprep.subr.mxu0 %v3099_v33 }
 0x962   :  { %3236 = vmatpush1.msra.mxu0 %v3098_v40 }
 0x963   :  { %3237 = vmatprep.subr.mxu0 %v3095_v4 }
 0x964   :  { %3238 = vmatpush1.msra.mxu0 %v3094_v44 }
 0x965   :  { %3239 = vmatprep.subr.mxu0 %v3091_v48 }
 0x966   :  { %3240 = vmatpush1.msra.mxu0 %v3090_v37 }
 0x967   :  { %3241 = vmatprep.subr.mxu0 %v3087_v1 }
 0x968   :  { %3242 = vmatpush1.msra.mxu0 %v3086_v59 }
 0x969   :  { %3243 = vmatprep.subr.mxu0 %v3083_v58 }
 0x96a   :  { %3244 = vmatpush1.msra.mxu0 %v3082_v25 }
 0x96b   :  { %3245 = vmatprep.subr.mxu0 %v3079_v0  ;;  %v3354_v0 = vld [vmem:[#allocation5 + $0x1f0] sm:$0xff] }
 0x96c   :  { %3246 = vmatpush1.msra.mxu0 %v3078_v9  ;;  %v3351_v9 = vld [vmem:[#allocation5 + $0x1d8] sm:$0xff] }
 0x96d   :  { %3247 = vmatprep.subr.mxu0 %v3075_v13  ;;  %v3345_v13 = vld [vmem:[#allocation5 + $0x1a8] sm:$0xff] }
 0x96e   :  { %3248 = vmatpush1.msra.mxu0 %v3074_v31  ;;  %v3344_v31 = vld [vmem:[#allocation5 + $0x1a0] sm:$0xff] }
 0x96f   :  { %3249 = vmatprep.subr.mxu0 %v3071_v42  ;;  %v3341_v42 = vld [vmem:[#allocation5 + $0x188] sm:$0xff] }
 0x970   :  { %3250 = vmatpush1.msra.mxu0 %v3070_v45  ;;  %v3340_v45 = vld [vmem:[#allocation5 + $0x180] sm:$0xff] }
 0x971   :  { %3251 = vmatprep.subr.mxu0 %v3067_v49  ;;  %v3337_v49 = vld [vmem:[#allocation5 + $0x168] sm:$0xff] }
 0x972   :  { %3252 = vmatpush1.msra.mxu0 %v3066_v56  ;;  %v3336_v56 = vld [vmem:[#allocation5 + $0x160] sm:$0xff] }
 0x973   :  { %3427 = vmatprep.subr.mxu0 %v3355_v60  ;;  %v3333_v60 = vld [vmem:[#allocation5 + $0x148] sm:$0xff] }
 0x9f3   :  { %v2796_v63 = vpop.f32.mrf.mxu0 }
 0x9f4   :  { %v2797_v2 = vadd.f32 %v2796_v63, %v2729_v62  ;;  %v3335_v62 = vld [vmem:[#allocation5 + $0x158] sm:$0xff]  ;;  %v3332_v63 = vld [vmem:[#allocation5 + $0x140] sm:$0xff] }
 0x9f5   :  { %v6637_v12 = vpop.f32.mrf.mxu0 }
 0x9f6   :  { %2800 = vst [vmem:[#allocation14 + $0x2] sm:$0x1] %v2797_v2  ;;  %v3334_v2 = vld [vmem:[#allocation5 + $0x150] sm:$0xff]  ;;  %v3329_v12 = vld [vmem:[#allocation5 + $0x128] sm:$0xff] }
 0xa13   :  { %v3004_v20 = vpop.f32.mrf.mxu0 }
 0xa15   :  { %v3006_v29 = vpop.f32.mrf.mxu0 }
 0xa16   :  { %v3014_v32 = vcombine.low %v3004_v20, %v3006_v29  ;;  %v3330_v20 = vld [vmem:[#allocation5 + $0x130] sm:$0xff]  ;;  %v3327_v29 = vld [vmem:[#allocation5 + $0x118] sm:$0xff] }
 0xa18   :  { %v3028_v35 = vrot.slane %v3014_v32, %v7299_v27  ;;  %v3324_v32 = vld [vmem:[#allocation5 + $0x100] sm:$0xff] }
 0xa1a   :  { %v3029_v54 = vcombine.low %v3021_v34, %v3028_v35  ;;  %v3326_v34 = vld [vmem:[#allocation5 + $0x110] sm:$0xff]  ;;  %v3321_v35 = vld [vmem:[#allocation5 + $0xe8] sm:$0xff] }
 0xa1c   :  { %v3036_v21 = vrot.slane %v3029_v54, %v7299_v27  ;;  %v3323_v54 = vld [vmem:[#allocation5 + $0xf8] sm:$0xff] }
 0xa1e   :  { %v3038_v28 = vadd.f32 %v3036_v21, %v2802_v18  ;;  %v3320_v18 = vld [vmem:[#allocation5 + $0xe0] sm:$0xff]  ;;  %v3322_v21 = vld [vmem:[#allocation5 + $0xf0] sm:$0xff] }
 0xa20   :  { %v3039_v30 = vmul.f32 0.5, %v3038_v28  ;;  %v3044_v10 = vrot.slane %v3038_v28, 1  ;;  %v3050_v39 = vrot.slane %v3038_v28, 2  ;;  %v3053_v40 = vrot.slane %v3038_v28, 3  ;;  %v3317_v28 = vld [vmem:[#allocation5 + $0xc8] sm:$0xff] }
 0xa22   :  { %6892 = vtanh.f32 %v3039_v30  ;;  %v3046_v33 = vmul.f32 0.5, %v3044_v10  ;;  %v3055_v41 = vmul.f32 0.5, %v3053_v40  ;;  %v3319_v30 = vld [vmem:[#allocation5 + $0xd8] sm:$0xff]  ;;  %v3316_v10 = vld [vmem:[#allocation5 + $0xc0] sm:$0xff] }
 0xa23   :  { %v3315_v40 = vld [vmem:[#allocation5 + $0xb8] sm:$0xff] }
 0xa24   :  { %6894 = vtanh.f32 %v3046_v33  ;;  %v3318_v33 = vld [vmem:[#allocation5 + $0xd0] sm:$0xff] }
 0xa25   :  { %6896 = vtanh.f32 %v3050_v39  ;;  %v3313_v39 = vld [vmem:[#allocation5 + $0xa8] sm:$0xff] }
 0xa26   :  { %6898 = vtanh.f32 %v3055_v41  ;;  %v3312_v41 = vld [vmem:[#allocation5 + $0xa0] sm:$0xff] }
 0xa2f   :  { %v6893_v4 = vpop.eup %6892 }
 0xa30   :  { %v3041_v14 = vmul.f32 0.5, %v6893_v4  ;;  %v3314_v4 = vld [vmem:[#allocation5 + $0xb0] sm:$0xff] }
 0xa31   :  { %v6895_v44 = vpop.eup %6894 }
 0xa32   :  { %v3042_v46 = vadd.f32 0.5, %v3041_v14  ;;  %v3048_v48 = vmul.f32 0.5, %v6895_v44  ;;  %v6897_v37 = vpop.eup %6896  ;;  %v3309_v14 = vld [vmem:[#allocation5 + $0x88] sm:$0xff]  ;;  %v3311_v44 = vld [vmem:[#allocation5 + $0x98] sm:$0xff] }
 0xa33   :  { %v6899_v59 = vpop.eup %6898 }
 0xa34   :  { %v3049_v50 = vadd.f32 0.5, %v3048_v48  ;;  %v3060_v1 = vmul.f32 %v6897_v37, %v3042_v46  ;;  %v3057_v7 = vmul.f32 0.5, %v6899_v59  ;;  %v3308_v46 = vld [vmem:[#allocation5 + $0x80] sm:$0xff]  ;;  %v3310_v48 = vld [vmem:[#allocation5 + $0x90] sm:$0xff]  ;;  %v3307_v37 = vld [vmem:[#allocation5 + $0x78] sm:$0xff] }
 0xa35   :  { %v3301_v59 = vld [vmem:[#allocation5 + $0x48] sm:$0xff] }
 0xa36   :  { %v3059_v3 = vmul.f32 %v3049_v50, %v7606_v22  ;;  %v3058_v58 = vadd.f32 0.5, %v3057_v7  ;;  %v3348_v22 = vld [vmem:[#allocation5 + $0x1c0] sm:$0xff]  ;;  %v3305_v50 = vld [vmem:[#allocation5 + $0x68] sm:$0xff]  ;;  %v3303_v7 = vld [vmem:[#allocation5 + $0x58] sm:$0xff] }
 0xa38   :  { %v7721_v11 = vadd.f32 %v3060_v1, %v3059_v3  ;;  %v3304_v3 = vld [vmem:[#allocation5 + $0x60] sm:$0xff]  ;;  %v3306_v1 = vld [vmem:[#allocation5 + $0x70] sm:$0xff] }
 0xa3a   :  { %6900 = vtanh.f32 %v7721_v11 }
 0xa47   :  { %v6901_v15 = vpop.eup %6900 }
 0xa48   :  { %v7724_v25 = vmul.f32 %v6901_v15, %v3058_v58  ;;  %v3300_v58 = vld [vmem:[#allocation5 + $0x40] sm:$0xff]  ;;  %v3302_v15 = vld [vmem:[#allocation5 + $0x50] sm:$0xff] }
 0xa4a   :  { %3215 = vmatmul.mubr.f32.vlgmr.msra.gmra.mxu1 %v7724_v25  ;;  %3286 = vmatmul.mubr.f32.vlgmr.msra.gmra.mxu0 %v7724_v25 }
 0xa4b   :  { %3357 = vmatpush1.msra.mxu1 %v3352_v5  ;;  %3428 = vmatpush1.msra.mxu0 %v3354_v0  ;;  %v3297_v5 = vld [vmem:[#allocation5 + $0x28] sm:$0xff]  ;;  %v3299_v0 = vld [vmem:[#allocation5 + $0x38] sm:$0xff] }
 0xa4c   :  { %3358 = vmatprep.subr.mxu1 %v3349_v17  ;;  %3429 = vmatprep.subr.mxu0 %v3351_v9  ;;  %v3296_v17 = vld [vmem:[#allocation5 + $0x20] sm:$0xff]  ;;  %v3298_v9 = vld [vmem:[#allocation5 + $0x30] sm:$0xff] }
 0xa4d   :  { %3359 = vmatpush1.msra.mxu1 %v3348_v22  ;;  %3430 = vmatpush1.msra.mxu0 %v3350_v23  ;;  %v3293_v22 = vld [vmem:[#allocation5 + $0x8] sm:$0xff]  ;;  %v3295_v23 = vld [vmem:[#allocation5 + $0x18] sm:$0xff] }
 0xa4e   :  { %3360 = vmatprep.subr.mxu1 %v3345_v13  ;;  %3431 = vmatprep.subr.mxu0 %v3347_v51  ;;  %v3292_v13 = vld [vmem:[#allocation5] sm:$0xff]  ;;  %v3294_v51 = vld [vmem:[#allocation5 + $0x10] sm:$0xff] }
 0xa4f   :  { %3361 = vmatpush1.msra.mxu1 %v3344_v31  ;;  %3432 = vmatpush1.msra.mxu0 %v3346_v55  ;;  %v3672_v31 = vld [vmem:[#allocation3 + $0x1e8] sm:$0xff]  ;;  %v3671_v55 = vld [vmem:[#allocation3 + $0x1e0] sm:$0xff] }
 0xa50   :  { %3362 = vmatprep.subr.mxu1 %v3341_v42  ;;  %3433 = vmatprep.subr.mxu0 %v3343_v43  ;;  %v3668_v42 = vld [vmem:[#allocation3 + $0x1c8] sm:$0xff]  ;;  %v3667_v43 = vld [vmem:[#allocation3 + $0x1c0] sm:$0xff] }
 0xa51   :  { %3363 = vmatpush1.msra.mxu1 %v3340_v45  ;;  %3434 = vmatpush1.msra.mxu0 %v3342_v47  ;;  %v3664_v45 = vld [vmem:[#allocation3 + $0x1a8] sm:$0xff]  ;;  %v3663_v47 = vld [vmem:[#allocation3 + $0x1a0] sm:$0xff] }
 0xa52   :  { %3364 = vmatprep.subr.mxu1 %v3337_v49  ;;  %3435 = vmatprep.subr.mxu0 %v3339_v52  ;;  %v3660_v49 = vld [vmem:[#allocation3 + $0x188] sm:$0xff]  ;;  %v3659_v52 = vld [vmem:[#allocation3 + $0x180] sm:$0xff] }
 0xa53   :  { %3365 = vmatpush1.msra.mxu1 %v3336_v56  ;;  %3436 = vmatpush1.msra.mxu0 %v3338_v36  ;;  %v3655_v56 = vld [vmem:[#allocation3 + $0x160] sm:$0xff]  ;;  %v3652_v36 = vld [vmem:[#allocation3 + $0x148] sm:$0xff] }
 0xa54   :  { %3366 = vmatprep.subr.mxu1 %v3333_v60  ;;  %3437 = vmatprep.subr.mxu0 %v3335_v62  ;;  %v3651_v60 = vld [vmem:[#allocation3 + $0x140] sm:$0xff]  ;;  %v3648_v62 = vld [vmem:[#allocation3 + $0x128] sm:$0xff] }
 0xa55   :  { %3367 = vmatpush1.msra.mxu1 %v3332_v63  ;;  %3438 = vmatpush1.msra.mxu0 %v3334_v2  ;;  %v3647_v63 = vld [vmem:[#allocation3 + $0x120] sm:$0xff]  ;;  %v3644_v2 = vld [vmem:[#allocation3 + $0x108] sm:$0xff] }
 0xa56   :  { %3368 = vmatprep.subr.mxu1 %v3329_v12  ;;  %3439 = vmatprep.subr.mxu0 %v3331_v57  ;;  %v3643_v12 = vld [vmem:[#allocation3 + $0x100] sm:$0xff]  ;;  %v3640_v57 = vld [vmem:[#allocation3 + $0xe8] sm:$0xff] }
 0xa57   :  { %3369 = vmatpush1.msra.mxu1 %v3328_v16  ;;  %3440 = vmatpush1.msra.mxu0 %v3330_v20  ;;  %v3639_v16 = vld [vmem:[#allocation3 + $0xe0] sm:$0xff]  ;;  %v3636_v20 = vld [vmem:[#allocation3 + $0xc8] sm:$0xff] }
 0xa58   :  { %3370 = vmatprep.subr.mxu1 %v3325_v24  ;;  %3441 = vmatprep.subr.mxu0 %v3327_v29  ;;  %v3635_v24 = vld [vmem:[#allocation3 + $0xc0] sm:$0xff]  ;;  %v3632_v29 = vld [vmem:[#allocation3 + $0xa8] sm:$0xff] }
 0xa59   :  { %3371 = vmatpush1.msra.mxu1 %v3324_v32  ;;  %3442 = vmatpush1.msra.mxu0 %v3326_v34  ;;  %v3631_v32 = vld [vmem:[#allocation3 + $0xa0] sm:$0xff]  ;;  %v3628_v34 = vld [vmem:[#allocation3 + $0x88] sm:$0xff] }
 0xa5a   :  { %3372 = vmatprep.subr.mxu1 %v3321_v35  ;;  %3443 = vmatprep.subr.mxu0 %v3323_v54  ;;  %v3627_v35 = vld [vmem:[#allocation3 + $0x80] sm:$0xff]  ;;  %v3624_v54 = vld [vmem:[#allocation3 + $0x68] sm:$0xff] }
 0xa5b   :  { %3373 = vmatpush1.msra.mxu1 %v3320_v18  ;;  %3444 = vmatpush1.msra.mxu0 %v3322_v21  ;;  %v3623_v18 = vld [vmem:[#allocation3 + $0x60] sm:$0xff]  ;;  %v3620_v21 = vld [vmem:[#allocation3 + $0x48] sm:$0xff] }
 0xa5c   :  { %3374 = vmatprep.subr.mxu1 %v3317_v28  ;;  %3445 = vmatprep.subr.mxu0 %v3319_v30  ;;  %v3619_v28 = vld [vmem:[#allocation3 + $0x40] sm:$0xff]  ;;  %v3616_v30 = vld [vmem:[#allocation3 + $0x28] sm:$0xff] }
 0xa5d   :  { %3375 = vmatpush1.msra.mxu1 %v3316_v10  ;;  %3446 = vmatpush1.msra.mxu0 %v3318_v33  ;;  %v3615_v10 = vld [vmem:[#allocation3 + $0x20] sm:$0xff]  ;;  %v3612_v33 = vld [vmem:[#allocation3 + $0x8] sm:$0xff] }
 0xa5e   :  { %3376 = vmatprep.subr.mxu1 %v3313_v39  ;;  %3447 = vmatprep.subr.mxu0 %v3315_v40  ;;  %v3611_v39 = vld [vmem:[#allocation3] sm:$0xff]  ;;  %v3536_v40 = vld [vmem:[#allocation6 + $0x78] sm:$0xff] }
 0xa5f   :  { %3377 = vmatpush1.msra.mxu1 %v3312_v41  ;;  %3448 = vmatpush1.msra.mxu0 %v3314_v4  ;;  %v3535_v41 = vld [vmem:[#allocation6 + $0x70] sm:$0xff]  ;;  %v3534_v4 = vld [vmem:[#allocation6 + $0x68] sm:$0xff] }
 0xa60   :  { %3378 = vmatprep.subr.mxu1 %v3309_v14  ;;  %3449 = vmatprep.subr.mxu0 %v3311_v44  ;;  %v3533_v14 = vld [vmem:[#allocation6 + $0x60] sm:$0xff]  ;;  %v3532_v44 = vld [vmem:[#allocation6 + $0x58] sm:$0xff] }
 0xa61   :  { %3379 = vmatpush1.msra.mxu1 %v3308_v46  ;;  %3450 = vmatpush1.msra.mxu0 %v3310_v48  ;;  %v3531_v46 = vld [vmem:[#allocation6 + $0x50] sm:$0xff]  ;;  %v3530_v48 = vld [vmem:[#allocation6 + $0x48] sm:$0xff] }
 0xa62   :  { %3380 = vmatprep.subr.mxu1 %v3305_v50  ;;  %3451 = vmatprep.subr.mxu0 %v3307_v37  ;;  %v3529_v50 = vld [vmem:[#allocation6 + $0x40] sm:$0xff]  ;;  %v3528_v37 = vld [vmem:[#allocation6 + $0x38] sm:$0xff] }
 0xa63   :  { %3381 = vmatpush1.msra.mxu1 %v3304_v3  ;;  %3452 = vmatpush1.msra.mxu0 %v3306_v1  ;;  %v3527_v3 = vld [vmem:[#allocation6 + $0x30] sm:$0xff]  ;;  %v3526_v1 = vld [vmem:[#allocation6 + $0x28] sm:$0xff] }
 0xa64   :  { %3382 = vmatprep.subr.mxu1 %v3301_v59  ;;  %3453 = vmatprep.subr.mxu0 %v3303_v7  ;;  %v3525_v59 = vld [vmem:[#allocation6 + $0x20] sm:$0xff]  ;;  %v3524_v7 = vld [vmem:[#allocation6 + $0x18] sm:$0xff] }
 0xa65   :  { %3383 = vmatpush1.msra.mxu1 %v3300_v58  ;;  %3454 = vmatpush1.msra.mxu0 %v3302_v15  ;;  %v3523_v58 = vld [vmem:[#allocation6 + $0x10] sm:$0xff]  ;;  %v3522_v15 = vld [vmem:[#allocation6 + $0x8] sm:$0xff] }
 0xa66   :  { %3384 = vmatprep.subr.mxu1 %v3297_v5  ;;  %3455 = vmatprep.subr.mxu0 %v3299_v0  ;;  %v3521_v5 = vld [vmem:[#allocation6] sm:$0xff]  ;;  %v3674_v0 = vld [vmem:[#allocation3 + $0x1f8] sm:$0xff] }
 0xa67   :  { %3385 = vmatpush1.msra.mxu1 %v3296_v17  ;;  %3456 = vmatpush1.msra.mxu0 %v3298_v9  ;;  %v2320_v17 = vld [vmem:[%s8336_s5] sm:$0xf] }
 0xa68   :  { %3386 = vmatprep.subr.mxu1 %v3293_v22  ;;  %3457 = vmatprep.subr.mxu0 %v3295_v23  ;;  %v8437_v22 = vld [vmem:[#allocation32_spill] sm:$0xff] }
 0xa69   :  { %3387 = vmatpush1.msra.mxu1 %v3292_v13  ;;  %3420 = vmatprep.mubr.f32.mxu1 %v8416_v8  ;;  %v2325_v23 = vrot.slane %v2320_v17, %v8437_v22 }
 0xa6a   :  { %3458 = vmatpush1.msra.mxu0 %v3294_v51  ;;  %3491 = vmatprep.mubr.f32.mxu0 %v8416_v8  ;;  %v8438_v51 = vld [vmem:[#allocation34_spill] sm:$0xff] }
 0xa6b   :  { %3421 = vmatmul.mubr.f32.vlgmr.msra.gmra.mxu1 %v7708_v38  ;;  %3492 = vmatmul.mubr.f32.vlgmr.msra.gmra.mxu0 %v7708_v38  ;;  %v3656_v38 = vld [vmem:[#allocation3 + $0x168] sm:$0xff] }
 0xa6c   :  { %3675 = vmatprep.subr.mxu0 %v3672_v31  ;;  %3739 = vmatprep.mubr.f32.mxu0 %v8416_v8  ;;  %v2329_v31 = vrot.slane %v2320_v17, %v8438_v51 }
 0xa6d   :  { %3676 = vmatpush1.msra.mxu0 %v3671_v55  ;;  %6638 = vmatprep.subr.mxu1 %v8416_v8 }
 0xa6e   :  { %3677 = vmatprep.subr.mxu0 %v3668_v42  ;;  %6670 = vmatprep.mubr.msk.f32.mxu1 %vm7176_vm0, %v8416_v8  ;;  %v2409_v42 = vadd.f32 %v7692_v19, %v2325_v23  ;;  %v3638_v23 = vld [vmem:[#allocation3 + $0xd8] sm:$0xff] }
 0xa6f   :  { %3678 = vmatpush1.msra.mxu0 %v3667_v43  ;;  %6639 = vmatpush3.msra.mxu1 %v3536_v40  ;;  %v8439_v43 = vld [vmem:[#allocation33_spill] sm:$0xff] }
 0xa70   :  { %3679 = vmatprep.subr.mxu0 %v3664_v45  ;;  %6640 = vmatprep.subr.mxu1 %v8416_v8  ;;  %v2333_v45 = vrot.slane %v2320_v17, %v8439_v43 }
 0xa71   :  { %3680 = vmatpush1.msra.mxu0 %v3663_v47  ;;  %6641 = vmatpush3.msra.mxu1 %v3535_v41 }
 0xa72   :  { %3681 = vmatprep.subr.mxu0 %v3660_v49  ;;  %6642 = vmatprep.subr.mxu1 %v8416_v8 }
 0xa73   :  { %3682 = vmatpush1.msra.mxu0 %v3659_v52  ;;  %6643 = vmatpush3.msra.mxu1 %v3534_v4  ;;  %v2411_v52 = vadd.f32 %v7696_v53, %v2329_v31  ;;  %v3673_v4 = vld [vmem:[#allocation3 + $0x1f0] sm:$0xff] }
 0xa74   :  { %3683 = vmatprep.subr.mxu0 %v3656_v38  ;;  %6644 = vmatprep.subr.mxu1 %v8416_v8  ;;  %v3637_v31 = vld [vmem:[#allocation3 + $0xd0] sm:$0xff] }
 0xa75   :  { %3684 = vmatpush1.msra.mxu0 %v3655_v56  ;;  %6645 = vmatpush3.msra.mxu1 %v3533_v14  ;;  %v3670_v14 = vld [vmem:[#allocation3 + $0x1d8] sm:$0xff] }
 0xa76   :  { %3685 = vmatprep.subr.mxu0 %v3652_v36  ;;  %6646 = vmatprep.subr.mxu1 %v8416_v8 }
 0xa77   :  { %3686 = vmatpush1.msra.mxu0 %v3651_v60  ;;  %6647 = vmatpush3.msra.mxu1 %v3532_v44  ;;  %v2480_v60 = vadd.f32 %v7694_v6, %v2333_v45  ;;  %v3669_v44 = vld [vmem:[#allocation3 + $0x1d0] sm:$0xff] }
 0xa78   :  { %3687 = vmatprep.subr.mxu0 %v3648_v62  ;;  %6648 = vmatprep.subr.mxu1 %v8416_v8  ;;  %v3633_v45 = vld [vmem:[#allocation3 + $0xb0] sm:$0xff] }
 0xa79   :  { %3688 = vmatpush1.msra.mxu0 %v3647_v63  ;;  %6649 = vmatpush3.msra.mxu1 %v3531_v46  ;;  %v3666_v46 = vld [vmem:[#allocation3 + $0x1b8] sm:$0xff] }
 0xa7a   :  { %3689 = vmatprep.subr.mxu0 %v3644_v2  ;;  %6650 = vmatprep.subr.mxu1 %v8416_v8 }
 0xa7b   :  { %3690 = vmatpush1.msra.mxu0 %v3643_v12  ;;  %6651 = vmatpush3.msra.mxu1 %v3530_v48  ;;  %v3662_v48 = vld [vmem:[#allocation3 + $0x198] sm:$0xff] }
 0xa7c   :  { %3691 = vmatprep.subr.mxu0 %v3640_v57  ;;  %6652 = vmatprep.subr.mxu1 %v8416_v8  ;;  %v8440_v57 = vld [vmem:[#allocation35_spill] sm:$0xff] }
 0xa7d   :  { %3692 = vmatpush1.msra.mxu0 %v3639_v16  ;;  %6653 = vmatpush3.msra.mxu1 %v3529_v50  ;;  %v2337_v16 = vrot.slane %v2320_v17, %v8440_v57  ;;  %v3661_v50 = vld [vmem:[#allocation3 + $0x190] sm:$0xff] }
 0xa7e   :  { %3693 = vmatprep.subr.mxu0 %v3636_v20  ;;  %6654 = vmatprep.subr.mxu1 %v8416_v8  ;;  %v3641_v17 = vld [vmem:[#allocation3 + $0xf0] sm:$0xff] }
 0xa7f   :  { %3694 = vmatpush1.msra.mxu0 %v3635_v24  ;;  %6655 = vmatpush3.msra.mxu1 %v3528_v37  ;;  %v2482_v20 = vadd.f32 %v7699_v61, %v2337_v16  ;;  %v3658_v37 = vld [vmem:[#allocation3 + $0x178] sm:$0xff]  ;;  %v3933_v16 = vld [vmem:[#allocation4 + $0x1e8] sm:$0xff] }
 0xa80   :  { %3695 = vmatprep.subr.mxu0 %v3632_v29  ;;  %6656 = vmatprep.subr.mxu1 %v8416_v8 }
 0xa81   :  { %3696 = vmatpush1.msra.mxu0 %v3631_v32  ;;  %6657 = vmatpush3.msra.mxu1 %v3527_v3  ;;  %v3657_v3 = vld [vmem:[#allocation3 + $0x170] sm:$0xff] }
 0xa82   :  { %3697 = vmatprep.subr.mxu0 %v3628_v34  ;;  %6658 = vmatprep.subr.mxu1 %v8416_v8 }
 0xa83   :  { %3698 = vmatpush1.msra.mxu0 %v3627_v35  ;;  %6659 = vmatpush3.msra.mxu1 %v3526_v1  ;;  %v3654_v1 = vld [vmem:[#allocation3 + $0x158] sm:$0xff] }
 0xa84   :  { %3699 = vmatprep.subr.mxu0 %v3624_v54  ;;  %6660 = vmatprep.subr.mxu1 %v8416_v8 }
 0xa85   :  { %3700 = vmatpush1.msra.mxu0 %v3623_v18  ;;  %6661 = vmatpush3.msra.mxu1 %v3525_v59  ;;  %v3653_v59 = vld [vmem:[#allocation3 + $0x150] sm:$0xff] }
 0xa86   :  { %3701 = vmatprep.subr.mxu0 %v3620_v21  ;;  %6662 = vmatprep.subr.mxu1 %v8416_v8 }
 0xa87   :  { %3702 = vmatpush1.msra.mxu0 %v3619_v28  ;;  %6663 = vmatpush3.msra.mxu1 %v3524_v7  ;;  %v3650_v7 = vld [vmem:[#allocation3 + $0x138] sm:$0xff] }
 0xa88   :  { %3703 = vmatprep.subr.mxu0 %v3616_v30  ;;  %6664 = vmatprep.subr.mxu1 %v8416_v8 }
 0xa89   :  { %3704 = vmatpush1.msra.mxu0 %v3615_v10  ;;  %6665 = vmatpush3.msra.mxu1 %v3523_v58  ;;  %v3649_v58 = vld [vmem:[#allocation3 + $0x130] sm:$0xff] }
 0xa8a   :  { %3705 = vmatprep.subr.mxu0 %v3612_v33  ;;  %6666 = vmatprep.subr.mxu1 %v8416_v8 }
 0xa8b   :  { %3706 = vmatpush1.msra.mxu0 %v3611_v39  ;;  %6667 = vmatpush3.msra.mxu1 %v3522_v15  ;;  %v3646_v15 = vld [vmem:[#allocation3 + $0x118] sm:$0xff] }
 0xa8c   :  { %3740 = vmatmul.mubr.f32.vlgmr.msra.gmra.mxu0 %v7724_v25  ;;  %6668 = vmatprep.subr.mxu1 %v8416_v8 }
 0xa8d   :  { %4022 = vmatprep.mubr.f32.mxu0 %v8416_v8  ;;  %6669 = vmatpush3.msra.mxu1 %v3521_v5  ;;  %v3645_v5 = vld [vmem:[#allocation3 + $0x110] sm:$0xff] }
 0xa8e   :  { %3746 = vmatprep.subr.mxu1 %v3674_v0  ;;  %v3642_v0 = vld [vmem:[#allocation3 + $0xf8] sm:$0xff]  ;;  %3958 = vmatprep.subr.mxu0 %v3933_v16  ;;  %v3886_v16 = vld [vmem:[#allocation4 + $0x70] sm:$0xff] }
 0xb0a   :  { %v7756_v9 = vpop.f32.mrf.mxu1  ;;  %v7759_v13 = vpop.f32.mrf.mxu0 }
 0xb0c   :  { %v7762_v55 = vpop.f32.mrf.mxu1  ;;  %v7766_v47 = vpop.f32.mrf.mxu0 }
 0xb2b   :  { %v3422_v49 = vpop.f32.mrf.mxu1  ;;  %v3493_v56 = vpop.f32.mrf.mxu0 }
 0xb2c   :  { %v3498_v38 = vadd.f32 %v3422_v49, %v2409_v42  ;;  %v3500_v2 = vadd.f32 %v3493_v56, %v2480_v60  ;;  %v3634_v42 = vld [vmem:[#allocation3 + $0xb8] sm:$0xff]  ;;  %v3625_v56 = vld [vmem:[#allocation3 + $0x70] sm:$0xff] }
 0xb2d   :  { %v3424_v36 = vpop.f32.mrf.mxu1  ;;  %v3495_v19 = vpop.f32.mrf.mxu0  ;;  %v3630_v49 = vld [vmem:[#allocation3 + $0x98] sm:$0xff]  ;;  %v3621_v60 = vld [vmem:[#allocation3 + $0x50] sm:$0xff] }
 0xb2e   :  { %v3502_v62 = vmul.f32 0.5, %v3498_v38  ;;  %v3499_v63 = vadd.f32 %v3424_v36, %v2411_v52  ;;  %v3501_v24 = vadd.f32 %v3495_v19, %v2482_v20  ;;  %v3629_v52 = vld [vmem:[#allocation3 + $0x90] sm:$0xff]  ;;  %v3626_v38 = vld [vmem:[#allocation3 + $0x78] sm:$0xff]  ;;  %v3932_v20 = vld [vmem:[#allocation4 + $0x1e0] sm:$0xff] }
 0xb2f   :  { %v3622_v36 = vld [vmem:[#allocation3 + $0x58] sm:$0xff]  ;;  %3959 = vmatpush1.msra.mxu0 %v3932_v20 }
 0xb30   :  { %6902 = vtanh.f32 %v3502_v62  ;;  %v3506_v12 = vmul.f32 0.5, %v3499_v63  ;;  %v3511_v29 = vmul.f32 0.5, %v3501_v24  ;;  %v3618_v62 = vld [vmem:[#allocation3 + $0x38] sm:$0xff]  ;;  %v3617_v63 = vld [vmem:[#allocation3 + $0x30] sm:$0xff] }
 0xb31   :  { %v3935_v19 = vld [vmem:[#allocation4 + $0x1f8] sm:$0xff]  ;;  %v3934_v24 = vld [vmem:[#allocation4 + $0x1f0] sm:$0xff] }
 0xb32   :  { %6904 = vtanh.f32 %v3506_v12  ;;  %v3613_v12 = vld [vmem:[#allocation3 + $0x10] sm:$0xff]  ;;  %v3883_v20 = vld [vmem:[#allocation4 + $0x58] sm:$0xff] }
 0xb33   :  { %6906 = vtanh.f32 %v3500_v2  ;;  %v3614_v2 = vld [vmem:[#allocation3 + $0x18] sm:$0xff] }
 0xb34   :  { %6908 = vtanh.f32 %v3511_v29  ;;  %v3929_v29 = vld [vmem:[#allocation4 + $0x1c8] sm:$0xff] }
 0xb35   :  { %3960 = vmatprep.subr.mxu0 %v3929_v29  ;;  %v3882_v29 = vld [vmem:[#allocation4 + $0x50] sm:$0xff] }
 0xb3d   :  { %v6903_v53 = vpop.eup %6902 }
 0xb3e   :  { %v3504_v32 = vmul.f32 0.5, %v6903_v53  ;;  %v3931_v53 = vld [vmem:[#allocation4 + $0x1d8] sm:$0xff] }
 0xb3f   :  { %v6905_v34 = vpop.eup %6904 }
 0xb40   :  { %v3505_v35 = vadd.f32 0.5, %v3504_v32  ;;  %v3508_v54 = vmul.f32 0.5, %v6905_v34  ;;  %v6907_v6 = vpop.eup %6906  ;;  %v3928_v32 = vld [vmem:[#allocation4 + $0x1c0] sm:$0xff]  ;;  %v3930_v34 = vld [vmem:[#allocation4 + $0x1d0] sm:$0xff] }
 0xb41   :  { %v6909_v10 = vpop.eup %6908  ;;  %3961 = vmatpush1.msra.mxu0 %v3928_v32  ;;  %v3879_v32 = vld [vmem:[#allocation4 + $0x38] sm:$0xff] }
 0xb42   :  { %v3509_v18 = vadd.f32 0.5, %v3508_v54  ;;  %v3516_v21 = vmul.f32 %v6907_v6, %v3505_v35  ;;  %v3513_v33 = vmul.f32 0.5, %v6909_v10  ;;  %v3925_v35 = vld [vmem:[#allocation4 + $0x1a8] sm:$0xff]  ;;  %v3924_v54 = vld [vmem:[#allocation4 + $0x1a0] sm:$0xff]  ;;  %v3926_v6 = vld [vmem:[#allocation4 + $0x1b0] sm:$0xff] }
 0xb43   :  { %3962 = vmatprep.subr.mxu0 %v3925_v35  ;;  %v3922_v10 = vld [vmem:[#allocation4 + $0x190] sm:$0xff] }
 0xb44   :  { %v3515_v28 = vmul.f32 %v3509_v18, %v7705_v26  ;;  %v3514_v61 = vadd.f32 0.5, %v3513_v33  ;;  %v3665_v26 = vld [vmem:[#allocation3 + $0x1b0] sm:$0xff]  ;;  %3963 = vmatpush1.msra.mxu0 %v3924_v54  ;;  %v3921_v18 = vld [vmem:[#allocation4 + $0x188] sm:$0xff]  ;;  %v3875_v54 = vld [vmem:[#allocation4 + $0x18] sm:$0xff] }
 0xb45   :  { %3964 = vmatprep.subr.mxu0 %v3921_v18  ;;  %v3917_v33 = vld [vmem:[#allocation4 + $0x168] sm:$0xff]  ;;  %v3878_v35 = vld [vmem:[#allocation4 + $0x30] sm:$0xff] }
 0xb46   :  { %v7773_v30 = vadd.f32 %v3516_v21, %v3515_v28  ;;  %v3923_v21 = vld [vmem:[#allocation4 + $0x198] sm:$0xff]  ;;  %v3920_v28 = vld [vmem:[#allocation4 + $0x180] sm:$0xff]  ;;  %v3874_v18 = vld [vmem:[#allocation4 + $0x10] sm:$0xff] }
 0xb47   :  { %3965 = vmatpush1.msra.mxu0 %v3920_v28  ;;  %v4163_v28 = vld [vmem:[#allocation5 + $0x1f8] sm:$0xff] }
 0xb48   :  { %6910 = vtanh.f32 %v7773_v30  ;;  %3966 = vmatprep.subr.mxu0 %v3917_v33 }
 0xb55   :  { %v6911_v39 = vpop.eup %6910 }
 0xb56   :  { %v7776_v40 = vmul.f32 %v6911_v39, %v3514_v61  ;;  %v3919_v61 = vld [vmem:[#allocation4 + $0x178] sm:$0xff]  ;;  %v3916_v39 = vld [vmem:[#allocation4 + $0x160] sm:$0xff] }
 0xb57   :  { %3967 = vmatpush1.msra.mxu0 %v3916_v39 }
 0xb58   :  { %v3520_v41 = vmax.f32 %v7776_v40, 0.0 }
 0xb5a   :  { %6671 = vmatmul.mubr.f32.vlgmr.msra.gmra.mxu1 %v3520_v41  ;;  %v3918_v41 = vld [vmem:[#allocation4 + $0x170] sm:$0xff] }
 0xb5b   :  { %3747 = vmatpush1.msra.mxu1 %v3673_v4  ;;  %3810 = vmatprep.mubr.f32.mxu1 %v8416_v8  ;;  %v3913_v4 = vld [vmem:[#allocation4 + $0x148] sm:$0xff] }
 0xb5c   :  { %3748 = vmatprep.subr.mxu1 %v3670_v14  ;;  %v3915_v14 = vld [vmem:[#allocation4 + $0x158] sm:$0xff]  ;;  %3968 = vmatprep.subr.mxu0 %v3913_v4 }
 0xb5d   :  { %3749 = vmatpush1.msra.mxu1 %v3669_v44  ;;  %v3912_v44 = vld [vmem:[#allocation4 + $0x140] sm:$0xff] }
 0xb5e   :  { %3750 = vmatprep.subr.mxu1 %v3666_v46  ;;  %v3914_v46 = vld [vmem:[#allocation4 + $0x150] sm:$0xff]  ;;  %3969 = vmatpush1.msra.mxu0 %v3912_v44 }
 0xb5f   :  { %3751 = vmatpush1.msra.mxu1 %v3665_v26  ;;  %v3909_v26 = vld [vmem:[#allocation4 + $0x128] sm:$0xff] }
 0xb60   :  { %3752 = vmatprep.subr.mxu1 %v3662_v48  ;;  %v3911_v48 = vld [vmem:[#allocation4 + $0x138] sm:$0xff]  ;;  %3970 = vmatprep.subr.mxu0 %v3909_v26 }
 0xb61   :  { %3753 = vmatpush1.msra.mxu1 %v3661_v50  ;;  %v3908_v50 = vld [vmem:[#allocation4 + $0x120] sm:$0xff] }
 0xb62   :  { %3754 = vmatprep.subr.mxu1 %v3658_v37  ;;  %v3910_v37 = vld [vmem:[#allocation4 + $0x130] sm:$0xff]  ;;  %3971 = vmatpush1.msra.mxu0 %v3908_v50 }
 0xb63   :  { %3755 = vmatpush1.msra.mxu1 %v3657_v3  ;;  %v3905_v3 = vld [vmem:[#allocation4 + $0x108] sm:$0xff] }
 0xb64   :  { %3756 = vmatprep.subr.mxu1 %v3654_v1  ;;  %v3907_v1 = vld [vmem:[#allocation4 + $0x118] sm:$0xff]  ;;  %3972 = vmatprep.subr.mxu0 %v3905_v3 }
 0xb65   :  { %3757 = vmatpush1.msra.mxu1 %v3653_v59  ;;  %v3904_v59 = vld [vmem:[#allocation4 + $0x100] sm:$0xff] }
 0xb66   :  { %3758 = vmatprep.subr.mxu1 %v3650_v7  ;;  %v3906_v7 = vld [vmem:[#allocation4 + $0x110] sm:$0xff]  ;;  %3973 = vmatpush1.msra.mxu0 %v3904_v59 }
 0xb67   :  { %3759 = vmatpush1.msra.mxu1 %v3649_v58  ;;  %v3901_v58 = vld [vmem:[#allocation4 + $0xe8] sm:$0xff] }
 0xb68   :  { %3760 = vmatprep.subr.mxu1 %v3646_v15  ;;  %v3903_v15 = vld [vmem:[#allocation4 + $0xf8] sm:$0xff]  ;;  %3974 = vmatprep.subr.mxu0 %v3901_v58 }
 0xb69   :  { %3761 = vmatpush1.msra.mxu1 %v3645_v5  ;;  %v3900_v5 = vld [vmem:[#allocation4 + $0xe0] sm:$0xff] }
 0xb6a   :  { %3762 = vmatprep.subr.mxu1 %v3642_v0  ;;  %v3902_v0 = vld [vmem:[#allocation4 + $0xf0] sm:$0xff]  ;;  %3975 = vmatpush1.msra.mxu0 %v3900_v5 }
 0xb6b   :  { %3763 = vmatpush1.msra.mxu1 %v3641_v17  ;;  %v3897_v17 = vld [vmem:[#allocation4 + $0xc8] sm:$0xff] }
 0xb6c   :  { %3764 = vmatprep.subr.mxu1 %v3638_v23  ;;  %v3899_v23 = vld [vmem:[#allocation4 + $0xd8] sm:$0xff]  ;;  %3976 = vmatprep.subr.mxu0 %v3897_v17 }
 0xb6d   :  { %3765 = vmatpush1.msra.mxu1 %v3637_v31  ;;  %v3896_v31 = vld [vmem:[#allocation4 + $0xc0] sm:$0xff] }
 0xb6e   :  { %3766 = vmatprep.subr.mxu1 %v3634_v42  ;;  %v3898_v42 = vld [vmem:[#allocation4 + $0xd0] sm:$0xff]  ;;  %3977 = vmatpush1.msra.mxu0 %v3896_v31 }
 0xb6f   :  { %3767 = vmatpush1.msra.mxu1 %v3633_v45  ;;  %v3893_v45 = vld [vmem:[#allocation4 + $0xa8] sm:$0xff] }
 0xb70   :  { %3768 = vmatprep.subr.mxu1 %v3630_v49  ;;  %v3895_v49 = vld [vmem:[#allocation4 + $0xb8] sm:$0xff]  ;;  %3978 = vmatprep.subr.mxu0 %v3893_v45 }
 0xb71   :  { %3769 = vmatpush1.msra.mxu1 %v3629_v52  ;;  %v3892_v52 = vld [vmem:[#allocation4 + $0xa0] sm:$0xff] }
 0xb72   :  { %3770 = vmatprep.subr.mxu1 %v3626_v38  ;;  %v3894_v38 = vld [vmem:[#allocation4 + $0xb0] sm:$0xff]  ;;  %3979 = vmatpush1.msra.mxu0 %v3892_v52 }
 0xb73   :  { %3771 = vmatpush1.msra.mxu1 %v3625_v56  ;;  %v3889_v56 = vld [vmem:[#allocation4 + $0x88] sm:$0xff] }
 0xb74   :  { %3772 = vmatprep.subr.mxu1 %v3622_v36  ;;  %v3891_v36 = vld [vmem:[#allocation4 + $0x98] sm:$0xff]  ;;  %3980 = vmatprep.subr.mxu0 %v3889_v56 }
 0xb75   :  { %3773 = vmatpush1.msra.mxu1 %v3621_v60  ;;  %v3888_v60 = vld [vmem:[#allocation4 + $0x80] sm:$0xff] }
 0xb76   :  { %3774 = vmatprep.subr.mxu1 %v3618_v62  ;;  %v3890_v62 = vld [vmem:[#allocation4 + $0x90] sm:$0xff]  ;;  %3981 = vmatpush1.msra.mxu0 %v3888_v60 }
 0xb77   :  { %3775 = vmatpush1.msra.mxu1 %v3617_v63  ;;  %v3885_v63 = vld [vmem:[#allocation4 + $0x68] sm:$0xff] }
 0xb78   :  { %3776 = vmatprep.subr.mxu1 %v3614_v2  ;;  %v3887_v2 = vld [vmem:[#allocation4 + $0x78] sm:$0xff]  ;;  %3982 = vmatprep.subr.mxu0 %v3885_v63 }
 0xb79   :  { %3777 = vmatpush1.msra.mxu1 %v3613_v12  ;;  %v3884_v12 = vld [vmem:[#allocation4 + $0x60] sm:$0xff] }
 0xb7a   :  { %3811 = vmatmul.mubr.f32.vlgmr.msra.gmra.mxu1 %v7724_v25  ;;  %4029 = vmatprep.subr.mxu1 %v3935_v19  ;;  %v3927_v25 = vld [vmem:[#allocation4 + $0x1b8] sm:$0xff]  ;;  %v3881_v19 = vld [vmem:[#allocation4 + $0x48] sm:$0xff] }
 0xb7b   :  { %4093 = vmatprep.mubr.f32.mxu1 %v8416_v8  ;;  %4030 = vmatpush1.msra.mxu1 %v3934_v24  ;;  %v3880_v24 = vld [vmem:[#allocation4 + $0x40] sm:$0xff] }
 0xb7c   :  { %4031 = vmatprep.subr.mxu1 %v3931_v53  ;;  %3983 = vmatpush1.msra.mxu0 %v3884_v12  ;;  %v3877_v53 = vld [vmem:[#allocation4 + $0x28] sm:$0xff] }
 0xb7d   :  { %4032 = vmatpush1.msra.mxu1 %v3930_v34  ;;  %3984 = vmatprep.subr.mxu0 %v3881_v19  ;;  %v3876_v34 = vld [vmem:[#allocation4 + $0x20] sm:$0xff] }
 0xb7e   :  { %4033 = vmatprep.subr.mxu1 %v3927_v25  ;;  %3985 = vmatpush1.msra.mxu0 %v3880_v24  ;;  %v3873_v25 = vld [vmem:[#allocation4 + $0x8] sm:$0xff]  ;;  %v4160_v19 = vld [vmem:[#allocation5 + $0x1e0] sm:$0xff] }
 0xb7f   :  { %4034 = vmatpush1.msra.mxu1 %v3926_v6  ;;  %3986 = vmatprep.subr.mxu0 %v3877_v53  ;;  %v3872_v6 = vld [vmem:[#allocation4] sm:$0xff]  ;;  %v4157_v24 = vld [vmem:[#allocation5 + $0x1c8] sm:$0xff]  ;;  %v4158_v53 = vld [vmem:[#allocation5 + $0x1d0] sm:$0xff] }
 0xb80   :  { %4035 = vmatprep.subr.mxu1 %v3923_v21  ;;  %3987 = vmatpush1.msra.mxu0 %v3876_v34  ;;  %v4161_v21 = vld [vmem:[#allocation5 + $0x1e8] sm:$0xff]  ;;  %v4155_v34 = vld [vmem:[#allocation5 + $0x1b8] sm:$0xff] }
 0xb81   :  { %4036 = vmatpush1.msra.mxu1 %v3922_v10  ;;  %3988 = vmatprep.subr.mxu0 %v3873_v25  ;;  %v3537_v10 = vld [vmem:[%s8339_s8] sm:$0x1]  ;;  %v3610_v3 = vld [vmem:[#allocation2 + $0x5] ss:$8 sm:$0xf] }
 0xb82   :  { %4037 = vmatprep.subr.mxu1 %v3919_v61  ;;  %3989 = vmatpush1.msra.mxu0 %v3872_v6  ;;  %v4154_v25 = vld [vmem:[#allocation5 + $0x1b0] sm:$0xff]  ;;  %v4151_v6 = vld [vmem:[#allocation5 + $0x198] sm:$0xff] }
 0xb83   :  { %4038 = vmatpush1.msra.mxu1 %v3918_v41  ;;  %4164 = vmatprep.subr.mxu0 %v4161_v21  ;;  %v3741_v41 = vpop.f32.mrf.mxu0  ;;  %v4150_v21 = vld [vmem:[#allocation5 + $0x190] sm:$0xff] }
 0xb84   :  { %4039 = vmatprep.subr.mxu1 %v3915_v14 }
 0xb85   :  { %4040 = vmatpush1.msra.mxu1 %v3914_v46  ;;  %v3743_v4 = vpop.f32.mrf.mxu0 }
 0xb86   :  { %4041 = vmatprep.subr.mxu1 %v3911_v48  ;;  %v3821_v44 = vcombine.low %v3741_v41, %v3743_v4  ;;  %v4143_v41 = vld [vmem:[#allocation5 + $0x158] sm:$0xff]  ;;  %v4140_v4 = vld [vmem:[#allocation5 + $0x140] sm:$0xff] }
 0xb87   :  { %4042 = vmatpush1.msra.mxu1 %v3910_v37 }
 0xb88   :  { %4043 = vmatprep.subr.mxu1 %v3907_v1  ;;  %v3829_v48 = vrot.slane %v3821_v44, %v7299_v27  ;;  %v4137_v44 = vld [vmem:[#allocation5 + $0x128] sm:$0xff] }
 0xb89   :  { %4044 = vmatpush1.msra.mxu1 %v3906_v7 }
 0xb8a   :  { %4045 = vmatprep.subr.mxu1 %v3903_v15 }
 0xb8b   :  { %4046 = vmatpush1.msra.mxu1 %v3902_v0 }
 0xb8c   :  { %4047 = vmatprep.subr.mxu1 %v3899_v23 }
 0xb8d   :  { %4048 = vmatpush1.msra.mxu1 %v3898_v42 }
 0xb8e   :  { %4049 = vmatprep.subr.mxu1 %v3895_v49 }
 0xb8f   :  { %4050 = vmatpush1.msra.mxu1 %v3894_v38 }
 0xb90   :  { %4051 = vmatprep.subr.mxu1 %v3891_v36 }
 0xb91   :  { %4052 = vmatpush1.msra.mxu1 %v3890_v62 }
 0xb92   :  { %4053 = vmatprep.subr.mxu1 %v3887_v2 }
 0xb93   :  { %4054 = vmatpush1.msra.mxu1 %v3886_v16 }
 0xb94   :  { %4055 = vmatprep.subr.mxu1 %v3883_v20  ;;  %v4162_v20 = vld [vmem:[#allocation5 + $0x1f0] sm:$0xff] }
 0xb95   :  { %4056 = vmatpush1.msra.mxu1 %v3882_v29  ;;  %v4159_v29 = vld [vmem:[#allocation5 + $0x1d8] sm:$0xff] }
 0xb96   :  { %4057 = vmatprep.subr.mxu1 %v3879_v32  ;;  %v4153_v32 = vld [vmem:[#allocation5 + $0x1a8] sm:$0xff] }
 0xb97   :  { %4058 = vmatpush1.msra.mxu1 %v3878_v35  ;;  %v4152_v35 = vld [vmem:[#allocation5 + $0x1a0] sm:$0xff] }
 0xb98   :  { %4059 = vmatprep.subr.mxu1 %v3875_v54  ;;  %v4149_v54 = vld [vmem:[#allocation5 + $0x188] sm:$0xff] }
 0xb99   :  { %4060 = vmatpush1.msra.mxu1 %v3874_v18  ;;  %v4148_v18 = vld [vmem:[#allocation5 + $0x180] sm:$0xff] }
 0xb9a   :  { %4235 = vmatprep.subr.mxu1 %v4163_v28  ;;  %v4145_v28 = vld [vmem:[#allocation5 + $0x168] sm:$0xff] }
 0xc1a   :  { %v3604_v33 = vpop.f32.mrf.mxu1 }
 0xc1b   :  { %v3605_v61 = vadd.f32 %v3604_v33, %v3537_v10  ;;  %v4147_v10 = vld [vmem:[#allocation5 + $0x178] sm:$0xff]  ;;  %v4144_v33 = vld [vmem:[#allocation5 + $0x160] sm:$0xff] }
 0xc1c   :  { %v6672_v39 = vpop.f32.mrf.mxu1 }
 0xc1d   :  { %3608 = vst [vmem:[#allocation14 + $0x3] sm:$0x1] %v3605_v61  ;;  %v4146_v61 = vld [vmem:[#allocation5 + $0x170] sm:$0xff]  ;;  %v4141_v39 = vld [vmem:[#allocation5 + $0x148] sm:$0xff] }
 0xc3a   :  { %v3812_v14 = vpop.f32.mrf.mxu1 }
 0xc3c   :  { %v3814_v46 = vpop.f32.mrf.mxu1 }
 0xc3d   :  { %v3822_v26 = vcombine.low %v3812_v14, %v3814_v46  ;;  %v4142_v14 = vld [vmem:[#allocation5 + $0x150] sm:$0xff]  ;;  %v4139_v46 = vld [vmem:[#allocation5 + $0x138] sm:$0xff] }
 0xc3f   :  { %v3836_v50 = vrot.slane %v3822_v26, %v7299_v27  ;;  %v4136_v26 = vld [vmem:[#allocation5 + $0x120] sm:$0xff] }
 0xc41   :  { %v3837_v37 = vcombine.low %v3829_v48, %v3836_v50  ;;  %v4138_v48 = vld [vmem:[#allocation5 + $0x130] sm:$0xff]  ;;  %v4133_v50 = vld [vmem:[#allocation5 + $0x108] sm:$0xff] }
 0xc43   :  { %v3844_v1 = vrot.slane %v3837_v37, %v7299_v27  ;;  %v4135_v37 = vld [vmem:[#allocation5 + $0x118] sm:$0xff] }
 0xc45   :  { %v3846_v59 = vadd.f32 %v3844_v1, %v3610_v3  ;;  %v4132_v3 = vld [vmem:[#allocation5 + $0x100] sm:$0xff]  ;;  %v4134_v1 = vld [vmem:[#allocation5 + $0x110] sm:$0xff] }
 0xc47   :  { %v3847_v7 = vmul.f32 0.5, %v3846_v59  ;;  %v3852_v58 = vrot.slane %v3846_v59, 1  ;;  %v3858_v5 = vrot.slane %v3846_v59, 2  ;;  %v3861_v0 = vrot.slane %v3846_v59, 3  ;;  %v4129_v59 = vld [vmem:[#allocation5 + $0xe8] sm:$0xff] }
 0xc49   :  { %6912 = vtanh.f32 %v3847_v7  ;;  %v3854_v15 = vmul.f32 0.5, %v3852_v58  ;;  %v3863_v17 = vmul.f32 0.5, %v3861_v0  ;;  %v4131_v7 = vld [vmem:[#allocation5 + $0xf8] sm:$0xff]  ;;  %v4128_v58 = vld [vmem:[#allocation5 + $0xe0] sm:$0xff] }
 0xc4a   :  { %v4127_v0 = vld [vmem:[#allocation5 + $0xd8] sm:$0xff] }
 0xc4b   :  { %6914 = vtanh.f32 %v3854_v15  ;;  %v4130_v15 = vld [vmem:[#allocation5 + $0xf0] sm:$0xff] }
 0xc4c   :  { %6916 = vtanh.f32 %v3858_v5  ;;  %v4125_v5 = vld [vmem:[#allocation5 + $0xc8] sm:$0xff] }
 0xc4d   :  { %6918 = vtanh.f32 %v3863_v17  ;;  %v4124_v17 = vld [vmem:[#allocation5 + $0xc0] sm:$0xff] }
 0xc56   :  { %v6913_v23 = vpop.eup %6912 }
 0xc57   :  { %v3849_v31 = vmul.f32 0.5, %v6913_v23  ;;  %v4126_v23 = vld [vmem:[#allocation5 + $0xd0] sm:$0xff] }
 0xc58   :  { %v6915_v42 = vpop.eup %6914 }
 0xc59   :  { %v3850_v45 = vadd.f32 0.5, %v3849_v31  ;;  %v3856_v49 = vmul.f32 0.5, %v6915_v42  ;;  %v6917_v38 = vpop.eup %6916  ;;  %v4121_v31 = vld [vmem:[#allocation5 + $0xa8] sm:$0xff]  ;;  %v4123_v42 = vld [vmem:[#allocation5 + $0xb8] sm:$0xff] }
 0xc5a   :  { %v6919_v62 = vpop.eup %6918 }
 0xc5b   :  { %v3857_v52 = vadd.f32 0.5, %v3856_v49  ;;  %v3868_v36 = vmul.f32 %v6917_v38, %v3850_v45  ;;  %v3865_v63 = vmul.f32 0.5, %v6919_v62  ;;  %v4120_v45 = vld [vmem:[#allocation5 + $0xa0] sm:$0xff]  ;;  %v4122_v49 = vld [vmem:[#allocation5 + $0xb0] sm:$0xff]  ;;  %v4119_v38 = vld [vmem:[#allocation5 + $0x98] sm:$0xff] }
 0xc5c   :  { %v4113_v62 = vld [vmem:[#allocation5 + $0x68] sm:$0xff] }
 0xc5d   :  { %v3867_v56 = vmul.f32 %v3857_v52, %v7721_v11  ;;  %v3866_v2 = vadd.f32 0.5, %v3865_v63  ;;  %v4156_v11 = vld [vmem:[#allocation5 + $0x1c0] sm:$0xff]  ;;  %v4117_v52 = vld [vmem:[#allocation5 + $0x88] sm:$0xff]  ;;  %v4115_v63 = vld [vmem:[#allocation5 + $0x78] sm:$0xff] }
 0xc5f   :  { %v7789_v60 = vadd.f32 %v3868_v36, %v3867_v56  ;;  %v4116_v56 = vld [vmem:[#allocation5 + $0x80] sm:$0xff]  ;;  %v4118_v36 = vld [vmem:[#allocation5 + $0x90] sm:$0xff] }
 0xc61   :  { %6920 = vtanh.f32 %v7789_v60 }
 0xc6e   :  { %v6921_v12 = vpop.eup %6920 }
 0xc6f   :  { %v7792_v16 = vmul.f32 %v6921_v12, %v3866_v2  ;;  %v4112_v2 = vld [vmem:[#allocation5 + $0x60] sm:$0xff]  ;;  %v4114_v12 = vld [vmem:[#allocation5 + $0x70] sm:$0xff] }
 0xc71   :  { %4023 = vmatmul.mubr.f32.vlgmr.msra.gmra.mxu0 %v7792_v16  ;;  %4094 = vmatmul.mubr.f32.vlgmr.msra.gmra.mxu1 %v7792_v16 }
 0xc72   :  { %4165 = vmatpush1.msra.mxu0 %v4160_v19  ;;  %4236 = vmatpush1.msra.mxu1 %v4162_v20  ;;  %v4109_v19 = vld [vmem:[#allocation5 + $0x48] sm:$0xff]  ;;  %v4111_v20 = vld [vmem:[#allocation5 + $0x58] sm:$0xff] }
 0xc73   :  { %4166 = vmatprep.subr.mxu0 %v4157_v24  ;;  %4237 = vmatprep.subr.mxu1 %v4159_v29  ;;  %v4108_v24 = vld [vmem:[#allocation5 + $0x40] sm:$0xff]  ;;  %v4110_v29 = vld [vmem:[#allocation5 + $0x50] sm:$0xff] }
 0xc74   :  { %4167 = vmatpush1.msra.mxu0 %v4156_v11  ;;  %4238 = vmatpush1.msra.mxu1 %v4158_v53  ;;  %v4105_v11 = vld [vmem:[#allocation5 + $0x28] sm:$0xff]  ;;  %v4107_v53 = vld [vmem:[#allocation5 + $0x38] sm:$0xff] }
 0xc75   :  { %4168 = vmatprep.subr.mxu0 %v4153_v32  ;;  %4239 = vmatprep.subr.mxu1 %v4155_v34  ;;  %v4104_v32 = vld [vmem:[#allocation5 + $0x20] sm:$0xff]  ;;  %v4106_v34 = vld [vmem:[#allocation5 + $0x30] sm:$0xff] }
 0xc76   :  { %4169 = vmatpush1.msra.mxu0 %v4152_v35  ;;  %4240 = vmatpush1.msra.mxu1 %v4154_v25  ;;  %v4101_v35 = vld [vmem:[#allocation5 + $0x8] sm:$0xff]  ;;  %v4103_v25 = vld [vmem:[#allocation5 + $0x18] sm:$0xff] }
 0xc77   :  { %4170 = vmatprep.subr.mxu0 %v4149_v54  ;;  %4241 = vmatprep.subr.mxu1 %v4151_v6  ;;  %v4100_v54 = vld [vmem:[#allocation5] sm:$0xff]  ;;  %v4102_v6 = vld [vmem:[#allocation5 + $0x10] sm:$0xff] }
 0xc78   :  { %4171 = vmatpush1.msra.mxu0 %v4148_v18  ;;  %4242 = vmatpush1.msra.mxu1 %v4150_v21  ;;  %v4480_v18 = vld [vmem:[#allocation3 + $0x1e8] sm:$0xff]  ;;  %v4479_v21 = vld [vmem:[#allocation3 + $0x1e0] sm:$0xff] }
 0xc79   :  { %4172 = vmatprep.subr.mxu0 %v4145_v28  ;;  %4243 = vmatprep.subr.mxu1 %v4147_v10  ;;  %v4476_v28 = vld [vmem:[#allocation3 + $0x1c8] sm:$0xff]  ;;  %v4475_v10 = vld [vmem:[#allocation3 + $0x1c0] sm:$0xff] }
 0xc7a   :  { %4173 = vmatpush1.msra.mxu0 %v4144_v33  ;;  %4244 = vmatpush1.msra.mxu1 %v4146_v61  ;;  %v4472_v33 = vld [vmem:[#allocation3 + $0x1a8] sm:$0xff]  ;;  %v4471_v61 = vld [vmem:[#allocation3 + $0x1a0] sm:$0xff] }
 0xc7b   :  { %4174 = vmatprep.subr.mxu0 %v4141_v39  ;;  %4245 = vmatprep.subr.mxu1 %v4143_v41  ;;  %v4468_v39 = vld [vmem:[#allocation3 + $0x188] sm:$0xff]  ;;  %v4467_v41 = vld [vmem:[#allocation3 + $0x180] sm:$0xff] }
 0xc7c   :  { %4175 = vmatpush1.msra.mxu0 %v4140_v4  ;;  %4246 = vmatpush1.msra.mxu1 %v4142_v14  ;;  %v4463_v4 = vld [vmem:[#allocation3 + $0x160] sm:$0xff]  ;;  %v4460_v14 = vld [vmem:[#allocation3 + $0x148] sm:$0xff] }
 0xc7d   :  { %4176 = vmatprep.subr.mxu0 %v4137_v44  ;;  %4247 = vmatprep.subr.mxu1 %v4139_v46  ;;  %v4459_v44 = vld [vmem:[#allocation3 + $0x140] sm:$0xff]  ;;  %v4456_v46 = vld [vmem:[#allocation3 + $0x128] sm:$0xff] }
 0xc7e   :  { %4177 = vmatpush1.msra.mxu0 %v4136_v26  ;;  %4248 = vmatpush1.msra.mxu1 %v4138_v48  ;;  %v4455_v26 = vld [vmem:[#allocation3 + $0x120] sm:$0xff]  ;;  %v4452_v48 = vld [vmem:[#allocation3 + $0x108] sm:$0xff] }
 0xc7f   :  { %4178 = vmatprep.subr.mxu0 %v4133_v50  ;;  %4249 = vmatprep.subr.mxu1 %v4135_v37  ;;  %v4451_v50 = vld [vmem:[#allocation3 + $0x100] sm:$0xff]  ;;  %v4448_v37 = vld [vmem:[#allocation3 + $0xe8] sm:$0xff] }
 0xc80   :  { %4179 = vmatpush1.msra.mxu0 %v4132_v3  ;;  %4250 = vmatpush1.msra.mxu1 %v4134_v1  ;;  %v4447_v3 = vld [vmem:[#allocation3 + $0xe0] sm:$0xff]  ;;  %v4444_v1 = vld [vmem:[#allocation3 + $0xc8] sm:$0xff] }
 0xc81   :  { %4180 = vmatprep.subr.mxu0 %v4129_v59  ;;  %4251 = vmatprep.subr.mxu1 %v4131_v7  ;;  %v4443_v59 = vld [vmem:[#allocation3 + $0xc0] sm:$0xff]  ;;  %v4440_v7 = vld [vmem:[#allocation3 + $0xa8] sm:$0xff] }
 0xc82   :  { %4181 = vmatpush1.msra.mxu0 %v4128_v58  ;;  %4252 = vmatpush1.msra.mxu1 %v4130_v15  ;;  %v4439_v58 = vld [vmem:[#allocation3 + $0xa0] sm:$0xff]  ;;  %v4436_v15 = vld [vmem:[#allocation3 + $0x88] sm:$0xff] }
 0xc83   :  { %4182 = vmatprep.subr.mxu0 %v4125_v5  ;;  %4253 = vmatprep.subr.mxu1 %v4127_v0  ;;  %v4435_v5 = vld [vmem:[#allocation3 + $0x80] sm:$0xff]  ;;  %v4432_v0 = vld [vmem:[#allocation3 + $0x68] sm:$0xff] }
 0xc84   :  { %4183 = vmatpush1.msra.mxu0 %v4124_v17  ;;  %4254 = vmatpush1.msra.mxu1 %v4126_v23  ;;  %v4431_v17 = vld [vmem:[#allocation3 + $0x60] sm:$0xff]  ;;  %v4428_v23 = vld [vmem:[#allocation3 + $0x48] sm:$0xff] }
 0xc85   :  { %4184 = vmatprep.subr.mxu0 %v4121_v31  ;;  %4255 = vmatprep.subr.mxu1 %v4123_v42  ;;  %v4427_v31 = vld [vmem:[#allocation3 + $0x40] sm:$0xff]  ;;  %v4424_v42 = vld [vmem:[#allocation3 + $0x28] sm:$0xff] }
 0xc86   :  { %4185 = vmatpush1.msra.mxu0 %v4120_v45  ;;  %4256 = vmatpush1.msra.mxu1 %v4122_v49  ;;  %v4423_v45 = vld [vmem:[#allocation3 + $0x20] sm:$0xff]  ;;  %v4420_v49 = vld [vmem:[#allocation3 + $0x8] sm:$0xff] }
 0xc87   :  { %4186 = vmatprep.subr.mxu0 %v4117_v52  ;;  %4257 = vmatprep.subr.mxu1 %v4119_v38  ;;  %v4419_v52 = vld [vmem:[#allocation3] sm:$0xff]  ;;  %v4344_v38 = vld [vmem:[#allocation6 + $0x78] sm:$0xff] }
 0xc88   :  { %4187 = vmatpush1.msra.mxu0 %v4116_v56  ;;  %4258 = vmatpush1.msra.mxu1 %v4118_v36  ;;  %v4343_v56 = vld [vmem:[#allocation6 + $0x70] sm:$0xff]  ;;  %v4342_v36 = vld [vmem:[#allocation6 + $0x68] sm:$0xff] }
 0xc89   :  { %4188 = vmatprep.subr.mxu0 %v4113_v62  ;;  %4259 = vmatprep.subr.mxu1 %v4115_v63  ;;  %v4341_v62 = vld [vmem:[#allocation6 + $0x60] sm:$0xff]  ;;  %v4340_v63 = vld [vmem:[#allocation6 + $0x58] sm:$0xff] }
 0xc8a   :  { %4189 = vmatpush1.msra.mxu0 %v4112_v2  ;;  %4260 = vmatpush1.msra.mxu1 %v4114_v12  ;;  %v4339_v2 = vld [vmem:[#allocation6 + $0x50] sm:$0xff]  ;;  %v4338_v12 = vld [vmem:[#allocation6 + $0x48] sm:$0xff] }
 0xc8b   :  { %4190 = vmatprep.subr.mxu0 %v4109_v19  ;;  %4261 = vmatprep.subr.mxu1 %v4111_v20  ;;  %v4337_v19 = vld [vmem:[#allocation6 + $0x40] sm:$0xff]  ;;  %v4336_v20 = vld [vmem:[#allocation6 + $0x38] sm:$0xff] }
 0xc8c   :  { %4191 = vmatpush1.msra.mxu0 %v4108_v24  ;;  %4262 = vmatpush1.msra.mxu1 %v4110_v29  ;;  %v4335_v24 = vld [vmem:[#allocation6 + $0x30] sm:$0xff]  ;;  %v4334_v29 = vld [vmem:[#allocation6 + $0x28] sm:$0xff] }
 0xc8d   :  { %4192 = vmatprep.subr.mxu0 %v4105_v11  ;;  %4263 = vmatprep.subr.mxu1 %v4107_v53  ;;  %v4333_v11 = vld [vmem:[#allocation6 + $0x20] sm:$0xff]  ;;  %v4332_v53 = vld [vmem:[#allocation6 + $0x18] sm:$0xff] }
 0xc8e   :  { %4193 = vmatpush1.msra.mxu0 %v4104_v32  ;;  %4264 = vmatpush1.msra.mxu1 %v4106_v34  ;;  %v4331_v32 = vld [vmem:[#allocation6 + $0x10] sm:$0xff]  ;;  %v4330_v34 = vld [vmem:[#allocation6 + $0x8] sm:$0xff] }
 0xc8f   :  { %4194 = vmatprep.subr.mxu0 %v4101_v35  ;;  %4265 = vmatprep.subr.mxu1 %v4103_v25  ;;  %v4329_v35 = vld [vmem:[#allocation6] sm:$0xff]  ;;  %v4482_v25 = vld [vmem:[#allocation3 + $0x1f8] sm:$0xff] }
 0xc90   :  { %4195 = vmatpush1.msra.mxu0 %v4100_v54  ;;  %4228 = vmatprep.mubr.f32.mxu0 %v8416_v8  ;;  %v3128_v54 = vld [vmem:[%s8336_s5] sm:$0xf] }
 0xc91   :  { %4266 = vmatpush1.msra.mxu1 %v4102_v6  ;;  %4299 = vmatprep.mubr.f32.mxu1 %v8416_v8 }
 0xc92   :  { %4229 = vmatmul.mubr.f32.vlgmr.msra.gmra.mxu0 %v7776_v40  ;;  %4300 = vmatmul.mubr.f32.vlgmr.msra.gmra.mxu1 %v7776_v40  ;;  %v4464_v40 = vld [vmem:[#allocation3 + $0x168] sm:$0xff] }
 0xc93   :  { %4483 = vmatprep.subr.mxu1 %v4480_v18  ;;  %4547 = vmatprep.mubr.f32.mxu1 %v8416_v8  ;;  %v3133_v18 = vrot.slane %v3128_v54, %v8437_v22 }
 0xc94   :  { %4484 = vmatpush1.msra.mxu1 %v4479_v21  ;;  %6673 = vmatprep.subr.mxu0 %v8416_v8 }
 0xc95   :  { %4485 = vmatprep.subr.mxu1 %v4476_v28  ;;  %6705 = vmatprep.mubr.msk.f32.mxu0 %vm7176_vm0, %v8416_v8  ;;  %v3137_v28 = vrot.slane %v3128_v54, %v8438_v51 }
 0xc96   :  { %4486 = vmatpush1.msra.mxu1 %v4475_v10  ;;  %6674 = vmatpush3.msra.mxu0 %v4344_v38 }
 0xc97   :  { %4487 = vmatprep.subr.mxu1 %v4472_v33  ;;  %6675 = vmatprep.subr.mxu0 %v8416_v8  ;;  %v3217_v33 = vadd.f32 %v7756_v9, %v3133_v18  ;;  %v4446_v18 = vld [vmem:[#allocation3 + $0xd8] sm:$0xff] }
 0xc98   :  { %4488 = vmatpush1.msra.mxu1 %v4471_v61  ;;  %6676 = vmatpush3.msra.mxu0 %v4343_v56  ;;  %v3141_v61 = vrot.slane %v3128_v54, %v8439_v43 }
 0xc99   :  { %4489 = vmatprep.subr.mxu1 %v4468_v39  ;;  %6677 = vmatprep.subr.mxu0 %v8416_v8 }
 0xc9a   :  { %4490 = vmatpush1.msra.mxu1 %v4467_v41  ;;  %6678 = vmatpush3.msra.mxu0 %v4342_v36  ;;  %v4481_v36 = vld [vmem:[#allocation3 + $0x1f0] sm:$0xff] }
 0xc9b   :  { %4491 = vmatprep.subr.mxu1 %v4464_v40  ;;  %6679 = vmatprep.subr.mxu0 %v8416_v8  ;;  %v3219_v40 = vadd.f32 %v7762_v55, %v3137_v28  ;;  %v4445_v28 = vld [vmem:[#allocation3 + $0xd0] sm:$0xff] }
 0xc9c   :  { %4492 = vmatpush1.msra.mxu1 %v4463_v4  ;;  %6680 = vmatpush3.msra.mxu0 %v4341_v62  ;;  %v4478_v62 = vld [vmem:[#allocation3 + $0x1d8] sm:$0xff] }
 0xc9d   :  { %4493 = vmatprep.subr.mxu1 %v4460_v14  ;;  %6681 = vmatprep.subr.mxu0 %v8416_v8 }
 0xc9e   :  { %4494 = vmatpush1.msra.mxu1 %v4459_v44  ;;  %6682 = vmatpush3.msra.mxu0 %v4340_v63  ;;  %v4477_v63 = vld [vmem:[#allocation3 + $0x1d0] sm:$0xff] }
 0xc9f   :  { %4495 = vmatprep.subr.mxu1 %v4456_v46  ;;  %6683 = vmatprep.subr.mxu0 %v8416_v8  ;;  %v3288_v46 = vadd.f32 %v7759_v13, %v3141_v61  ;;  %v4441_v61 = vld [vmem:[#allocation3 + $0xb0] sm:$0xff] }
 0xca0   :  { %4496 = vmatpush1.msra.mxu1 %v4455_v26  ;;  %6684 = vmatpush3.msra.mxu0 %v4339_v2  ;;  %v4474_v2 = vld [vmem:[#allocation3 + $0x1b8] sm:$0xff] }
 0xca1   :  { %4497 = vmatprep.subr.mxu1 %v4452_v48  ;;  %6685 = vmatprep.subr.mxu0 %v8416_v8 }
 0xca2   :  { %4498 = vmatpush1.msra.mxu1 %v4451_v50  ;;  %6686 = vmatpush3.msra.mxu0 %v4338_v12  ;;  %v4470_v12 = vld [vmem:[#allocation3 + $0x198] sm:$0xff] }
 0xca3   :  { %4499 = vmatprep.subr.mxu1 %v4448_v37  ;;  %6687 = vmatprep.subr.mxu0 %v8416_v8 }
 0xca4   :  { %4500 = vmatpush1.msra.mxu1 %v4447_v3  ;;  %6688 = vmatpush3.msra.mxu0 %v4337_v19  ;;  %v3145_v3 = vrot.slane %v3128_v54, %v8440_v57  ;;  %v4469_v19 = vld [vmem:[#allocation3 + $0x190] sm:$0xff] }
 0xca5   :  { %4501 = vmatprep.subr.mxu1 %v4444_v1  ;;  %6689 = vmatprep.subr.mxu0 %v8416_v8  ;;  %v4449_v54 = vld [vmem:[#allocation3 + $0xf0] sm:$0xff] }
 0xca6   :  { %4502 = vmatpush1.msra.mxu1 %v4443_v59  ;;  %6690 = vmatpush3.msra.mxu0 %v4336_v20  ;;  %v3290_v1 = vadd.f32 %v7766_v47, %v3145_v3  ;;  %v4466_v20 = vld [vmem:[#allocation3 + $0x178] sm:$0xff]  ;;  %v4741_v3 = vld [vmem:[#allocation4 + $0x1e8] sm:$0xff] }
 0xca7   :  { %4503 = vmatprep.subr.mxu1 %v4440_v7  ;;  %6691 = vmatprep.subr.mxu0 %v8416_v8 }
 0xca8   :  { %4504 = vmatpush1.msra.mxu1 %v4439_v58  ;;  %6692 = vmatpush3.msra.mxu0 %v4335_v24  ;;  %v4465_v24 = vld [vmem:[#allocation3 + $0x170] sm:$0xff] }
 0xca9   :  { %4505 = vmatprep.subr.mxu1 %v4436_v15  ;;  %6693 = vmatprep.subr.mxu0 %v8416_v8 }
 0xcaa   :  { %4506 = vmatpush1.msra.mxu1 %v4435_v5  ;;  %6694 = vmatpush3.msra.mxu0 %v4334_v29  ;;  %v4462_v29 = vld [vmem:[#allocation3 + $0x158] sm:$0xff] }
 0xcab   :  { %4507 = vmatprep.subr.mxu1 %v4432_v0  ;;  %6695 = vmatprep.subr.mxu0 %v8416_v8 }
 0xcac   :  { %4508 = vmatpush1.msra.mxu1 %v4431_v17  ;;  %6696 = vmatpush3.msra.mxu0 %v4333_v11  ;;  %v4461_v11 = vld [vmem:[#allocation3 + $0x150] sm:$0xff] }
 0xcad   :  { %4509 = vmatprep.subr.mxu1 %v4428_v23  ;;  %6697 = vmatprep.subr.mxu0 %v8416_v8 }
 0xcae   :  { %4510 = vmatpush1.msra.mxu1 %v4427_v31  ;;  %6698 = vmatpush3.msra.mxu0 %v4332_v53  ;;  %v4458_v53 = vld [vmem:[#allocation3 + $0x138] sm:$0xff] }
 0xcaf   :  { %4511 = vmatprep.subr.mxu1 %v4424_v42  ;;  %6699 = vmatprep.subr.mxu0 %v8416_v8 }
 0xcb0   :  { %4512 = vmatpush1.msra.mxu1 %v4423_v45  ;;  %6700 = vmatpush3.msra.mxu0 %v4331_v32  ;;  %v4457_v32 = vld [vmem:[#allocation3 + $0x130] sm:$0xff] }
 0xcb1   :  { %4513 = vmatprep.subr.mxu1 %v4420_v49  ;;  %6701 = vmatprep.subr.mxu0 %v8416_v8 }
 0xcb2   :  { %4514 = vmatpush1.msra.mxu1 %v4419_v52  ;;  %6702 = vmatpush3.msra.mxu0 %v4330_v34  ;;  %v4454_v34 = vld [vmem:[#allocation3 + $0x118] sm:$0xff] }
 0xcb3   :  { %4548 = vmatmul.mubr.f32.vlgmr.msra.gmra.mxu1 %v7792_v16  ;;  %6703 = vmatprep.subr.mxu0 %v8416_v8 }
 0xcb4   :  { %4830 = vmatprep.mubr.f32.mxu1 %v8416_v8  ;;  %6704 = vmatpush3.msra.mxu0 %v4329_v35  ;;  %v4453_v35 = vld [vmem:[#allocation3 + $0x110] sm:$0xff] }
 0xcb5   :  { %4554 = vmatprep.subr.mxu0 %v4482_v25  ;;  %v4450_v25 = vld [vmem:[#allocation3 + $0xf8] sm:$0xff]  ;;  %4766 = vmatprep.subr.mxu1 %v4741_v3  ;;  %v4694_v3 = vld [vmem:[#allocation4 + $0x70] sm:$0xff] }
 0xd31   :  { %v7824_v6 = vpop.f32.mrf.mxu0  ;;  %v7827_v21 = vpop.f32.mrf.mxu1 }
 0xd33   :  { %v7830_v10 = vpop.f32.mrf.mxu0  ;;  %v7834_v39 = vpop.f32.mrf.mxu1 }
 0xd52   :  { %v4230_v41 = vpop.f32.mrf.mxu0  ;;  %v4301_v14 = vpop.f32.mrf.mxu1 }
 0xd53   :  { %v4306_v4 = vadd.f32 %v4230_v41, %v3217_v33  ;;  %v4308_v50 = vadd.f32 %v4301_v14, %v3288_v46  ;;  %v4442_v33 = vld [vmem:[#allocation3 + $0xb8] sm:$0xff]  ;;  %v4433_v14 = vld [vmem:[#allocation3 + $0x70] sm:$0xff] }
 0xd54   :  { %v4232_v44 = vpop.f32.mrf.mxu0  ;;  %v4303_v9 = vpop.f32.mrf.mxu1  ;;  %v4438_v41 = vld [vmem:[#allocation3 + $0x98] sm:$0xff]  ;;  %v4429_v46 = vld [vmem:[#allocation3 + $0x50] sm:$0xff] }
 0xd55   :  { %v4310_v26 = vmul.f32 0.5, %v4306_v4  ;;  %v4307_v48 = vadd.f32 %v4232_v44, %v3219_v40  ;;  %v4309_v59 = vadd.f32 %v4303_v9, %v3290_v1  ;;  %v4437_v40 = vld [vmem:[#allocation3 + $0x90] sm:$0xff]  ;;  %v4434_v4 = vld [vmem:[#allocation3 + $0x78] sm:$0xff]  ;;  %v4740_v1 = vld [vmem:[#allocation4 + $0x1e0] sm:$0xff] }
 0xd56   :  { %v4430_v44 = vld [vmem:[#allocation3 + $0x58] sm:$0xff]  ;;  %4767 = vmatpush1.msra.mxu1 %v4740_v1 }
 0xd57   :  { %6922 = vtanh.f32 %v4310_v26  ;;  %v4314_v37 = vmul.f32 0.5, %v4307_v48  ;;  %v4319_v7 = vmul.f32 0.5, %v4309_v59  ;;  %v4426_v26 = vld [vmem:[#allocation3 + $0x38] sm:$0xff]  ;;  %v4425_v48 = vld [vmem:[#allocation3 + $0x30] sm:$0xff] }
 0xd58   :  { %v4743_v9 = vld [vmem:[#allocation4 + $0x1f8] sm:$0xff]  ;;  %v4742_v59 = vld [vmem:[#allocation4 + $0x1f0] sm:$0xff] }
 0xd59   :  { %6924 = vtanh.f32 %v4314_v37  ;;  %v4421_v37 = vld [vmem:[#allocation3 + $0x10] sm:$0xff]  ;;  %v4691_v1 = vld [vmem:[#allocation4 + $0x58] sm:$0xff] }
 0xd5a   :  { %6926 = vtanh.f32 %v4308_v50  ;;  %v4422_v50 = vld [vmem:[#allocation3 + $0x18] sm:$0xff] }
 0xd5b   :  { %6928 = vtanh.f32 %v4319_v7  ;;  %v4737_v7 = vld [vmem:[#allocation4 + $0x1c8] sm:$0xff] }
 0xd5c   :  { %4768 = vmatprep.subr.mxu1 %v4737_v7  ;;  %v4690_v7 = vld [vmem:[#allocation4 + $0x50] sm:$0xff] }
 0xd64   :  { %v6923_v55 = vpop.eup %6922 }
 0xd65   :  { %v4312_v58 = vmul.f32 0.5, %v6923_v55  ;;  %v4739_v55 = vld [vmem:[#allocation4 + $0x1d8] sm:$0xff] }
 0xd66   :  { %v6925_v15 = vpop.eup %6924 }
 0xd67   :  { %v4313_v5 = vadd.f32 0.5, %v4312_v58  ;;  %v4316_v0 = vmul.f32 0.5, %v6925_v15  ;;  %v6927_v13 = vpop.eup %6926  ;;  %v4736_v58 = vld [vmem:[#allocation4 + $0x1c0] sm:$0xff]  ;;  %v4738_v15 = vld [vmem:[#allocation4 + $0x1d0] sm:$0xff] }
 0xd68   :  { %v6929_v45 = vpop.eup %6928  ;;  %4769 = vmatpush1.msra.mxu1 %v4736_v58  ;;  %v4687_v58 = vld [vmem:[#allocation4 + $0x38] sm:$0xff] }
 0xd69   :  { %v4317_v17 = vadd.f32 0.5, %v4316_v0  ;;  %v4324_v23 = vmul.f32 %v6927_v13, %v4313_v5  ;;  %v4321_v49 = vmul.f32 0.5, %v6929_v45  ;;  %v4733_v5 = vld [vmem:[#allocation4 + $0x1a8] sm:$0xff]  ;;  %v4732_v0 = vld [vmem:[#allocation4 + $0x1a0] sm:$0xff]  ;;  %v4734_v13 = vld [vmem:[#allocation4 + $0x1b0] sm:$0xff] }
 0xd6a   :  { %4770 = vmatprep.subr.mxu1 %v4733_v5  ;;  %v4730_v45 = vld [vmem:[#allocation4 + $0x190] sm:$0xff] }
 0xd6b   :  { %v4323_v31 = vmul.f32 %v4317_v17, %v7773_v30  ;;  %v4322_v47 = vadd.f32 0.5, %v4321_v49  ;;  %v4473_v30 = vld [vmem:[#allocation3 + $0x1b0] sm:$0xff]  ;;  %4771 = vmatpush1.msra.mxu1 %v4732_v0  ;;  %v4729_v17 = vld [vmem:[#allocation4 + $0x188] sm:$0xff]  ;;  %v4683_v0 = vld [vmem:[#allocation4 + $0x18] sm:$0xff] }
 0xd6c   :  { %4772 = vmatprep.subr.mxu1 %v4729_v17  ;;  %v4725_v49 = vld [vmem:[#allocation4 + $0x168] sm:$0xff]  ;;  %v4686_v5 = vld [vmem:[#allocation4 + $0x30] sm:$0xff] }
 0xd6d   :  { %v7841_v42 = vadd.f32 %v4324_v23, %v4323_v31  ;;  %v4731_v23 = vld [vmem:[#allocation4 + $0x198] sm:$0xff]  ;;  %v4728_v31 = vld [vmem:[#allocation4 + $0x180] sm:$0xff]  ;;  %v4682_v17 = vld [vmem:[#allocation4 + $0x10] sm:$0xff] }
 0xd6e   :  { %4773 = vmatpush1.msra.mxu1 %v4728_v31  ;;  %v4971_v31 = vld [vmem:[#allocation5 + $0x1f8] sm:$0xff] }
 0xd6f   :  { %6930 = vtanh.f32 %v7841_v42  ;;  %4774 = vmatprep.subr.mxu1 %v4725_v49 }
 0xd7c   :  { %v6931_v52 = vpop.eup %6930 }
 0xd7d   :  { %v7844_v38 = vmul.f32 %v6931_v52, %v4322_v47  ;;  %v4727_v47 = vld [vmem:[#allocation4 + $0x178] sm:$0xff]  ;;  %v4724_v52 = vld [vmem:[#allocation4 + $0x160] sm:$0xff] }
 0xd7e   :  { %4775 = vmatpush1.msra.mxu1 %v4724_v52 }
 0xd7f   :  { %v4328_v56 = vmax.f32 %v7844_v38, 0.0 }
 0xd81   :  { %6706 = vmatmul.mubr.f32.vlgmr.msra.gmra.mxu0 %v4328_v56  ;;  %v4726_v56 = vld [vmem:[#allocation4 + $0x170] sm:$0xff] }
 0xd82   :  { %4555 = vmatpush1.msra.mxu0 %v4481_v36  ;;  %4618 = vmatprep.mubr.f32.mxu0 %v8416_v8  ;;  %v4721_v36 = vld [vmem:[#allocation4 + $0x148] sm:$0xff] }
 0xd83   :  { %4556 = vmatprep.subr.mxu0 %v4478_v62  ;;  %v4723_v62 = vld [vmem:[#allocation4 + $0x158] sm:$0xff]  ;;  %4776 = vmatprep.subr.mxu1 %v4721_v36 }
 0xd84   :  { %4557 = vmatpush1.msra.mxu0 %v4477_v63  ;;  %v4720_v63 = vld [vmem:[#allocation4 + $0x140] sm:$0xff] }
 0xd85   :  { %4558 = vmatprep.subr.mxu0 %v4474_v2  ;;  %v4722_v2 = vld [vmem:[#allocation4 + $0x150] sm:$0xff]  ;;  %4777 = vmatpush1.msra.mxu1 %v4720_v63 }
 0xd86   :  { %4559 = vmatpush1.msra.mxu0 %v4473_v30  ;;  %v4717_v30 = vld [vmem:[#allocation4 + $0x128] sm:$0xff] }
 0xd87   :  { %4560 = vmatprep.subr.mxu0 %v4470_v12  ;;  %v4719_v12 = vld [vmem:[#allocation4 + $0x138] sm:$0xff]  ;;  %4778 = vmatprep.subr.mxu1 %v4717_v30 }
 0xd88   :  { %4561 = vmatpush1.msra.mxu0 %v4469_v19  ;;  %v4716_v19 = vld [vmem:[#allocation4 + $0x120] sm:$0xff] }
 0xd89   :  { %4562 = vmatprep.subr.mxu0 %v4466_v20  ;;  %v4718_v20 = vld [vmem:[#allocation4 + $0x130] sm:$0xff]  ;;  %4779 = vmatpush1.msra.mxu1 %v4716_v19 }
 0xd8a   :  { %4563 = vmatpush1.msra.mxu0 %v4465_v24  ;;  %v4713_v24 = vld [vmem:[#allocation4 + $0x108] sm:$0xff] }
 0xd8b   :  { %4564 = vmatprep.subr.mxu0 %v4462_v29  ;;  %v4715_v29 = vld [vmem:[#allocation4 + $0x118] sm:$0xff]  ;;  %4780 = vmatprep.subr.mxu1 %v4713_v24 }
 0xd8c   :  { %4565 = vmatpush1.msra.mxu0 %v4461_v11  ;;  %v4712_v11 = vld [vmem:[#allocation4 + $0x100] sm:$0xff] }
 0xd8d   :  { %4566 = vmatprep.subr.mxu0 %v4458_v53  ;;  %v4714_v53 = vld [vmem:[#allocation4 + $0x110] sm:$0xff]  ;;  %4781 = vmatpush1.msra.mxu1 %v4712_v11 }
 0xd8e   :  { %4567 = vmatpush1.msra.mxu0 %v4457_v32  ;;  %v4709_v32 = vld [vmem:[#allocation4 + $0xe8] sm:$0xff] }
 0xd8f   :  { %4568 = vmatprep.subr.mxu0 %v4454_v34  ;;  %v4711_v34 = vld [vmem:[#allocation4 + $0xf8] sm:$0xff]  ;;  %4782 = vmatprep.subr.mxu1 %v4709_v32 }
 0xd90   :  { %4569 = vmatpush1.msra.mxu0 %v4453_v35  ;;  %v4708_v35 = vld [vmem:[#allocation4 + $0xe0] sm:$0xff] }
 0xd91   :  { %4570 = vmatprep.subr.mxu0 %v4450_v25  ;;  %v4710_v25 = vld [vmem:[#allocation4 + $0xf0] sm:$0xff]  ;;  %4783 = vmatpush1.msra.mxu1 %v4708_v35 }
 0xd92   :  { %4571 = vmatpush1.msra.mxu0 %v4449_v54  ;;  %v4705_v54 = vld [vmem:[#allocation4 + $0xc8] sm:$0xff] }
 0xd93   :  { %4572 = vmatprep.subr.mxu0 %v4446_v18  ;;  %v4707_v18 = vld [vmem:[#allocation4 + $0xd8] sm:$0xff]  ;;  %4784 = vmatprep.subr.mxu1 %v4705_v54 }
 0xd94   :  { %4573 = vmatpush1.msra.mxu0 %v4445_v28  ;;  %v4704_v28 = vld [vmem:[#allocation4 + $0xc0] sm:$0xff] }
 0xd95   :  { %4574 = vmatprep.subr.mxu0 %v4442_v33  ;;  %v4706_v33 = vld [vmem:[#allocation4 + $0xd0] sm:$0xff]  ;;  %4785 = vmatpush1.msra.mxu1 %v4704_v28 }
 0xd96   :  { %4575 = vmatpush1.msra.mxu0 %v4441_v61  ;;  %v4701_v61 = vld [vmem:[#allocation4 + $0xa8] sm:$0xff] }
 0xd97   :  { %4576 = vmatprep.subr.mxu0 %v4438_v41  ;;  %v4703_v41 = vld [vmem:[#allocation4 + $0xb8] sm:$0xff]  ;;  %4786 = vmatprep.subr.mxu1 %v4701_v61 }
 0xd98   :  { %4577 = vmatpush1.msra.mxu0 %v4437_v40  ;;  %v4700_v40 = vld [vmem:[#allocation4 + $0xa0] sm:$0xff] }
 0xd99   :  { %4578 = vmatprep.subr.mxu0 %v4434_v4  ;;  %v4702_v4 = vld [vmem:[#allocation4 + $0xb0] sm:$0xff]  ;;  %4787 = vmatpush1.msra.mxu1 %v4700_v40 }
 0xd9a   :  { %4579 = vmatpush1.msra.mxu0 %v4433_v14  ;;  %v4697_v14 = vld [vmem:[#allocation4 + $0x88] sm:$0xff] }
 0xd9b   :  { %4580 = vmatprep.subr.mxu0 %v4430_v44  ;;  %v4699_v44 = vld [vmem:[#allocation4 + $0x98] sm:$0xff]  ;;  %4788 = vmatprep.subr.mxu1 %v4697_v14 }
 0xd9c   :  { %4581 = vmatpush1.msra.mxu0 %v4429_v46  ;;  %v4696_v46 = vld [vmem:[#allocation4 + $0x80] sm:$0xff] }
 0xd9d   :  { %4582 = vmatprep.subr.mxu0 %v4426_v26  ;;  %v4698_v26 = vld [vmem:[#allocation4 + $0x90] sm:$0xff]  ;;  %4789 = vmatpush1.msra.mxu1 %v4696_v46 }
 0xd9e   :  { %4583 = vmatpush1.msra.mxu0 %v4425_v48  ;;  %v4693_v48 = vld [vmem:[#allocation4 + $0x68] sm:$0xff] }
 0xd9f   :  { %4584 = vmatprep.subr.mxu0 %v4422_v50  ;;  %v4695_v50 = vld [vmem:[#allocation4 + $0x78] sm:$0xff]  ;;  %4790 = vmatprep.subr.mxu1 %v4693_v48 }
 0xda0   :  { %4585 = vmatpush1.msra.mxu0 %v4421_v37  ;;  %v4692_v37 = vld [vmem:[#allocation4 + $0x60] sm:$0xff] }
 0xda1   :  { %4619 = vmatmul.mubr.f32.vlgmr.msra.gmra.mxu0 %v7792_v16  ;;  %4837 = vmatprep.subr.mxu0 %v4743_v9  ;;  %v4735_v16 = vld [vmem:[#allocation4 + $0x1b8] sm:$0xff]  ;;  %v4689_v9 = vld [vmem:[#allocation4 + $0x48] sm:$0xff] }
 0xda2   :  { %4901 = vmatprep.mubr.f32.mxu0 %v8416_v8  ;;  %4838 = vmatpush1.msra.mxu0 %v4742_v59  ;;  %v4688_v59 = vld [vmem:[#allocation4 + $0x40] sm:$0xff] }
 0xda3   :  { %4839 = vmatprep.subr.mxu0 %v4739_v55  ;;  %4791 = vmatpush1.msra.mxu1 %v4692_v37  ;;  %v4685_v55 = vld [vmem:[#allocation4 + $0x28] sm:$0xff] }
 0xda4   :  { %4840 = vmatpush1.msra.mxu0 %v4738_v15  ;;  %4792 = vmatprep.subr.mxu1 %v4689_v9  ;;  %v4684_v15 = vld [vmem:[#allocation4 + $0x20] sm:$0xff] }
 0xda5   :  { %4841 = vmatprep.subr.mxu0 %v4735_v16  ;;  %4793 = vmatpush1.msra.mxu1 %v4688_v59  ;;  %v4681_v16 = vld [vmem:[#allocation4 + $0x8] sm:$0xff]  ;;  %v4968_v9 = vld [vmem:[#allocation5 + $0x1e0] sm:$0xff] }
 0xda6   :  { %4842 = vmatpush1.msra.mxu0 %v4734_v13  ;;  %4794 = vmatprep.subr.mxu1 %v4685_v55  ;;  %v4680_v13 = vld [vmem:[#allocation4] sm:$0xff]  ;;  %v4965_v59 = vld [vmem:[#allocation5 + $0x1c8] sm:$0xff]  ;;  %v4966_v55 = vld [vmem:[#allocation5 + $0x1d0] sm:$0xff] }
 0xda7   :  { %4843 = vmatprep.subr.mxu0 %v4731_v23  ;;  %4795 = vmatpush1.msra.mxu1 %v4684_v15  ;;  %v4969_v23 = vld [vmem:[#allocation5 + $0x1e8] sm:$0xff]  ;;  %v4963_v15 = vld [vmem:[#allocation5 + $0x1b8] sm:$0xff] }
 0xda8   :  { %4844 = vmatpush1.msra.mxu0 %v4730_v45  ;;  %4796 = vmatprep.subr.mxu1 %v4681_v16  ;;  %v4345_v45 = vld [vmem:[%s8339_s8] sm:$0x1]  ;;  %v4418_v24 = vld [vmem:[#allocation2 + $0x6] ss:$8 sm:$0xf] }
 0xda9   :  { %4845 = vmatprep.subr.mxu0 %v4727_v47  ;;  %4797 = vmatpush1.msra.mxu1 %v4680_v13  ;;  %v4962_v16 = vld [vmem:[#allocation5 + $0x1b0] sm:$0xff]  ;;  %v4959_v13 = vld [vmem:[#allocation5 + $0x198] sm:$0xff] }
 0xdaa   :  { %4846 = vmatpush1.msra.mxu0 %v4726_v56  ;;  %4972 = vmatprep.subr.mxu1 %v4969_v23  ;;  %v4549_v56 = vpop.f32.mrf.mxu1  ;;  %v4958_v23 = vld [vmem:[#allocation5 + $0x190] sm:$0xff] }
 0xdab   :  { %4847 = vmatprep.subr.mxu0 %v4723_v62 }
 0xdac   :  { %4848 = vmatpush1.msra.mxu0 %v4722_v2  ;;  %v4551_v36 = vpop.f32.mrf.mxu1 }
 0xdad   :  { %4849 = vmatprep.subr.mxu0 %v4719_v12  ;;  %v4629_v63 = vcombine.low %v4549_v56, %v4551_v36  ;;  %v4951_v56 = vld [vmem:[#allocation5 + $0x158] sm:$0xff]  ;;  %v4948_v36 = vld [vmem:[#allocation5 + $0x140] sm:$0xff] }
 0xdae   :  { %4850 = vmatpush1.msra.mxu0 %v4718_v20 }
 0xdaf   :  { %4851 = vmatprep.subr.mxu0 %v4715_v29  ;;  %v4637_v12 = vrot.slane %v4629_v63, %v7299_v27  ;;  %v4945_v63 = vld [vmem:[#allocation5 + $0x128] sm:$0xff] }
 0xdb0   :  { %4852 = vmatpush1.msra.mxu0 %v4714_v53 }
 0xdb1   :  { %4853 = vmatprep.subr.mxu0 %v4711_v34 }
 0xdb2   :  { %4854 = vmatpush1.msra.mxu0 %v4710_v25 }
 0xdb3   :  { %4855 = vmatprep.subr.mxu0 %v4707_v18 }
 0xdb4   :  { %4856 = vmatpush1.msra.mxu0 %v4706_v33 }
 0xdb5   :  { %4857 = vmatprep.subr.mxu0 %v4703_v41 }
 0xdb6   :  { %4858 = vmatpush1.msra.mxu0 %v4702_v4 }
 0xdb7   :  { %4859 = vmatprep.subr.mxu0 %v4699_v44 }
 0xdb8   :  { %4860 = vmatpush1.msra.mxu0 %v4698_v26 }
 0xdb9   :  { %4861 = vmatprep.subr.mxu0 %v4695_v50 }
 0xdba   :  { %4862 = vmatpush1.msra.mxu0 %v4694_v3 }
 0xdbb   :  { %4863 = vmatprep.subr.mxu0 %v4691_v1  ;;  %v4970_v1 = vld [vmem:[#allocation5 + $0x1f0] sm:$0xff] }
 0xdbc   :  { %4864 = vmatpush1.msra.mxu0 %v4690_v7  ;;  %v4967_v7 = vld [vmem:[#allocation5 + $0x1d8] sm:$0xff] }
 0xdbd   :  { %4865 = vmatprep.subr.mxu0 %v4687_v58  ;;  %v4961_v58 = vld [vmem:[#allocation5 + $0x1a8] sm:$0xff] }
 0xdbe   :  { %4866 = vmatpush1.msra.mxu0 %v4686_v5  ;;  %v4960_v5 = vld [vmem:[#allocation5 + $0x1a0] sm:$0xff] }
 0xdbf   :  { %4867 = vmatprep.subr.mxu0 %v4683_v0  ;;  %v4957_v0 = vld [vmem:[#allocation5 + $0x188] sm:$0xff] }
 0xdc0   :  { %4868 = vmatpush1.msra.mxu0 %v4682_v17  ;;  %v4956_v17 = vld [vmem:[#allocation5 + $0x180] sm:$0xff] }
 0xdc1   :  { %5043 = vmatprep.subr.mxu0 %v4971_v31  ;;  %v4953_v31 = vld [vmem:[#allocation5 + $0x168] sm:$0xff] }
 0xe41   :  { %v4412_v49 = vpop.f32.mrf.mxu0 }
 0xe42   :  { %v4413_v47 = vadd.f32 %v4412_v49, %v4345_v45  ;;  %v4955_v45 = vld [vmem:[#allocation5 + $0x178] sm:$0xff]  ;;  %v4952_v49 = vld [vmem:[#allocation5 + $0x160] sm:$0xff] }
 0xe43   :  { %v6707_v52 = vpop.f32.mrf.mxu0 }
 0xe44   :  { %4416 = vst [vmem:[#allocation14 + $0x4] sm:$0x1] %v4413_v47  ;;  %v4954_v47 = vld [vmem:[#allocation5 + $0x170] sm:$0xff]  ;;  %v4949_v52 = vld [vmem:[#allocation5 + $0x148] sm:$0xff] }
 0xe61   :  { %v4620_v62 = vpop.f32.mrf.mxu0 }
 0xe63   :  { %v4622_v2 = vpop.f32.mrf.mxu0 }
 0xe64   :  { %v4630_v30 = vcombine.low %v4620_v62, %v4622_v2  ;;  %v4950_v62 = vld [vmem:[#allocation5 + $0x150] sm:$0xff]  ;;  %v4947_v2 = vld [vmem:[#allocation5 + $0x138] sm:$0xff] }
 0xe66   :  { %v4644_v19 = vrot.slane %v4630_v30, %v7299_v27  ;;  %v4944_v30 = vld [vmem:[#allocation5 + $0x120] sm:$0xff] }
 0xe68   :  { %v4645_v20 = vcombine.low %v4637_v12, %v4644_v19  ;;  %v4946_v12 = vld [vmem:[#allocation5 + $0x130] sm:$0xff]  ;;  %v4941_v19 = vld [vmem:[#allocation5 + $0x108] sm:$0xff] }
 0xe6a   :  { %v4652_v29 = vrot.slane %v4645_v20, %v7299_v27  ;;  %v4943_v20 = vld [vmem:[#allocation5 + $0x118] sm:$0xff] }
 0xe6c   :  { %v4654_v11 = vadd.f32 %v4652_v29, %v4418_v24  ;;  %v4940_v24 = vld [vmem:[#allocation5 + $0x100] sm:$0xff]  ;;  %v4942_v29 = vld [vmem:[#allocation5 + $0x110] sm:$0xff] }
 0xe6e   :  { %v4655_v53 = vmul.f32 0.5, %v4654_v11  ;;  %v4660_v32 = vrot.slane %v4654_v11, 1  ;;  %v4666_v35 = vrot.slane %v4654_v11, 2  ;;  %v4669_v25 = vrot.slane %v4654_v11, 3  ;;  %v4937_v11 = vld [vmem:[#allocation5 + $0xe8] sm:$0xff] }
 0xe70   :  { %6932 = vtanh.f32 %v4655_v53  ;;  %v4662_v34 = vmul.f32 0.5, %v4660_v32  ;;  %v4671_v54 = vmul.f32 0.5, %v4669_v25  ;;  %v4939_v53 = vld [vmem:[#allocation5 + $0xf8] sm:$0xff]  ;;  %v4936_v32 = vld [vmem:[#allocation5 + $0xe0] sm:$0xff] }
 0xe71   :  { %v4935_v25 = vld [vmem:[#allocation5 + $0xd8] sm:$0xff] }
 0xe72   :  { %6934 = vtanh.f32 %v4662_v34  ;;  %v4938_v34 = vld [vmem:[#allocation5 + $0xf0] sm:$0xff] }
 0xe73   :  { %6936 = vtanh.f32 %v4666_v35  ;;  %v4933_v35 = vld [vmem:[#allocation5 + $0xc8] sm:$0xff] }
 0xe74   :  { %6938 = vtanh.f32 %v4671_v54  ;;  %v4932_v54 = vld [vmem:[#allocation5 + $0xc0] sm:$0xff] }
 0xe7d   :  { %v6933_v18 = vpop.eup %6932 }
 0xe7e   :  { %v4657_v28 = vmul.f32 0.5, %v6933_v18  ;;  %v4934_v18 = vld [vmem:[#allocation5 + $0xd0] sm:$0xff] }
 0xe7f   :  { %v6935_v33 = vpop.eup %6934 }
 0xe80   :  { %v4658_v61 = vadd.f32 0.5, %v4657_v28  ;;  %v4664_v41 = vmul.f32 0.5, %v6935_v33  ;;  %v6937_v4 = vpop.eup %6936  ;;  %v4929_v28 = vld [vmem:[#allocation5 + $0xa8] sm:$0xff]  ;;  %v4931_v33 = vld [vmem:[#allocation5 + $0xb8] sm:$0xff] }
 0xe81   :  { %v6939_v26 = vpop.eup %6938 }
 0xe82   :  { %v4665_v40 = vadd.f32 0.5, %v4664_v41  ;;  %v4676_v44 = vmul.f32 %v6937_v4, %v4658_v61  ;;  %v4673_v48 = vmul.f32 0.5, %v6939_v26  ;;  %v4928_v61 = vld [vmem:[#allocation5 + $0xa0] sm:$0xff]  ;;  %v4930_v41 = vld [vmem:[#allocation5 + $0xb0] sm:$0xff]  ;;  %v4927_v4 = vld [vmem:[#allocation5 + $0x98] sm:$0xff] }
 0xe83   :  { %v4921_v26 = vld [vmem:[#allocation5 + $0x68] sm:$0xff] }
 0xe84   :  { %v4675_v14 = vmul.f32 %v4665_v40, %v7789_v60  ;;  %v4674_v50 = vadd.f32 0.5, %v4673_v48  ;;  %v4964_v60 = vld [vmem:[#allocation5 + $0x1c0] sm:$0xff]  ;;  %v4925_v40 = vld [vmem:[#allocation5 + $0x88] sm:$0xff]  ;;  %v4923_v48 = vld [vmem:[#allocation5 + $0x78] sm:$0xff] }
 0xe86   :  { %v7857_v46 = vadd.f32 %v4676_v44, %v4675_v14  ;;  %v4924_v14 = vld [vmem:[#allocation5 + $0x80] sm:$0xff]  ;;  %v4926_v44 = vld [vmem:[#allocation5 + $0x90] sm:$0xff] }
 0xe88   :  { %6940 = vtanh.f32 %v7857_v46 }
 0xe95   :  { %v6941_v37 = vpop.eup %6940 }
 0xe96   :  { %v7860_v3 = vmul.f32 %v6941_v37, %v4674_v50  ;;  %v4920_v50 = vld [vmem:[#allocation5 + $0x60] sm:$0xff]  ;;  %v4922_v37 = vld [vmem:[#allocation5 + $0x70] sm:$0xff] }
 0xe98   :  { %4831 = vmatmul.mubr.f32.vlgmr.msra.gmra.mxu1 %v7860_v3  ;;  %4902 = vmatmul.mubr.f32.vlgmr.msra.gmra.mxu0 %v7860_v3 }
 0xe99   :  { %4973 = vmatpush1.msra.mxu1 %v4968_v9  ;;  %5044 = vmatpush1.msra.mxu0 %v4970_v1  ;;  %v4917_v9 = vld [vmem:[#allocation5 + $0x48] sm:$0xff]  ;;  %v4919_v1 = vld [vmem:[#allocation5 + $0x58] sm:$0xff] }
 0xe9a   :  { %4974 = vmatprep.subr.mxu1 %v4965_v59  ;;  %5045 = vmatprep.subr.mxu0 %v4967_v7  ;;  %v4916_v59 = vld [vmem:[#allocation5 + $0x40] sm:$0xff]  ;;  %v4918_v7 = vld [vmem:[#allocation5 + $0x50] sm:$0xff] }
 0xe9b   :  { %4975 = vmatpush1.msra.mxu1 %v4964_v60  ;;  %5046 = vmatpush1.msra.mxu0 %v4966_v55  ;;  %v4913_v60 = vld [vmem:[#allocation5 + $0x28] sm:$0xff]  ;;  %v4915_v55 = vld [vmem:[#allocation5 + $0x38] sm:$0xff] }
 0xe9c   :  { %4976 = vmatprep.subr.mxu1 %v4961_v58  ;;  %5047 = vmatprep.subr.mxu0 %v4963_v15  ;;  %v4912_v58 = vld [vmem:[#allocation5 + $0x20] sm:$0xff]  ;;  %v4914_v15 = vld [vmem:[#allocation5 + $0x30] sm:$0xff] }
 0xe9d   :  { %4977 = vmatpush1.msra.mxu1 %v4960_v5  ;;  %5048 = vmatpush1.msra.mxu0 %v4962_v16  ;;  %v4909_v5 = vld [vmem:[#allocation5 + $0x8] sm:$0xff]  ;;  %v4911_v16 = vld [vmem:[#allocation5 + $0x18] sm:$0xff] }
 0xe9e   :  { %4978 = vmatprep.subr.mxu1 %v4957_v0  ;;  %5049 = vmatprep.subr.mxu0 %v4959_v13  ;;  %v4908_v0 = vld [vmem:[#allocation5] sm:$0xff]  ;;  %v4910_v13 = vld [vmem:[#allocation5 + $0x10] sm:$0xff] }
 0xe9f   :  { %4979 = vmatpush1.msra.mxu1 %v4956_v17  ;;  %5050 = vmatpush1.msra.mxu0 %v4958_v23  ;;  %v5288_v17 = vld [vmem:[#allocation3 + $0x1e8] sm:$0xff]  ;;  %v5287_v23 = vld [vmem:[#allocation3 + $0x1e0] sm:$0xff] }
 0xea0   :  { %4980 = vmatprep.subr.mxu1 %v4953_v31  ;;  %5051 = vmatprep.subr.mxu0 %v4955_v45  ;;  %v5284_v31 = vld [vmem:[#allocation3 + $0x1c8] sm:$0xff]  ;;  %v5283_v45 = vld [vmem:[#allocation3 + $0x1c0] sm:$0xff] }
 0xea1   :  { %4981 = vmatpush1.msra.mxu1 %v4952_v49  ;;  %5052 = vmatpush1.msra.mxu0 %v4954_v47  ;;  %v5280_v49 = vld [vmem:[#allocation3 + $0x1a8] sm:$0xff]  ;;  %v5279_v47 = vld [vmem:[#allocation3 + $0x1a0] sm:$0xff] }
 0xea2   :  { %4982 = vmatprep.subr.mxu1 %v4949_v52  ;;  %5053 = vmatprep.subr.mxu0 %v4951_v56  ;;  %v5276_v52 = vld [vmem:[#allocation3 + $0x188] sm:$0xff]  ;;  %v5275_v56 = vld [vmem:[#allocation3 + $0x180] sm:$0xff] }
 0xea3   :  { %4983 = vmatpush1.msra.mxu1 %v4948_v36  ;;  %5054 = vmatpush1.msra.mxu0 %v4950_v62  ;;  %v5271_v36 = vld [vmem:[#allocation3 + $0x160] sm:$0xff]  ;;  %v5268_v62 = vld [vmem:[#allocation3 + $0x148] sm:$0xff] }
 0xea4   :  { %4984 = vmatprep.subr.mxu1 %v4945_v63  ;;  %5055 = vmatprep.subr.mxu0 %v4947_v2  ;;  %v5267_v63 = vld [vmem:[#allocation3 + $0x140] sm:$0xff]  ;;  %v5264_v2 = vld [vmem:[#allocation3 + $0x128] sm:$0xff] }
 0xea5   :  { %4985 = vmatpush1.msra.mxu1 %v4944_v30  ;;  %5056 = vmatpush1.msra.mxu0 %v4946_v12  ;;  %v5263_v30 = vld [vmem:[#allocation3 + $0x120] sm:$0xff]  ;;  %v5260_v12 = vld [vmem:[#allocation3 + $0x108] sm:$0xff] }
 0xea6   :  { %4986 = vmatprep.subr.mxu1 %v4941_v19  ;;  %5057 = vmatprep.subr.mxu0 %v4943_v20  ;;  %v5259_v19 = vld [vmem:[#allocation3 + $0x100] sm:$0xff]  ;;  %v5256_v20 = vld [vmem:[#allocation3 + $0xe8] sm:$0xff] }
 0xea7   :  { %4987 = vmatpush1.msra.mxu1 %v4940_v24  ;;  %5058 = vmatpush1.msra.mxu0 %v4942_v29  ;;  %v5255_v24 = vld [vmem:[#allocation3 + $0xe0] sm:$0xff]  ;;  %v5252_v29 = vld [vmem:[#allocation3 + $0xc8] sm:$0xff] }
 0xea8   :  { %4988 = vmatprep.subr.mxu1 %v4937_v11  ;;  %5059 = vmatprep.subr.mxu0 %v4939_v53  ;;  %v5251_v11 = vld [vmem:[#allocation3 + $0xc0] sm:$0xff]  ;;  %v5248_v53 = vld [vmem:[#allocation3 + $0xa8] sm:$0xff] }
 0xea9   :  { %4989 = vmatpush1.msra.mxu1 %v4936_v32  ;;  %5060 = vmatpush1.msra.mxu0 %v4938_v34  ;;  %v5247_v32 = vld [vmem:[#allocation3 + $0xa0] sm:$0xff]  ;;  %v5244_v34 = vld [vmem:[#allocation3 + $0x88] sm:$0xff] }
 0xeaa   :  { %4990 = vmatprep.subr.mxu1 %v4933_v35  ;;  %5061 = vmatprep.subr.mxu0 %v4935_v25  ;;  %v5243_v35 = vld [vmem:[#allocation3 + $0x80] sm:$0xff]  ;;  %v5240_v25 = vld [vmem:[#allocation3 + $0x68] sm:$0xff] }
 0xeab   :  { %4991 = vmatpush1.msra.mxu1 %v4932_v54  ;;  %5062 = vmatpush1.msra.mxu0 %v4934_v18  ;;  %v5239_v54 = vld [vmem:[#allocation3 + $0x60] sm:$0xff]  ;;  %v5236_v18 = vld [vmem:[#allocation3 + $0x48] sm:$0xff] }
 0xeac   :  { %4992 = vmatprep.subr.mxu1 %v4929_v28  ;;  %5063 = vmatprep.subr.mxu0 %v4931_v33  ;;  %v5235_v28 = vld [vmem:[#allocation3 + $0x40] sm:$0xff]  ;;  %v5232_v33 = vld [vmem:[#allocation3 + $0x28] sm:$0xff] }
 0xead   :  { %4993 = vmatpush1.msra.mxu1 %v4928_v61  ;;  %5064 = vmatpush1.msra.mxu0 %v4930_v41  ;;  %v5231_v61 = vld [vmem:[#allocation3 + $0x20] sm:$0xff]  ;;  %v5228_v41 = vld [vmem:[#allocation3 + $0x8] sm:$0xff] }
 0xeae   :  { %4994 = vmatprep.subr.mxu1 %v4925_v40  ;;  %5065 = vmatprep.subr.mxu0 %v4927_v4  ;;  %v5227_v40 = vld [vmem:[#allocation3] sm:$0xff]  ;;  %v7874_v4 = vld [vmem:[#allocation6 + $0x78] sm:$0xff] }
 0xeaf   :  { %4995 = vmatpush1.msra.mxu1 %v4924_v14  ;;  %5066 = vmatpush1.msra.mxu0 %v4926_v44  ;;  %v7878_v14 = vld [vmem:[#allocation6 + $0x70] sm:$0xff]  ;;  %v7882_v44 = vld [vmem:[#allocation6 + $0x68] sm:$0xff] }
 0xeb0   :  { %4996 = vmatprep.subr.mxu1 %v4921_v26  ;;  %5067 = vmatprep.subr.mxu0 %v4923_v48  ;;  %v7886_v26 = vld [vmem:[#allocation6 + $0x60] sm:$0xff]  ;;  %v7890_v48 = vld [vmem:[#allocation6 + $0x58] sm:$0xff] }
 0xeb1   :  { %4997 = vmatpush1.msra.mxu1 %v4920_v50  ;;  %5068 = vmatpush1.msra.mxu0 %v4922_v37  ;;  %v7894_v50 = vld [vmem:[#allocation6 + $0x50] sm:$0xff]  ;;  %v7898_v37 = vld [vmem:[#allocation6 + $0x48] sm:$0xff] }
 0xeb2   :  { %4998 = vmatprep.subr.mxu1 %v4917_v9  ;;  %5069 = vmatprep.subr.mxu0 %v4919_v1  ;;  %v7902_v9 = vld [vmem:[#allocation6 + $0x40] sm:$0xff]  ;;  %v7906_v1 = vld [vmem:[#allocation6 + $0x38] sm:$0xff] }
 0xeb3   :  { %4999 = vmatpush1.msra.mxu1 %v4916_v59  ;;  %5070 = vmatpush1.msra.mxu0 %v4918_v7  ;;  %v7910_v59 = vld [vmem:[#allocation6 + $0x30] sm:$0xff]  ;;  %v7914_v7 = vld [vmem:[#allocation6 + $0x28] sm:$0xff] }
 0xeb4   :  { %5000 = vmatprep.subr.mxu1 %v4913_v60  ;;  %5071 = vmatprep.subr.mxu0 %v4915_v55  ;;  %v7918_v60 = vld [vmem:[#allocation6 + $0x20] sm:$0xff]  ;;  %v7922_v55 = vld [vmem:[#allocation6 + $0x18] sm:$0xff] }
 0xeb5   :  { %5001 = vmatpush1.msra.mxu1 %v4912_v58  ;;  %5072 = vmatpush1.msra.mxu0 %v4914_v15  ;;  %v7926_v58 = vld [vmem:[#allocation6 + $0x10] sm:$0xff]  ;;  %v5138_v15 = vld [vmem:[#allocation6 + $0x8] sm:$0xff] }
 0xeb6   :  { %5002 = vmatprep.subr.mxu1 %v4909_v5  ;;  %5073 = vmatprep.subr.mxu0 %v4911_v16  ;;  %v5137_v5 = vld [vmem:[#allocation6] sm:$0xff]  ;;  %v5290_v16 = vld [vmem:[#allocation3 + $0x1f8] sm:$0xff] }
 0xeb7   :  { %5003 = vmatpush1.msra.mxu1 %v4908_v0  ;;  %5036 = vmatprep.mubr.f32.mxu1 %v8416_v8  ;;  %v3936_v0 = vld [vmem:[%s8336_s5] sm:$0xf] }
 0xeb8   :  { %5074 = vmatpush1.msra.mxu0 %v4910_v13  ;;  %5107 = vmatprep.mubr.f32.mxu0 %v8416_v8 }
 0xeb9   :  { %5037 = vmatmul.mubr.f32.vlgmr.msra.gmra.mxu1 %v7844_v38  ;;  %5108 = vmatmul.mubr.f32.vlgmr.msra.gmra.mxu0 %v7844_v38  ;;  %v5272_v38 = vld [vmem:[#allocation3 + $0x168] sm:$0xff] }
 0xeba   :  { %5291 = vmatprep.subr.mxu0 %v5288_v17  ;;  %5355 = vmatprep.mubr.f32.mxu0 %v8416_v8  ;;  %v3941_v17 = vrot.slane %v3936_v0, %v8437_v22 }
 0xebb   :  { %5292 = vmatpush1.msra.mxu0 %v5287_v23  ;;  %6708 = vmatprep.subr.mxu1 %v8416_v8 }
 0xebc   :  { %5293 = vmatprep.subr.mxu0 %v5284_v31  ;;  %6740 = vmatprep.mubr.msk.f32.mxu1 %vm7176_vm0, %v8416_v8  ;;  %v3945_v31 = vrot.slane %v3936_v0, %v8438_v51 }
 0xebd   :  { %5294 = vmatpush1.msra.mxu0 %v5283_v45  ;;  %6709 = vmatpush3.msra.mxu1 %v7874_v4 }
 0xebe   :  { %5295 = vmatprep.subr.mxu0 %v5280_v49  ;;  %6710 = vmatprep.subr.mxu1 %v8416_v8  ;;  %v4025_v49 = vadd.f32 %v7824_v6, %v3941_v17  ;;  %v5285_v17 = vld [vmem:[#allocation3 + $0x1d0] sm:$0xff] }
 0xebf   :  { %5296 = vmatpush1.msra.mxu0 %v5279_v47  ;;  %6711 = vmatpush3.msra.mxu1 %v7878_v14  ;;  %v3949_v47 = vrot.slane %v3936_v0, %v8439_v43 }
 0xec0   :  { %5297 = vmatprep.subr.mxu0 %v5276_v52  ;;  %6712 = vmatprep.subr.mxu1 %v8416_v8 }
 0xec1   :  { %5298 = vmatpush1.msra.mxu0 %v5275_v56  ;;  %6713 = vmatpush3.msra.mxu1 %v7882_v44 }
 0xec2   :  { %5299 = vmatprep.subr.mxu0 %v5272_v38  ;;  %6714 = vmatprep.subr.mxu1 %v8416_v8  ;;  %v4027_v38 = vadd.f32 %v7830_v10, %v3945_v31  ;;  %v5282_v31 = vld [vmem:[#allocation3 + $0x1b8] sm:$0xff] }
 0xec3   :  { %5300 = vmatpush1.msra.mxu0 %v5271_v36  ;;  %6715 = vmatpush3.msra.mxu1 %v7886_v26 }
 0xec4   :  { %5301 = vmatprep.subr.mxu0 %v5268_v62  ;;  %6716 = vmatprep.subr.mxu1 %v8416_v8 }
 0xec5   :  { %5302 = vmatpush1.msra.mxu0 %v5267_v63  ;;  %6717 = vmatpush3.msra.mxu1 %v7890_v48 }
 0xec6   :  { %5303 = vmatprep.subr.mxu0 %v5264_v2  ;;  %6718 = vmatprep.subr.mxu1 %v8416_v8  ;;  %v4096_v2 = vadd.f32 %v7827_v21, %v3949_v47  ;;  %v5277_v47 = vld [vmem:[#allocation3 + $0x190] sm:$0xff] }
 0xec7   :  { %5304 = vmatpush1.msra.mxu0 %v5263_v30  ;;  %6719 = vmatpush3.msra.mxu1 %v7894_v50 }
 0xec8   :  { %5305 = vmatprep.subr.mxu0 %v5260_v12  ;;  %6720 = vmatprep.subr.mxu1 %v8416_v8 }
 0xec9   :  { %5306 = vmatpush1.msra.mxu0 %v5259_v19  ;;  %6721 = vmatpush3.msra.mxu1 %v7898_v37 }
 0xeca   :  { %5307 = vmatprep.subr.mxu0 %v5256_v20  ;;  %6722 = vmatprep.subr.mxu1 %v8416_v8 }
 0xecb   :  { %5308 = vmatpush1.msra.mxu0 %v5255_v24  ;;  %6723 = vmatpush3.msra.mxu1 %v7902_v9  ;;  %v3953_v24 = vrot.slane %v3936_v0, %v8440_v57  ;;  %v5286_v0 = vld [vmem:[#allocation3 + $0x1d8] sm:$0xff] }
 0xecc   :  { %5309 = vmatprep.subr.mxu0 %v5252_v29  ;;  %6724 = vmatprep.subr.mxu1 %v8416_v8 }
 0xecd   :  { %5310 = vmatpush1.msra.mxu0 %v5251_v11  ;;  %6725 = vmatpush3.msra.mxu1 %v7906_v1  ;;  %v4098_v29 = vadd.f32 %v7834_v39, %v3953_v24  ;;  %v5254_v24 = vld [vmem:[#allocation3 + $0xd8] sm:$0xff] }
 0xece   :  { %5311 = vmatprep.subr.mxu0 %v5248_v53  ;;  %6726 = vmatprep.subr.mxu1 %v8416_v8 }
 0xecf   :  { %5312 = vmatpush1.msra.mxu0 %v5247_v32  ;;  %6727 = vmatpush3.msra.mxu1 %v7910_v59 }
 0xed0   :  { %5313 = vmatprep.subr.mxu0 %v5244_v34  ;;  %6728 = vmatprep.subr.mxu1 %v8416_v8 }
 0xed1   :  { %5314 = vmatpush1.msra.mxu0 %v5243_v35  ;;  %6729 = vmatpush3.msra.mxu1 %v7914_v7 }
 0xed2   :  { %5315 = vmatprep.subr.mxu0 %v5240_v25  ;;  %6730 = vmatprep.subr.mxu1 %v8416_v8 }
 0xed3   :  { %5316 = vmatpush1.msra.mxu0 %v5239_v54  ;;  %6731 = vmatpush3.msra.mxu1 %v7918_v60 }
 0xed4   :  { %5317 = vmatprep.subr.mxu0 %v5236_v18  ;;  %6732 = vmatprep.subr.mxu1 %v8416_v8 }
 0xed5   :  { %5318 = vmatpush1.msra.mxu0 %v5235_v28  ;;  %6733 = vmatpush3.msra.mxu1 %v7922_v55 }
 0xed6   :  { %5319 = vmatprep.subr.mxu0 %v5232_v33  ;;  %6734 = vmatprep.subr.mxu1 %v8416_v8 }
 0xed7   :  { %5320 = vmatpush1.msra.mxu0 %v5231_v61  ;;  %6735 = vmatpush3.msra.mxu1 %v7926_v58 }
 0xed8   :  { %5321 = vmatprep.subr.mxu0 %v5228_v41  ;;  %6736 = vmatprep.subr.mxu1 %v8416_v8 }
 0xed9   :  { %5322 = vmatpush1.msra.mxu0 %v5227_v40  ;;  %6737 = vmatpush3.msra.mxu1 %v5138_v15 }
 0xeda   :  { %5356 = vmatmul.mubr.f32.vlgmr.msra.gmra.mxu0 %v7860_v3  ;;  %6738 = vmatprep.subr.mxu1 %v8416_v8 }
 0xedb   :  { %5638 = vmatprep.mubr.f32.mxu0 %v8416_v8  ;;  %6739 = vmatpush3.msra.mxu1 %v5137_v5 }
 0xedc   :  { %5362 = vmatprep.subr.mxu1 %v5290_v16  ;;  %v5289_v16 = vld [vmem:[#allocation3 + $0x1f0] sm:$0xff] }
 0xf58   :  { %v7934_v13 = vpop.f32.mrf.mxu1  ;;  %v7937_v23 = vpop.f32.mrf.mxu0 }
 0xf5a   :  { %v7940_v45 = vpop.f32.mrf.mxu1  ;;  %v7944_v52 = vpop.f32.mrf.mxu0 }
 0xf79   :  { %v5038_v56 = vpop.f32.mrf.mxu1  ;;  %v5109_v62 = vpop.f32.mrf.mxu0 }
 0xf7a   :  { %v5114_v36 = vadd.f32 %v5038_v56, %v4025_v49  ;;  %v5116_v19 = vadd.f32 %v5109_v62, %v4096_v2  ;;  %v5278_v49 = vld [vmem:[#allocation3 + $0x198] sm:$0xff]  ;;  %v5269_v62 = vld [vmem:[#allocation3 + $0x150] sm:$0xff] }
 0xf7b   :  { %v5040_v63 = vpop.f32.mrf.mxu1  ;;  %v5111_v6 = vpop.f32.mrf.mxu0  ;;  %v5274_v56 = vld [vmem:[#allocation3 + $0x178] sm:$0xff]  ;;  %v5265_v2 = vld [vmem:[#allocation3 + $0x130] sm:$0xff] }
 0xf7c   :  { %v5118_v30 = vmul.f32 0.5, %v5114_v36  ;;  %v5115_v12 = vadd.f32 %v5040_v63, %v4027_v38  ;;  %v5117_v11 = vadd.f32 %v5111_v6, %v4098_v29  ;;  %v5273_v38 = vld [vmem:[#allocation3 + $0x170] sm:$0xff]  ;;  %v5270_v36 = vld [vmem:[#allocation3 + $0x158] sm:$0xff] }
 0xf7d   :  { %v5266_v63 = vld [vmem:[#allocation3 + $0x138] sm:$0xff]  ;;  %v5253_v6 = vld [vmem:[#allocation3 + $0xd0] sm:$0xff] }
 0xf7e   :  { %6942 = vtanh.f32 %v5118_v30  ;;  %v5122_v20 = vmul.f32 0.5, %v5115_v12  ;;  %v5127_v53 = vmul.f32 0.5, %v5117_v11  ;;  %v5262_v30 = vld [vmem:[#allocation3 + $0x118] sm:$0xff]  ;;  %v5261_v12 = vld [vmem:[#allocation3 + $0x110] sm:$0xff] }
 0xf7f   :  { %v5250_v29 = vld [vmem:[#allocation3 + $0xb8] sm:$0xff]  ;;  %v5249_v11 = vld [vmem:[#allocation3 + $0xb0] sm:$0xff] }
 0xf80   :  { %6944 = vtanh.f32 %v5122_v20  ;;  %v5257_v20 = vld [vmem:[#allocation3 + $0xf0] sm:$0xff] }
 0xf81   :  { %6946 = vtanh.f32 %v5116_v19  ;;  %v5258_v19 = vld [vmem:[#allocation3 + $0xf8] sm:$0xff] }
 0xf82   :  { %6948 = vtanh.f32 %v5127_v53  ;;  %v5246_v53 = vld [vmem:[#allocation3 + $0x98] sm:$0xff] }
 0xf8b   :  { %v6943_v10 = vpop.eup %6942 }
 0xf8c   :  { %v5120_v32 = vmul.f32 0.5, %v6943_v10  ;;  %v5245_v10 = vld [vmem:[#allocation3 + $0x90] sm:$0xff] }
 0xf8d   :  { %v6945_v34 = vpop.eup %6944 }
 0xf8e   :  { %v5121_v35 = vadd.f32 0.5, %v5120_v32  ;;  %v5124_v25 = vmul.f32 0.5, %v6945_v34  ;;  %v6947_v21 = vpop.eup %6946  ;;  %v5242_v32 = vld [vmem:[#allocation3 + $0x78] sm:$0xff]  ;;  %v5241_v34 = vld [vmem:[#allocation3 + $0x70] sm:$0xff] }
 0xf8f   :  { %v6949_v61 = vpop.eup %6948 }
 0xf90   :  { %v5125_v54 = vadd.f32 0.5, %v5124_v25  ;;  %v5132_v18 = vmul.f32 %v6947_v21, %v5121_v35  ;;  %v5129_v41 = vmul.f32 0.5, %v6949_v61  ;;  %v5238_v35 = vld [vmem:[#allocation3 + $0x58] sm:$0xff]  ;;  %v5237_v25 = vld [vmem:[#allocation3 + $0x50] sm:$0xff]  ;;  %v5549_v61 = vld [vmem:[#allocation4 + $0x1e8] sm:$0xff] }
 0xf91   :  { %v5234_v21 = vld [vmem:[#allocation3 + $0x38] sm:$0xff]  ;;  %5574 = vmatprep.subr.mxu0 %v5549_v61 }
 0xf92   :  { %v5131_v28 = vmul.f32 %v5125_v54, %v7841_v42  ;;  %v5130_v39 = vadd.f32 0.5, %v5129_v41  ;;  %v5281_v42 = vld [vmem:[#allocation3 + $0x1b0] sm:$0xff]  ;;  %v5551_v41 = vld [vmem:[#allocation4 + $0x1f8] sm:$0xff] }
 0xf93   :  { %v5233_v54 = vld [vmem:[#allocation3 + $0x30] sm:$0xff]  ;;  %v5515_v61 = vld [vmem:[#allocation4 + $0xd8] sm:$0xff] }
 0xf94   :  { %v7951_v33 = vadd.f32 %v5132_v18, %v5131_v28  ;;  %v5230_v18 = vld [vmem:[#allocation3 + $0x18] sm:$0xff]  ;;  %v5229_v28 = vld [vmem:[#allocation3 + $0x10] sm:$0xff] }
 0xf96   :  { %6950 = vtanh.f32 %v7951_v33 }
 0xfa3   :  { %v6951_v40 = vpop.eup %6950 }
 0xfa4   :  { %v7954_v15 = vmul.f32 %v6951_v40, %v5130_v39  ;;  %v5548_v39 = vld [vmem:[#allocation4 + $0x1e0] sm:$0xff]  ;;  %v5550_v40 = vld [vmem:[#allocation4 + $0x1f0] sm:$0xff] }
 0xfa5   :  { %5575 = vmatpush1.msra.mxu0 %v5548_v39  ;;  %v5514_v39 = vld [vmem:[#allocation4 + $0xd0] sm:$0xff] }
 0xfa6   :  { %v5136_v5 = vmax.f32 %v7954_v15, 0.0 }
 0xfa8   :  { %6741 = vmatmul.mubr.f32.vlgmr.msra.gmra.mxu1 %v5136_v5  ;;  %v5545_v5 = vld [vmem:[#allocation4 + $0x1c8] sm:$0xff] }
 0xfa9   :  { %5363 = vmatpush1.msra.mxu1 %v5289_v16  ;;  %5426 = vmatprep.mubr.f32.mxu1 %v8416_v8  ;;  %v5547_v16 = vld [vmem:[#allocation4 + $0x1d8] sm:$0xff] }
 0xfaa   :  { %5364 = vmatprep.subr.mxu1 %v5286_v0  ;;  %5576 = vmatprep.subr.mxu0 %v5545_v5  ;;  %v5544_v0 = vld [vmem:[#allocation4 + $0x1c0] sm:$0xff]  ;;  %v5511_v5 = vld [vmem:[#allocation4 + $0xb8] sm:$0xff] }
 0xfab   :  { %5365 = vmatpush1.msra.mxu1 %v5285_v17  ;;  %v5546_v17 = vld [vmem:[#allocation4 + $0x1d0] sm:$0xff]  ;;  %5577 = vmatpush1.msra.mxu0 %v5544_v0 }
 0xfac   :  { %5366 = vmatprep.subr.mxu1 %v5282_v31  ;;  %v5541_v31 = vld [vmem:[#allocation4 + $0x1a8] sm:$0xff]  ;;  %v5510_v0 = vld [vmem:[#allocation4 + $0xb0] sm:$0xff] }
 0xfad   :  { %5367 = vmatpush1.msra.mxu1 %v5281_v42  ;;  %5578 = vmatprep.subr.mxu0 %v5541_v31  ;;  %v5540_v42 = vld [vmem:[#allocation4 + $0x1a0] sm:$0xff]  ;;  %v5507_v31 = vld [vmem:[#allocation4 + $0x98] sm:$0xff] }
 0xfae   :  { %5368 = vmatprep.subr.mxu1 %v5278_v49  ;;  %v5542_v49 = vld [vmem:[#allocation4 + $0x1b0] sm:$0xff]  ;;  %5579 = vmatpush1.msra.mxu0 %v5540_v42 }
 0xfaf   :  { %5369 = vmatpush1.msra.mxu1 %v5277_v47  ;;  %v5537_v47 = vld [vmem:[#allocation4 + $0x188] sm:$0xff]  ;;  %v5506_v42 = vld [vmem:[#allocation4 + $0x90] sm:$0xff] }
 0xfb0   :  { %5370 = vmatprep.subr.mxu1 %v5274_v56  ;;  %v5539_v56 = vld [vmem:[#allocation4 + $0x198] sm:$0xff]  ;;  %5580 = vmatprep.subr.mxu0 %v5537_v47 }
 0xfb1   :  { %5371 = vmatpush1.msra.mxu1 %v5273_v38  ;;  %v5536_v38 = vld [vmem:[#allocation4 + $0x180] sm:$0xff]  ;;  %v5503_v47 = vld [vmem:[#allocation4 + $0x78] sm:$0xff] }
 0xfb2   :  { %5372 = vmatprep.subr.mxu1 %v5270_v36  ;;  %v5538_v36 = vld [vmem:[#allocation4 + $0x190] sm:$0xff]  ;;  %5581 = vmatpush1.msra.mxu0 %v5536_v38 }
 0xfb3   :  { %5373 = vmatpush1.msra.mxu1 %v5269_v62  ;;  %v5533_v62 = vld [vmem:[#allocation4 + $0x168] sm:$0xff]  ;;  %v5502_v38 = vld [vmem:[#allocation4 + $0x70] sm:$0xff] }
 0xfb4   :  { %5374 = vmatprep.subr.mxu1 %v5266_v63  ;;  %v5535_v63 = vld [vmem:[#allocation4 + $0x178] sm:$0xff]  ;;  %5582 = vmatprep.subr.mxu0 %v5533_v62 }
 0xfb5   :  { %5375 = vmatpush1.msra.mxu1 %v5265_v2  ;;  %v5532_v2 = vld [vmem:[#allocation4 + $0x160] sm:$0xff]  ;;  %v5499_v62 = vld [vmem:[#allocation4 + $0x58] sm:$0xff] }
 0xfb6   :  { %5376 = vmatprep.subr.mxu1 %v5262_v30  ;;  %v5534_v30 = vld [vmem:[#allocation4 + $0x170] sm:$0xff]  ;;  %5583 = vmatpush1.msra.mxu0 %v5532_v2 }
 0xfb7   :  { %5377 = vmatpush1.msra.mxu1 %v5261_v12  ;;  %v5529_v12 = vld [vmem:[#allocation4 + $0x148] sm:$0xff]  ;;  %v5498_v2 = vld [vmem:[#allocation4 + $0x50] sm:$0xff] }
 0xfb8   :  { %5378 = vmatprep.subr.mxu1 %v5258_v19  ;;  %v5531_v19 = vld [vmem:[#allocation4 + $0x158] sm:$0xff]  ;;  %5584 = vmatprep.subr.mxu0 %v5529_v12 }
 0xfb9   :  { %5379 = vmatpush1.msra.mxu1 %v5257_v20  ;;  %v5528_v20 = vld [vmem:[#allocation4 + $0x140] sm:$0xff]  ;;  %v5495_v12 = vld [vmem:[#allocation4 + $0x38] sm:$0xff] }
 0xfba   :  { %5380 = vmatprep.subr.mxu1 %v5254_v24  ;;  %v5530_v24 = vld [vmem:[#allocation4 + $0x150] sm:$0xff]  ;;  %5585 = vmatpush1.msra.mxu0 %v5528_v20 }
 0xfbb   :  { %5381 = vmatpush1.msra.mxu1 %v5253_v6  ;;  %v5525_v6 = vld [vmem:[#allocation4 + $0x128] sm:$0xff]  ;;  %v5494_v20 = vld [vmem:[#allocation4 + $0x30] sm:$0xff] }
 0xfbc   :  { %5382 = vmatprep.subr.mxu1 %v5250_v29  ;;  %v5527_v29 = vld [vmem:[#allocation4 + $0x138] sm:$0xff]  ;;  %5586 = vmatprep.subr.mxu0 %v5525_v6 }
 0xfbd   :  { %5383 = vmatpush1.msra.mxu1 %v5249_v11  ;;  %v5524_v11 = vld [vmem:[#allocation4 + $0x120] sm:$0xff]  ;;  %v5491_v6 = vld [vmem:[#allocation4 + $0x18] sm:$0xff] }
 0xfbe   :  { %5384 = vmatprep.subr.mxu1 %v5246_v53  ;;  %v5526_v53 = vld [vmem:[#allocation4 + $0x130] sm:$0xff]  ;;  %5587 = vmatpush1.msra.mxu0 %v5524_v11 }
 0xfbf   :  { %5385 = vmatpush1.msra.mxu1 %v5245_v10  ;;  %v5521_v10 = vld [vmem:[#allocation4 + $0x108] sm:$0xff]  ;;  %v5490_v11 = vld [vmem:[#allocation4 + $0x10] sm:$0xff] }
 0xfc0   :  { %5386 = vmatprep.subr.mxu1 %v5242_v32  ;;  %v5523_v32 = vld [vmem:[#allocation4 + $0x118] sm:$0xff]  ;;  %5588 = vmatprep.subr.mxu0 %v5521_v10 }
 0xfc1   :  { %5387 = vmatpush1.msra.mxu1 %v5241_v34  ;;  %v5520_v34 = vld [vmem:[#allocation4 + $0x100] sm:$0xff]  ;;  %v7962_v10 = vld [vmem:[#allocation5 + $0x1f8] sm:$0xff] }
 0xfc2   :  { %5388 = vmatprep.subr.mxu1 %v5238_v35  ;;  %v5522_v35 = vld [vmem:[#allocation4 + $0x110] sm:$0xff]  ;;  %5589 = vmatpush1.msra.mxu0 %v5520_v34 }
 0xfc3   :  { %5389 = vmatpush1.msra.mxu1 %v5237_v25  ;;  %v5517_v25 = vld [vmem:[#allocation4 + $0xe8] sm:$0xff] }
 0xfc4   :  { %5390 = vmatprep.subr.mxu1 %v5234_v21  ;;  %v5519_v21 = vld [vmem:[#allocation4 + $0xf8] sm:$0xff]  ;;  %5590 = vmatprep.subr.mxu0 %v5517_v25 }
 0xfc5   :  { %5391 = vmatpush1.msra.mxu1 %v5233_v54  ;;  %v5516_v54 = vld [vmem:[#allocation4 + $0xe0] sm:$0xff] }
 0xfc6   :  { %5392 = vmatprep.subr.mxu1 %v5230_v18  ;;  %v5518_v18 = vld [vmem:[#allocation4 + $0xf0] sm:$0xff]  ;;  %5591 = vmatpush1.msra.mxu0 %v5516_v54 }
 0xfc7   :  { %5393 = vmatpush1.msra.mxu1 %v5229_v28  ;;  %v5513_v28 = vld [vmem:[#allocation4 + $0xc8] sm:$0xff] }
 0xfc8   :  { %5427 = vmatmul.mubr.f32.vlgmr.msra.gmra.mxu1 %v7860_v3  ;;  %5645 = vmatprep.subr.mxu1 %v5551_v41  ;;  %v5543_v3 = vld [vmem:[#allocation4 + $0x1b8] sm:$0xff]  ;;  %v5512_v41 = vld [vmem:[#allocation4 + $0xc0] sm:$0xff] }
 0xfc9   :  { %5709 = vmatprep.mubr.f32.mxu1 %v8416_v8  ;;  %5646 = vmatpush1.msra.mxu1 %v5550_v40  ;;  %v5509_v40 = vld [vmem:[#allocation4 + $0xa8] sm:$0xff] }
 0xfca   :  { %5647 = vmatprep.subr.mxu1 %v5547_v16  ;;  %5592 = vmatprep.subr.mxu0 %v5513_v28  ;;  %v5508_v16 = vld [vmem:[#allocation4 + $0xa0] sm:$0xff] }
 0xfcb   :  { %5648 = vmatpush1.msra.mxu1 %v5546_v17  ;;  %5593 = vmatpush1.msra.mxu0 %v5512_v41  ;;  %v5505_v17 = vld [vmem:[#allocation4 + $0x88] sm:$0xff] }
 0xfcc   :  { %5649 = vmatprep.subr.mxu1 %v5543_v3  ;;  %5594 = vmatprep.subr.mxu0 %v5509_v40  ;;  %v5504_v3 = vld [vmem:[#allocation4 + $0x80] sm:$0xff] }
 0xfcd   :  { %5650 = vmatpush1.msra.mxu1 %v5542_v49  ;;  %5595 = vmatpush1.msra.mxu0 %v5508_v16  ;;  %v5501_v49 = vld [vmem:[#allocation4 + $0x68] sm:$0xff] }
 0xfce   :  { %5651 = vmatprep.subr.mxu1 %v5539_v56  ;;  %5596 = vmatprep.subr.mxu0 %v5505_v17  ;;  %v5500_v56 = vld [vmem:[#allocation4 + $0x60] sm:$0xff] }
 0xfcf   :  { %5652 = vmatpush1.msra.mxu1 %v5538_v36  ;;  %5597 = vmatpush1.msra.mxu0 %v5504_v3  ;;  %v5497_v36 = vld [vmem:[#allocation4 + $0x48] sm:$0xff] }
 0xfd0   :  { %5653 = vmatprep.subr.mxu1 %v5535_v63  ;;  %5598 = vmatprep.subr.mxu0 %v5501_v49  ;;  %v5496_v63 = vld [vmem:[#allocation4 + $0x40] sm:$0xff] }
 0xfd1   :  { %5654 = vmatpush1.msra.mxu1 %v5534_v30  ;;  %5599 = vmatpush1.msra.mxu0 %v5500_v56  ;;  %v5493_v30 = vld [vmem:[#allocation4 + $0x28] sm:$0xff] }
 0xfd2   :  { %5655 = vmatprep.subr.mxu1 %v5531_v19  ;;  %5600 = vmatprep.subr.mxu0 %v5497_v36  ;;  %v5492_v19 = vld [vmem:[#allocation4 + $0x20] sm:$0xff] }
 0xfd3   :  { %5656 = vmatpush1.msra.mxu1 %v5530_v24  ;;  %5601 = vmatpush1.msra.mxu0 %v5496_v63  ;;  %v5489_v24 = vld [vmem:[#allocation4 + $0x8] sm:$0xff] }
 0xfd4   :  { %5657 = vmatprep.subr.mxu1 %v5527_v29  ;;  %5602 = vmatprep.subr.mxu0 %v5493_v30  ;;  %v5488_v29 = vld [vmem:[#allocation4] sm:$0xff] }
 0xfd5   :  { %5658 = vmatpush1.msra.mxu1 %v5526_v53  ;;  %5603 = vmatpush1.msra.mxu0 %v5492_v19  ;;  %v7960_v53 = vld [vmem:[#allocation5 + $0x1e8] sm:$0xff] }
 0xfd6   :  { %5659 = vmatprep.subr.mxu1 %v5523_v32  ;;  %5604 = vmatprep.subr.mxu0 %v5489_v24  ;;  %v5153_v32 = vld [vmem:[%s8339_s8] sm:$0x1]  ;;  %v5226_v16 = vld [vmem:[#allocation2 + $0x7] ss:$8 sm:$0xf] }
 0xfd7   :  { %5660 = vmatpush1.msra.mxu1 %v5522_v35  ;;  %5605 = vmatpush1.msra.mxu0 %v5488_v29 }
 0xfd8   :  { %5661 = vmatprep.subr.mxu1 %v5519_v21  ;;  %5780 = vmatprep.subr.mxu0 %v7960_v53  ;;  %v5357_v21 = vpop.f32.mrf.mxu0 }
 0xfd9   :  { %5662 = vmatpush1.msra.mxu1 %v5518_v18 }
 0xfda   :  { %5663 = vmatprep.subr.mxu1 %v5515_v61  ;;  %v5359_v54 = vpop.f32.mrf.mxu0 }
 0xfdb   :  { %5664 = vmatpush1.msra.mxu1 %v5514_v39  ;;  %v5437_v28 = vcombine.low %v5357_v21, %v5359_v54  ;;  %v7979_v21 = vld [vmem:[#allocation5 + $0x1d8] sm:$0xff]  ;;  %v7981_v54 = vld [vmem:[#allocation5 + $0x1c0] sm:$0xff] }
 0xfdc   :  { %5665 = vmatprep.subr.mxu1 %v5511_v5  ;;  %8441 = vst [vmem:[#allocation40_spill] sm:$0xff] %v7979_v21 }
 0xfdd   :  { %5666 = vmatpush1.msra.mxu1 %v5510_v0  ;;  %v5445_v39 = vrot.slane %v5437_v28, %v7299_v27  ;;  %v7989_v28 = vld [vmem:[#allocation5 + $0x1b8] sm:$0xff] }
 0xfde   :  { %5667 = vmatprep.subr.mxu1 %v5507_v31  ;;  %8443 = vst [vmem:[#allocation42_spill] sm:$0xff] %v7989_v28 }
 0xfdf   :  { %5668 = vmatpush1.msra.mxu1 %v5506_v42 }
 0xfe0   :  { %5669 = vmatprep.subr.mxu1 %v5503_v47 }
 0xfe1   :  { %5670 = vmatpush1.msra.mxu1 %v5502_v38 }
 0xfe2   :  { %5671 = vmatprep.subr.mxu1 %v5499_v62 }
 0xfe3   :  { %5672 = vmatpush1.msra.mxu1 %v5498_v2 }
 0xfe4   :  { %5673 = vmatprep.subr.mxu1 %v5495_v12 }
 0xfe5   :  { %5674 = vmatpush1.msra.mxu1 %v5494_v20 }
 0xfe6   :  { %5675 = vmatprep.subr.mxu1 %v5491_v6 }
 0xfe7   :  { %5676 = vmatpush1.msra.mxu1 %v5490_v11 }
 0xfe8   :  { %5851 = vmatprep.subr.mxu1 %v7962_v10 }
0x1068   :  { %v5220_v34 = vpop.f32.mrf.mxu1 }
0x1069   :  { %v5221_v35 = vadd.f32 %v5220_v34, %v5153_v32  ;;  %v7973_v34 = vld [vmem:[#allocation5 + $0x1e0] sm:$0xff] }
0x106a   :  { %v6742_v25 = vpop.f32.mrf.mxu1 }
0x106b   :  { %5224 = vst [vmem:[#allocation14 + $0x5] sm:$0x1] %v5221_v35  ;;  %v7975_v35 = vld [vmem:[#allocation5 + $0x1f0] sm:$0xff]  ;;  %v7977_v25 = vld [vmem:[#allocation5 + $0x1c8] sm:$0xff] }
0x1088   :  { %v5428_v18 = vpop.f32.mrf.mxu1 }
0x108a   :  { %v5430_v61 = vpop.f32.mrf.mxu1 }
0x108b   :  { %v5438_v41 = vcombine.low %v5428_v18, %v5430_v61  ;;  %v7987_v18 = vld [vmem:[#allocation5 + $0x1a8] sm:$0xff]  ;;  %v7993_v61 = vld [vmem:[#allocation5 + $0x1a0] sm:$0xff] }
0x108d   :  { %v5452_v40 = vrot.slane %v5438_v41, %v7299_v27  ;;  %v7995_v41 = vld [vmem:[#allocation5 + $0x1b0] sm:$0xff] }
0x108e   :  { %8444 = vst [vmem:[#allocation43_spill] sm:$0xff] %v7995_v41 }
0x108f   :  { %v5453_v5 = vcombine.low %v5445_v39, %v5452_v40  ;;  %v7999_v39 = vld [vmem:[#allocation5 + $0x188] sm:$0xff]  ;;  %v8001_v40 = vld [vmem:[#allocation5 + $0x198] sm:$0xff] }
0x1090   :  { %8445 = vst [vmem:[#allocation44_spill] sm:$0xff] %v8001_v40 }
0x1091   :  { %v5460_v0 = vrot.slane %v5453_v5, %v7299_v27  ;;  %v8005_v5 = vld [vmem:[#allocation5 + $0x180] sm:$0xff] }
0x1093   :  { %v5462_v17 = vadd.f32 %v5460_v0, %v5226_v16  ;;  %v8007_v16 = vld [vmem:[#allocation5 + $0x190] sm:$0xff]  ;;  %v8011_v0 = vld [vmem:[#allocation5 + $0x168] sm:$0xff] }
0x1094   :  { %8446 = vst [vmem:[#allocation45_spill] sm:$0xff] %v8007_v16 }
0x1095   :  { %v5463_v31 = vmul.f32 0.5, %v5462_v17  ;;  %v5468_v3 = vrot.slane %v5462_v17, 1  ;;  %v5474_v49 = vrot.slane %v5462_v17, 2  ;;  %v5477_v47 = vrot.slane %v5462_v17, 3  ;;  %v8013_v17 = vld [vmem:[#allocation5 + $0x178] sm:$0xff] }
0x1096   :  { %8447 = vst [vmem:[#allocation46_spill] sm:$0xff] %v8013_v17 }
0x1097   :  { %6952 = vtanh.f32 %v5463_v31  ;;  %v5470_v42 = vmul.f32 0.5, %v5468_v3  ;;  %v5479_v56 = vmul.f32 0.5, %v5477_v47  ;;  %v8017_v31 = vld [vmem:[#allocation5 + $0x160] sm:$0xff]  ;;  %v8019_v3 = vld [vmem:[#allocation5 + $0x170] sm:$0xff] }
0x1098   :  { %8448 = vst [vmem:[#allocation47_spill] sm:$0xff] %v8019_v3  ;;  %v8029_v47 = vld [vmem:[#allocation5 + $0x140] sm:$0xff] }
0x1099   :  { %6954 = vtanh.f32 %v5470_v42  ;;  %v8023_v42 = vld [vmem:[#allocation5 + $0x148] sm:$0xff] }
0x109a   :  { %6956 = vtanh.f32 %v5474_v49  ;;  %v8025_v49 = vld [vmem:[#allocation5 + $0x158] sm:$0xff] }
0x109b   :  { %6958 = vtanh.f32 %v5479_v56  ;;  %8449 = vst [vmem:[#allocation48_spill] sm:$0xff] %v8025_v49  ;;  %v8031_v56 = vld [vmem:[#allocation5 + $0x150] sm:$0xff] }
0x109c   :  { %8450 = vst [vmem:[#allocation49_spill] sm:$0xff] %v8031_v56 }
0x10a4   :  { %v6953_v38 = vpop.eup %6952 }
0x10a5   :  { %v5465_v36 = vmul.f32 0.5, %v6953_v38  ;;  %v8035_v38 = vld [vmem:[#allocation5 + $0x128] sm:$0xff] }
0x10a6   :  { %v6955_v62 = vpop.eup %6954 }
0x10a7   :  { %v5466_v63 = vadd.f32 0.5, %v5465_v36  ;;  %v5472_v2 = vmul.f32 0.5, %v6955_v62  ;;  %v6957_v12 = vpop.eup %6956  ;;  %v8037_v36 = vld [vmem:[#allocation5 + $0x138] sm:$0xff]  ;;  %v8041_v62 = vld [vmem:[#allocation5 + $0x120] sm:$0xff] }
0x10a8   :  { %v6959_v24 = vpop.eup %6958  ;;  %8451 = vst [vmem:[#allocation50_spill] sm:$0xff] %v8037_v36 }
0x10a9   :  { %v5473_v30 = vadd.f32 0.5, %v5472_v2  ;;  %v5484_v19 = vmul.f32 %v6957_v12, %v5466_v63  ;;  %v5481_v6 = vmul.f32 0.5, %v6959_v24  ;;  %v8043_v63 = vld [vmem:[#allocation5 + $0x130] sm:$0xff]  ;;  %v8047_v2 = vld [vmem:[#allocation5 + $0x108] sm:$0xff]  ;;  %v8053_v12 = vld [vmem:[#allocation5 + $0x100] sm:$0xff] }
0x10aa   :  { %8452 = vst [vmem:[#allocation51_spill] sm:$0xff] %v8043_v63  ;;  %v8065_v24 = vld [vmem:[#allocation5 + $0xe0] sm:$0xff] }
0x10ab   :  { %v5483_v27 = vmul.f32 %v5473_v30, %v7857_v46  ;;  %v5482_v29 = vadd.f32 0.5, %v5481_v6  ;;  %v7983_v46 = vld [vmem:[#allocation5 + $0x1d0] sm:$0xff]  ;;  %v8049_v30 = vld [vmem:[#allocation5 + $0x118] sm:$0xff] }
0x10ac   :  { %8442 = vst [vmem:[#allocation41_spill] sm:$0xff] %v7983_v46  ;;  %8453 = vst [vmem:[#allocation52_spill] sm:$0xff] %v8049_v30  ;;  %v8067_v6 = vld [vmem:[#allocation5 + $0xf0] sm:$0xff] }
0x10ad   :  { %v5485_v20 = vadd.f32 %v5484_v19, %v5483_v27  ;;  %v8055_v27 = vld [vmem:[#allocation5 + $0x110] sm:$0xff]  ;;  %v8059_v19 = vld [vmem:[#allocation5 + $0xe8] sm:$0xff]  ;;  %8456 = vst [vmem:[#allocation55_spill] sm:$0xff] %v8067_v6 }
0x10ae   :  { %8454 = vst [vmem:[#allocation53_spill] sm:$0xff] %v8055_v27 }
0x10af   :  { %6960 = vtanh.f32 %v5485_v20  ;;  %v8061_v20 = vld [vmem:[#allocation5 + $0xf8] sm:$0xff] }
0x10b0   :  { %8455 = vst [vmem:[#allocation54_spill] sm:$0xff] %v8061_v20 }
0x10bc   :  { %v6961_v11 = vpop.eup %6960 }
0x10bd   :  { %v5487_v32 = vmul.f32 %v6961_v11, %v5482_v29  ;;  %v8071_v29 = vld [vmem:[#allocation5 + $0xc8] sm:$0xff]  ;;  %v8073_v11 = vld [vmem:[#allocation5 + $0xd8] sm:$0xff] }
0x10be   :  { %8457 = vst [vmem:[#allocation36_spill] sm:$0xff] %v8073_v11 }
0x10bf   :  { %5639 = vmatmul.mubr.f32.vlgmr.msra.gmra.mxu0 %v5487_v32  ;;  %5710 = vmatmul.mubr.f32.vlgmr.msra.gmra.mxu1 %v5487_v32  ;;  %v8077_v32 = vld [vmem:[#allocation5 + $0xc0] sm:$0xff] }
0x10c0   :  { %5781 = vmatpush1.msra.mxu0 %v7973_v34  ;;  %5852 = vmatpush1.msra.mxu1 %v7975_v35 }
0x10c1   :  { %5782 = vmatprep.subr.mxu0 %v7977_v25  ;;  %5853 = vmatprep.subr.mxu1 %v7979_v21  ;;  %v8145_v21 = vld [vmem:[#allocation5 + $0x18] sm:$0xff] }
0x10c2   :  { %5783 = vmatpush1.msra.mxu0 %v7981_v54  ;;  %5854 = vmatpush1.msra.mxu1 %v7983_v46  ;;  %v8139_v46 = vld [vmem:[#allocation5 + $0x30] sm:$0xff] }
0x10c3   :  { %5784 = vmatprep.subr.mxu0 %v7987_v18  ;;  %5855 = vmatprep.subr.mxu1 %v7989_v28  ;;  %v8133_v28 = vld [vmem:[#allocation5 + $0x38] sm:$0xff] }
0x10c4   :  { %5785 = vmatpush1.msra.mxu0 %v7993_v61  ;;  %5856 = vmatpush1.msra.mxu1 %v7995_v41  ;;  %v8127_v41 = vld [vmem:[#allocation5 + $0x50] sm:$0xff] }
0x10c5   :  { %5786 = vmatprep.subr.mxu0 %v7999_v39  ;;  %5857 = vmatprep.subr.mxu1 %v8001_v40  ;;  %v8121_v40 = vld [vmem:[#allocation5 + $0x58] sm:$0xff] }
0x10c6   :  { %5787 = vmatpush1.msra.mxu0 %v8005_v5  ;;  %5858 = vmatpush1.msra.mxu1 %v8007_v16  ;;  %v8115_v16 = vld [vmem:[#allocation5 + $0x70] sm:$0xff]  ;;  %8465 = vst [vmem:[#allocation56_spill] sm:$0xff] %v8121_v40 }
0x10c7   :  { %5788 = vmatprep.subr.mxu0 %v8011_v0  ;;  %5859 = vmatprep.subr.mxu1 %v8013_v17  ;;  %v8109_v17 = vld [vmem:[#allocation5 + $0x78] sm:$0xff]  ;;  %8464 = vst [vmem:[#allocation35_spill] sm:$0xff] %v8115_v16 }
0x10c8   :  { %5789 = vmatpush1.msra.mxu0 %v8017_v31  ;;  %5860 = vmatpush1.msra.mxu1 %v8019_v3  ;;  %v8103_v3 = vld [vmem:[#allocation5 + $0x90] sm:$0xff]  ;;  %8463 = vst [vmem:[#allocation33_spill] sm:$0xff] %v8109_v17 }
0x10c9   :  { %5790 = vmatprep.subr.mxu0 %v8023_v42  ;;  %5861 = vmatprep.subr.mxu1 %v8025_v49  ;;  %v8097_v49 = vld [vmem:[#allocation5 + $0x98] sm:$0xff]  ;;  %8462 = vst [vmem:[#allocation34_spill] sm:$0xff] %v8103_v3 }
0x10ca   :  { %5791 = vmatpush1.msra.mxu0 %v8029_v47  ;;  %5862 = vmatpush1.msra.mxu1 %v8031_v56  ;;  %v8091_v56 = vld [vmem:[#allocation5 + $0xb0] sm:$0xff]  ;;  %8461 = vst [vmem:[#allocation32_spill] sm:$0xff] %v8097_v49 }
0x10cb   :  { %5792 = vmatprep.subr.mxu0 %v8035_v38  ;;  %5863 = vmatprep.subr.mxu1 %v8037_v36  ;;  %v8085_v36 = vld [vmem:[#allocation5 + $0xb8] sm:$0xff]  ;;  %8460 = vst [vmem:[#allocation39_spill] sm:$0xff] %v8091_v56 }
0x10cc   :  { %5793 = vmatpush1.msra.mxu0 %v8041_v62  ;;  %5864 = vmatpush1.msra.mxu1 %v8043_v63  ;;  %v8079_v63 = vld [vmem:[#allocation5 + $0xd0] sm:$0xff]  ;;  %8459 = vst [vmem:[#allocation37_spill] sm:$0xff] %v8085_v36 }
0x10cd   :  { %5794 = vmatprep.subr.mxu0 %v8047_v2  ;;  %5865 = vmatprep.subr.mxu1 %v8049_v30  ;;  %8458 = vst [vmem:[#allocation38_spill] sm:$0xff] %v8079_v63  ;;  %v8083_v30 = vld [vmem:[#allocation5 + $0xa8] sm:$0xff] }
0x10ce   :  { %5795 = vmatpush1.msra.mxu0 %v8053_v12  ;;  %5866 = vmatpush1.msra.mxu1 %v8055_v27  ;;  %v8089_v27 = vld [vmem:[#allocation5 + $0xa0] sm:$0xff] }
0x10cf   :  { %5796 = vmatprep.subr.mxu0 %v8059_v19  ;;  %5867 = vmatprep.subr.mxu1 %v8061_v20  ;;  %v8095_v20 = vld [vmem:[#allocation5 + $0x88] sm:$0xff] }
0x10d0   :  { %5797 = vmatpush1.msra.mxu0 %v8065_v24  ;;  %5868 = vmatpush1.msra.mxu1 %v8067_v6  ;;  %v8101_v6 = vld [vmem:[#allocation5 + $0x80] sm:$0xff] }
0x10d1   :  { %5798 = vmatprep.subr.mxu0 %v8071_v29  ;;  %5869 = vmatprep.subr.mxu1 %v8073_v11  ;;  %v8107_v11 = vld [vmem:[#allocation5 + $0x68] sm:$0xff] }
0x10d2   :  { %5799 = vmatpush1.msra.mxu0 %v8077_v32  ;;  %5870 = vmatpush1.msra.mxu1 %v8079_v63  ;;  %v8113_v63 = vld [vmem:[#allocation5 + $0x60] sm:$0xff] }
0x10d3   :  { %5800 = vmatprep.subr.mxu0 %v8083_v30  ;;  %5871 = vmatprep.subr.mxu1 %v8085_v36  ;;  %v8119_v36 = vld [vmem:[#allocation5 + $0x48] sm:$0xff] }
0x10d4   :  { %5801 = vmatpush1.msra.mxu0 %v8089_v27  ;;  %5872 = vmatpush1.msra.mxu1 %v8091_v56  ;;  %v8125_v56 = vld [vmem:[#allocation5 + $0x40] sm:$0xff] }
0x10d5   :  { %5802 = vmatprep.subr.mxu0 %v8095_v20  ;;  %5873 = vmatprep.subr.mxu1 %v8097_v49  ;;  %v8131_v49 = vld [vmem:[#allocation5 + $0x28] sm:$0xff] }
0x10d6   :  { %5803 = vmatpush1.msra.mxu0 %v8101_v6  ;;  %5874 = vmatpush1.msra.mxu1 %v8103_v3  ;;  %v8137_v3 = vld [vmem:[#allocation5 + $0x20] sm:$0xff] }
0x10d7   :  { %5804 = vmatprep.subr.mxu0 %v8107_v11  ;;  %5875 = vmatprep.subr.mxu1 %v8109_v17  ;;  %v8143_v17 = vld [vmem:[#allocation5 + $0x8] sm:$0xff] }
0x10d8   :  { %5805 = vmatpush1.msra.mxu0 %v8113_v63  ;;  %5876 = vmatpush1.msra.mxu1 %v8115_v16  ;;  %v8149_v16 = vld [vmem:[#allocation5] sm:$0xff] }
0x10d9   :  { %5806 = vmatprep.subr.mxu0 %v8119_v36  ;;  %5877 = vmatprep.subr.mxu1 %v8121_v40  ;;  %v8153_v40 = vld [vmem:[#allocation5 + $0x10] sm:$0xff] }
0x10da   :  { %5807 = vmatpush1.msra.mxu0 %v8125_v56  ;;  %5878 = vmatpush1.msra.mxu1 %v8127_v41 }
0x10db   :  { %5808 = vmatprep.subr.mxu0 %v8131_v49  ;;  %5879 = vmatprep.subr.mxu1 %v8133_v28 }
0x10dc   :  { %5809 = vmatpush1.msra.mxu0 %v8137_v3  ;;  %5880 = vmatpush1.msra.mxu1 %v8139_v46 }
0x10dd   :  { %5810 = vmatprep.subr.mxu0 %v8143_v17  ;;  %5881 = vmatprep.subr.mxu1 %v8145_v21 }
0x10de   :  { %5811 = vmatpush1.msra.mxu0 %v8149_v16  ;;  %5844 = vmatprep.mubr.f32.mxu0 %v8416_v8 }
0x10df   :  { %5882 = vmatpush1.msra.mxu1 %v8153_v40  ;;  %5915 = vmatprep.mubr.f32.mxu1 %v8416_v8 }
0x10e0   :  { %5845 = vmatmul.mubr.f32.vlgmr.msra.gmra.mxu0 %v7954_v15  ;;  %5916 = vmatmul.mubr.f32.vlgmr.msra.gmra.mxu1 %v7954_v15 }
0x10e1   :  { %6097 = vmatprep.subr.mxu1 %v7960_v53  ;;  %6743 = vmatprep.subr.mxu0 %v8416_v8 }
0x10e2   :  { %6098 = vmatpush1.msra.mxu1 %v7973_v34  ;;  %6744 = vmatpush3.msra.mxu0 %v7874_v4  ;;  %v8228_v4 = vld [vmem:[#allocation6 + $0x8] sm:$0xff] }
0x10e3   :  { %6099 = vmatprep.subr.mxu1 %v7977_v25  ;;  %6745 = vmatprep.subr.mxu0 %v8416_v8 }
0x10e4   :  { %6100 = vmatpush1.msra.mxu1 %v7981_v54  ;;  %6746 = vmatpush3.msra.mxu0 %v7878_v14  ;;  %v8230_v14 = vld [vmem:[#allocation6] sm:$0xff] }
0x10e5   :  { %6101 = vmatprep.subr.mxu1 %v7987_v18  ;;  %6747 = vmatprep.subr.mxu0 %v8416_v8 }
0x10e6   :  { %6102 = vmatpush1.msra.mxu1 %v7993_v61  ;;  %6748 = vmatpush3.msra.mxu0 %v7882_v44  ;;  %v4744_v44 = vld [vmem:[%s8336_s5] sm:$0xf] }
0x10e7   :  { %6103 = vmatprep.subr.mxu1 %v7999_v39  ;;  %6749 = vmatprep.subr.mxu0 %v8416_v8  ;;  %v4761_v61 = vrot.slane %v4744_v44, %v8440_v57 }
0x10e8   :  { %6104 = vmatpush1.msra.mxu1 %v8005_v5  ;;  %6750 = vmatpush3.msra.mxu0 %v7886_v26 }
0x10e9   :  { %6105 = vmatprep.subr.mxu1 %v8011_v0  ;;  %6751 = vmatprep.subr.mxu0 %v8416_v8  ;;  %v4906_v39 = vadd.f32 %v7944_v52, %v4761_v61  ;;  %v6275_v61 = vld [vmem:[#allocation6 + $0x68] sm:$0xff] }
0x10ea   :  { %6106 = vmatpush1.msra.mxu1 %v8017_v31  ;;  %6752 = vmatpush3.msra.mxu0 %v7890_v48  ;;  %v4749_v48 = vrot.slane %v4744_v44, %v8437_v22 }
0x10eb   :  { %6107 = vmatprep.subr.mxu1 %v8023_v42  ;;  %6753 = vmatprep.subr.mxu0 %v8416_v8 }
0x10ec   :  { %6108 = vmatpush1.msra.mxu1 %v8029_v47  ;;  %6754 = vmatpush3.msra.mxu0 %v7894_v50 }
0x10ed   :  { %6109 = vmatprep.subr.mxu1 %v8035_v38  ;;  %6755 = vmatprep.subr.mxu0 %v8416_v8 }
0x10ee   :  { %6110 = vmatpush1.msra.mxu1 %v8041_v62  ;;  %6756 = vmatpush3.msra.mxu0 %v7898_v37  ;;  %v4753_v37 = vrot.slane %v4744_v44, %v8438_v51 }
0x10ef   :  { %6111 = vmatprep.subr.mxu1 %v8047_v2  ;;  %6757 = vmatprep.subr.mxu0 %v8416_v8 }
0x10f0   :  { %6112 = vmatpush1.msra.mxu1 %v8053_v12  ;;  %6758 = vmatpush3.msra.mxu0 %v7902_v9  ;;  %v8468_v12 = vld [vmem:[#allocation42_spill] sm:$0xff] }
0x10f1   :  { %6113 = vmatprep.subr.mxu1 %v8059_v19  ;;  %6759 = vmatprep.subr.mxu0 %v8416_v8  ;;  %v8470_v19 = vld [vmem:[#allocation44_spill] sm:$0xff] }
0x10f2   :  { %6114 = vmatpush1.msra.mxu1 %v8065_v24  ;;  %6760 = vmatpush3.msra.mxu0 %v7906_v1  ;;  %v4833_v1 = vadd.f32 %v7934_v13, %v4749_v48  ;;  %v8472_v24 = vld [vmem:[#allocation46_spill] sm:$0xff]  ;;  %v8479_v48 = vld [vmem:[#allocation53_spill] sm:$0xff] }
0x10f3   :  { %6115 = vmatprep.subr.mxu1 %v8071_v29  ;;  %6761 = vmatprep.subr.mxu0 %v8416_v8  ;;  %v8474_v29 = vld [vmem:[#allocation48_spill] sm:$0xff] }
0x10f4   :  { %6116 = vmatpush1.msra.mxu1 %v8077_v32  ;;  %6762 = vmatpush3.msra.mxu0 %v7910_v59  ;;  %v4757_v59 = vrot.slane %v4744_v44, %v8439_v43  ;;  %v8477_v32 = vld [vmem:[#allocation51_spill] sm:$0xff]  ;;  %v8478_v44 = vld [vmem:[#allocation52_spill] sm:$0xff] }
0x10f5   :  { %6117 = vmatprep.subr.mxu1 %v8083_v30  ;;  %6763 = vmatprep.subr.mxu0 %v8416_v8  ;;  %v8467_v30 = vld [vmem:[#allocation41_spill] sm:$0xff] }
0x10f6   :  { %6118 = vmatpush1.msra.mxu1 %v8089_v27  ;;  %6764 = vmatpush3.msra.mxu0 %v7914_v7  ;;  %v8469_v27 = vld [vmem:[#allocation43_spill] sm:$0xff] }
0x10f7   :  { %6119 = vmatprep.subr.mxu1 %v8095_v20  ;;  %6765 = vmatprep.subr.mxu0 %v8416_v8  ;;  %v8471_v20 = vld [vmem:[#allocation45_spill] sm:$0xff] }
0x10f8   :  { %6120 = vmatpush1.msra.mxu1 %v8101_v6  ;;  %6766 = vmatpush3.msra.mxu0 %v7918_v60  ;;  %v8473_v6 = vld [vmem:[#allocation47_spill] sm:$0xff] }
0x10f9   :  { %6121 = vmatprep.subr.mxu1 %v8107_v11  ;;  %6767 = vmatprep.subr.mxu0 %v8416_v8  ;;  %v8476_v11 = vld [vmem:[#allocation50_spill] sm:$0xff] }
0x10fa   :  { %6122 = vmatpush1.msra.mxu1 %v8113_v63  ;;  %6768 = vmatpush3.msra.mxu0 %v7922_v55  ;;  %v4835_v55 = vadd.f32 %v7940_v45, %v4753_v37  ;;  %v8480_v37 = vld [vmem:[#allocation54_spill] sm:$0xff] }
0x10fb   :  { %6123 = vmatprep.subr.mxu1 %v8119_v36  ;;  %6769 = vmatprep.subr.mxu0 %v8416_v8 }
0x10fc   :  { %6124 = vmatpush1.msra.mxu1 %v8125_v56  ;;  %6770 = vmatpush3.msra.mxu0 %v7926_v58 }
0x10fd   :  { %6125 = vmatprep.subr.mxu1 %v8131_v49  ;;  %6771 = vmatprep.subr.mxu0 %v8416_v8 }
0x10fe   :  { %6126 = vmatpush1.msra.mxu1 %v8137_v3  ;;  %6161 = vmatprep.mubr.f32.mxu1 %v8416_v8 }
0x10ff   :  { %6127 = vmatprep.subr.mxu1 %v8143_v17  ;;  %6775 = vmatprep.mubr.msk.f32.mxu0 %vm7176_vm0, %v8416_v8 }
0x1100   :  { %6128 = vmatpush1.msra.mxu1 %v8149_v16  ;;  %6772 = vmatpush3.msra.mxu0 %v8228_v4 }
0x1101   :  { %6778 = vmatprep.subr.mxu1 %v8416_v8  ;;  %6773 = vmatprep.subr.mxu0 %v8416_v8 }
0x1102   :  { %6774 = vmatpush3.msra.mxu0 %v8230_v14 }
0x1103   :  { %6168 = vmatprep.subr.mxu0 %v7962_v10  ;;  %v4904_v10 = vadd.f32 %v7937_v23, %v4757_v59  ;;  %v8482_v59 = vld [vmem:[#allocation36_spill] sm:$0xff] }
0x117f   :  { %v8239_v26 = vpop.f32.mrf.mxu0  ;;  %v8242_v50 = vpop.f32.mrf.mxu1 }
0x1181   :  { %v8245_v9 = vpop.f32.mrf.mxu0  ;;  %v8249_v7 = vpop.f32.mrf.mxu1 }
0x11a0   :  { %v5846_v60 = vpop.f32.mrf.mxu0  ;;  %v5917_v15 = vpop.f32.mrf.mxu1 }
0x11a1   :  { %v5922_v58 = vadd.f32 %v5846_v60, %v4833_v1  ;;  %v5924_v54 = vadd.f32 %v5917_v15, %v4904_v10  ;;  %v8481_v1 = vld [vmem:[#allocation55_spill] sm:$0xff]  ;;  %v8483_v60 = vld [vmem:[#allocation38_spill] sm:$0xff]  ;;  %v8486_v15 = vld [vmem:[#allocation32_spill] sm:$0xff] }
0x11a2   :  { %v5848_v53 = vpop.f32.mrf.mxu0  ;;  %v5919_v13 = vpop.f32.mrf.mxu1  ;;  %v8488_v10 = vld [vmem:[#allocation33_spill] sm:$0xff] }
0x11a3   :  { %v5926_v34 = vmul.f32 0.5, %v5922_v58  ;;  %v5923_v25 = vadd.f32 %v5848_v53, %v4835_v55  ;;  %v5925_v5 = vadd.f32 %v5919_v13, %v4906_v39  ;;  %v8484_v55 = vld [vmem:[#allocation37_spill] sm:$0xff]  ;;  %v8485_v58 = vld [vmem:[#allocation39_spill] sm:$0xff]  ;;  %v8487_v53 = vld [vmem:[#allocation34_spill] sm:$0xff] }
0x11a4   :  { %v6269_v13 = vld [vmem:[#allocation6 + $0x38] sm:$0xff]  ;;  %v6268_v39 = vld [vmem:[#allocation6 + $0x30] sm:$0xff] }
0x11a5   :  { %6962 = vtanh.f32 %v5926_v34  ;;  %v5930_v18 = vmul.f32 0.5, %v5923_v25  ;;  %v5935_v16 = vmul.f32 0.5, %v5925_v5  ;;  %v8489_v34 = vld [vmem:[#allocation35_spill] sm:$0xff]  ;;  %v8490_v25 = vld [vmem:[#allocation56_spill] sm:$0xff] }
0x11a6   :  { %v6267_v5 = vld [vmem:[#allocation6 + $0x28] sm:$0xff] }
0x11a7   :  { %6964 = vtanh.f32 %v5930_v18  ;;  %v6276_v18 = vld [vmem:[#allocation6 + $0x70] sm:$0xff] }
0x11a8   :  { %6966 = vtanh.f32 %v5924_v54  ;;  %v6277_v54 = vld [vmem:[#allocation6 + $0x78] sm:$0xff] }
0x11a9   :  { %6968 = vtanh.f32 %v5935_v16  ;;  %v6266_v16 = vld [vmem:[#allocation6 + $0x20] sm:$0xff] }
0x11b2   :  { %v6963_v45 = vpop.eup %6962 }
0x11b3   :  { %v5928_v0 = vmul.f32 0.5, %v6963_v45  ;;  %v6265_v45 = vld [vmem:[#allocation6 + $0x18] sm:$0xff] }
0x11b4   :  { %v6965_v17 = vpop.eup %6964 }
0x11b5   :  { %v5929_v31 = vadd.f32 0.5, %v5928_v0  ;;  %v5932_v3 = vmul.f32 0.5, %v6965_v17  ;;  %v6967_v23 = vpop.eup %6966  ;;  %v6264_v0 = vld [vmem:[#allocation6 + $0x10] sm:$0xff]  ;;  %v5961_v17 = vld [vmem:[%s8339_s8] sm:$0x1] }
0x11b6   :  { %v6969_v38 = vpop.eup %6968 }
0x11b7   :  { %v5933_v42 = vadd.f32 0.5, %v5932_v3  ;;  %v5940_v49 = vmul.f32 %v6967_v23, %v5929_v31  ;;  %v5937_v36 = vmul.f32 0.5, %v6969_v38 }
0x11b9   :  { %v5939_v47 = vmul.f32 %v5933_v42, %v7951_v33  ;;  %v5938_v52 = vadd.f32 0.5, %v5937_v36  ;;  %v8466_v33 = vld [vmem:[#allocation40_spill] sm:$0xff]  ;;  %v5552_v42 = vld [vmem:[%s8336_s5] sm:$0xf] }
0x11bb   :  { %v8256_v56 = vadd.f32 %v5940_v49, %v5939_v47  ;;  %v5561_v47 = vrot.slane %v5552_v42, %v8438_v51 }
0x11bd   :  { %6970 = vtanh.f32 %v8256_v56 }
0x11ca   :  { %v6971_v62 = vpop.eup %6970 }
0x11cb   :  { %v5943_v63 = vmul.f32 %v6971_v62, %v5938_v52 }
0x11cd   :  { %6162 = vmatmul.mubr.f32.vlgmr.msra.gmra.mxu1 %v5943_v63  ;;  %v5944_v2 = vmax.f32 %v5943_v63, 0.0 }
0x11ce   :  { %6810 = vmatprep.mubr.msk.f32.mxu1 %vm7176_vm0, %v8416_v8  ;;  %6779 = vmatpush3.msra.mxu1 %v6277_v54 }
0x11cf   :  { %6776 = vmatmul.mubr.f32.vlgmr.msra.gmra.mxu0 %v5944_v2  ;;  %6780 = vmatprep.subr.mxu1 %v8416_v8  ;;  %v5565_v2 = vrot.slane %v5552_v42, %v8439_v43 }
0x11d0   :  { %6169 = vmatpush1.msra.mxu0 %v7975_v35  ;;  %6232 = vmatprep.mubr.f32.mxu0 %v8416_v8  ;;  %v8475_v35 = vld [vmem:[#allocation49_spill] sm:$0xff] }
0x11d1   :  { %6170 = vmatprep.subr.mxu0 %v8466_v33  ;;  %6781 = vmatpush3.msra.mxu1 %v6276_v18  ;;  %v5712_v33 = vadd.f32 %v8242_v50, %v5565_v2 }
0x11d2   :  { %6171 = vmatpush1.msra.mxu0 %v8467_v30  ;;  %6782 = vmatprep.subr.mxu1 %v8416_v8  ;;  %v5569_v30 = vrot.slane %v5552_v42, %v8440_v57 }
0x11d3   :  { %6172 = vmatprep.subr.mxu0 %v8468_v12  ;;  %6783 = vmatpush3.msra.mxu1 %v6275_v61 }
0x11d4   :  { %6173 = vmatpush1.msra.mxu0 %v8469_v27  ;;  %6784 = vmatprep.subr.mxu1 %v8416_v8  ;;  %v5714_v27 = vadd.f32 %v8249_v7, %v5569_v30 }
0x11d5   :  { %6174 = vmatprep.subr.mxu0 %v8470_v19 }
0x11d6   :  { %6175 = vmatpush1.msra.mxu0 %v8471_v20 }
0x11d7   :  { %6176 = vmatprep.subr.mxu0 %v8472_v24 }
0x11d8   :  { %6177 = vmatpush1.msra.mxu0 %v8473_v6 }
0x11d9   :  { %6178 = vmatprep.subr.mxu0 %v8474_v29 }
0x11da   :  { %6179 = vmatpush1.msra.mxu0 %v8475_v35 }
0x11db   :  { %6180 = vmatprep.subr.mxu0 %v8476_v11 }
0x11dc   :  { %6181 = vmatpush1.msra.mxu0 %v8477_v32 }
0x11dd   :  { %6182 = vmatprep.subr.mxu0 %v8478_v44 }
0x11de   :  { %6183 = vmatpush1.msra.mxu0 %v8479_v48 }
0x11df   :  { %6184 = vmatprep.subr.mxu0 %v8480_v37 }
0x11e0   :  { %6185 = vmatpush1.msra.mxu0 %v8481_v1 }
0x11e1   :  { %6186 = vmatprep.subr.mxu0 %v8482_v59  ;;  %v6278_v59 = vld [vmem:[%s8339_s8] sm:$0x1] }
0x11e2   :  { %6187 = vmatpush1.msra.mxu0 %v8483_v60 }
0x11e3   :  { %6188 = vmatprep.subr.mxu0 %v8484_v55 }
0x11e4   :  { %6189 = vmatpush1.msra.mxu0 %v8485_v58 }
0x11e5   :  { %6190 = vmatprep.subr.mxu0 %v8486_v15 }
0x11e6   :  { %6191 = vmatpush1.msra.mxu0 %v8487_v53 }
0x11e7   :  { %6192 = vmatprep.subr.mxu0 %v8488_v10 }
0x11e8   :  { %6193 = vmatpush1.msra.mxu0 %v8489_v34 }
0x11e9   :  { %6194 = vmatprep.subr.mxu0 %v8490_v25 }
0x11ea   :  { %6195 = vmatpush1.msra.mxu0 %v8127_v41  ;;  %v6271_v41 = vld [vmem:[#allocation6 + $0x48] sm:$0xff] }
0x11eb   :  { %6196 = vmatprep.subr.mxu0 %v8133_v28  ;;  %v6274_v28 = vld [vmem:[#allocation6 + $0x60] sm:$0xff] }
0x11ec   :  { %6197 = vmatpush1.msra.mxu0 %v8139_v46  ;;  %6785 = vmatpush3.msra.mxu1 %v6274_v28  ;;  %v6272_v46 = vld [vmem:[#allocation6 + $0x50] sm:$0xff] }
0x11ed   :  { %6198 = vmatprep.subr.mxu0 %v8145_v21  ;;  %6786 = vmatprep.subr.mxu1 %v8416_v8  ;;  %v6273_v21 = vld [vmem:[#allocation6 + $0x58] sm:$0xff] }
0x11ee   :  { %6199 = vmatpush1.msra.mxu0 %v8153_v40  ;;  %6787 = vmatpush3.msra.mxu1 %v6273_v21  ;;  %v6270_v40 = vld [vmem:[#allocation6 + $0x40] sm:$0xff] }
0x11ef   :  { %6233 = vmatmul.mubr.f32.vlgmr.msra.gmra.mxu0 %v5943_v63  ;;  %6788 = vmatprep.subr.mxu1 %v8416_v8 }
0x11f0   :  { %6789 = vmatpush3.msra.mxu1 %v6272_v46 }
0x11f1   :  { %6790 = vmatprep.subr.mxu1 %v8416_v8 }
0x11f2   :  { %6791 = vmatpush3.msra.mxu1 %v6271_v41 }
0x11f3   :  { %6792 = vmatprep.subr.mxu1 %v8416_v8 }
0x11f4   :  { %6793 = vmatpush3.msra.mxu1 %v6270_v40 }
0x11f5   :  { %6794 = vmatprep.subr.mxu1 %v8416_v8 }
0x11f6   :  { %6795 = vmatpush3.msra.mxu1 %v6269_v13 }
0x11f7   :  { %6796 = vmatprep.subr.mxu1 %v8416_v8 }
0x11f8   :  { %6797 = vmatpush3.msra.mxu1 %v6268_v39 }
0x11f9   :  { %6798 = vmatprep.subr.mxu1 %v8416_v8 }
0x11fa   :  { %6799 = vmatpush3.msra.mxu1 %v6267_v5 }
0x11fb   :  { %6800 = vmatprep.subr.mxu1 %v8416_v8 }
0x11fc   :  { %6801 = vmatpush3.msra.mxu1 %v6266_v16 }
0x11fd   :  { %6802 = vmatprep.subr.mxu1 %v8416_v8 }
0x11fe   :  { %6803 = vmatpush3.msra.mxu1 %v6265_v45 }
0x11ff   :  { %6804 = vmatprep.subr.mxu1 %v8416_v8 }
0x1200   :  { %6805 = vmatpush3.msra.mxu1 %v6264_v0 }
0x1201   :  { %6806 = vmatprep.subr.mxu1 %v8416_v8 }
0x1202   :  { %6807 = vmatpush3.msra.mxu1 %v8228_v4  ;;  %v5557_v4 = vrot.slane %v5552_v42, %v8437_v22 }
0x1203   :  { %6808 = vmatprep.subr.mxu1 %v8416_v8 }
0x1204   :  { %6809 = vmatpush3.msra.mxu1 %v8230_v14  ;;  %v5643_v14 = vadd.f32 %v8245_v9, %v5561_v47  ;;  %v5641_v38 = vadd.f32 %v8239_v26, %v5557_v4 }
0x128d   :  { %v6163_v49 = vpop.f32.mrf.mxu1 }
0x128e   :  { %v6239_v52 = vadd.f32 %v6163_v49, %v5641_v38 }
0x128f   :  { %v6028_v31 = vpop.f32.mrf.mxu0  ;;  %v6165_v8 = vpop.f32.mrf.mxu1 }
0x1290   :  { %v6029_v3 = vadd.f32 %v6028_v31, %v5961_v17  ;;  %v6240_v36 = vadd.f32 %v6165_v8, %v5643_v14  ;;  %v6243_v63 = vmul.f32 0.5, %v6239_v52 }
0x1291   :  { %v6777_v23 = vpop.f32.mrf.mxu0 }
0x1292   :  { %6032 = vst [vmem:[#allocation14 + $0x6] sm:$0x1] %v6029_v3  ;;  %v6247_v62 = vmul.f32 0.5, %v6240_v36 }
0x1294   :  { %6972 = vtanh.f32 %v6247_v62 }
0x1295   :  { %6974 = vtanh.f32 %v6243_v63 }
0x12a1   :  { %v6973_v26 = vpop.eup %6972 }
0x12a2   :  { %v6975_v19 = vpop.eup %6974  ;;  %v6249_v20 = vmul.f32 0.5, %v6973_v26 }
0x12a3   :  { %v6245_v6 = vmul.f32 0.5, %v6975_v19 }
0x12a4   :  { %v6250_v29 = vadd.f32 0.5, %v6249_v20 }
0x12a5   :  { %v6246_v43 = vadd.f32 0.5, %v6245_v6 }
0x12a6   :  { %v6256_v50 = vmul.f32 %v6250_v29, %v8256_v56 }
0x12af   :  { %v6234_v51 = vpop.f32.mrf.mxu0 }
0x12b0   :  { %v6241_v12 = vadd.f32 %v6234_v51, %v5712_v33 }
0x12b1   :  { %v6236_v22 = vpop.f32.mrf.mxu0 }
0x12b2   :  { %6976 = vtanh.f32 %v6241_v12  ;;  %v6242_v9 = vadd.f32 %v6236_v22, %v5714_v27 }
0x12b4   :  { %v6252_v24 = vmul.f32 0.5, %v6242_v9 }
0x12b6   :  { %6978 = vtanh.f32 %v6252_v24 }
0x12bf   :  { %v6977_v35 = vpop.eup %6976 }
0x12c0   :  { %v6257_v11 = vmul.f32 %v6977_v35, %v6246_v43 }
0x12c2   :  { %v6258_v57 = vadd.f32 %v6257_v11, %v6256_v50 }
0x12c3   :  { %v6979_v32 = vpop.eup %6978 }
0x12c4   :  { %6980 = vtanh.f32 %v6258_v57  ;;  %v6254_v44 = vmul.f32 0.5, %v6979_v32 }
0x12c6   :  { %v6255_v48 = vadd.f32 0.5, %v6254_v44 }
0x12d1   :  { %v6981_v7 = vpop.eup %6980 }
0x12d2   :  { %v6260_v37 = vmul.f32 %v6981_v7, %v6255_v48 }
0x12d4   :  { %v6261_v1 = vmax.f32 %v6260_v37, 0.0 }
0x12d6   :  { %6811 = vmatmul.mubr.f32.vlgmr.msra.gmra.mxu1 %v6261_v1 }
0x1396   :  { %v6345_v60 = vpop.f32.mrf.mxu1 }
0x1397   :  { %v6346_v55 = vadd.f32 %v6345_v60, %v6278_v59 }
0x1398   :  { %v6812_v56 = vpop.f32.mrf.mxu1 }
0x1399   :  { %6349 = vst [vmem:[#allocation14 + $0x7] sm:$0x1] %v6346_v55 }
0x139a   :  { %7142 = shalt.err (!%p7139_p11)
}
0x139b   :  { %6359 = dma.vmem_to_hbm [thread:$0]  %s6357_s22, 128, %s8340_s9, [#allocation10]  }
0x139c   :  { %7163 = dma.done.wait [#allocation10], 128  }
0x139d   :  { %7164 = vsyncadd [#allocation10], 4294967168 }
0x139e   :  { %6363 = vsyncpa [#allocation9], 1 }
0x139f   :  { %6364 = vsyncpa [#allocation12], 1 }
0x13a0   :  { %6365 = vsyncpa [#allocation10], 1 }
0x13a1   :  { %6366 = vsyncmov [#allocation7] }
0x13a4   :  { %s6367_s8 = vpop.sfrf %6366 }
0x13a5   :  { %p6393_p12 = scmp.ne.s32.totalorder %s6367_s8, 0 }
0x13a7   :  { %6371 = shalt.err (%p6393_p12)  }
0x13a8   :  { %6373 = vsyncmov [#allocation7 + $0x1] }
0x13ab   :  { %s6374_s0 = vpop.sfrf %6373 }
0x13ac   :  { %p6394_p13 = scmp.ne.s32.totalorder %s6374_s0, 0 }
0x13ae   :  { %6378 = shalt.err (%p6394_p13)  }
0x13af   :  { %6380 = vsyncmov [#allocation7 + $0x2] }
0x13b2   :  { %s6381_s2 = vpop.sfrf %6380 }
0x13b3   :  { %p6395_p0 = scmp.ne.s32.totalorder %s6381_s2, 0 }
0x13b5   :  { %6385 = shalt.err (%p6395_p0)  }
0x13b6   :  { %6387 = vsyncmov [#allocation7 + $0x3] }
0x13b9   :  { %s6388_s25 = vpop.sfrf %6387 }
0x13ba   :  { %p6396_p1 = scmp.ne.s32.totalorder %s6388_s25, 0 }
0x13bc   :  { %6392 = shalt.err (%p6396_p1)  }

</bundles_post_ra>
